<compile_context>
chip_gen: v7x
topology: tpu7x:2x2x1
jax: 0.10.0
libtpu: 0.0.40
codegen_flags: <defaults>
</compile_context>

<pallas_src>
import jax
import jax.numpy as jnp
from jax.experimental import pallas as pl
from jax.experimental.pallas import tpu as pltpu


_TAPS3 = tuple((dy, dx) for dy in range(3) for dx in range(3))
_TAPS5 = tuple((dy, dx) for dy in range(5) for dx in range(5))


# ----------------------------------------------------------------------------
# Fused whole-network kernel (one grid step == one batch element)
# ----------------------------------------------------------------------------
def _fcnn_kernel(x_ref, w1_ref, b1_ref, w2_ref, b2_ref, w3_ref, b3_ref,
                 w4_ref, b4_ref, o_ref, p1, p2, s2, p3, p4):
    """Refs:
      x_ref : (1, H, W, 1)  f32   input block (one batch element)
      w1_ref: (9,  C1) f32        b1_ref: (1, C1) f32
      w2_ref: (9*C1, C2) bf16     b2_ref: (1, C2) f32
      w3_ref: (9*C2, C3) bf16     b3_ref: (1, C3) f32
      w4_ref: (25, C3) f32        b4_ref: (1, 1)  f32
      o_ref : (1, H, W) f32
      p1/p2/p3/p4: zero-padded conv-input scratch, s2: conv2 output scratch.
    """
    Nb, H, W, _ = x_ref.shape
    C1 = w1_ref.shape[1]
    C2 = w2_ref.shape[1]
    C3 = w3_ref.shape[1]
    Hh, Wh = H // 2, W // 2

    # ---- conv1 (1 -> C1, 3x3, pad 1) + ReLU --------------------------------
    # Cin == 1 would waste the entire MXU contraction dim -> VPU per-tap MAC.
    p1[...] = jnp.zeros_like(p1)
    p1[:, 1:1 + H, 1:1 + W, :] = x_ref[...]
    w1 = w1_ref[...]                                            # (9, C1)
    acc1 = jnp.zeros((Nb, H, W, C1), jnp.float32)
    for t, (dy, dx) in enumerate(_TAPS3):
        acc1 = acc1 + p1[:, dy:dy + H, dx:dx + W, :] * w1[t]
    act1 = jnp.maximum(acc1 + b1_ref[...], 0.0)                 # (Nb,H,W,C1)

    # ---- conv2 (C1 -> C2, 3x3, pad 1) + ReLU -------------------------------
    # im2col slab + one bf16 MXU matmul (K = 9*C1 = 144), f32 accumulation.
    p2[...] = jnp.zeros_like(p2)
    p2[:, 1:1 + H, 1:1 + W, :] = act1
    cols = [p2[:, dy:dy + H, dx:dx + W, :].reshape(Nb * H * W, C1)
            for dy, dx in _TAPS3]
    slab2 = jnp.concatenate(cols, axis=-1).astype(jnp.bfloat16)  # (M, 9*C1)
    acc2 = jnp.dot(slab2, w2_ref[...], preferred_element_type=jnp.float32)
    act2 = jnp.maximum(acc2 + b2_ref[...], 0.0)                  # (M, C2)

    # ---- 2x2 max-pool on the VMEM-resident conv2 output --------------------
    s2[...] = act2.reshape(Nb, H, W, C2)
    wa = s2[:, :, pl.ds(0, Wh, stride=2), :]                     # even cols
    wb = s2[:, :, pl.ds(1, Wh, stride=2), :]                     # odd cols
    wmax = jnp.maximum(wa, wb)                                   # (Nb,H,Wh,C2)
    hmax = wmax.reshape(Nb, Hh, 2, Wh, C2)                       # split leading H
    pooled = jnp.maximum(hmax[:, :, 0, :, :], hmax[:, :, 1, :, :])  # (Nb,Hh,Wh,C2)

    # ---- conv3 (C2 -> C3, 3x3, pad 1) + ReLU -------------------------------
    # im2col + bf16 MXU matmul (K = 9*C2 = 288).
    p3[...] = jnp.zeros_like(p3)
    p3[:, 1:1 + Hh, 1:1 + Wh, :] = pooled
    cols = [p3[:, dy:dy + Hh, dx:dx + Wh, :].reshape(Nb * Hh * Wh, C2)
            for dy, dx in _TAPS3]
    slab3 = jnp.concatenate(cols, axis=-1).astype(jnp.bfloat16)  # (M/4, 9*C2)
    acc3 = jnp.dot(slab3, w3_ref[...], preferred_element_type=jnp.float32)
    act3 = jnp.maximum(acc3 + b3_ref[...], 0.0).reshape(Nb, Hh, Wh, C3)

    # ---- nearest 2x upsample fused into conv4's padded-input build ---------
    # H direction: broadcast a new leading pair dim and merge (free); W
    # direction: two stride-2 sublane stores into the padded scratch.
    uh = jnp.broadcast_to(act3[:, :, None, :, :],
                          (Nb, Hh, 2, Wh, C3)).reshape(Nb, H, Wh, C3)
    p4[...] = jnp.zeros_like(p4)
    p4[:, 2:2 + H, pl.ds(2, Wh, stride=2), :] = uh               # even cols
    p4[:, 2:2 + H, pl.ds(3, Wh, stride=2), :] = uh               # odd cols

    # ---- conv4 (C3 -> 1, 5x5, pad 2), no ReLU ------------------------------
    # Cout == 1 would waste the entire MXU output dim -> VPU weighted sum
    # over the 25 taps + a single channel reduction.
    w4 = w4_ref[...]                                             # (25, C3)
    acc4 = jnp.zeros((Nb, H, W, C3), jnp.float32)
    for t, (dy, dx) in enumerate(_TAPS5):
        acc4 = acc4 + p4[:, dy:dy + H, dx:dx + W, :] * w4[t]
    o_ref[...] = jnp.sum(acc4, axis=-1) + b4_ref[...]            # (Nb,H,W)


# ----------------------------------------------------------------------------
# Wrapper: NCHW in / NCHW out, single fused pallas_call
# ----------------------------------------------------------------------------
def fcnn_forward(params, x_nchw):
    N, Cin, H, W = x_nchw.shape
    assert Cin == 1 and H % 2 == 0 and W % 2 == 0

    w1, b1 = params["conv1"]
    w2, b2 = params["conv2"]
    w3, b3 = params["conv3"]
    w4, b4 = params["conv4"]
    C1, C2, C3 = w1.shape[-1], w2.shape[-1], w3.shape[-1]

    # NCHW -> NHWC is a pure reshape because C == 1 (no transpose op).
    x = x_nchw.reshape(N, H, W, 1)

    # Weight layouts for the kernel.
    w1r = w1.reshape(9, C1)                                   # f32 (VPU path)
    w2r = w2.reshape(9 * C1, C2).astype(jnp.bfloat16)         # bf16 (MXU path)
    w3r = w3.reshape(9 * C2, C3).astype(jnp.bfloat16)         # bf16 (MXU path)
    w4r = w4.reshape(25, C3)                                  # f32 (VPU path)
    b1r = b1.reshape(1, C1)
    b2r = b2.reshape(1, C2)
    b3r = b3.reshape(1, C3)
    b4r = b4.reshape(1, 1)

    out = pl.pallas_call(
        _fcnn_kernel,
        out_shape=jax.ShapeDtypeStruct((N, H, W), jnp.float32),
        grid_spec=pltpu.PrefetchScalarGridSpec(
            num_scalar_prefetch=0,
            grid=(N,),
            in_specs=[
                pl.BlockSpec((1, H, W, 1), lambda n: (n, 0, 0, 0)),
                pl.BlockSpec((9, C1), lambda n: (0, 0)),
                pl.BlockSpec((1, C1), lambda n: (0, 0)),
                pl.BlockSpec((9 * C1, C2), lambda n: (0, 0)),
                pl.BlockSpec((1, C2), lambda n: (0, 0)),
                pl.BlockSpec((9 * C2, C3), lambda n: (0, 0)),
                pl.BlockSpec((1, C3), lambda n: (0, 0)),
                pl.BlockSpec((25, C3), lambda n: (0, 0)),
                pl.BlockSpec((1, 1), lambda n: (0, 0)),
            ],
            out_specs=pl.BlockSpec((1, H, W), lambda n: (n, 0, 0)),
            scratch_shapes=[
                pltpu.VMEM((1, H + 2, W + 2, 1), jnp.float32),       # p1
                pltpu.VMEM((1, H + 2, W + 2, C1), jnp.float32),      # p2
                pltpu.VMEM((1, H, W, C2), jnp.float32),              # s2
                pltpu.VMEM((1, H // 2 + 2, W // 2 + 2, C2), jnp.float32),  # p3
                pltpu.VMEM((1, H + 4, W + 4, C3), jnp.float32),      # p4
            ],
        ),
        compiler_params=pltpu.CompilerParams(
            dimension_semantics=("parallel",)),   # 2x on v7x (2 TCs/chip)
    )(x, w1r, b1r, w2r, b2r, w3r, b3r, w4r, b4r)
    return out.reshape(N, 1, H, W)


# ----------------------------------------------------------------------------
# Parameter init (deterministic, mirroring the PyTorch __init__)
# ----------------------------------------------------------------------------
def _init_conv_params(key, K, cin, cout):
    """Kaiming-normal weights (fan_in, relu gain) + PyTorch-default uniform bias.
    Weight layout is (K, K, Cin, Cout) (HWIO)."""
    kw, kb = jax.random.split(key)
    fan_in = cin * K * K
    std = (2.0 / fan_in) ** 0.5
    w = std * jax.random.normal(kw, (K, K, cin, cout), dtype=jnp.float32)
    bound = 1.0 / (fan_in ** 0.5)
    b = jax.random.uniform(kb, (cout,), minval=-bound, maxval=bound,
                           dtype=jnp.float32)
    return w, b


def init_fcnn_params(key):
    k1, k2, k3, k4 = jax.random.split(key, 4)
    return {
        "conv1": _init_conv_params(k1, 3, 1, 16),
        "conv2": _init_conv_params(k2, 3, 16, 32),
        "conv3": _init_conv_params(k3, 3, 32, 16),
        "conv4": _init_conv_params(k4, 5, 16, 1),
    }


# ----------------------------------------------------------------------------
# Pure-JAX f32 reference (correctness sanity check)
# ----------------------------------------------------------------------------
def _ref_conv(x, w, b, K, relu):
    y = jax.lax.conv_general_dilated(
        x, w, window_strides=(1, 1),
        padding=[((K - 1) // 2, (K - 1) // 2)] * 2,
        dimension_numbers=("NHWC", "HWIO", "NHWC"),
        precision=jax.lax.Precision.HIGHEST)
    y = y + b.reshape(1, 1, 1, -1)
    return jnp.maximum(y, 0.0) if relu else y


def fcnn_forward_ref(params, x_nchw):
    x = jnp.transpose(x_nchw, (0, 2, 3, 1))
    x = _ref_conv(x, *params["conv1"], 3, True)
    x = _ref_conv(x, *params["conv2"], 3, True)
    x = jax.lax.reduce_window(x, -jnp.inf, jax.lax.max,
                              (1, 2, 2, 1), (1, 2, 2, 1), "VALID")
    x = _ref_conv(x, *params["conv3"], 3, True)
    x = jnp.repeat(jnp.repeat(x, 2, axis=1), 2, axis=2)
    x = _ref_conv(x, *params["conv4"], 5, False)
    return jnp.transpose(x, (0, 3, 1, 2))


# ----------------------------------------------------------------------------
if __name__ == "__main__":
    key = jax.random.PRNGKey(0)
    k_params, k_x = jax.random.split(key)

    params = init_fcnn_params(k_params)
    x = jax.random.normal(k_x, (2, 1, 16, 16), dtype=jnp.float32)  # NCHW input

    out = jax.block_until_ready(jax.jit(fcnn_forward)(params, x))
    assert out.shape == (2, 1, 16, 16), out.shape

    ref = jax.block_until_ready(fcnn_forward_ref(params, x))
    max_err = float(jnp.max(jnp.abs(out - ref)))
    # Tolerance reflects bf16 MXU operands for conv2/conv3 (f32 accumulation).
    assert jnp.allclose(out, ref, atol=7.5e-2, rtol=7.5e-2), max_err

    print("KERNEL_OK")
</pallas_src>

<mosaic_0001>
module attributes {stable_mosaic.version = 11 : i64} {
  func.func @_fcnn_kernel(%arg0: i32, %arg1: memref<1x16x16x1xf32, #tpu.memory_space<vmem>>, %arg2: memref<9x16xf32, #tpu.memory_space<vmem>>, %arg3: memref<1x16xf32, #tpu.memory_space<vmem>>, %arg4: memref<144x32xbf16, #tpu.memory_space<vmem>>, %arg5: memref<1x32xf32, #tpu.memory_space<vmem>>, %arg6: memref<288x16xbf16, #tpu.memory_space<vmem>>, %arg7: memref<1x16xf32, #tpu.memory_space<vmem>>, %arg8: memref<25x16xf32, #tpu.memory_space<vmem>>, %arg9: memref<1x1xf32, #tpu.memory_space<vmem>>, %arg10: memref<1x16x16xf32, #tpu.memory_space<vmem>>, %arg11: memref<1x18x18x1xf32, #tpu.memory_space<vmem>>, %arg12: memref<1x18x18x16xf32, #tpu.memory_space<vmem>>, %arg13: memref<1x16x16x32xf32, #tpu.memory_space<vmem>>, %arg14: memref<1x10x10x32xf32, #tpu.memory_space<vmem>>, %arg15: memref<1x20x20x16xf32, #tpu.memory_space<vmem>>) attributes {dimension_semantics = [#tpu.dimension_semantics<parallel>], iteration_bounds = array<i64: 2>, scalar_prefetch = 0 : i64, scratch_operands = 5 : i64, tpu.core_type = #tpu.core_type<tc>, window_params = [{transform_indices = @transform_0, window_bounds = array<i64: 1, 16, 16, 1>}, {pipeline_mode = #tpu.pipeline_mode<synchronous>, transform_indices = @transform_1, window_bounds = array<i64: 9, 16>}, {pipeline_mode = #tpu.pipeline_mode<synchronous>, transform_indices = @transform_2, window_bounds = array<i64: 1, 16>}, {pipeline_mode = #tpu.pipeline_mode<synchronous>, transform_indices = @transform_3, window_bounds = array<i64: 144, 32>}, {pipeline_mode = #tpu.pipeline_mode<synchronous>, transform_indices = @transform_4, window_bounds = array<i64: 1, 32>}, {pipeline_mode = #tpu.pipeline_mode<synchronous>, transform_indices = @transform_5, window_bounds = array<i64: 288, 16>}, {pipeline_mode = #tpu.pipeline_mode<synchronous>, transform_indices = @transform_6, window_bounds = array<i64: 1, 16>}, {pipeline_mode = #tpu.pipeline_mode<synchronous>, transform_indices = @transform_7, window_bounds = array<i64: 25, 16>}, {pipeline_mode = #tpu.pipeline_mode<synchronous>, transform_indices = @transform_8, window_bounds = array<i64: 1, 1>}, {transform_indices = @transform_9, window_bounds = array<i64: 1, 16, 16>}]} {
    %cst = arith.constant 0.000000e+00 : f32
    %0 = vector.broadcast %cst : f32 to vector<1x18x18x1xf32>
    %c0 = arith.constant 0 : index
    %c0_0 = arith.constant 0 : index
    %c0_1 = arith.constant 0 : index
    %c0_2 = arith.constant 0 : index
    %1 = vector.load %arg11[%c0, %c0_0, %c0_1, %c0_2] : memref<1x18x18x1xf32, #tpu.memory_space<vmem>>, vector<1x18x18x1xf32>
    tpu.vector_store %arg11[%c0, %c0_0, %c0_1, %c0_2], %0 {strides = array<i32>} : memref<1x18x18x1xf32, #tpu.memory_space<vmem>>, vector<1x18x18x1xf32>,
    %c0_3 = arith.constant 0 : index
    %c0_4 = arith.constant 0 : index
    %c0_5 = arith.constant 0 : index
    %c0_6 = arith.constant 0 : index
    %2 = vector.load %arg1[%c0_3, %c0_4, %c0_5, %c0_6] : memref<1x16x16x1xf32, #tpu.memory_space<vmem>>, vector<1x16x16x1xf32>
    %c0_7 = arith.constant 0 : index
    %c1 = arith.constant 1 : index
    %c1_8 = arith.constant 1 : index
    %c0_9 = arith.constant 0 : index
    %3 = vector.load %arg11[%c0_7, %c1, %c1_8, %c0_9] : memref<1x18x18x1xf32, #tpu.memory_space<vmem>>, vector<1x16x16x1xf32>
    tpu.vector_store %arg11[%c0_7, %c1, %c1_8, %c0_9], %2 {strides = array<i32>} : memref<1x18x18x1xf32, #tpu.memory_space<vmem>>, vector<1x16x16x1xf32>,
    %c0_10 = arith.constant 0 : index
    %c0_11 = arith.constant 0 : index
    %4 = vector.load %arg2[%c0_10, %c0_11] : memref<9x16xf32, #tpu.memory_space<vmem>>, vector<9x16xf32>
    %cst_12 = arith.constant 0.000000e+00 : f32
    %5 = vector.broadcast %cst_12 : f32 to vector<1x16x16x16xf32>
    %c0_13 = arith.constant 0 : index
    %c0_14 = arith.constant 0 : index
    %c0_15 = arith.constant 0 : index
    %c0_16 = arith.constant 0 : index
    %6 = vector.load %arg11[%c0_13, %c0_14, %c0_15, %c0_16] : memref<1x18x18x1xf32, #tpu.memory_space<vmem>>, vector<1x16x16x1xf32>
    %7 = vector.extract_strided_slice %4 {offsets = [0, 0], sizes = [1, 16], strides = [1, 1]} : vector<9x16xf32> to vector<1x16xf32>
    %8 = vector.shape_cast %7 : vector<1x16xf32> to vector<16xf32>
    %9 = vector.shape_cast %8 : vector<16xf32> to vector<1x1x1x16xf32>
    %10 = vector.broadcast %6 : vector<1x16x16x1xf32> to vector<1x16x16x16xf32>
    %11 = vector.broadcast %9 : vector<1x1x1x16xf32> to vector<1x16x16x16xf32>
    %12 = arith.mulf %10, %11 : vector<1x16x16x16xf32>
    %13 = arith.addf %5, %12 : vector<1x16x16x16xf32>
    %c0_17 = arith.constant 0 : index
    %c0_18 = arith.constant 0 : index
    %c1_19 = arith.constant 1 : index
    %c0_20 = arith.constant 0 : index
    %14 = vector.load %arg11[%c0_17, %c0_18, %c1_19, %c0_20] : memref<1x18x18x1xf32, #tpu.memory_space<vmem>>, vector<1x16x16x1xf32>
    %15 = vector.extract_strided_slice %4 {offsets = [1, 0], sizes = [1, 16], strides = [1, 1]} : vector<9x16xf32> to vector<1x16xf32>
    %16 = vector.shape_cast %15 : vector<1x16xf32> to vector<16xf32>
    %17 = vector.shape_cast %16 : vector<16xf32> to vector<1x1x1x16xf32>
    %18 = vector.broadcast %14 : vector<1x16x16x1xf32> to vector<1x16x16x16xf32>
    %19 = vector.broadcast %17 : vector<1x1x1x16xf32> to vector<1x16x16x16xf32>
    %20 = arith.mulf %18, %19 : vector<1x16x16x16xf32>
    %21 = arith.addf %13, %20 : vector<1x16x16x16xf32>
    %c0_21 = arith.constant 0 : index
    %c0_22 = arith.constant 0 : index
    %c2 = arith.constant 2 : index
    %c0_23 = arith.constant 0 : index
    %22 = vector.load %arg11[%c0_21, %c0_22, %c2, %c0_23] : memref<1x18x18x1xf32, #tpu.memory_space<vmem>>, vector<1x16x16x1xf32>
    %23 = vector.extract_strided_slice %4 {offsets = [2, 0], sizes = [1, 16], strides = [1, 1]} : vector<9x16xf32> to vector<1x16xf32>
    %24 = vector.shape_cast %23 : vector<1x16xf32> to vector<16xf32>
    %25 = vector.shape_cast %24 : vector<16xf32> to vector<1x1x1x16xf32>
    %26 = vector.broadcast %22 : vector<1x16x16x1xf32> to vector<1x16x16x16xf32>
    %27 = vector.broadcast %25 : vector<1x1x1x16xf32> to vector<1x16x16x16xf32>
    %28 = arith.mulf %26, %27 : vector<1x16x16x16xf32>
    %29 = arith.addf %21, %28 : vector<1x16x16x16xf32>
    %c0_24 = arith.constant 0 : index
    %c1_25 = arith.constant 1 : index
    %c0_26 = arith.constant 0 : index
    %c0_27 = arith.constant 0 : index
    %30 = vector.load %arg11[%c0_24, %c1_25, %c0_26, %c0_27] : memref<1x18x18x1xf32, #tpu.memory_space<vmem>>, vector<1x16x16x1xf32>
    %31 = vector.extract_strided_slice %4 {offsets = [3, 0], sizes = [1, 16], strides = [1, 1]} : vector<9x16xf32> to vector<1x16xf32>
    %32 = vector.shape_cast %31 : vector<1x16xf32> to vector<16xf32>
    %33 = vector.shape_cast %32 : vector<16xf32> to vector<1x1x1x16xf32>
    %34 = vector.broadcast %30 : vector<1x16x16x1xf32> to vector<1x16x16x16xf32>
    %35 = vector.broadcast %33 : vector<1x1x1x16xf32> to vector<1x16x16x16xf32>
    %36 = arith.mulf %34, %35 : vector<1x16x16x16xf32>
    %37 = arith.addf %29, %36 : vector<1x16x16x16xf32>
    %c0_28 = arith.constant 0 : index
    %c1_29 = arith.constant 1 : index
    %c1_30 = arith.constant 1 : index
    %c0_31 = arith.constant 0 : index
    %38 = vector.load %arg11[%c0_28, %c1_29, %c1_30, %c0_31] : memref<1x18x18x1xf32, #tpu.memory_space<vmem>>, vector<1x16x16x1xf32>
    %39 = vector.extract_strided_slice %4 {offsets = [4, 0], sizes = [1, 16], strides = [1, 1]} : vector<9x16xf32> to vector<1x16xf32>
    %40 = vector.shape_cast %39 : vector<1x16xf32> to vector<16xf32>
    %41 = vector.shape_cast %40 : vector<16xf32> to vector<1x1x1x16xf32>
    %42 = vector.broadcast %38 : vector<1x16x16x1xf32> to vector<1x16x16x16xf32>
    %43 = vector.broadcast %41 : vector<1x1x1x16xf32> to vector<1x16x16x16xf32>
    %44 = arith.mulf %42, %43 : vector<1x16x16x16xf32>
    %45 = arith.addf %37, %44 : vector<1x16x16x16xf32>
    %c0_32 = arith.constant 0 : index
    %c1_33 = arith.constant 1 : index
    %c2_34 = arith.constant 2 : index
    %c0_35 = arith.constant 0 : index
    %46 = vector.load %arg11[%c0_32, %c1_33, %c2_34, %c0_35] : memref<1x18x18x1xf32, #tpu.memory_space<vmem>>, vector<1x16x16x1xf32>
    %47 = vector.extract_strided_slice %4 {offsets = [5, 0], sizes = [1, 16], strides = [1, 1]} : vector<9x16xf32> to vector<1x16xf32>
    %48 = vector.shape_cast %47 : vector<1x16xf32> to vector<16xf32>
    %49 = vector.shape_cast %48 : vector<16xf32> to vector<1x1x1x16xf32>
    %50 = vector.broadcast %46 : vector<1x16x16x1xf32> to vector<1x16x16x16xf32>
    %51 = vector.broadcast %49 : vector<1x1x1x16xf32> to vector<1x16x16x16xf32>
    %52 = arith.mulf %50, %51 : vector<1x16x16x16xf32>
    %53 = arith.addf %45, %52 : vector<1x16x16x16xf32>
    %c0_36 = arith.constant 0 : index
    %c2_37 = arith.constant 2 : index
    %c0_38 = arith.constant 0 : index
    %c0_39 = arith.constant 0 : index
    %54 = vector.load %arg11[%c0_36, %c2_37, %c0_38, %c0_39] : memref<1x18x18x1xf32, #tpu.memory_space<vmem>>, vector<1x16x16x1xf32>
    %55 = vector.extract_strided_slice %4 {offsets = [6, 0], sizes = [1, 16], strides = [1, 1]} : vector<9x16xf32> to vector<1x16xf32>
    %56 = vector.shape_cast %55 : vector<1x16xf32> to vector<16xf32>
    %57 = vector.shape_cast %56 : vector<16xf32> to vector<1x1x1x16xf32>
    %58 = vector.broadcast %54 : vector<1x16x16x1xf32> to vector<1x16x16x16xf32>
    %59 = vector.broadcast %57 : vector<1x1x1x16xf32> to vector<1x16x16x16xf32>
    %60 = arith.mulf %58, %59 : vector<1x16x16x16xf32>
    %61 = arith.addf %53, %60 : vector<1x16x16x16xf32>
    %c0_40 = arith.constant 0 : index
    %c2_41 = arith.constant 2 : index
    %c1_42 = arith.constant 1 : index
    %c0_43 = arith.constant 0 : index
    %62 = vector.load %arg11[%c0_40, %c2_41, %c1_42, %c0_43] : memref<1x18x18x1xf32, #tpu.memory_space<vmem>>, vector<1x16x16x1xf32>
    %63 = vector.extract_strided_slice %4 {offsets = [7, 0], sizes = [1, 16], strides = [1, 1]} : vector<9x16xf32> to vector<1x16xf32>
    %64 = vector.shape_cast %63 : vector<1x16xf32> to vector<16xf32>
    %65 = vector.shape_cast %64 : vector<16xf32> to vector<1x1x1x16xf32>
    %66 = vector.broadcast %62 : vector<1x16x16x1xf32> to vector<1x16x16x16xf32>
    %67 = vector.broadcast %65 : vector<1x1x1x16xf32> to vector<1x16x16x16xf32>
    %68 = arith.mulf %66, %67 : vector<1x16x16x16xf32>
    %69 = arith.addf %61, %68 : vector<1x16x16x16xf32>
    %c0_44 = arith.constant 0 : index
    %c2_45 = arith.constant 2 : index
    %c2_46 = arith.constant 2 : index
    %c0_47 = arith.constant 0 : index
    %70 = vector.load %arg11[%c0_44, %c2_45, %c2_46, %c0_47] : memref<1x18x18x1xf32, #tpu.memory_space<vmem>>, vector<1x16x16x1xf32>
    %71 = vector.extract_strided_slice %4 {offsets = [8, 0], sizes = [1, 16], strides = [1, 1]} : vector<9x16xf32> to vector<1x16xf32>
    %72 = vector.shape_cast %71 : vector<1x16xf32> to vector<16xf32>
    %73 = vector.shape_cast %72 : vector<16xf32> to vector<1x1x1x16xf32>
    %74 = vector.broadcast %70 : vector<1x16x16x1xf32> to vector<1x16x16x16xf32>
    %75 = vector.broadcast %73 : vector<1x1x1x16xf32> to vector<1x16x16x16xf32>
    %76 = arith.mulf %74, %75 : vector<1x16x16x16xf32>
    %77 = arith.addf %69, %76 : vector<1x16x16x16xf32>
    %c0_48 = arith.constant 0 : index
    %c0_49 = arith.constant 0 : index
    %78 = vector.load %arg3[%c0_48, %c0_49] : memref<1x16xf32, #tpu.memory_space<vmem>>, vector<1x16xf32>
    %79 = vector.shape_cast %78 : vector<1x16xf32> to vector<1x1x1x16xf32>
    %80 = vector.broadcast %79 : vector<1x1x1x16xf32> to vector<1x16x16x16xf32>
    %81 = arith.addf %77, %80 : vector<1x16x16x16xf32>
    %cst_50 = arith.constant 0.000000e+00 : f32
    %82 = vector.broadcast %cst_50 : f32 to vector<1x16x16x16xf32>
    %83 = arith.maximumf %81, %82 : vector<1x16x16x16xf32>
    %cst_51 = arith.constant 0.000000e+00 : f32
    %84 = vector.broadcast %cst_51 : f32 to vector<1x18x18x16xf32>
    %c0_52 = arith.constant 0 : index
    %c0_53 = arith.constant 0 : index
    %c0_54 = arith.constant 0 : index
    %c0_55 = arith.constant 0 : index
    %85 = vector.load %arg12[%c0_52, %c0_53, %c0_54, %c0_55] : memref<1x18x18x16xf32, #tpu.memory_space<vmem>>, vector<1x18x18x16xf32>
    tpu.vector_store %arg12[%c0_52, %c0_53, %c0_54, %c0_55], %84 {strides = array<i32>} : memref<1x18x18x16xf32, #tpu.memory_space<vmem>>, vector<1x18x18x16xf32>,
    %c0_56 = arith.constant 0 : index
    %c1_57 = arith.constant 1 : index
    %c1_58 = arith.constant 1 : index
    %c0_59 = arith.constant 0 : index
    %86 = vector.load %arg12[%c0_56, %c1_57, %c1_58, %c0_59] : memref<1x18x18x16xf32, #tpu.memory_space<vmem>>, vector<1x16x16x16xf32>
    tpu.vector_store %arg12[%c0_56, %c1_57, %c1_58, %c0_59], %83 {strides = array<i32>} : memref<1x18x18x16xf32, #tpu.memory_space<vmem>>, vector<1x16x16x16xf32>,
    %c0_60 = arith.constant 0 : index
    %c0_61 = arith.constant 0 : index
    %c0_62 = arith.constant 0 : index
    %c0_63 = arith.constant 0 : index
    %87 = vector.load %arg12[%c0_60, %c0_61, %c0_62, %c0_63] : memref<1x18x18x16xf32, #tpu.memory_space<vmem>>, vector<1x16x16x16xf32>
    %88 = vector.shape_cast %87 : vector<1x16x16x16xf32> to vector<256x16xf32>
    %c0_64 = arith.constant 0 : index
    %c0_65 = arith.constant 0 : index
    %c1_66 = arith.constant 1 : index
    %c0_67 = arith.constant 0 : index
    %89 = vector.load %arg12[%c0_64, %c0_65, %c1_66, %c0_67] : memref<1x18x18x16xf32, #tpu.memory_space<vmem>>, vector<1x16x16x16xf32>
    %90 = vector.shape_cast %89 : vector<1x16x16x16xf32> to vector<256x16xf32>
    %c0_68 = arith.constant 0 : index
    %c0_69 = arith.constant 0 : index
    %c2_70 = arith.constant 2 : index
    %c0_71 = arith.constant 0 : index
    %91 = vector.load %arg12[%c0_68, %c0_69, %c2_70, %c0_71] : memref<1x18x18x16xf32, #tpu.memory_space<vmem>>, vector<1x16x16x16xf32>
    %92 = vector.shape_cast %91 : vector<1x16x16x16xf32> to vector<256x16xf32>
    %c0_72 = arith.constant 0 : index
    %c1_73 = arith.constant 1 : index
    %c0_74 = arith.constant 0 : index
    %c0_75 = arith.constant 0 : index
    %93 = vector.load %arg12[%c0_72, %c1_73, %c0_74, %c0_75] : memref<1x18x18x16xf32, #tpu.memory_space<vmem>>, vector<1x16x16x16xf32>
    %94 = vector.shape_cast %93 : vector<1x16x16x16xf32> to vector<256x16xf32>
    %c0_76 = arith.constant 0 : index
    %c1_77 = arith.constant 1 : index
    %c1_78 = arith.constant 1 : index
    %c0_79 = arith.constant 0 : index
    %95 = vector.load %arg12[%c0_76, %c1_77, %c1_78, %c0_79] : memref<1x18x18x16xf32, #tpu.memory_space<vmem>>, vector<1x16x16x16xf32>
    %96 = vector.shape_cast %95 : vector<1x16x16x16xf32> to vector<256x16xf32>
    %c0_80 = arith.constant 0 : index
    %c1_81 = arith.constant 1 : index
    %c2_82 = arith.constant 2 : index
    %c0_83 = arith.constant 0 : index
    %97 = vector.load %arg12[%c0_80, %c1_81, %c2_82, %c0_83] : memref<1x18x18x16xf32, #tpu.memory_space<vmem>>, vector<1x16x16x16xf32>
    %98 = vector.shape_cast %97 : vector<1x16x16x16xf32> to vector<256x16xf32>
    %c0_84 = arith.constant 0 : index
    %c2_85 = arith.constant 2 : index
    %c0_86 = arith.constant 0 : index
    %c0_87 = arith.constant 0 : index
    %99 = vector.load %arg12[%c0_84, %c2_85, %c0_86, %c0_87] : memref<1x18x18x16xf32, #tpu.memory_space<vmem>>, vector<1x16x16x16xf32>
    %100 = vector.shape_cast %99 : vector<1x16x16x16xf32> to vector<256x16xf32>
    %c0_88 = arith.constant 0 : index
    %c2_89 = arith.constant 2 : index
    %c1_90 = arith.constant 1 : index
    %c0_91 = arith.constant 0 : index
    %101 = vector.load %arg12[%c0_88, %c2_89, %c1_90, %c0_91] : memref<1x18x18x16xf32, #tpu.memory_space<vmem>>, vector<1x16x16x16xf32>
    %102 = vector.shape_cast %101 : vector<1x16x16x16xf32> to vector<256x16xf32>
    %c0_92 = arith.constant 0 : index
    %c2_93 = arith.constant 2 : index
    %c2_94 = arith.constant 2 : index
    %c0_95 = arith.constant 0 : index
    %103 = vector.load %arg12[%c0_92, %c2_93, %c2_94, %c0_95] : memref<1x18x18x16xf32, #tpu.memory_space<vmem>>, vector<1x16x16x16xf32>
    %104 = vector.shape_cast %103 : vector<1x16x16x16xf32> to vector<256x16xf32>
    %105 = tpu.concatenate %88, %90, %92, %94, %96, %98, %100, %102, %104 in 1 : vector<256x16xf32>, vector<256x16xf32>, vector<256x16xf32>, vector<256x16xf32>, vector<256x16xf32>, vector<256x16xf32>, vector<256x16xf32>, vector<256x16xf32>, vector<256x16xf32> -> vector<256x144xf32>
    %106 = arith.truncf %105 : vector<256x144xf32> to vector<256x144xbf16>
    %c0_96 = arith.constant 0 : index
    %c0_97 = arith.constant 0 : index
    %107 = vector.load %arg4[%c0_96, %c0_97] : memref<144x32xbf16, #tpu.memory_space<vmem>>, vector<144x32xbf16>
    %cst_98 = arith.constant dense<0.000000e+00> : vector<256x32xf32>
    %108 = tpu.matmul %106, %107, %cst_98 {dimension_numbers = #tpu.dot_dimension_numbers<[1], [0], [0], [1], [0, 0, 1, 1], [], []>} : vector<256x144xbf16>, vector<144x32xbf16>, vector<256x32xf32> -> vector<256x32xf32>
    %c0_99 = arith.constant 0 : index
    %c0_100 = arith.constant 0 : index
    %109 = vector.load %arg5[%c0_99, %c0_100] : memref<1x32xf32, #tpu.memory_space<vmem>>, vector<1x32xf32>
    %110 = vector.broadcast %109 : vector<1x32xf32> to vector<256x32xf32>
    %111 = arith.addf %108, %110 : vector<256x32xf32>
    %cst_101 = arith.constant 0.000000e+00 : f32
    %112 = vector.broadcast %cst_101 : f32 to vector<256x32xf32>
    %113 = arith.maximumf %111, %112 : vector<256x32xf32>
    %114 = vector.shape_cast %113 : vector<256x32xf32> to vector<1x16x16x32xf32>
    %c0_102 = arith.constant 0 : index
    %c0_103 = arith.constant 0 : index
    %c0_104 = arith.constant 0 : index
    %c0_105 = arith.constant 0 : index
    %115 = vector.load %arg13[%c0_102, %c0_103, %c0_104, %c0_105] : memref<1x16x16x32xf32, #tpu.memory_space<vmem>>, vector<1x16x16x32xf32>
    tpu.vector_store %arg13[%c0_102, %c0_103, %c0_104, %c0_105], %114 {strides = array<i32>} : memref<1x16x16x32xf32, #tpu.memory_space<vmem>>, vector<1x16x16x32xf32>,
    %c0_106 = arith.constant 0 : index
    %c0_107 = arith.constant 0 : index
    %c0_108 = arith.constant 0 : index
    %c0_109 = arith.constant 0 : index
    %116 = tpu.strided_load %arg13[%c0_106, %c0_107, %c0_108, %c0_109] {strides = array<i32: 1, 1, 2, 1>} : memref<1x16x16x32xf32, #tpu.memory_space<vmem>>, vector<1x16x8x32xf32>
    %c0_110 = arith.constant 0 : index
    %c0_111 = arith.constant 0 : index
    %c1_112 = arith.constant 1 : index
    %c0_113 = arith.constant 0 : index
    %117 = tpu.strided_load %arg13[%c0_110, %c0_111, %c1_112, %c0_113] {strides = array<i32: 1, 1, 2, 1>} : memref<1x16x16x32xf32, #tpu.memory_space<vmem>>, vector<1x16x8x32xf32>
    %118 = arith.maximumf %116, %117 : vector<1x16x8x32xf32>
    %119 = vector.shape_cast %118 : vector<1x16x8x32xf32> to vector<1x8x2x8x32xf32>
    %120 = vector.extract_strided_slice %119 {offsets = [0, 0, 0, 0, 0], sizes = [1, 8, 1, 8, 32], strides = [1, 1, 1, 1, 1]} : vector<1x8x2x8x32xf32> to vector<1x8x1x8x32xf32>
    %121 = vector.shape_cast %120 : vector<1x8x1x8x32xf32> to vector<1x8x8x32xf32>
    %122 = vector.extract_strided_slice %119 {offsets = [0, 0, 1, 0, 0], sizes = [1, 8, 1, 8, 32], strides = [1, 1, 1, 1, 1]} : vector<1x8x2x8x32xf32> to vector<1x8x1x8x32xf32>
    %123 = vector.shape_cast %122 : vector<1x8x1x8x32xf32> to vector<1x8x8x32xf32>
    %124 = arith.maximumf %121, %123 : vector<1x8x8x32xf32>
    %cst_114 = arith.constant 0.000000e+00 : f32
    %125 = vector.broadcast %cst_114 : f32 to vector<1x10x10x32xf32>
    %c0_115 = arith.constant 0 : index
    %c0_116 = arith.constant 0 : index
    %c0_117 = arith.constant 0 : index
    %c0_118 = arith.constant 0 : index
    %126 = vector.load %arg14[%c0_115, %c0_116, %c0_117, %c0_118] : memref<1x10x10x32xf32, #tpu.memory_space<vmem>>, vector<1x10x10x32xf32>
    tpu.vector_store %arg14[%c0_115, %c0_116, %c0_117, %c0_118], %125 {strides = array<i32>} : memref<1x10x10x32xf32, #tpu.memory_space<vmem>>, vector<1x10x10x32xf32>,
    %c0_119 = arith.constant 0 : index
    %c1_120 = arith.constant 1 : index
    %c1_121 = arith.constant 1 : index
    %c0_122 = arith.constant 0 : index
    %127 = vector.load %arg14[%c0_119, %c1_120, %c1_121, %c0_122] : memref<1x10x10x32xf32, #tpu.memory_space<vmem>>, vector<1x8x8x32xf32>
    tpu.vector_store %arg14[%c0_119, %c1_120, %c1_121, %c0_122], %124 {strides = array<i32>} : memref<1x10x10x32xf32, #tpu.memory_space<vmem>>, vector<1x8x8x32xf32>,
    %c0_123 = arith.constant 0 : index
    %c0_124 = arith.constant 0 : index
    %c0_125 = arith.constant 0 : index
    %c0_126 = arith.constant 0 : index
    %128 = vector.load %arg14[%c0_123, %c0_124, %c0_125, %c0_126] : memref<1x10x10x32xf32, #tpu.memory_space<vmem>>, vector<1x8x8x32xf32>
    %129 = vector.shape_cast %128 : vector<1x8x8x32xf32> to vector<64x32xf32>
    %c0_127 = arith.constant 0 : index
    %c0_128 = arith.constant 0 : index
    %c1_129 = arith.constant 1 : index
    %c0_130 = arith.constant 0 : index
    %130 = vector.load %arg14[%c0_127, %c0_128, %c1_129, %c0_130] : memref<1x10x10x32xf32, #tpu.memory_space<vmem>>, vector<1x8x8x32xf32>
    %131 = vector.shape_cast %130 : vector<1x8x8x32xf32> to vector<64x32xf32>
    %c0_131 = arith.constant 0 : index
    %c0_132 = arith.constant 0 : index
    %c2_133 = arith.constant 2 : index
    %c0_134 = arith.constant 0 : index
    %132 = vector.load %arg14[%c0_131, %c0_132, %c2_133, %c0_134] : memref<1x10x10x32xf32, #tpu.memory_space<vmem>>, vector<1x8x8x32xf32>
    %133 = vector.shape_cast %132 : vector<1x8x8x32xf32> to vector<64x32xf32>
    %c0_135 = arith.constant 0 : index
    %c1_136 = arith.constant 1 : index
    %c0_137 = arith.constant 0 : index
    %c0_138 = arith.constant 0 : index
    %134 = vector.load %arg14[%c0_135, %c1_136, %c0_137, %c0_138] : memref<1x10x10x32xf32, #tpu.memory_space<vmem>>, vector<1x8x8x32xf32>
    %135 = vector.shape_cast %134 : vector<1x8x8x32xf32> to vector<64x32xf32>
    %c0_139 = arith.constant 0 : index
    %c1_140 = arith.constant 1 : index
    %c1_141 = arith.constant 1 : index
    %c0_142 = arith.constant 0 : index
    %136 = vector.load %arg14[%c0_139, %c1_140, %c1_141, %c0_142] : memref<1x10x10x32xf32, #tpu.memory_space<vmem>>, vector<1x8x8x32xf32>
    %137 = vector.shape_cast %136 : vector<1x8x8x32xf32> to vector<64x32xf32>
    %c0_143 = arith.constant 0 : index
    %c1_144 = arith.constant 1 : index
    %c2_145 = arith.constant 2 : index
    %c0_146 = arith.constant 0 : index
    %138 = vector.load %arg14[%c0_143, %c1_144, %c2_145, %c0_146] : memref<1x10x10x32xf32, #tpu.memory_space<vmem>>, vector<1x8x8x32xf32>
    %139 = vector.shape_cast %138 : vector<1x8x8x32xf32> to vector<64x32xf32>
    %c0_147 = arith.constant 0 : index
    %c2_148 = arith.constant 2 : index
    %c0_149 = arith.constant 0 : index
    %c0_150 = arith.constant 0 : index
    %140 = vector.load %arg14[%c0_147, %c2_148, %c0_149, %c0_150] : memref<1x10x10x32xf32, #tpu.memory_space<vmem>>, vector<1x8x8x32xf32>
    %141 = vector.shape_cast %140 : vector<1x8x8x32xf32> to vector<64x32xf32>
    %c0_151 = arith.constant 0 : index
    %c2_152 = arith.constant 2 : index
    %c1_153 = arith.constant 1 : index
    %c0_154 = arith.constant 0 : index
    %142 = vector.load %arg14[%c0_151, %c2_152, %c1_153, %c0_154] : memref<1x10x10x32xf32, #tpu.memory_space<vmem>>, vector<1x8x8x32xf32>
    %143 = vector.shape_cast %142 : vector<1x8x8x32xf32> to vector<64x32xf32>
    %c0_155 = arith.constant 0 : index
    %c2_156 = arith.constant 2 : index
    %c2_157 = arith.constant 2 : index
    %c0_158 = arith.constant 0 : index
    %144 = vector.load %arg14[%c0_155, %c2_156, %c2_157, %c0_158] : memref<1x10x10x32xf32, #tpu.memory_space<vmem>>, vector<1x8x8x32xf32>
    %145 = vector.shape_cast %144 : vector<1x8x8x32xf32> to vector<64x32xf32>
    %146 = tpu.concatenate %129, %131, %133, %135, %137, %139, %141, %143, %145 in 1 : vector<64x32xf32>, vector<64x32xf32>, vector<64x32xf32>, vector<64x32xf32>, vector<64x32xf32>, vector<64x32xf32>, vector<64x32xf32>, vector<64x32xf32>, vector<64x32xf32> -> vector<64x288xf32>
    %147 = arith.truncf %146 : vector<64x288xf32> to vector<64x288xbf16>
    %c0_159 = arith.constant 0 : index
    %c0_160 = arith.constant 0 : index
    %148 = vector.load %arg6[%c0_159, %c0_160] : memref<288x16xbf16, #tpu.memory_space<vmem>>, vector<288x16xbf16>
    %cst_161 = arith.constant dense<0.000000e+00> : vector<64x16xf32>
    %149 = tpu.matmul %147, %148, %cst_161 {dimension_numbers = #tpu.dot_dimension_numbers<[1], [0], [0], [1], [0, 0, 1, 1], [], []>} : vector<64x288xbf16>, vector<288x16xbf16>, vector<64x16xf32> -> vector<64x16xf32>
    %c0_162 = arith.constant 0 : index
    %c0_163 = arith.constant 0 : index
    %150 = vector.load %arg7[%c0_162, %c0_163] : memref<1x16xf32, #tpu.memory_space<vmem>>, vector<1x16xf32>
    %151 = vector.broadcast %150 : vector<1x16xf32> to vector<64x16xf32>
    %152 = arith.addf %149, %151 : vector<64x16xf32>
    %cst_164 = arith.constant 0.000000e+00 : f32
    %153 = vector.broadcast %cst_164 : f32 to vector<64x16xf32>
    %154 = arith.maximumf %152, %153 : vector<64x16xf32>
    %155 = vector.shape_cast %154 : vector<64x16xf32> to vector<1x8x8x16xf32>
    %156 = vector.shape_cast %155 : vector<1x8x8x16xf32> to vector<1x8x1x8x16xf32>
    %157 = vector.shape_cast %156 : vector<1x8x1x8x16xf32> to vector<1x8x1x8x16xf32>
    %158 = vector.broadcast %157 : vector<1x8x1x8x16xf32> to vector<1x8x2x8x16xf32>
    %159 = vector.shape_cast %158 : vector<1x8x2x8x16xf32> to vector<1x16x8x16xf32>
    %cst_165 = arith.constant 0.000000e+00 : f32
    %160 = vector.broadcast %cst_165 : f32 to vector<1x20x20x16xf32>
    %c0_166 = arith.constant 0 : index
    %c0_167 = arith.constant 0 : index
    %c0_168 = arith.constant 0 : index
    %c0_169 = arith.constant 0 : index
    %161 = vector.load %arg15[%c0_166, %c0_167, %c0_168, %c0_169] : memref<1x20x20x16xf32, #tpu.memory_space<vmem>>, vector<1x20x20x16xf32>
    tpu.vector_store %arg15[%c0_166, %c0_167, %c0_168, %c0_169], %160 {strides = array<i32>} : memref<1x20x20x16xf32, #tpu.memory_space<vmem>>, vector<1x20x20x16xf32>,
    %c0_170 = arith.constant 0 : index
    %c2_171 = arith.constant 2 : index
    %c2_172 = arith.constant 2 : index
    %c0_173 = arith.constant 0 : index
    %162 = tpu.strided_load %arg15[%c0_170, %c2_171, %c2_172, %c0_173] {strides = array<i32: 1, 1, 2, 1>} : memref<1x20x20x16xf32, #tpu.memory_space<vmem>>, vector<1x16x8x16xf32>
    tpu.strided_store %arg15[%c0_170, %c2_171, %c2_172, %c0_173], %159 {strides = array<i32: 1, 1, 2, 1>} : memref<1x20x20x16xf32, #tpu.memory_space<vmem>>, vector<1x16x8x16xf32>
    %c0_174 = arith.constant 0 : index
    %c2_175 = arith.constant 2 : index
    %c3 = arith.constant 3 : index
    %c0_176 = arith.constant 0 : index
    %163 = tpu.strided_load %arg15[%c0_174, %c2_175, %c3, %c0_176] {strides = array<i32: 1, 1, 2, 1>} : memref<1x20x20x16xf32, #tpu.memory_space<vmem>>, vector<1x16x8x16xf32>
    tpu.strided_store %arg15[%c0_174, %c2_175, %c3, %c0_176], %159 {strides = array<i32: 1, 1, 2, 1>} : memref<1x20x20x16xf32, #tpu.memory_space<vmem>>, vector<1x16x8x16xf32>
    %c0_177 = arith.constant 0 : index
    %c0_178 = arith.constant 0 : index
    %164 = vector.load %arg8[%c0_177, %c0_178] : memref<25x16xf32, #tpu.memory_space<vmem>>, vector<25x16xf32>
    %cst_179 = arith.constant 0.000000e+00 : f32
    %165 = vector.broadcast %cst_179 : f32 to vector<1x16x16x16xf32>
    %c0_180 = arith.constant 0 : index
    %c0_181 = arith.constant 0 : index
    %c0_182 = arith.constant 0 : index
    %c0_183 = arith.constant 0 : index
    %166 = vector.load %arg15[%c0_180, %c0_181, %c0_182, %c0_183] : memref<1x20x20x16xf32, #tpu.memory_space<vmem>>, vector<1x16x16x16xf32>
    %167 = vector.extract_strided_slice %164 {offsets = [0, 0], sizes = [1, 16], strides = [1, 1]} : vector<25x16xf32> to vector<1x16xf32>
    %168 = vector.shape_cast %167 : vector<1x16xf32> to vector<16xf32>
    %169 = vector.shape_cast %168 : vector<16xf32> to vector<1x1x1x16xf32>
    %170 = vector.broadcast %169 : vector<1x1x1x16xf32> to vector<1x16x16x16xf32>
    %171 = arith.mulf %166, %170 : vector<1x16x16x16xf32>
    %172 = arith.addf %165, %171 : vector<1x16x16x16xf32>
    %c0_184 = arith.constant 0 : index
    %c0_185 = arith.constant 0 : index
    %c1_186 = arith.constant 1 : index
    %c0_187 = arith.constant 0 : index
    %173 = vector.load %arg15[%c0_184, %c0_185, %c1_186, %c0_187] : memref<1x20x20x16xf32, #tpu.memory_space<vmem>>, vector<1x16x16x16xf32>
    %174 = vector.extract_strided_slice %164 {offsets = [1, 0], sizes = [1, 16], strides = [1, 1]} : vector<25x16xf32> to vector<1x16xf32>
    %175 = vector.shape_cast %174 : vector<1x16xf32> to vector<16xf32>
    %176 = vector.shape_cast %175 : vector<16xf32> to vector<1x1x1x16xf32>
    %177 = vector.broadcast %176 : vector<1x1x1x16xf32> to vector<1x16x16x16xf32>
    %178 = arith.mulf %173, %177 : vector<1x16x16x16xf32>
    %179 = arith.addf %172, %178 : vector<1x16x16x16xf32>
    %c0_188 = arith.constant 0 : index
    %c0_189 = arith.constant 0 : index
    %c2_190 = arith.constant 2 : index
    %c0_191 = arith.constant 0 : index
    %180 = vector.load %arg15[%c0_188, %c0_189, %c2_190, %c0_191] : memref<1x20x20x16xf32, #tpu.memory_space<vmem>>, vector<1x16x16x16xf32>
    %181 = vector.extract_strided_slice %164 {offsets = [2, 0], sizes = [1, 16], strides = [1, 1]} : vector<25x16xf32> to vector<1x16xf32>
    %182 = vector.shape_cast %181 : vector<1x16xf32> to vector<16xf32>
    %183 = vector.shape_cast %182 : vector<16xf32> to vector<1x1x1x16xf32>
    %184 = vector.broadcast %183 : vector<1x1x1x16xf32> to vector<1x16x16x16xf32>
    %185 = arith.mulf %180, %184 : vector<1x16x16x16xf32>
    %186 = arith.addf %179, %185 : vector<1x16x16x16xf32>
    %c0_192 = arith.constant 0 : index
    %c0_193 = arith.constant 0 : index
    %c3_194 = arith.constant 3 : index
    %c0_195 = arith.constant 0 : index
    %187 = vector.load %arg15[%c0_192, %c0_193, %c3_194, %c0_195] : memref<1x20x20x16xf32, #tpu.memory_space<vmem>>, vector<1x16x16x16xf32>
    %188 = vector.extract_strided_slice %164 {offsets = [3, 0], sizes = [1, 16], strides = [1, 1]} : vector<25x16xf32> to vector<1x16xf32>
    %189 = vector.shape_cast %188 : vector<1x16xf32> to vector<16xf32>
    %190 = vector.shape_cast %189 : vector<16xf32> to vector<1x1x1x16xf32>
    %191 = vector.broadcast %190 : vector<1x1x1x16xf32> to vector<1x16x16x16xf32>
    %192 = arith.mulf %187, %191 : vector<1x16x16x16xf32>
    %193 = arith.addf %186, %192 : vector<1x16x16x16xf32>
    %c0_196 = arith.constant 0 : index
    %c0_197 = arith.constant 0 : index
    %c4 = arith.constant 4 : index
    %c0_198 = arith.constant 0 : index
    %194 = vector.load %arg15[%c0_196, %c0_197, %c4, %c0_198] : memref<1x20x20x16xf32, #tpu.memory_space<vmem>>, vector<1x16x16x16xf32>
    %195 = vector.extract_strided_slice %164 {offsets = [4, 0], sizes = [1, 16], strides = [1, 1]} : vector<25x16xf32> to vector<1x16xf32>
    %196 = vector.shape_cast %195 : vector<1x16xf32> to vector<16xf32>
    %197 = vector.shape_cast %196 : vector<16xf32> to vector<1x1x1x16xf32>
    %198 = vector.broadcast %197 : vector<1x1x1x16xf32> to vector<1x16x16x16xf32>
    %199 = arith.mulf %194, %198 : vector<1x16x16x16xf32>
    %200 = arith.addf %193, %199 : vector<1x16x16x16xf32>
    %c0_199 = arith.constant 0 : index
    %c1_200 = arith.constant 1 : index
    %c0_201 = arith.constant 0 : index
    %c0_202 = arith.constant 0 : index
    %201 = vector.load %arg15[%c0_199, %c1_200, %c0_201, %c0_202] : memref<1x20x20x16xf32, #tpu.memory_space<vmem>>, vector<1x16x16x16xf32>
    %202 = vector.extract_strided_slice %164 {offsets = [5, 0], sizes = [1, 16], strides = [1, 1]} : vector<25x16xf32> to vector<1x16xf32>
    %203 = vector.shape_cast %202 : vector<1x16xf32> to vector<16xf32>
    %204 = vector.shape_cast %203 : vector<16xf32> to vector<1x1x1x16xf32>
    %205 = vector.broadcast %204 : vector<1x1x1x16xf32> to vector<1x16x16x16xf32>
    %206 = arith.mulf %201, %205 : vector<1x16x16x16xf32>
    %207 = arith.addf %200, %206 : vector<1x16x16x16xf32>
    %c0_203 = arith.constant 0 : index
    %c1_204 = arith.constant 1 : index
    %c1_205 = arith.constant 1 : index
    %c0_206 = arith.constant 0 : index
    %208 = vector.load %arg15[%c0_203, %c1_204, %c1_205, %c0_206] : memref<1x20x20x16xf32, #tpu.memory_space<vmem>>, vector<1x16x16x16xf32>
    %209 = vector.extract_strided_slice %164 {offsets = [6, 0], sizes = [1, 16], strides = [1, 1]} : vector<25x16xf32> to vector<1x16xf32>
    %210 = vector.shape_cast %209 : vector<1x16xf32> to vector<16xf32>
    %211 = vector.shape_cast %210 : vector<16xf32> to vector<1x1x1x16xf32>
    %212 = vector.broadcast %211 : vector<1x1x1x16xf32> to vector<1x16x16x16xf32>
    %213 = arith.mulf %208, %212 : vector<1x16x16x16xf32>
    %214 = arith.addf %207, %213 : vector<1x16x16x16xf32>
    %c0_207 = arith.constant 0 : index
    %c1_208 = arith.constant 1 : index
    %c2_209 = arith.constant 2 : index
    %c0_210 = arith.constant 0 : index
    %215 = vector.load %arg15[%c0_207, %c1_208, %c2_209, %c0_210] : memref<1x20x20x16xf32, #tpu.memory_space<vmem>>, vector<1x16x16x16xf32>
    %216 = vector.extract_strided_slice %164 {offsets = [7, 0], sizes = [1, 16], strides = [1, 1]} : vector<25x16xf32> to vector<1x16xf32>
    %217 = vector.shape_cast %216 : vector<1x16xf32> to vector<16xf32>
    %218 = vector.shape_cast %217 : vector<16xf32> to vector<1x1x1x16xf32>
    %219 = vector.broadcast %218 : vector<1x1x1x16xf32> to vector<1x16x16x16xf32>
    %220 = arith.mulf %215, %219 : vector<1x16x16x16xf32>
    %221 = arith.addf %214, %220 : vector<1x16x16x16xf32>
    %c0_211 = arith.constant 0 : index
    %c1_212 = arith.constant 1 : index
    %c3_213 = arith.constant 3 : index
    %c0_214 = arith.constant 0 : index
    %222 = vector.load %arg15[%c0_211, %c1_212, %c3_213, %c0_214] : memref<1x20x20x16xf32, #tpu.memory_space<vmem>>, vector<1x16x16x16xf32>
    %223 = vector.extract_strided_slice %164 {offsets = [8, 0], sizes = [1, 16], strides = [1, 1]} : vector<25x16xf32> to vector<1x16xf32>
    %224 = vector.shape_cast %223 : vector<1x16xf32> to vector<16xf32>
    %225 = vector.shape_cast %224 : vector<16xf32> to vector<1x1x1x16xf32>
    %226 = vector.broadcast %225 : vector<1x1x1x16xf32> to vector<1x16x16x16xf32>
    %227 = arith.mulf %222, %226 : vector<1x16x16x16xf32>
    %228 = arith.addf %221, %227 : vector<1x16x16x16xf32>
    %c0_215 = arith.constant 0 : index
    %c1_216 = arith.constant 1 : index
    %c4_217 = arith.constant 4 : index
    %c0_218 = arith.constant 0 : index
    %229 = vector.load %arg15[%c0_215, %c1_216, %c4_217, %c0_218] : memref<1x20x20x16xf32, #tpu.memory_space<vmem>>, vector<1x16x16x16xf32>
    %230 = vector.extract_strided_slice %164 {offsets = [9, 0], sizes = [1, 16], strides = [1, 1]} : vector<25x16xf32> to vector<1x16xf32>
    %231 = vector.shape_cast %230 : vector<1x16xf32> to vector<16xf32>
    %232 = vector.shape_cast %231 : vector<16xf32> to vector<1x1x1x16xf32>
    %233 = vector.broadcast %232 : vector<1x1x1x16xf32> to vector<1x16x16x16xf32>
    %234 = arith.mulf %229, %233 : vector<1x16x16x16xf32>
    %235 = arith.addf %228, %234 : vector<1x16x16x16xf32>
    %c0_219 = arith.constant 0 : index
    %c2_220 = arith.constant 2 : index
    %c0_221 = arith.constant 0 : index
    %c0_222 = arith.constant 0 : index
    %236 = vector.load %arg15[%c0_219, %c2_220, %c0_221, %c0_222] : memref<1x20x20x16xf32, #tpu.memory_space<vmem>>, vector<1x16x16x16xf32>
    %237 = vector.extract_strided_slice %164 {offsets = [10, 0], sizes = [1, 16], strides = [1, 1]} : vector<25x16xf32> to vector<1x16xf32>
    %238 = vector.shape_cast %237 : vector<1x16xf32> to vector<16xf32>
    %239 = vector.shape_cast %238 : vector<16xf32> to vector<1x1x1x16xf32>
    %240 = vector.broadcast %239 : vector<1x1x1x16xf32> to vector<1x16x16x16xf32>
    %241 = arith.mulf %236, %240 : vector<1x16x16x16xf32>
    %242 = arith.addf %235, %241 : vector<1x16x16x16xf32>
    %c0_223 = arith.constant 0 : index
    %c2_224 = arith.constant 2 : index
    %c1_225 = arith.constant 1 : index
    %c0_226 = arith.constant 0 : index
    %243 = vector.load %arg15[%c0_223, %c2_224, %c1_225, %c0_226] : memref<1x20x20x16xf32, #tpu.memory_space<vmem>>, vector<1x16x16x16xf32>
    %244 = vector.extract_strided_slice %164 {offsets = [11, 0], sizes = [1, 16], strides = [1, 1]} : vector<25x16xf32> to vector<1x16xf32>
    %245 = vector.shape_cast %244 : vector<1x16xf32> to vector<16xf32>
    %246 = vector.shape_cast %245 : vector<16xf32> to vector<1x1x1x16xf32>
    %247 = vector.broadcast %246 : vector<1x1x1x16xf32> to vector<1x16x16x16xf32>
    %248 = arith.mulf %243, %247 : vector<1x16x16x16xf32>
    %249 = arith.addf %242, %248 : vector<1x16x16x16xf32>
    %c0_227 = arith.constant 0 : index
    %c2_228 = arith.constant 2 : index
    %c2_229 = arith.constant 2 : index
    %c0_230 = arith.constant 0 : index
    %250 = vector.load %arg15[%c0_227, %c2_228, %c2_229, %c0_230] : memref<1x20x20x16xf32, #tpu.memory_space<vmem>>, vector<1x16x16x16xf32>
    %251 = vector.extract_strided_slice %164 {offsets = [12, 0], sizes = [1, 16], strides = [1, 1]} : vector<25x16xf32> to vector<1x16xf32>
    %252 = vector.shape_cast %251 : vector<1x16xf32> to vector<16xf32>
    %253 = vector.shape_cast %252 : vector<16xf32> to vector<1x1x1x16xf32>
    %254 = vector.broadcast %253 : vector<1x1x1x16xf32> to vector<1x16x16x16xf32>
    %255 = arith.mulf %250, %254 : vector<1x16x16x16xf32>
    %256 = arith.addf %249, %255 : vector<1x16x16x16xf32>
    %c0_231 = arith.constant 0 : index
    %c2_232 = arith.constant 2 : index
    %c3_233 = arith.constant 3 : index
    %c0_234 = arith.constant 0 : index
    %257 = vector.load %arg15[%c0_231, %c2_232, %c3_233, %c0_234] : memref<1x20x20x16xf32, #tpu.memory_space<vmem>>, vector<1x16x16x16xf32>
    %258 = vector.extract_strided_slice %164 {offsets = [13, 0], sizes = [1, 16], strides = [1, 1]} : vector<25x16xf32> to vector<1x16xf32>
    %259 = vector.shape_cast %258 : vector<1x16xf32> to vector<16xf32>
    %260 = vector.shape_cast %259 : vector<16xf32> to vector<1x1x1x16xf32>
    %261 = vector.broadcast %260 : vector<1x1x1x16xf32> to vector<1x16x16x16xf32>
    %262 = arith.mulf %257, %261 : vector<1x16x16x16xf32>
    %263 = arith.addf %256, %262 : vector<1x16x16x16xf32>
    %c0_235 = arith.constant 0 : index
    %c2_236 = arith.constant 2 : index
    %c4_237 = arith.constant 4 : index
    %c0_238 = arith.constant 0 : index
    %264 = vector.load %arg15[%c0_235, %c2_236, %c4_237, %c0_238] : memref<1x20x20x16xf32, #tpu.memory_space<vmem>>, vector<1x16x16x16xf32>
    %265 = vector.extract_strided_slice %164 {offsets = [14, 0], sizes = [1, 16], strides = [1, 1]} : vector<25x16xf32> to vector<1x16xf32>
    %266 = vector.shape_cast %265 : vector<1x16xf32> to vector<16xf32>
    %267 = vector.shape_cast %266 : vector<16xf32> to vector<1x1x1x16xf32>
    %268 = vector.broadcast %267 : vector<1x1x1x16xf32> to vector<1x16x16x16xf32>
    %269 = arith.mulf %264, %268 : vector<1x16x16x16xf32>
    %270 = arith.addf %263, %269 : vector<1x16x16x16xf32>
    %c0_239 = arith.constant 0 : index
    %c3_240 = arith.constant 3 : index
    %c0_241 = arith.constant 0 : index
    %c0_242 = arith.constant 0 : index
    %271 = vector.load %arg15[%c0_239, %c3_240, %c0_241, %c0_242] : memref<1x20x20x16xf32, #tpu.memory_space<vmem>>, vector<1x16x16x16xf32>
    %272 = vector.extract_strided_slice %164 {offsets = [15, 0], sizes = [1, 16], strides = [1, 1]} : vector<25x16xf32> to vector<1x16xf32>
    %273 = vector.shape_cast %272 : vector<1x16xf32> to vector<16xf32>
    %274 = vector.shape_cast %273 : vector<16xf32> to vector<1x1x1x16xf32>
    %275 = vector.broadcast %274 : vector<1x1x1x16xf32> to vector<1x16x16x16xf32>
    %276 = arith.mulf %271, %275 : vector<1x16x16x16xf32>
    %277 = arith.addf %270, %276 : vector<1x16x16x16xf32>
    %c0_243 = arith.constant 0 : index
    %c3_244 = arith.constant 3 : index
    %c1_245 = arith.constant 1 : index
    %c0_246 = arith.constant 0 : index
    %278 = vector.load %arg15[%c0_243, %c3_244, %c1_245, %c0_246] : memref<1x20x20x16xf32, #tpu.memory_space<vmem>>, vector<1x16x16x16xf32>
    %279 = vector.extract_strided_slice %164 {offsets = [16, 0], sizes = [1, 16], strides = [1, 1]} : vector<25x16xf32> to vector<1x16xf32>
    %280 = vector.shape_cast %279 : vector<1x16xf32> to vector<16xf32>
    %281 = vector.shape_cast %280 : vector<16xf32> to vector<1x1x1x16xf32>
    %282 = vector.broadcast %281 : vector<1x1x1x16xf32> to vector<1x16x16x16xf32>
    %283 = arith.mulf %278, %282 : vector<1x16x16x16xf32>
    %284 = arith.addf %277, %283 : vector<1x16x16x16xf32>
    %c0_247 = arith.constant 0 : index
    %c3_248 = arith.constant 3 : index
    %c2_249 = arith.constant 2 : index
    %c0_250 = arith.constant 0 : index
    %285 = vector.load %arg15[%c0_247, %c3_248, %c2_249, %c0_250] : memref<1x20x20x16xf32, #tpu.memory_space<vmem>>, vector<1x16x16x16xf32>
    %286 = vector.extract_strided_slice %164 {offsets = [17, 0], sizes = [1, 16], strides = [1, 1]} : vector<25x16xf32> to vector<1x16xf32>
    %287 = vector.shape_cast %286 : vector<1x16xf32> to vector<16xf32>
    %288 = vector.shape_cast %287 : vector<16xf32> to vector<1x1x1x16xf32>
    %289 = vector.broadcast %288 : vector<1x1x1x16xf32> to vector<1x16x16x16xf32>
    %290 = arith.mulf %285, %289 : vector<1x16x16x16xf32>
    %291 = arith.addf %284, %290 : vector<1x16x16x16xf32>
    %c0_251 = arith.constant 0 : index
    %c3_252 = arith.constant 3 : index
    %c3_253 = arith.constant 3 : index
    %c0_254 = arith.constant 0 : index
    %292 = vector.load %arg15[%c0_251, %c3_252, %c3_253, %c0_254] : memref<1x20x20x16xf32, #tpu.memory_space<vmem>>, vector<1x16x16x16xf32>
    %293 = vector.extract_strided_slice %164 {offsets = [18, 0], sizes = [1, 16], strides = [1, 1]} : vector<25x16xf32> to vector<1x16xf32>
    %294 = vector.shape_cast %293 : vector<1x16xf32> to vector<16xf32>
    %295 = vector.shape_cast %294 : vector<16xf32> to vector<1x1x1x16xf32>
    %296 = vector.broadcast %295 : vector<1x1x1x16xf32> to vector<1x16x16x16xf32>
    %297 = arith.mulf %292, %296 : vector<1x16x16x16xf32>
    %298 = arith.addf %291, %297 : vector<1x16x16x16xf32>
    %c0_255 = arith.constant 0 : index
    %c3_256 = arith.constant 3 : index
    %c4_257 = arith.constant 4 : index
    %c0_258 = arith.constant 0 : index
    %299 = vector.load %arg15[%c0_255, %c3_256, %c4_257, %c0_258] : memref<1x20x20x16xf32, #tpu.memory_space<vmem>>, vector<1x16x16x16xf32>
    %300 = vector.extract_strided_slice %164 {offsets = [19, 0], sizes = [1, 16], strides = [1, 1]} : vector<25x16xf32> to vector<1x16xf32>
    %301 = vector.shape_cast %300 : vector<1x16xf32> to vector<16xf32>
    %302 = vector.shape_cast %301 : vector<16xf32> to vector<1x1x1x16xf32>
    %303 = vector.broadcast %302 : vector<1x1x1x16xf32> to vector<1x16x16x16xf32>
    %304 = arith.mulf %299, %303 : vector<1x16x16x16xf32>
    %305 = arith.addf %298, %304 : vector<1x16x16x16xf32>
    %c0_259 = arith.constant 0 : index
    %c4_260 = arith.constant 4 : index
    %c0_261 = arith.constant 0 : index
    %c0_262 = arith.constant 0 : index
    %306 = vector.load %arg15[%c0_259, %c4_260, %c0_261, %c0_262] : memref<1x20x20x16xf32, #tpu.memory_space<vmem>>, vector<1x16x16x16xf32>
    %307 = vector.extract_strided_slice %164 {offsets = [20, 0], sizes = [1, 16], strides = [1, 1]} : vector<25x16xf32> to vector<1x16xf32>
    %308 = vector.shape_cast %307 : vector<1x16xf32> to vector<16xf32>
    %309 = vector.shape_cast %308 : vector<16xf32> to vector<1x1x1x16xf32>
    %310 = vector.broadcast %309 : vector<1x1x1x16xf32> to vector<1x16x16x16xf32>
    %311 = arith.mulf %306, %310 : vector<1x16x16x16xf32>
    %312 = arith.addf %305, %311 : vector<1x16x16x16xf32>
    %c0_263 = arith.constant 0 : index
    %c4_264 = arith.constant 4 : index
    %c1_265 = arith.constant 1 : index
    %c0_266 = arith.constant 0 : index
    %313 = vector.load %arg15[%c0_263, %c4_264, %c1_265, %c0_266] : memref<1x20x20x16xf32, #tpu.memory_space<vmem>>, vector<1x16x16x16xf32>
    %314 = vector.extract_strided_slice %164 {offsets = [21, 0], sizes = [1, 16], strides = [1, 1]} : vector<25x16xf32> to vector<1x16xf32>
    %315 = vector.shape_cast %314 : vector<1x16xf32> to vector<16xf32>
    %316 = vector.shape_cast %315 : vector<16xf32> to vector<1x1x1x16xf32>
    %317 = vector.broadcast %316 : vector<1x1x1x16xf32> to vector<1x16x16x16xf32>
    %318 = arith.mulf %313, %317 : vector<1x16x16x16xf32>
    %319 = arith.addf %312, %318 : vector<1x16x16x16xf32>
    %c0_267 = arith.constant 0 : index
    %c4_268 = arith.constant 4 : index
    %c2_269 = arith.constant 2 : index
    %c0_270 = arith.constant 0 : index
    %320 = vector.load %arg15[%c0_267, %c4_268, %c2_269, %c0_270] : memref<1x20x20x16xf32, #tpu.memory_space<vmem>>, vector<1x16x16x16xf32>
    %321 = vector.extract_strided_slice %164 {offsets = [22, 0], sizes = [1, 16], strides = [1, 1]} : vector<25x16xf32> to vector<1x16xf32>
    %322 = vector.shape_cast %321 : vector<1x16xf32> to vector<16xf32>
    %323 = vector.shape_cast %322 : vector<16xf32> to vector<1x1x1x16xf32>
    %324 = vector.broadcast %323 : vector<1x1x1x16xf32> to vector<1x16x16x16xf32>
    %325 = arith.mulf %320, %324 : vector<1x16x16x16xf32>
    %326 = arith.addf %319, %325 : vector<1x16x16x16xf32>
    %c0_271 = arith.constant 0 : index
    %c4_272 = arith.constant 4 : index
    %c3_273 = arith.constant 3 : index
    %c0_274 = arith.constant 0 : index
    %327 = vector.load %arg15[%c0_271, %c4_272, %c3_273, %c0_274] : memref<1x20x20x16xf32, #tpu.memory_space<vmem>>, vector<1x16x16x16xf32>
    %328 = vector.extract_strided_slice %164 {offsets = [23, 0], sizes = [1, 16], strides = [1, 1]} : vector<25x16xf32> to vector<1x16xf32>
    %329 = vector.shape_cast %328 : vector<1x16xf32> to vector<16xf32>
    %330 = vector.shape_cast %329 : vector<16xf32> to vector<1x1x1x16xf32>
    %331 = vector.broadcast %330 : vector<1x1x1x16xf32> to vector<1x16x16x16xf32>
    %332 = arith.mulf %327, %331 : vector<1x16x16x16xf32>
    %333 = arith.addf %326, %332 : vector<1x16x16x16xf32>
    %c0_275 = arith.constant 0 : index
    %c4_276 = arith.constant 4 : index
    %c4_277 = arith.constant 4 : index
    %c0_278 = arith.constant 0 : index
    %334 = vector.load %arg15[%c0_275, %c4_276, %c4_277, %c0_278] : memref<1x20x20x16xf32, #tpu.memory_space<vmem>>, vector<1x16x16x16xf32>
    %335 = vector.extract_strided_slice %164 {offsets = [24, 0], sizes = [1, 16], strides = [1, 1]} : vector<25x16xf32> to vector<1x16xf32>
    %336 = vector.shape_cast %335 : vector<1x16xf32> to vector<16xf32>
    %337 = vector.shape_cast %336 : vector<16xf32> to vector<1x1x1x16xf32>
    %338 = vector.broadcast %337 : vector<1x1x1x16xf32> to vector<1x16x16x16xf32>
    %339 = arith.mulf %334, %338 : vector<1x16x16x16xf32>
    %340 = arith.addf %333, %339 : vector<1x16x16x16xf32>
    %cst_279 = arith.constant dense<0.000000e+00> : vector<1x16x16xf32>
    %341 = vector.multi_reduction <add>, %340, %cst_279 [3] : vector<1x16x16x16xf32> to vector<1x16x16xf32>
    %c0_280 = arith.constant 0 : index
    %c0_281 = arith.constant 0 : index
    %342 = vector.load %arg9[%c0_280, %c0_281] : memref<1x1xf32, #tpu.memory_space<vmem>>, vector<1x1xf32>
    %343 = vector.shape_cast %342 : vector<1x1xf32> to vector<1x1x1xf32>
    %344 = vector.broadcast %343 : vector<1x1x1xf32> to vector<1x16x16xf32>
    %345 = arith.addf %341, %344 : vector<1x16x16xf32>
    %c0_282 = arith.constant 0 : index
    %c0_283 = arith.constant 0 : index
    %c0_284 = arith.constant 0 : index
    %346 = vector.load %arg10[%c0_282, %c0_283, %c0_284] : memref<1x16x16xf32, #tpu.memory_space<vmem>>, vector<1x16x16xf32>
    tpu.vector_store %arg10[%c0_282, %c0_283, %c0_284], %345 {strides = array<i32>} : memref<1x16x16xf32, #tpu.memory_space<vmem>>, vector<1x16x16xf32>,
    return
  }
  func.func @transform_0(%arg0: i32) -> (i32, i32, i32, i32) {
    %c0_i32 = arith.constant 0 : i32
    %c0_i32_0 = arith.constant 0 : i32
    %c0_i32_1 = arith.constant 0 : i32
    %c0_i32_2 = arith.constant 0 : i32
    return %arg0, %c0_i32, %c0_i32_0, %c0_i32_1 : i32, i32, i32, i32
  }
  func.func @transform_1(%arg0: i32) -> (i32, i32) {
    %c0_i32 = arith.constant 0 : i32
    %c0_i32_0 = arith.constant 0 : i32
    %c0_i32_1 = arith.constant 0 : i32
    return %c0_i32, %c0_i32_0 : i32, i32
  }
  func.func @transform_2(%arg0: i32) -> (i32, i32) {
    %c0_i32 = arith.constant 0 : i32
    %c0_i32_0 = arith.constant 0 : i32
    %c0_i32_1 = arith.constant 0 : i32
    return %c0_i32, %c0_i32_0 : i32, i32
  }
  func.func @transform_3(%arg0: i32) -> (i32, i32) {
    %c0_i32 = arith.constant 0 : i32
    %c0_i32_0 = arith.constant 0 : i32
    %c0_i32_1 = arith.constant 0 : i32
    return %c0_i32, %c0_i32_0 : i32, i32
  }
  func.func @transform_4(%arg0: i32) -> (i32, i32) {
    %c0_i32 = arith.constant 0 : i32
    %c0_i32_0 = arith.constant 0 : i32
    %c0_i32_1 = arith.constant 0 : i32
    return %c0_i32, %c0_i32_0 : i32, i32
  }
  func.func @transform_5(%arg0: i32) -> (i32, i32) {
    %c0_i32 = arith.constant 0 : i32
    %c0_i32_0 = arith.constant 0 : i32
    %c0_i32_1 = arith.constant 0 : i32
    return %c0_i32, %c0_i32_0 : i32, i32
  }
  func.func @transform_6(%arg0: i32) -> (i32, i32) {
    %c0_i32 = arith.constant 0 : i32
    %c0_i32_0 = arith.constant 0 : i32
    %c0_i32_1 = arith.constant 0 : i32
    return %c0_i32, %c0_i32_0 : i32, i32
  }
  func.func @transform_7(%arg0: i32) -> (i32, i32) {
    %c0_i32 = arith.constant 0 : i32
    %c0_i32_0 = arith.constant 0 : i32
    %c0_i32_1 = arith.constant 0 : i32
    return %c0_i32, %c0_i32_0 : i32, i32
  }
  func.func @transform_8(%arg0: i32) -> (i32, i32) {
    %c0_i32 = arith.constant 0 : i32
    %c0_i32_0 = arith.constant 0 : i32
    %c0_i32_1 = arith.constant 0 : i32
    return %c0_i32, %c0_i32_0 : i32, i32
  }
  func.func @transform_9(%arg0: i32) -> (i32, i32, i32) {
    %c0_i32 = arith.constant 0 : i32
    %c0_i32_0 = arith.constant 0 : i32
    %c0_i32_1 = arith.constant 0 : i32
    return %arg0, %c0_i32, %c0_i32_0 : i32, i32, i32
  }
}

</mosaic_0001>

<bundles_post_ra>
// kernel: fcnn_forward.1
= control target key start
LH: loop header
LB: loop body
LE: loop exit
PB: predicated region body
PF: predicated region fallthrough
CT: control target
= control target key end

     0   :  { %s15185_s0 = inlined_call_operand.vmem [shape: f32[2,16,16,1], index: 0, kind: input, shape index: {}]   ;;  %s15186_s1 = inlined_call_operand.vmem [shape: f32[9,16], index: 1, kind: input, shape index: {}]   ;;  %s15187_s2 = inlined_call_operand.vmem [shape: f32[1,16], index: 2, kind: input, shape index: {}]   ;;  %s15188_s3 = inlined_call_operand.vmem [shape: bf16[144,32], index: 3, kind: input, shape index: {}]   ;;  %s15189_s4 = inlined_call_operand.vmem [shape: f32[1,32], index: 4, kind: input, shape index: {}]   ;;  %s15190_s5 = inlined_call_operand.vmem [shape: bf16[288,16], index: 5, kind: input, shape index: {}]   ;;  %s15191_s6 = inlined_call_operand.vmem [shape: f32[1,16], index: 6, kind: input, shape index: {}]   ;;  %s15192_s7 = inlined_call_operand.vmem [shape: f32[25,16], index: 7, kind: input, shape index: {}]   ;;  %s15193_s8 = inlined_call_operand.<no memory space> [shape: f32[1,1], index: 8, kind: input, shape index: {}]   ;;  %s15194_s9 = inlined_call_operand.hbm [shape: f32[2,16,16], index: 9, kind: output, shape index: {}]  }
   0x1   :  { %v14_v0 = vstv %s15193_s8 }
   0x2   :  { %15 = vst [vmem:[#allocation7] sm:$0x1] %v14_v0 }
   0x3   :  { %16 = vsyncpa [#allocation9], 0 }
   0x4   :  { %18 = vsyncpa [#allocation9 + $0x1], 0  ;;  %s9642_s11 = smov 0   ;;  %s9644_s12 = smov 0  }
   0x5   :  { %s9646_s13 = smov 0   ;;  %s9648_s14 = smov 0  }
   0x6 LB: > { %s9663_s8 = sadd.s32 4294967295, %s9575_s14   ;;  %s8584_s15 = sadd.s32 4294967294, %s9575_s14   ;;  %s9575_s14 = sphi %s9648_s14, %s16237_s14   ;;  %s9571_s13 = sphi %s9646_s13, %s16236_s13   ;;  %s9567_s12 = sphi %s9644_s12, %s16235_s12   ;;  %s9563_s11 = sphi %s9642_s11, %s16234_s11  }
   0x7   : > { %s9667_s16 = sadd.s32 1, %s9575_s14   ;;  %s225_s17 = sadd.s32 1, %s9571_s13 }
   0x8   : > { %s222_s18 = ssub.s32 %s9575_s14, %s9667_s16  ;;  %p235_p0 = scmp.ne.s32.totalorder %s9571_s13, %s9567_s12 }
   0x9   : > { %p223_p1 = scmp.eq.s32.totalorder %s222_s18, 0  ;;  %p236_p2 = scmp.eq.s32.totalorder %s9663_s8, 1 }
   0xa   : > { %p241_p3 = scmp.ne.s32.totalorder %s9567_s12, %s9563_s11  ;;  %p242_p4 = scmp.eq.s32.totalorder %s8584_s15, 1 }
   0xb   : > { %s9678_s19 = scalar_select %p223_p1, %s9571_s13, %s225_s17  }
   0xc   : > { %p9680_p5 = por %p236_p2, %p235_p0  ;;  %p9684_p6 = por %p242_p4, %p241_p3 }
   0xd   : > { %p8587_p7 = scmp.ge.s32.totalorder %s9575_s14, 1  ;;  %p292_p8 = scmp.lt.s32.totalorder %s9575_s14, 3 }
   0xf   : > { %p293_p9 = pnand %p8587_p7, %p292_p8 }
  0x11   : > { %296 = sbr.rel (%p293_p9) target bundleno = 2222 (0x8ae), region = 56 }
  0x18   : > { %vm334_vm0 = vcmask 7168   ;;  %p328_p10 = scmp.lt.s32.totalorder %s9663_s8, 1  ;;  %vm337_vm1 = vcmask 1024   ;;  %v15195_v1 = vmov 0   ;;  %v15197_v2 = vmov 0.0   ;;  %s9579_s29 = smov 16  }
  0x19   : > { %8777 = vset.pattern.permute.xlu0 %v15195_v1  ;;  %335 = vst.msk [vmem:[#allocation2] sm:$0xff] %vm334_vm0, %v15197_v2  ;;  %336 = vst.msk [vmem:[#allocation2 + $0x8] sm:$0xff] %vm334_vm0, %v15197_v2  ;;  %8778 = vset.pattern.permute.xlu1 %v15195_v1  ;;  %vm2869_vm2 = vcmask 130048   ;;  %vm2872_vm3 = vcmask 123904   ;;  %s9580_s15 = smov 32   ;;  %vm4175_vm4 = vcmask 261120  }
  0x1a   : > { %339 = vst.msk [vmem:[#allocation2 + $0x18] sm:$0xff] %vm334_vm0, %v15197_v2  ;;  %340 = vst.msk [vmem:[#allocation2 + $0x20] sm:$0xff] %vm334_vm0, %v15197_v2  ;;  %s329_s22 = scalar_select %p328_p10, %s9663_s8, 1  ;;  %4532 = vmatprep.subr.bf16.mxu0 %v15195_v1  ;;  %8709 = vmatprep.subr.bf16.mxu1 %v15195_v1  ;;  %vm4208_vm5 = vcmask 392192   ;;  %vm4241_vm6 = vcmask 523264   ;;  %vm4274_vm7 = vcmask 654336  }
  0x1b   : > { %342 = vst.msk [vmem:[#allocation2 + $0x30] sm:$0xff] %vm334_vm0, %v15197_v2  ;;  %343 = vst.msk [vmem:[#allocation2 + $0x38] sm:$0xff] %vm334_vm0, %v15197_v2  ;;  %s9581_s18 = smov 64   ;;  %s9583_s27 = smov 80   ;;  %vm4307_vm8 = vcmask 785408   ;;  %vm4340_vm9 = vcmask 916480  }
  0x1c   : > { %345 = vst.msk [vmem:[#allocation2 + $0x48] sm:$0xff] %vm334_vm0, %v15197_v2  ;;  %346 = vst.msk [vmem:[#allocation2 + $0x50] sm:$0xff] %vm334_vm0, %v15197_v2  ;;  %s8649_s23 = sshll.u32 %s329_s22, 8  ;;  %s9582_s22 = smov 48   ;;  %vm4845_vm10 = vcmask 254976   ;;  %vm5502_vm11 = vcmask 125952  }
  0x1d   : > { %348 = vst.msk [vmem:[#allocation2 + $0x60] sm:$0xff] %vm334_vm0, %v15197_v2  ;;  %349 = vst.msk [vmem:[#allocation2 + $0x68] sm:$0xff] %vm334_vm0, %v15197_v2  ;;  %s9809_s26 = scalar_lea.vmem %s15185_s0, %s8649_s23  ;;  %s9584_s28 = smov 96   ;;  %vm8314_vm12 = vcmask 130112   ;;  %vm8451_vm13 = vcmask 1041409   ;;  %vm8453_vm14 = vcmask 1042434  }
  0x1e   : > { %351 = vst.msk [vmem:[#allocation2 + $0x78] sm:$0xff] %vm334_vm0, %v15197_v2  ;;  %352 = vst.msk [vmem:[#allocation2 + $0x80] sm:$0xff] %vm334_vm0, %v15197_v2  ;;  %v390_v3 = vld [vmem:[%s9809_s26] sm:$0xff]  ;;  %v392_v4 = vld [vmem:[%s9809_s26 + $0x10] sm:$0xff]  ;;  %s9585_s17 = smov 112   ;;  %vm8455_vm15 = vcmask 1043459  }
  0x1f   : > { %354 = vst.msk [vmem:[#allocation2 + $0x90] sm:$0xff] %vm334_vm0, %v15197_v2  ;;  %355 = vst.msk [vmem:[#allocation2 + $0x98] sm:$0xff] %vm334_vm0, %v15197_v2  ;;  %v391_v5 = vld [vmem:[%s9809_s26 + $0x8] sm:$0xff]  ;;  %v394_v6 = vld [vmem:[%s9809_s26 + $0x20] sm:$0xff]  ;;  %s325_s30 = sand.u32 1, %s9567_s12  }
  0x20   : > { %357 = vst.msk [vmem:[#allocation2 + $0xa8] sm:$0xff] %vm334_vm0, %v15197_v2  ;;  %358 = vst.msk [vmem:[#allocation2 + $0xb0] sm:$0xff] %vm334_vm0, %v15197_v2  ;;  %v393_v7 = vld [vmem:[%s9809_s26 + $0x18] sm:$0xff]  ;;  %v396_v8 = vld [vmem:[%s9809_s26 + $0x30] sm:$0xff]  ;;  %s15076_s10 = sshll.u32 %s325_s30, 4  ;;  %s15144_s24 = scalar_lea.sflag [#allocation9], %s325_s30 }
  0x21   : > { %360 = vst.msk [vmem:[#allocation2 + $0xc0] sm:$0xff] %vm334_vm0, %v15197_v2  ;;  %361 = vst.msk [vmem:[#allocation2 + $0xc8] sm:$0xff] %vm334_vm0, %v15197_v2  ;;  %v457_v9 = vld [vmem:[#allocation2] sm:$0xff]  ;;  %v458_v10 = vld [vmem:[#allocation2 + $0x8] sm:$0xff] }
  0x22   : > { %363 = vst.msk [vmem:[#allocation2 + $0xd8] sm:$0xff] %vm334_vm0, %v15197_v2  ;;  %364 = vst.msk [vmem:[#allocation2 + $0xe0] sm:$0xff] %vm334_vm0, %v15197_v2  ;;  %v395_v11 = vld [vmem:[%s9809_s26 + $0x28] sm:$0xff]  ;;  %491 = vperm.xlu0 %8777, %v457_v9   ;;  %v398_v12 = vld [vmem:[%s9809_s26 + $0x40] sm:$0xff] }
  0x23   : > { %366 = vst.msk [vmem:[#allocation2 + $0xf0] sm:$0xff] %vm334_vm0, %v15197_v2  ;;  %367 = vst.msk [vmem:[#allocation2 + $0xf8] sm:$0xff] %vm334_vm0, %v15197_v2  ;;  %v397_v13 = vld [vmem:[%s9809_s26 + $0x38] sm:$0xff]  ;;  %v400_v14 = vld [vmem:[%s9809_s26 + $0x50] sm:$0xff] }
  0x24   : > { %369 = vst.msk [vmem:[#allocation2 + $0x108] sm:$0xff] %vm334_vm0, %v15197_v2  ;;  %370 = vst.msk [vmem:[#allocation2 + $0x110] sm:$0xff] %vm334_vm0, %v15197_v2  ;;  %v399_v15 = vld [vmem:[%s9809_s26 + $0x48] sm:$0xff]  ;;  %v402_v16 = vld [vmem:[%s9809_s26 + $0x60] sm:$0xff] }
  0x25   : > { %372 = vst.msk [vmem:[#allocation2 + $0x120] sm:$0xff] %vm334_vm0, %v15197_v2  ;;  %373 = vst.msk [vmem:[#allocation2 + $0x128] sm:$0xff] %vm334_vm0, %v15197_v2  ;;  %v401_v17 = vld [vmem:[%s9809_s26 + $0x58] sm:$0xff]  ;;  %v404_v18 = vld [vmem:[%s9809_s26 + $0x70] sm:$0xff] }
  0x26   : > { %375 = vst.msk [vmem:[#allocation2 + $0x138] sm:$0xff] %vm334_vm0, %v15197_v2  ;;  %376 = vst.msk [vmem:[#allocation2 + $0x140] sm:$0xff] %vm334_vm0, %v15197_v2  ;;  %v403_v19 = vld [vmem:[%s9809_s26 + $0x68] sm:$0xff]  ;;  %v406_v20 = vld [vmem:[%s9809_s26 + $0x80] sm:$0xff]  ;;  %496 = vperm.xlu0 %8777, %v458_v10  }
  0x27   : > { %378 = vst.msk [vmem:[#allocation2 + $0x150] sm:$0xff] %vm334_vm0, %v15197_v2  ;;  %379 = vst.msk [vmem:[#allocation2 + $0x158] sm:$0xff] %vm334_vm0, %v15197_v2  ;;  %v405_v21 = vld [vmem:[%s9809_s26 + $0x78] sm:$0xff]  ;;  %v408_v22 = vld [vmem:[%s9809_s26 + $0x90] sm:$0xff] }
  0x28   : > { %381 = vst.msk [vmem:[#allocation2 + $0x168] sm:$0xff] %vm334_vm0, %v15197_v2  ;;  %382 = vst.msk [vmem:[#allocation2 + $0x170] sm:$0xff] %vm334_vm0, %v15197_v2  ;;  %v407_v23 = vld [vmem:[%s9809_s26 + $0x88] sm:$0xff]  ;;  %v410_v24 = vld [vmem:[%s9809_s26 + $0xa0] sm:$0xff] }
  0x29   : > { %384 = vst.msk [vmem:[#allocation2 + $0x180] sm:$0xff] %vm334_vm0, %v15197_v2  ;;  %385 = vst.msk [vmem:[#allocation2 + $0x188] sm:$0xff] %vm334_vm0, %v15197_v2  ;;  %v409_v25 = vld [vmem:[%s9809_s26 + $0x98] sm:$0xff]  ;;  %v412_v26 = vld [vmem:[%s9809_s26 + $0xb0] sm:$0xff] }
  0x2a   : > { %387 = vst.msk [vmem:[#allocation2 + $0x198] sm:$0xff] %vm334_vm0, %v15197_v2  ;;  %388 = vst.msk [vmem:[#allocation2 + $0x1a0] sm:$0xff] %vm334_vm0, %v15197_v2  ;;  %v411_v30 = vld [vmem:[%s9809_s26 + $0xa8] sm:$0xff]  ;;  %v414_v31 = vld [vmem:[%s9809_s26 + $0xc0] sm:$0xff] }
  0x2b   : > { %341 = vst.msk [vmem:[#allocation2 + $0x28] sm:$0x3] %vm337_vm1, %v15197_v2  ;;  %338 = vst.msk [vmem:[#allocation2 + $0x10] sm:$0x3] %vm337_vm1, %v15197_v2  ;;  %v413_v35 = vld [vmem:[%s9809_s26 + $0xb8] sm:$0xff]  ;;  %v416_v36 = vld [vmem:[%s9809_s26 + $0xd0] sm:$0xff] }
  0x2c   : > { %344 = vst.msk [vmem:[#allocation2 + $0x40] sm:$0x3] %vm337_vm1, %v15197_v2  ;;  %347 = vst.msk [vmem:[#allocation2 + $0x58] sm:$0x3] %vm337_vm1, %v15197_v2  ;;  %v415_v37 = vld [vmem:[%s9809_s26 + $0xc8] sm:$0xff]  ;;  %v418_v38 = vld [vmem:[%s9809_s26 + $0xe0] sm:$0xff] }
  0x2d   : > { %350 = vst.msk [vmem:[#allocation2 + $0x70] sm:$0x3] %vm337_vm1, %v15197_v2  ;;  %353 = vst.msk [vmem:[#allocation2 + $0x88] sm:$0x3] %vm337_vm1, %v15197_v2  ;;  %v417_v39 = vld [vmem:[%s9809_s26 + $0xd8] sm:$0xff]  ;;  %v419_v41 = vld [vmem:[%s9809_s26 + $0xe8] sm:$0xff] }
  0x2e   : > { %356 = vst.msk [vmem:[#allocation2 + $0xa0] sm:$0x3] %vm337_vm1, %v15197_v2  ;;  %359 = vst.msk [vmem:[#allocation2 + $0xb8] sm:$0x3] %vm337_vm1, %v15197_v2  ;;  %v717_v0 = vld [vmem:[#allocation2 + $0x1] sm:$0xff] }
  0x2f   : > { %362 = vst.msk [vmem:[#allocation2 + $0xd0] sm:$0x3] %vm337_vm1, %v15197_v2  ;;  %365 = vst.msk [vmem:[#allocation2 + $0xe8] sm:$0x3] %vm337_vm1, %v15197_v2 }
  0x30   : > { %368 = vst.msk [vmem:[#allocation2 + $0x100] sm:$0x3] %vm337_vm1, %v15197_v2  ;;  %371 = vst.msk [vmem:[#allocation2 + $0x118] sm:$0x3] %vm337_vm1, %v15197_v2 }
  0x31   : > { %374 = vst.msk [vmem:[#allocation2 + $0x130] sm:$0x3] %vm337_vm1, %v15197_v2  ;;  %377 = vst.msk [vmem:[#allocation2 + $0x148] sm:$0x3] %vm337_vm1, %v15197_v2 }
  0x32   : > { %380 = vst.msk [vmem:[#allocation2 + $0x160] sm:$0x3] %vm337_vm1, %v15197_v2  ;;  %383 = vst.msk [vmem:[#allocation2 + $0x178] sm:$0x3] %vm337_vm1, %v15197_v2 }
  0x33   : > { %386 = vst.msk [vmem:[#allocation2 + $0x190] sm:$0x3] %vm337_vm1, %v15197_v2  ;;  %389 = vst.msk [vmem:[#allocation2 + $0x1a8] sm:$0x3] %vm337_vm1, %v15197_v2  ;;  %vm8459_vm1 = vcmask 1045509  }
  0x34   : > { %423 = vst.msk [vmem:[#allocation2 + $0x19] sm:$0xff] %vm334_vm0, %v390_v3  ;;  %425 = vst.msk [vmem:[#allocation2 + $0x31] sm:$0xff] %vm334_vm0, %v392_v4 }
  0x35   : > { %424 = vst.msk [vmem:[#allocation2 + $0x21] sm:$0xff] %vm334_vm0, %v391_v5  ;;  %427 = vst.msk [vmem:[#allocation2 + $0x49] sm:$0xff] %vm334_vm0, %v394_v6  ;;  %v718_v5 = vld [vmem:[#allocation2 + $0x9] sm:$0xff] }
  0x36   : > { %426 = vst.msk [vmem:[#allocation2 + $0x39] sm:$0xff] %vm334_vm0, %v393_v7  ;;  %429 = vst.msk [vmem:[#allocation2 + $0x61] sm:$0xff] %vm334_vm0, %v396_v8 }
  0x37   : > { %428 = vst.msk [vmem:[#allocation2 + $0x51] sm:$0xff] %vm334_vm0, %v395_v11  ;;  %431 = vst.msk [vmem:[#allocation2 + $0x79] sm:$0xff] %vm334_vm0, %v398_v12 }
  0x38   : > { %430 = vst.msk [vmem:[#allocation2 + $0x69] sm:$0xff] %vm334_vm0, %v397_v13  ;;  %433 = vst.msk [vmem:[#allocation2 + $0x91] sm:$0xff] %vm334_vm0, %v400_v14 }
  0x39   : > { %432 = vst.msk [vmem:[#allocation2 + $0x81] sm:$0xff] %vm334_vm0, %v399_v15  ;;  %435 = vst.msk [vmem:[#allocation2 + $0xa9] sm:$0xff] %vm334_vm0, %v402_v16 }
  0x3a   : > { %434 = vst.msk [vmem:[#allocation2 + $0x99] sm:$0xff] %vm334_vm0, %v401_v17  ;;  %437 = vst.msk [vmem:[#allocation2 + $0xc1] sm:$0xff] %vm334_vm0, %v404_v18 }
  0x3b   : > { %436 = vst.msk [vmem:[#allocation2 + $0xb1] sm:$0xff] %vm334_vm0, %v403_v19  ;;  %439 = vst.msk [vmem:[#allocation2 + $0xd9] sm:$0xff] %vm334_vm0, %v406_v20  ;;  %v9852_v27 = vld [vmem:[#allocation2 + $0x18] sm:$0xff]  ;;  %v9854_v28 = vld [vmem:[#allocation2 + $0x30] sm:$0xff] }
  0x3c   : > { %438 = vst.msk [vmem:[#allocation2 + $0xc9] sm:$0xff] %vm334_vm0, %v405_v21  ;;  %441 = vst.msk [vmem:[#allocation2 + $0xf1] sm:$0xff] %vm334_vm0, %v408_v22  ;;  %501 = vperm.xlu1 %8778, %v9852_v27   ;;  %v9860_v29 = vld [vmem:[#allocation2 + $0x20] sm:$0xff]  ;;  %511 = vperm.xlu0 %8777, %v9854_v28   ;;  %v9867_v32 = vld [vmem:[#allocation2 + $0x48] sm:$0xff] }
  0x3d   : > { %440 = vst.msk [vmem:[#allocation2 + $0xe1] sm:$0xff] %vm334_vm0, %v407_v23  ;;  %443 = vst.msk [vmem:[#allocation2 + $0x109] sm:$0xff] %vm334_vm0, %v410_v24  ;;  %v9870_v33 = vld [vmem:[#allocation2 + $0x38] sm:$0xff]  ;;  %v9873_v34 = vld [vmem:[#allocation2 + $0x60] sm:$0xff] }
  0x3e   : > { %442 = vst.msk [vmem:[#allocation2 + $0xf9] sm:$0xff] %vm334_vm0, %v409_v25  ;;  %445 = vst.msk [vmem:[#allocation2 + $0x121] sm:$0xff] %vm334_vm0, %v412_v26  ;;  %v9884_v40 = vld [vmem:[#allocation2 + $0x50] sm:$0xff]  ;;  %v9891_v42 = vld [vmem:[#allocation2 + $0x78] sm:$0xff] }
  0x3f   : > { %444 = vst.msk [vmem:[#allocation2 + $0x111] sm:$0xff] %vm334_vm0, %v411_v30  ;;  %447 = vst.msk [vmem:[#allocation2 + $0x139] sm:$0xff] %vm334_vm0, %v414_v31  ;;  %v9894_v43 = vld [vmem:[#allocation2 + $0x68] sm:$0xff]  ;;  %v9897_v44 = vld [vmem:[#allocation2 + $0x90] sm:$0xff] }
  0x40   : > { %506 = vperm.xlu1 %8778, %v9860_v29   ;;  %521 = vperm.xlu0 %8777, %v9867_v32   ;;  %446 = vst.msk [vmem:[#allocation2 + $0x129] sm:$0xff] %vm334_vm0, %v413_v35  ;;  %449 = vst.msk [vmem:[#allocation2 + $0x151] sm:$0xff] %vm334_vm0, %v416_v36  ;;  %v9900_v45 = vld [vmem:[#allocation2 + $0x80] sm:$0xff]  ;;  %v9903_v46 = vld [vmem:[#allocation2 + $0xa8] sm:$0xff] }
  0x41   : > { %448 = vst.msk [vmem:[#allocation2 + $0x141] sm:$0xff] %vm334_vm0, %v415_v37  ;;  %451 = vst.msk [vmem:[#allocation2 + $0x169] sm:$0xff] %vm334_vm0, %v418_v38  ;;  %v9906_v47 = vld [vmem:[#allocation2 + $0x98] sm:$0xff]  ;;  %v9909_v48 = vld [vmem:[#allocation2 + $0xc0] sm:$0xff] }
  0x42   : > { %450 = vst.msk [vmem:[#allocation2 + $0x159] sm:$0xff] %vm334_vm0, %v417_v39  ;;  %452 = vst.msk [vmem:[#allocation2 + $0x171] sm:$0xff] %vm334_vm0, %v419_v41  ;;  %v9912_v49 = vld [vmem:[#allocation2 + $0xb0] sm:$0xff]  ;;  %v9915_v50 = vld [vmem:[#allocation2 + $0xd8] sm:$0xff] }
  0x43   : > { %v9918_v51 = vld [vmem:[#allocation2 + $0xc8] sm:$0xff]  ;;  %v9921_v52 = vld [vmem:[#allocation2 + $0xf0] sm:$0xff]  ;;  %v9960_v4 = vld [vmem:[#allocation2 + $0x19] sm:$0xff] }
  0x44   : > { %516 = vperm.xlu1 %8778, %v9870_v33   ;;  %531 = vperm.xlu0 %8777, %v9873_v34   ;;  %v9924_v53 = vld [vmem:[#allocation2 + $0xe0] sm:$0xff]  ;;  %v9927_v54 = vld [vmem:[#allocation2 + $0x108] sm:$0xff]  ;;  %v9964_v6 = vld [vmem:[#allocation2 + $0x31] sm:$0xff] }
  0x45   : > { %v9930_v55 = vld [vmem:[#allocation2 + $0xf8] sm:$0xff]  ;;  %v9933_v56 = vld [vmem:[#allocation2 + $0x120] sm:$0xff]  ;;  %v9969_v8 = vld [vmem:[#allocation2 + $0x49] sm:$0xff] }
  0x46   : > { %v9936_v57 = vld [vmem:[#allocation2 + $0x110] sm:$0xff]  ;;  %v9939_v58 = vld [vmem:[#allocation2 + $0x138] sm:$0xff]  ;;  %v9966_v7 = vld [vmem:[#allocation2 + $0x21] sm:$0xff] }
  0x47   : > { %v9942_v59 = vld [vmem:[#allocation2 + $0x128] sm:$0xff]  ;;  %v9945_v60 = vld [vmem:[#allocation2 + $0x150] sm:$0xff]  ;;  %v9972_v9 = vld [vmem:[#allocation2 + $0x39] sm:$0xff] }
  0x48   : > { %526 = vperm.xlu1 %8778, %v9884_v40   ;;  %541 = vperm.xlu0 %8777, %v9891_v42   ;;  %v9948_v61 = vld [vmem:[#allocation2 + $0x140] sm:$0xff]  ;;  %v9951_v62 = vld [vmem:[#allocation2 + $0x168] sm:$0xff]  ;;  %v9978_v11 = vld [vmem:[#allocation2 + $0x51] sm:$0xff] }
  0x49   : > { %v9954_v63 = vld [vmem:[#allocation2 + $0x158] sm:$0xff]  ;;  %v9958_v3 = vld [vmem:[#allocation2 + $0x170] sm:$0xff]  ;;  %v9975_v10 = vld [vmem:[#allocation2 + $0x61] sm:$0xff] }
  0x4a   : > { %v9981_v12 = vld [vmem:[#allocation2 + $0x79] sm:$0xff]  ;;  %v9984_v13 = vld [vmem:[#allocation2 + $0x69] sm:$0xff]  ;;  %v9987_v14 = vld [vmem:[#allocation2 + $0x91] sm:$0xff] }
  0x4b   : > { %v9990_v15 = vld [vmem:[#allocation2 + $0x81] sm:$0xff]  ;;  %v9993_v16 = vld [vmem:[#allocation2 + $0xa9] sm:$0xff]  ;;  %v9996_v17 = vld [vmem:[#allocation2 + $0x99] sm:$0xff] }
  0x4c   : > { %536 = vperm.xlu1 %8778, %v9894_v43   ;;  %551 = vperm.xlu0 %8777, %v9897_v44   ;;  %v9999_v18 = vld [vmem:[#allocation2 + $0xc1] sm:$0xff]  ;;  %v10002_v19 = vld [vmem:[#allocation2 + $0xb1] sm:$0xff]  ;;  %v10005_v20 = vld [vmem:[#allocation2 + $0xd9] sm:$0xff] }
  0x4d   : > { %v10008_v21 = vld [vmem:[#allocation2 + $0xc9] sm:$0xff]  ;;  %v10011_v22 = vld [vmem:[#allocation2 + $0xf1] sm:$0xff]  ;;  %v10014_v23 = vld [vmem:[#allocation2 + $0xe1] sm:$0xff] }
  0x4e   : > { %v10017_v24 = vld [vmem:[#allocation2 + $0x109] sm:$0xff]  ;;  %v10020_v25 = vld [vmem:[#allocation2 + $0xf9] sm:$0xff]  ;;  %v10023_v26 = vld [vmem:[#allocation2 + $0x121] sm:$0xff] }
  0x4f   : > { %v10026_v30 = vld [vmem:[#allocation2 + $0x111] sm:$0xff]  ;;  %v10029_v31 = vld [vmem:[#allocation2 + $0x139] sm:$0xff]  ;;  %v10032_v35 = vld [vmem:[#allocation2 + $0x129] sm:$0xff] }
  0x50   : > { %546 = vperm.xlu1 %8778, %v9900_v45   ;;  %561 = vperm.xlu0 %8777, %v9903_v46   ;;  %15434 = vst [vmem:[#allocation11_spill] sm:$0xff] %v10032_v35  ;;  %v420_v36 = vld [vmem:[%s9809_s26 + $0xf0] sm:$0xff]  ;;  %v10040_v38 = vld [vmem:[#allocation2 + $0x141] sm:$0xff]  ;;  %v421_v41 = vld [vmem:[%s9809_s26 + $0xf8] sm:$0xff]  ;;  %s9586_s26 = smov [#allocation8]  }
  0x51   : > { %453 = vst.msk [vmem:[#allocation2 + $0x181] sm:$0xff] %vm334_vm0, %v420_v36  ;;  %v10037_v37 = vld [vmem:[#allocation2 + $0x151] sm:$0xff]  ;;  %15436 = vst [vmem:[#allocation13_spill] sm:$0xff] %v10040_v38  ;;  %v10043_v39 = vld [vmem:[#allocation2 + $0x169] sm:$0xff] }
  0x52   : > { %15435 = vst [vmem:[#allocation12_spill] sm:$0xff] %v10037_v37  ;;  %15437 = vst [vmem:[#allocation14_spill] sm:$0xff] %v10043_v39  ;;  %v10054_v1 = vld [vmem:[#allocation2 + $0x171] sm:$0xff]  ;;  %v10056_v2 = vld [vmem:[#allocation2 + $0x1a] sm:$0xff] }
  0x53   : > { %454 = vst.msk [vmem:[#allocation2 + $0x189] sm:$0xff] %vm334_vm0, %v421_v41  ;;  %15440 = vst [vmem:[#allocation17_spill] sm:$0xff] %v10056_v2  ;;  %vm8457_vm0 = vcmask 1044484  }
  0x54   : > { %556 = vperm.xlu1 %8778, %v9906_v47   ;;  %571 = vperm.xlu0 %8777, %v9909_v48  }
  0x58   : > { %566 = vperm.xlu1 %8778, %v9912_v49   ;;  %581 = vperm.xlu0 %8777, %v9915_v50  }
  0x5c   : > { %576 = vperm.xlu1 %8778, %v9918_v51   ;;  %591 = vperm.xlu0 %8777, %v9921_v52  }
  0x60   : > { %586 = vperm.xlu1 %8778, %v9924_v53   ;;  %601 = vperm.xlu0 %8777, %v9927_v54  }
  0x64   : > { %596 = vperm.xlu1 %8778, %v9930_v55   ;;  %611 = vperm.xlu0 %8777, %v9933_v56  }
  0x68   : > { %606 = vperm.xlu1 %8778, %v9936_v57   ;;  %621 = vperm.xlu0 %8777, %v9939_v58  }
  0x6c   : > { %616 = vperm.xlu1 %8778, %v9942_v59   ;;  %631 = vperm.xlu0 %8777, %v9945_v60  }
  0x70   : > { %626 = vperm.xlu1 %8778, %v9948_v61   ;;  %641 = vperm.xlu0 %8777, %v9951_v62  }
  0x74   : > { %636 = vperm.xlu1 %8778, %v9954_v63   ;;  %751 = vperm.xlu0 %8777, %v717_v0   ;;  %v10048_v0 = vld [vmem:[#allocation2 + $0x159] sm:$0xff] }
  0x75   : > { %15438 = vst [vmem:[#allocation15_spill] sm:$0xff] %v10048_v0 }
  0x78   : > { %646 = vperm.xlu1 %8778, %v9958_v3   ;;  %761 = vperm.xlu0 %8777, %v9960_v4  }
  0x7c   : > { %756 = vperm.xlu1 %8778, %v718_v5   ;;  %771 = vperm.xlu0 %8777, %v9964_v6   ;;  %v977_v5 = vld [vmem:[#allocation2 + $0x2] sm:$0xff] }
  0x80   : > { %766 = vperm.xlu1 %8778, %v9966_v7   ;;  %781 = vperm.xlu0 %8777, %v9969_v8  }
  0x84   : > { %776 = vperm.xlu1 %8778, %v9972_v9   ;;  %791 = vperm.xlu0 %8777, %v9975_v10  }
  0x88   : > { %786 = vperm.xlu1 %8778, %v9978_v11   ;;  %801 = vperm.xlu0 %8777, %v9981_v12  }
  0x8c   : > { %796 = vperm.xlu1 %8778, %v9984_v13   ;;  %811 = vperm.xlu0 %8777, %v9987_v14  }
  0x90   : > { %806 = vperm.xlu1 %8778, %v9990_v15   ;;  %821 = vperm.xlu0 %8777, %v9993_v16  }
  0x94   : > { %816 = vperm.xlu1 %8778, %v9996_v17   ;;  %831 = vperm.xlu0 %8777, %v9999_v18  }
  0x98   : > { %826 = vperm.xlu1 %8778, %v10002_v19   ;;  %841 = vperm.xlu0 %8777, %v10005_v20  }
  0x9c   : > { %836 = vperm.xlu1 %8778, %v10008_v21   ;;  %851 = vperm.xlu0 %8777, %v10011_v22  }
  0xa0   : > { %846 = vperm.xlu1 %8778, %v10014_v23   ;;  %861 = vperm.xlu0 %8777, %v10017_v24  }
  0xa1   : > { %v10052_v36 = vpop.permute.xlu0 %491 }
  0xa2   : > { %15439 = vst [vmem:[#allocation16_spill] sm:$0xff] %v10052_v36  ;;  %v10068_v36 = vld [vmem:[#allocation2 + $0x22] sm:$0xff] }
  0xa3   : > { %15445 = vst [vmem:[#allocation22_spill] sm:$0xff] %v10068_v36 }
  0xa4   : > { %856 = vperm.xlu1 %8778, %v10020_v25   ;;  %871 = vperm.xlu0 %8777, %v10023_v26  }
  0xa8   : > { %866 = vperm.xlu1 %8778, %v10026_v30   ;;  %881 = vperm.xlu0 %8777, %v10029_v31  }
  0xac   : > { %876 = vperm.xlu1 %8778, %v10032_v35   ;;  %891 = vperm.xlu0 %8777, %v10037_v37   ;;  %v10059_v37 = vpop.permute.xlu0 %496  ;;  %v10073_v35 = vld [vmem:[#allocation2 + $0x4a] sm:$0xff] }
  0xad   : > { %15441 = vst [vmem:[#allocation18_spill] sm:$0xff] %v10059_v37  ;;  %15447 = vst [vmem:[#allocation24_spill] sm:$0xff] %v10073_v35 }
  0xb0   : > { %886 = vperm.xlu1 %8778, %v10040_v38   ;;  %901 = vperm.xlu0 %8777, %v10043_v39   ;;  %v978_v38 = vld [vmem:[#allocation2 + $0xa] sm:$0xff]  ;;  %v10064_v39 = vld [vmem:[#allocation2 + $0x32] sm:$0xff] }
  0xb1   : > { %15443 = vst [vmem:[#allocation20_spill] sm:$0xff] %v10064_v39 }
  0xb4   : > { %896 = vperm.xlu1 %8778, %v10048_v0   ;;  %1011 = vperm.xlu0 %8777, %v977_v5  }
  0xb8   : > { %906 = vperm.xlu1 %8778, %v10054_v1   ;;  %1021 = vperm.xlu0 %8777, %v10056_v2   ;;  %v10078_v2 = vld [vmem:[#allocation2 + $0x3a] sm:$0xff] }
  0xb9   : > { %15449 = vst [vmem:[#allocation26_spill] sm:$0xff] %v10078_v2 }
  0xbb   : > { %v10062_v41 = vpop.permute.xlu1 %501  ;;  %v10066_v0 = vpop.permute.xlu0 %511 }
  0xbc   : > { %15442 = vst [vmem:[#allocation19_spill] sm:$0xff] %v10062_v41  ;;  %1016 = vperm.xlu1 %8778, %v978_v38   ;;  %15444 = vst [vmem:[#allocation21_spill] sm:$0xff] %v10066_v0  ;;  %1031 = vperm.xlu0 %8777, %v10064_v39   ;;  %v10083_v38 = vld [vmem:[#allocation2 + $0x62] sm:$0xff]  ;;  %v10088_v39 = vld [vmem:[#allocation2 + $0x52] sm:$0xff] }
  0xbd   : > { %15451 = vst [vmem:[#allocation28_spill] sm:$0xff] %v10083_v38  ;;  %15453 = vst [vmem:[#allocation30_spill] sm:$0xff] %v10088_v39 }
  0xbf   : > { %v10071_v5 = vpop.permute.xlu1 %506  ;;  %v10076_v37 = vpop.permute.xlu0 %521 }
  0xc0   : > { %15446 = vst [vmem:[#allocation23_spill] sm:$0xff] %v10071_v5  ;;  %1026 = vperm.xlu1 %8778, %v10068_v36   ;;  %15448 = vst [vmem:[#allocation25_spill] sm:$0xff] %v10076_v37  ;;  %1041 = vperm.xlu0 %8777, %v10073_v35   ;;  %v10093_v36 = vld [vmem:[#allocation2 + $0x7a] sm:$0xff]  ;;  %v10098_v35 = vld [vmem:[#allocation2 + $0x6a] sm:$0xff] }
  0xc1   : > { %15455 = vst [vmem:[#allocation32_spill] sm:$0xff] %v10093_v36  ;;  %15457 = vst [vmem:[#allocation34_spill] sm:$0xff] %v10098_v35 }
  0xc3   : > { %v10081_v41 = vpop.permute.xlu1 %516  ;;  %v10086_v0 = vpop.permute.xlu0 %531 }
  0xc4   : > { %15450 = vst [vmem:[#allocation27_spill] sm:$0xff] %v10081_v41  ;;  %1036 = vperm.xlu1 %8778, %v10078_v2   ;;  %15452 = vst [vmem:[#allocation29_spill] sm:$0xff] %v10086_v0  ;;  %1051 = vperm.xlu0 %8777, %v10083_v38   ;;  %v10103_v2 = vld [vmem:[#allocation2 + $0x92] sm:$0xff]  ;;  %v10108_v38 = vld [vmem:[#allocation2 + $0x82] sm:$0xff] }
  0xc5   : > { %15459 = vst [vmem:[#allocation36_spill] sm:$0xff] %v10103_v2  ;;  %15461 = vst [vmem:[#allocation38_spill] sm:$0xff] %v10108_v38 }
  0xc7   : > { %v10091_v5 = vpop.permute.xlu1 %526  ;;  %v10096_v37 = vpop.permute.xlu0 %541 }
  0xc8   : > { %15454 = vst [vmem:[#allocation31_spill] sm:$0xff] %v10091_v5  ;;  %1046 = vperm.xlu1 %8778, %v10088_v39   ;;  %15456 = vst [vmem:[#allocation33_spill] sm:$0xff] %v10096_v37  ;;  %1061 = vperm.xlu0 %8777, %v10093_v36   ;;  %v10113_v39 = vld [vmem:[#allocation2 + $0xaa] sm:$0xff]  ;;  %v10118_v36 = vld [vmem:[#allocation2 + $0x9a] sm:$0xff] }
  0xc9   : > { %15463 = vst [vmem:[#allocation40_spill] sm:$0xff] %v10113_v39  ;;  %15465 = vst [vmem:[#allocation42_spill] sm:$0xff] %v10118_v36 }
  0xcb   : > { %v10101_v41 = vpop.permute.xlu1 %536  ;;  %v10106_v0 = vpop.permute.xlu0 %551 }
  0xcc   : > { %15458 = vst [vmem:[#allocation35_spill] sm:$0xff] %v10101_v41  ;;  %1056 = vperm.xlu1 %8778, %v10098_v35   ;;  %15460 = vst [vmem:[#allocation37_spill] sm:$0xff] %v10106_v0  ;;  %1071 = vperm.xlu0 %8777, %v10103_v2   ;;  %v10123_v35 = vld [vmem:[#allocation2 + $0xc2] sm:$0xff]  ;;  %v10128_v2 = vld [vmem:[#allocation2 + $0xb2] sm:$0xff] }
  0xcd   : > { %15467 = vst [vmem:[#allocation44_spill] sm:$0xff] %v10123_v35  ;;  %15469 = vst [vmem:[#allocation46_spill] sm:$0xff] %v10128_v2 }
  0xcf   : > { %v10111_v5 = vpop.permute.xlu1 %546  ;;  %v10116_v37 = vpop.permute.xlu0 %561 }
  0xd0   : > { %15462 = vst [vmem:[#allocation39_spill] sm:$0xff] %v10111_v5  ;;  %1066 = vperm.xlu1 %8778, %v10108_v38   ;;  %15464 = vst [vmem:[#allocation41_spill] sm:$0xff] %v10116_v37  ;;  %1081 = vperm.xlu0 %8777, %v10113_v39   ;;  %v10133_v38 = vld [vmem:[#allocation2 + $0xda] sm:$0xff]  ;;  %v10138_v39 = vld [vmem:[#allocation2 + $0xca] sm:$0xff] }
  0xd1   : > { %15471 = vst [vmem:[#allocation48_spill] sm:$0xff] %v10133_v38  ;;  %15473 = vst [vmem:[#allocation50_spill] sm:$0xff] %v10138_v39 }
  0xd3   : > { %v10121_v41 = vpop.permute.xlu1 %556  ;;  %v10126_v0 = vpop.permute.xlu0 %571 }
  0xd4   : > { %15466 = vst [vmem:[#allocation43_spill] sm:$0xff] %v10121_v41  ;;  %1076 = vperm.xlu1 %8778, %v10118_v36   ;;  %15468 = vst [vmem:[#allocation45_spill] sm:$0xff] %v10126_v0  ;;  %1091 = vperm.xlu0 %8777, %v10123_v35   ;;  %v10143_v36 = vld [vmem:[#allocation2 + $0xf2] sm:$0xff]  ;;  %v10148_v35 = vld [vmem:[#allocation2 + $0xe2] sm:$0xff] }
  0xd5   : > { %15475 = vst [vmem:[#allocation52_spill] sm:$0xff] %v10143_v36  ;;  %15477 = vst [vmem:[#allocation54_spill] sm:$0xff] %v10148_v35 }
  0xd7   : > { %v10131_v5 = vpop.permute.xlu1 %566  ;;  %v10136_v37 = vpop.permute.xlu0 %581 }
  0xd8   : > { %15470 = vst [vmem:[#allocation47_spill] sm:$0xff] %v10131_v5  ;;  %1086 = vperm.xlu1 %8778, %v10128_v2   ;;  %15472 = vst [vmem:[#allocation49_spill] sm:$0xff] %v10136_v37  ;;  %1101 = vperm.xlu0 %8777, %v10133_v38   ;;  %v10153_v2 = vld [vmem:[#allocation2 + $0x10a] sm:$0xff]  ;;  %v10158_v38 = vld [vmem:[#allocation2 + $0xfa] sm:$0xff] }
  0xd9   : > { %15479 = vst [vmem:[#allocation56_spill] sm:$0xff] %v10153_v2  ;;  %15481 = vst [vmem:[#allocation58_spill] sm:$0xff] %v10158_v38 }
  0xdb   : > { %v10141_v41 = vpop.permute.xlu1 %576  ;;  %v10146_v0 = vpop.permute.xlu0 %591 }
  0xdc   : > { %15474 = vst [vmem:[#allocation51_spill] sm:$0xff] %v10141_v41  ;;  %1096 = vperm.xlu1 %8778, %v10138_v39   ;;  %15476 = vst [vmem:[#allocation53_spill] sm:$0xff] %v10146_v0  ;;  %1111 = vperm.xlu0 %8777, %v10143_v36   ;;  %v10163_v39 = vld [vmem:[#allocation2 + $0x122] sm:$0xff]  ;;  %v10168_v36 = vld [vmem:[#allocation2 + $0x112] sm:$0xff] }
  0xdd   : > { %15483 = vst [vmem:[#allocation60_spill] sm:$0xff] %v10163_v39  ;;  %15485 = vst [vmem:[#allocation62_spill] sm:$0xff] %v10168_v36 }
  0xdf   : > { %v10151_v5 = vpop.permute.xlu1 %586  ;;  %v10156_v37 = vpop.permute.xlu0 %601 }
  0xe0   : > { %15478 = vst [vmem:[#allocation55_spill] sm:$0xff] %v10151_v5  ;;  %1106 = vperm.xlu1 %8778, %v10148_v35   ;;  %15480 = vst [vmem:[#allocation57_spill] sm:$0xff] %v10156_v37  ;;  %1121 = vperm.xlu0 %8777, %v10153_v2   ;;  %v10173_v35 = vld [vmem:[#allocation2 + $0x13a] sm:$0xff]  ;;  %v10178_v2 = vld [vmem:[#allocation2 + $0x12a] sm:$0xff] }
  0xe1   : > { %15487 = vst [vmem:[#allocation64_spill] sm:$0xff] %v10173_v35  ;;  %15489 = vst [vmem:[#allocation66_spill] sm:$0xff] %v10178_v2 }
  0xe3   : > { %v10161_v41 = vpop.permute.xlu1 %596  ;;  %v10166_v0 = vpop.permute.xlu0 %611 }
  0xe4   : > { %15482 = vst [vmem:[#allocation59_spill] sm:$0xff] %v10161_v41  ;;  %1116 = vperm.xlu1 %8778, %v10158_v38   ;;  %15484 = vst [vmem:[#allocation61_spill] sm:$0xff] %v10166_v0  ;;  %1131 = vperm.xlu0 %8777, %v10163_v39   ;;  %v10183_v38 = vld [vmem:[#allocation2 + $0x152] sm:$0xff]  ;;  %v10188_v39 = vld [vmem:[#allocation2 + $0x142] sm:$0xff] }
  0xe5   : > { %15492 = vst [vmem:[#allocation69_spill] sm:$0xff] %v10188_v39 }
  0xe7   : > { %v10171_v5 = vpop.permute.xlu1 %606  ;;  %v10176_v37 = vpop.permute.xlu0 %621 }
  0xe8   : > { %15486 = vst [vmem:[#allocation63_spill] sm:$0xff] %v10171_v5  ;;  %1126 = vperm.xlu1 %8778, %v10168_v36   ;;  %15488 = vst [vmem:[#allocation65_spill] sm:$0xff] %v10176_v37  ;;  %1141 = vperm.xlu0 %8777, %v10173_v35   ;;  %v10193_v36 = vld [vmem:[#allocation2 + $0x16a] sm:$0xff]  ;;  %v10198_v35 = vld [vmem:[#allocation2 + $0x15a] sm:$0xff] }
  0xeb   : > { %v10181_v41 = vpop.permute.xlu1 %616  ;;  %v10186_v0 = vpop.permute.xlu0 %631 }
  0xec   : > { %15490 = vst [vmem:[#allocation67_spill] sm:$0xff] %v10181_v41  ;;  %1136 = vperm.xlu1 %8778, %v10178_v2   ;;  %15491 = vst [vmem:[#allocation68_spill] sm:$0xff] %v10186_v0  ;;  %1151 = vperm.xlu0 %8777, %v10183_v38   ;;  %v10206_v2 = vld [vmem:[#allocation2 + $0x172] sm:$0xff] }
  0xef   : > { %v10191_v5 = vpop.permute.xlu1 %626  ;;  %v10196_v37 = vpop.permute.xlu0 %641 }
  0xf0   : > { %15493 = vst [vmem:[#allocation70_spill] sm:$0xff] %v10191_v5  ;;  %1146 = vperm.xlu1 %8778, %v10188_v39   ;;  %15494 = vst [vmem:[#allocation71_spill] sm:$0xff] %v10196_v37  ;;  %1161 = vperm.xlu0 %8777, %v10193_v36  }
  0xf3   : > { %v10201_v41 = vpop.permute.xlu1 %636  ;;  %v10204_v0 = vpop.permute.xlu0 %751 }
  0xf4   : > { %15495 = vst [vmem:[#allocation72_spill] sm:$0xff] %v10201_v41  ;;  %1156 = vperm.xlu1 %8778, %v10198_v35   ;;  %15496 = vst [vmem:[#allocation73_spill] sm:$0xff] %v10204_v0  ;;  %1271 = vperm.xlu0 %8777, %v9852_v27  }
  0xf7   : > { %v10209_v5 = vpop.permute.xlu1 %646  ;;  %v10212_v39 = vpop.permute.xlu0 %761 }
  0xf8   : > { %15497 = vst [vmem:[#allocation74_spill] sm:$0xff] %v10209_v5  ;;  %1166 = vperm.xlu1 %8778, %v10206_v2   ;;  %1281 = vperm.xlu0 %8777, %v9854_v28  }
  0xfb   : > { %v10215_v37 = vpop.permute.xlu1 %756  ;;  %v10218_v41 = vpop.permute.xlu0 %771 }
  0xfc   : > { %1276 = vperm.xlu1 %8778, %v9860_v29   ;;  %1291 = vperm.xlu0 %8777, %v9867_v32  }
  0xff   : > { %v10221_v0 = vpop.permute.xlu1 %766  ;;  %v10224_v27 = vpop.permute.xlu0 %781 }
 0x100   : > { %1286 = vperm.xlu1 %8778, %v9870_v33   ;;  %1301 = vperm.xlu0 %8777, %v9873_v34  }
 0x103   : > { %v10227_v5 = vpop.permute.xlu1 %776  ;;  %v10230_v28 = vpop.permute.xlu0 %791 }
 0x104   : > { %1296 = vperm.xlu1 %8778, %v9884_v40   ;;  %1311 = vperm.xlu0 %8777, %v9891_v42  }
 0x107   : > { %v10233_v29 = vpop.permute.xlu1 %786  ;;  %v10236_v32 = vpop.permute.xlu0 %801 }
 0x108   : > { %1306 = vperm.xlu1 %8778, %v9894_v43   ;;  %1321 = vperm.xlu0 %8777, %v9897_v44  }
 0x10b   : > { %v10239_v33 = vpop.permute.xlu1 %796  ;;  %v10242_v34 = vpop.permute.xlu0 %811 }
 0x10c   : > { %1316 = vperm.xlu1 %8778, %v9900_v45   ;;  %1331 = vperm.xlu0 %8777, %v9903_v46  }
 0x10f   : > { %v10245_v40 = vpop.permute.xlu1 %806  ;;  %v10248_v42 = vpop.permute.xlu0 %821 }
 0x110   : > { %1326 = vperm.xlu1 %8778, %v9906_v47   ;;  %1341 = vperm.xlu0 %8777, %v9909_v48  }
 0x113   : > { %v10251_v43 = vpop.permute.xlu1 %816  ;;  %v10254_v44 = vpop.permute.xlu0 %831 }
 0x114   : > { %1336 = vperm.xlu1 %8778, %v9912_v49   ;;  %1351 = vperm.xlu0 %8777, %v9915_v50  }
 0x117   : > { %v10257_v45 = vpop.permute.xlu1 %826  ;;  %v10260_v46 = vpop.permute.xlu0 %841 }
 0x118   : > { %1346 = vperm.xlu1 %8778, %v9918_v51   ;;  %1361 = vperm.xlu0 %8777, %v9921_v52  }
 0x11b   : > { %v10263_v47 = vpop.permute.xlu1 %836  ;;  %v10266_v48 = vpop.permute.xlu0 %851 }
 0x11c   : > { %1356 = vperm.xlu1 %8778, %v9924_v53   ;;  %1371 = vperm.xlu0 %8777, %v9927_v54  }
 0x11f   : > { %v10269_v49 = vpop.permute.xlu1 %846  ;;  %v10272_v50 = vpop.permute.xlu0 %861 }
 0x120   : > { %1366 = vperm.xlu1 %8778, %v9930_v55   ;;  %1381 = vperm.xlu0 %8777, %v9933_v56  }
 0x123   : > { %v10275_v51 = vpop.permute.xlu1 %856  ;;  %v10278_v52 = vpop.permute.xlu0 %871 }
 0x124   : > { %1376 = vperm.xlu1 %8778, %v9936_v57   ;;  %15498 = vst [vmem:[#allocation75_spill] sm:$0xff] %v10278_v52  ;;  %1391 = vperm.xlu0 %8777, %v9939_v58   ;;  %v10295_v52 = vld [vmem:[#allocation2 + $0x180] sm:$0xff] }
 0x127   : > { %v10281_v53 = vpop.permute.xlu1 %866  ;;  %v10284_v54 = vpop.permute.xlu0 %881 }
 0x128   : > { %1386 = vperm.xlu1 %8778, %v9942_v59   ;;  %1401 = vperm.xlu0 %8777, %v9945_v60  }
 0x12b   : > { %v10287_v55 = vpop.permute.xlu1 %876  ;;  %v10290_v56 = vpop.permute.xlu0 %891 }
 0x12c   : > { %1396 = vperm.xlu1 %8778, %v9948_v61   ;;  %1411 = vperm.xlu0 %8777, %v9951_v62   ;;  %v1268_v61 = vld [vmem:[#allocation2 + $0x188] sm:$0xff] }
 0x12f   : > { %v10293_v57 = vpop.permute.xlu1 %886  ;;  %v10298_v58 = vpop.permute.xlu0 %901 }
 0x130   : > { %15499 = vst [vmem:[#allocation76_spill] sm:$0xff] %v10293_v57  ;;  %1406 = vperm.xlu1 %8778, %v9954_v63   ;;  %15500 = vst [vmem:[#allocation77_spill] sm:$0xff] %v10298_v58  ;;  %1421 = vperm.xlu0 %8777, %v10295_v52  }
 0x133   : > { %v10301_v59 = vpop.permute.xlu1 %896  ;;  %v10304_v60 = vpop.permute.xlu0 %1011 }
 0x134   : > { %15501 = vst [vmem:[#allocation78_spill] sm:$0xff] %v10301_v59  ;;  %1416 = vperm.xlu1 %8778, %v9958_v3   ;;  %15502 = vst [vmem:[#allocation79_spill] sm:$0xff] %v10304_v60  ;;  %1531 = vperm.xlu0 %8777, %v9960_v4  }
 0x137   : > { %v10307_v62 = vpop.permute.xlu1 %906  ;;  %v10309_v57 = vpop.permute.xlu0 %1021 }
 0x138   : > { %15503 = vst [vmem:[#allocation80_spill] sm:$0xff] %v10307_v62  ;;  %1426 = vperm.xlu1 %8778, %v1268_v61   ;;  %15504 = vst [vmem:[#allocation81_spill] sm:$0xff] %v10309_v57  ;;  %1541 = vperm.xlu0 %8777, %v9964_v6   ;;  %v15528_v62 = vld [vmem:[#allocation11_spill] sm:$0xff] }
 0x13b   : > { %v10312_v63 = vpop.permute.xlu1 %1016  ;;  %v10315_v58 = vpop.permute.xlu0 %1031 }
 0x13c   : > { %15505 = vst [vmem:[#allocation82_spill] sm:$0xff] %v10312_v63  ;;  %1536 = vperm.xlu1 %8778, %v9966_v7   ;;  %15506 = vst [vmem:[#allocation83_spill] sm:$0xff] %v10315_v58  ;;  %1551 = vperm.xlu0 %8777, %v9969_v8  }
 0x13f   : > { %v10318_v3 = vpop.permute.xlu1 %1026  ;;  %v10321_v4 = vpop.permute.xlu0 %1041 }
 0x140   : > { %15507 = vst [vmem:[#allocation84_spill] sm:$0xff] %v10318_v3  ;;  %1546 = vperm.xlu1 %8778, %v9972_v9   ;;  %15508 = vst [vmem:[#allocation85_spill] sm:$0xff] %v10321_v4  ;;  %1561 = vperm.xlu0 %8777, %v9975_v10   ;;  %v15704_v4 = vld [vmem:[#allocation53_spill] sm:$0xff] }
 0x143   : > { %v10324_v61 = vpop.permute.xlu1 %1036  ;;  %v10327_v6 = vpop.permute.xlu0 %1051 }
 0x144   : > { %15509 = vst [vmem:[#allocation86_spill] sm:$0xff] %v10324_v61  ;;  %1556 = vperm.xlu1 %8778, %v9978_v11   ;;  %15510 = vst [vmem:[#allocation87_spill] sm:$0xff] %v10327_v6  ;;  %1571 = vperm.xlu0 %8777, %v9981_v12   ;;  %v15702_v6 = vld [vmem:[#allocation49_spill] sm:$0xff]  ;;  %v15703_v61 = vld [vmem:[#allocation51_spill] sm:$0xff] }
 0x147   : > { %v10330_v7 = vpop.permute.xlu1 %1046  ;;  %v10333_v8 = vpop.permute.xlu0 %1061 }
 0x148   : > { %15511 = vst [vmem:[#allocation88_spill] sm:$0xff] %v10330_v7  ;;  %1566 = vperm.xlu1 %8778, %v9984_v13   ;;  %15512 = vst [vmem:[#allocation89_spill] sm:$0xff] %v10333_v8  ;;  %1581 = vperm.xlu0 %8777, %v9987_v14  }
 0x14b   : > { %v10336_v9 = vpop.permute.xlu1 %1056  ;;  %v10339_v10 = vpop.permute.xlu0 %1071 }
 0x14c   : > { %15513 = vst [vmem:[#allocation90_spill] sm:$0xff] %v10336_v9  ;;  %1576 = vperm.xlu1 %8778, %v9990_v15   ;;  %15514 = vst [vmem:[#allocation91_spill] sm:$0xff] %v10339_v10  ;;  %1591 = vperm.xlu0 %8777, %v9993_v16  }
 0x14f   : > { %v10342_v11 = vpop.permute.xlu1 %1066  ;;  %v10345_v12 = vpop.permute.xlu0 %1081 }
 0x150   : > { %15515 = vst [vmem:[#allocation92_spill] sm:$0xff] %v10342_v11  ;;  %1586 = vperm.xlu1 %8778, %v9996_v17   ;;  %15516 = vst [vmem:[#allocation93_spill] sm:$0xff] %v10345_v12  ;;  %1601 = vperm.xlu0 %8777, %v9999_v18   ;;  %v15695_v11 = vld [vmem:[#allocation37_spill] sm:$0xff] }
 0x153   : > { %v10348_v13 = vpop.permute.xlu1 %1076  ;;  %v10351_v14 = vpop.permute.xlu0 %1091 }
 0x154   : > { %15517 = vst [vmem:[#allocation94_spill] sm:$0xff] %v10348_v13  ;;  %1596 = vperm.xlu1 %8778, %v10002_v19   ;;  %15518 = vst [vmem:[#allocation95_spill] sm:$0xff] %v10351_v14  ;;  %1611 = vperm.xlu0 %8777, %v10005_v20  }
 0x157   : > { %v10354_v15 = vpop.permute.xlu1 %1086  ;;  %v10357_v16 = vpop.permute.xlu0 %1101 }
 0x158   : > { %15519 = vst [vmem:[#allocation96_spill] sm:$0xff] %v10354_v15  ;;  %1606 = vperm.xlu1 %8778, %v10008_v21   ;;  %15520 = vst [vmem:[#allocation97_spill] sm:$0xff] %v10357_v16  ;;  %1621 = vperm.xlu0 %8777, %v10011_v22  }
 0x15b   : > { %v10360_v17 = vpop.permute.xlu1 %1096  ;;  %v10363_v18 = vpop.permute.xlu0 %1111 }
 0x15c   : > { %15521 = vst [vmem:[#allocation98_spill] sm:$0xff] %v10360_v17  ;;  %1616 = vperm.xlu1 %8778, %v10014_v23   ;;  %15522 = vst [vmem:[#allocation99_spill] sm:$0xff] %v10363_v18  ;;  %1631 = vperm.xlu0 %8777, %v10017_v24   ;;  %v15553_v18 = vld [vmem:[#allocation30_spill] sm:$0xff]  ;;  %v15555_v17 = vld [vmem:[#allocation32_spill] sm:$0xff] }
 0x15f   : > { %v10366_v19 = vpop.permute.xlu1 %1106  ;;  %v10369_v20 = vpop.permute.xlu0 %1121 }
 0x160   : > { %15523 = vst [vmem:[#allocation100_spill] sm:$0xff] %v10366_v19  ;;  %1626 = vperm.xlu1 %8778, %v10020_v25   ;;  %15524 = vst [vmem:[#allocation101_spill] sm:$0xff] %v10369_v20  ;;  %1641 = vperm.xlu0 %8777, %v10023_v26   ;;  %v15530_v19 = vld [vmem:[#allocation12_spill] sm:$0xff]  ;;  %v15532_v20 = vld [vmem:[#allocation13_spill] sm:$0xff] }
 0x163   : > { %v10372_v21 = vpop.permute.xlu1 %1116  ;;  %v10375_v22 = vpop.permute.xlu0 %1131 }
 0x164   : > { %15525 = vst [vmem:[#allocation102_spill] sm:$0xff] %v10372_v21  ;;  %1636 = vperm.xlu1 %8778, %v10026_v30   ;;  %15526 = vst [vmem:[#allocation103_spill] sm:$0xff] %v10375_v22  ;;  %1651 = vperm.xlu0 %8777, %v10029_v31   ;;  %v15534_v21 = vld [vmem:[#allocation14_spill] sm:$0xff]  ;;  %v1527_v22 = vld [vmem:[#allocation2 + $0x181] sm:$0xff] }
 0x165   : > { %v15536_v31 = vld [vmem:[#allocation15_spill] sm:$0xff] }
 0x167   : > { %v10378_v23 = vpop.permute.xlu1 %1126  ;;  %v10381_v24 = vpop.permute.xlu0 %1141 }
 0x168   : > { %15527 = vst [vmem:[#allocation104_spill] sm:$0xff] %v10378_v23  ;;  %1646 = vperm.xlu1 %8778, %v15528_v62   ;;  %15529 = vst [vmem:[#allocation11_spill] sm:$0xff] %v10381_v24  ;;  %1661 = vperm.xlu0 %8777, %v15530_v19   ;;  %v15549_v24 = vld [vmem:[#allocation26_spill] sm:$0xff] }
 0x16b   : > { %v10384_v25 = vpop.permute.xlu1 %1136  ;;  %v10387_v26 = vpop.permute.xlu0 %1151 }
 0x16c   : > { %15531 = vst [vmem:[#allocation12_spill] sm:$0xff] %v10384_v25  ;;  %1656 = vperm.xlu1 %8778, %v15532_v20   ;;  %15533 = vst [vmem:[#allocation13_spill] sm:$0xff] %v10387_v26  ;;  %1671 = vperm.xlu0 %8777, %v15534_v21   ;;  %v1528_v25 = vld [vmem:[#allocation2 + $0x189] sm:$0xff]  ;;  %v15540_v20 = vld [vmem:[#allocation17_spill] sm:$0xff] }
 0x16f   : > { %v10390_v30 = vpop.permute.xlu1 %1146  ;;  %v10393_v23 = vpop.permute.xlu0 %1161 }
 0x170   : > { %15535 = vst [vmem:[#allocation14_spill] sm:$0xff] %v10390_v30  ;;  %1666 = vperm.xlu1 %8778, %v15536_v31   ;;  %15537 = vst [vmem:[#allocation15_spill] sm:$0xff] %v10393_v23  ;;  %1681 = vperm.xlu0 %8777, %v1527_v22   ;;  %v15543_v30 = vld [vmem:[#allocation20_spill] sm:$0xff]  ;;  %v15545_v23 = vld [vmem:[#allocation22_spill] sm:$0xff] }
 0x173   : > { %v10395_v62 = vpop.permute.xlu1 %1156  ;;  %v10398_v19 = vpop.permute.xlu0 %1271 }
 0x174   : > { %15538 = vst [vmem:[#allocation105_spill] sm:$0xff] %v10395_v62  ;;  %1676 = vperm.xlu1 %8778, %v10054_v1   ;;  %15539 = vst [vmem:[#allocation106_spill] sm:$0xff] %v10398_v19  ;;  %1791 = vperm.xlu0 %8777, %v15540_v20   ;;  %v15547_v62 = vld [vmem:[#allocation24_spill] sm:$0xff]  ;;  %v15690_v19 = vld [vmem:[#allocation27_spill] sm:$0xff] }
 0x177   : > { %v10401_v26 = vpop.permute.xlu1 %1166  ;;  %v10403_v21 = vpop.permute.xlu0 %1281 }
 0x178   : > { %15541 = vst [vmem:[#allocation17_spill] sm:$0xff] %v10401_v26  ;;  %1686 = vperm.xlu1 %8778, %v1528_v25   ;;  %15542 = vst [vmem:[#allocation107_spill] sm:$0xff] %v10403_v21  ;;  %1801 = vperm.xlu0 %8777, %v15543_v30   ;;  %v15551_v26 = vld [vmem:[#allocation28_spill] sm:$0xff]  ;;  %v2025_v21 = vld [vmem:[#allocation2 + $0x80] sm:$0xff] }
 0x17b   : > { %v10406_v31 = vpop.permute.xlu1 %1276  ;;  %v10409_v22 = vpop.permute.xlu0 %1291 }
 0x17c   : > { %15544 = vst [vmem:[#allocation20_spill] sm:$0xff] %v10406_v31  ;;  %1796 = vperm.xlu1 %8778, %v15545_v23   ;;  %15546 = vst [vmem:[#allocation22_spill] sm:$0xff] %v10409_v22  ;;  %1811 = vperm.xlu0 %8777, %v15547_v62   ;;  %v15557_v22 = vld [vmem:[#allocation34_spill] sm:$0xff] }
 0x17f   : > { %v10412_v1 = vpop.permute.xlu1 %1286  ;;  %v10415_v20 = vpop.permute.xlu0 %1301 }
 0x180   : > { %15548 = vst [vmem:[#allocation24_spill] sm:$0xff] %v10412_v1  ;;  %1806 = vperm.xlu1 %8778, %v15549_v24   ;;  %15550 = vst [vmem:[#allocation26_spill] sm:$0xff] %v10415_v20  ;;  %1821 = vperm.xlu0 %8777, %v15551_v26   ;;  %v15559_v1 = vld [vmem:[#allocation36_spill] sm:$0xff]  ;;  %v15561_v20 = vld [vmem:[#allocation38_spill] sm:$0xff] }
 0x183   : > { %v10418_v25 = vpop.permute.xlu1 %1296  ;;  %v10421_v30 = vpop.permute.xlu0 %1311 }
 0x184   : > { %15552 = vst [vmem:[#allocation28_spill] sm:$0xff] %v10418_v25  ;;  %1816 = vperm.xlu1 %8778, %v15553_v18   ;;  %15554 = vst [vmem:[#allocation30_spill] sm:$0xff] %v10421_v30  ;;  %1831 = vperm.xlu0 %8777, %v15555_v17   ;;  %v15563_v25 = vld [vmem:[#allocation40_spill] sm:$0xff]  ;;  %v15565_v30 = vld [vmem:[#allocation42_spill] sm:$0xff] }
 0x187   : > { %v10424_v23 = vpop.permute.xlu1 %1306  ;;  %v10427_v62 = vpop.permute.xlu0 %1321 }
 0x188   : > { %15556 = vst [vmem:[#allocation32_spill] sm:$0xff] %v10424_v23  ;;  %1826 = vperm.xlu1 %8778, %v15557_v22   ;;  %15558 = vst [vmem:[#allocation34_spill] sm:$0xff] %v10427_v62  ;;  %1841 = vperm.xlu0 %8777, %v15559_v1   ;;  %v15567_v23 = vld [vmem:[#allocation44_spill] sm:$0xff]  ;;  %v15569_v62 = vld [vmem:[#allocation46_spill] sm:$0xff] }
 0x18b   : > { %v10430_v24 = vpop.permute.xlu1 %1316  ;;  %v10433_v26 = vpop.permute.xlu0 %1331 }
 0x18c   : > { %15560 = vst [vmem:[#allocation36_spill] sm:$0xff] %v10430_v24  ;;  %1836 = vperm.xlu1 %8778, %v15561_v20   ;;  %15562 = vst [vmem:[#allocation38_spill] sm:$0xff] %v10433_v26  ;;  %1851 = vperm.xlu0 %8777, %v15563_v25   ;;  %v15571_v24 = vld [vmem:[#allocation48_spill] sm:$0xff]  ;;  %v15573_v26 = vld [vmem:[#allocation50_spill] sm:$0xff] }
 0x18f   : > { %v10436_v18 = vpop.permute.xlu1 %1326  ;;  %v10439_v17 = vpop.permute.xlu0 %1341 }
 0x190   : > { %15564 = vst [vmem:[#allocation40_spill] sm:$0xff] %v10436_v18  ;;  %1846 = vperm.xlu1 %8778, %v15565_v30   ;;  %15566 = vst [vmem:[#allocation42_spill] sm:$0xff] %v10439_v17  ;;  %1861 = vperm.xlu0 %8777, %v15567_v23   ;;  %v15575_v18 = vld [vmem:[#allocation52_spill] sm:$0xff]  ;;  %v15577_v17 = vld [vmem:[#allocation54_spill] sm:$0xff] }
 0x193   : > { %v10442_v22 = vpop.permute.xlu1 %1336  ;;  %v10445_v1 = vpop.permute.xlu0 %1351 }
 0x194   : > { %15568 = vst [vmem:[#allocation44_spill] sm:$0xff] %v10442_v22  ;;  %1856 = vperm.xlu1 %8778, %v15569_v62   ;;  %15570 = vst [vmem:[#allocation46_spill] sm:$0xff] %v10445_v1  ;;  %1871 = vperm.xlu0 %8777, %v15571_v24   ;;  %v15579_v22 = vld [vmem:[#allocation56_spill] sm:$0xff]  ;;  %v15581_v1 = vld [vmem:[#allocation58_spill] sm:$0xff] }
 0x197   : > { %v10448_v20 = vpop.permute.xlu1 %1346  ;;  %v10451_v25 = vpop.permute.xlu0 %1361 }
 0x198   : > { %15572 = vst [vmem:[#allocation48_spill] sm:$0xff] %v10448_v20  ;;  %1866 = vperm.xlu1 %8778, %v15573_v26   ;;  %15574 = vst [vmem:[#allocation50_spill] sm:$0xff] %v10451_v25  ;;  %1881 = vperm.xlu0 %8777, %v15575_v18   ;;  %v15583_v20 = vld [vmem:[#allocation60_spill] sm:$0xff]  ;;  %v15585_v25 = vld [vmem:[#allocation62_spill] sm:$0xff] }
 0x19b   : > { %v10454_v30 = vpop.permute.xlu1 %1356  ;;  %v10457_v23 = vpop.permute.xlu0 %1371 }
 0x19c   : > { %15576 = vst [vmem:[#allocation52_spill] sm:$0xff] %v10454_v30  ;;  %1876 = vperm.xlu1 %8778, %v15577_v17   ;;  %15578 = vst [vmem:[#allocation54_spill] sm:$0xff] %v10457_v23  ;;  %1891 = vperm.xlu0 %8777, %v15579_v22   ;;  %v15587_v30 = vld [vmem:[#allocation64_spill] sm:$0xff]  ;;  %v15589_v23 = vld [vmem:[#allocation66_spill] sm:$0xff] }
 0x19f   : > { %v10460_v62 = vpop.permute.xlu1 %1366  ;;  %v10463_v24 = vpop.permute.xlu0 %1381 }
 0x1a0   : > { %15580 = vst [vmem:[#allocation56_spill] sm:$0xff] %v10460_v62  ;;  %1886 = vperm.xlu1 %8778, %v15581_v1   ;;  %15582 = vst [vmem:[#allocation58_spill] sm:$0xff] %v10463_v24  ;;  %1901 = vperm.xlu0 %8777, %v15583_v20   ;;  %v15592_v62 = vld [vmem:[#allocation69_spill] sm:$0xff] }
 0x1a3   : > { %v10466_v26 = vpop.permute.xlu1 %1376  ;;  %v10469_v18 = vpop.permute.xlu0 %1391 }
 0x1a4   : > { %15584 = vst [vmem:[#allocation60_spill] sm:$0xff] %v10466_v26  ;;  %1896 = vperm.xlu1 %8778, %v15585_v25   ;;  %15586 = vst [vmem:[#allocation62_spill] sm:$0xff] %v10469_v18  ;;  %1911 = vperm.xlu0 %8777, %v15587_v30   ;;  %v10486_v18 = vld [vmem:[#allocation2 + $0x182] sm:$0xff] }
 0x1a5   : > { %15595 = vst [vmem:[#allocation110_spill] sm:$0xff] %v10486_v18 }
 0x1a7   : > { %v10472_v17 = vpop.permute.xlu1 %1386  ;;  %v10475_v22 = vpop.permute.xlu0 %1401 }
 0x1a8   : > { %15588 = vst [vmem:[#allocation64_spill] sm:$0xff] %v10472_v17  ;;  %1906 = vperm.xlu1 %8778, %v15589_v23   ;;  %15590 = vst [vmem:[#allocation66_spill] sm:$0xff] %v10475_v22  ;;  %1921 = vperm.xlu0 %8777, %v10183_v38   ;;  %v2018_v38 = vld [vmem:[#allocation2 + $0x30] sm:$0xff]  ;;  %v2023_v17 = vld [vmem:[#allocation2 + $0x68] sm:$0xff] }
 0x1ab   : > { %v10478_v1 = vpop.permute.xlu1 %1396  ;;  %v10481_v20 = vpop.permute.xlu0 %1411 }
 0x1ac   : > { %15591 = vst [vmem:[#allocation108_spill] sm:$0xff] %v10478_v1  ;;  %1916 = vperm.xlu1 %8778, %v15592_v62   ;;  %15593 = vst [vmem:[#allocation69_spill] sm:$0xff] %v10481_v20  ;;  %1931 = vperm.xlu0 %8777, %v10193_v36   ;;  %v10497_v20 = vld [vmem:[#allocation2 + $0x18a] sm:$0xff] }
 0x1ad   : > { %15599 = vst [vmem:[#allocation114_spill] sm:$0xff] %v10497_v20 }
 0x1af   : > { %v10484_v25 = vpop.permute.xlu1 %1406  ;;  %v10489_v30 = vpop.permute.xlu0 %1421 }
 0x1b0   : > { %15594 = vst [vmem:[#allocation109_spill] sm:$0xff] %v10484_v25  ;;  %1926 = vperm.xlu1 %8778, %v10198_v35   ;;  %15596 = vst [vmem:[#allocation111_spill] sm:$0xff] %v10489_v30  ;;  %1941 = vperm.xlu0 %8777, %v10486_v18   ;;  %v2020_v25 = vld [vmem:[#allocation2 + $0x48] sm:$0xff]  ;;  %v2019_v30 = vld [vmem:[#allocation2 + $0x38] sm:$0xff] }
 0x1b3   : > { %v10492_v23 = vpop.permute.xlu1 %1416  ;;  %v10495_v62 = vpop.permute.xlu0 %1531 }
 0x1b4   : > { %15597 = vst [vmem:[#allocation112_spill] sm:$0xff] %v10492_v23  ;;  %1936 = vperm.xlu1 %8778, %v10206_v2   ;;  %15598 = vst [vmem:[#allocation113_spill] sm:$0xff] %v10495_v62  ;;  %2052 = vperm.xlu0 %8777, %v2018_v38   ;;  %v2022_v23 = vld [vmem:[#allocation2 + $0x60] sm:$0xff]  ;;  %v2021_v2 = vld [vmem:[#allocation2 + $0x50] sm:$0xff] }
 0x1b5   : > { %v2024_v38 = vld [vmem:[#allocation2 + $0x78] sm:$0xff]  ;;  %v15685_v62 = vld [vmem:[#allocation19_spill] sm:$0xff] }
 0x1b7   : > { %v10499_v36 = vpop.permute.xlu1 %1426  ;;  %v10502_v35 = vpop.permute.xlu0 %1541 }
 0x1b8   : > { %15600 = vst [vmem:[#allocation115_spill] sm:$0xff] %v10499_v36  ;;  %1946 = vperm.xlu1 %8778, %v10497_v20   ;;  %15601 = vst [vmem:[#allocation116_spill] sm:$0xff] %v10502_v35  ;;  %2062 = vperm.xlu0 %8777, %v2020_v25   ;;  %v2026_v35 = vld [vmem:[#allocation2 + $0x90] sm:$0xff]  ;;  %v15688_v20 = vld [vmem:[#allocation23_spill] sm:$0xff] }
 0x1bb   : > { %v10504_v22 = vpop.permute.xlu1 %1536  ;;  %v10506_v1 = vpop.permute.xlu0 %1551 }
 0x1bc   : > { %15602 = vst [vmem:[#allocation117_spill] sm:$0xff] %v10504_v22  ;;  %2057 = vperm.xlu1 %8778, %v2019_v30   ;;  %15603 = vst [vmem:[#allocation118_spill] sm:$0xff] %v10506_v1  ;;  %2072 = vperm.xlu0 %8777, %v2022_v23   ;;  %v2028_v1 = vld [vmem:[#allocation2 + $0xa8] sm:$0xff]  ;;  %v15689_v22 = vld [vmem:[#allocation25_spill] sm:$0xff] }
 0x1bf   : > { %v10508_v24 = vpop.permute.xlu1 %1546  ;;  %v10510_v36 = vpop.permute.xlu0 %1561 }
 0x1c0   : > { %15604 = vst [vmem:[#allocation119_spill] sm:$0xff] %v10508_v24  ;;  %2067 = vperm.xlu1 %8778, %v2021_v2   ;;  %15605 = vst [vmem:[#allocation120_spill] sm:$0xff] %v10510_v36  ;;  %2082 = vperm.xlu0 %8777, %v2024_v38   ;;  %v2027_v24 = vld [vmem:[#allocation2 + $0x98] sm:$0xff]  ;;  %v2030_v36 = vld [vmem:[#allocation2 + $0xc0] sm:$0xff] }
 0x1c3   : > { %v10512_v26 = vpop.permute.xlu1 %1556  ;;  %v10514_v25 = vpop.permute.xlu0 %1571 }
 0x1c4   : > { %15606 = vst [vmem:[#allocation121_spill] sm:$0xff] %v10512_v26  ;;  %2077 = vperm.xlu1 %8778, %v2023_v17   ;;  %15607 = vst [vmem:[#allocation122_spill] sm:$0xff] %v10514_v25  ;;  %2092 = vperm.xlu0 %8777, %v2026_v35   ;;  %v2029_v26 = vld [vmem:[#allocation2 + $0xb0] sm:$0xff]  ;;  %v2032_v25 = vld [vmem:[#allocation2 + $0xd8] sm:$0xff] }
 0x1c7   : > { %v10516_v30 = vpop.permute.xlu1 %1566  ;;  %v10518_v23 = vpop.permute.xlu0 %1581 }
 0x1c8   : > { %15608 = vst [vmem:[#allocation123_spill] sm:$0xff] %v10516_v30  ;;  %2087 = vperm.xlu1 %8778, %v2025_v21   ;;  %15609 = vst [vmem:[#allocation124_spill] sm:$0xff] %v10518_v23  ;;  %2102 = vperm.xlu0 %8777, %v2028_v1   ;;  %v2031_v30 = vld [vmem:[#allocation2 + $0xc8] sm:$0xff]  ;;  %v2034_v23 = vld [vmem:[#allocation2 + $0xf0] sm:$0xff] }
 0x1cb   : > { %v10520_v2 = vpop.permute.xlu1 %1576  ;;  %v10522_v38 = vpop.permute.xlu0 %1591 }
 0x1cc   : > { %15610 = vst [vmem:[#allocation125_spill] sm:$0xff] %v10520_v2  ;;  %2097 = vperm.xlu1 %8778, %v2027_v24   ;;  %15611 = vst [vmem:[#allocation126_spill] sm:$0xff] %v10522_v38  ;;  %2112 = vperm.xlu0 %8777, %v2030_v36   ;;  %v2033_v2 = vld [vmem:[#allocation2 + $0xe0] sm:$0xff]  ;;  %v2036_v38 = vld [vmem:[#allocation2 + $0x108] sm:$0xff] }
 0x1cf   : > { %v10524_v17 = vpop.permute.xlu1 %1586  ;;  %v10526_v35 = vpop.permute.xlu0 %1601 }
 0x1d0   : > { %15612 = vst [vmem:[#allocation127_spill] sm:$0xff] %v10524_v17  ;;  %2107 = vperm.xlu1 %8778, %v2029_v26   ;;  %15613 = vst [vmem:[#allocation128_spill] sm:$0xff] %v10526_v35  ;;  %2122 = vperm.xlu0 %8777, %v2032_v25   ;;  %v2035_v17 = vld [vmem:[#allocation2 + $0xf8] sm:$0xff]  ;;  %v2038_v35 = vld [vmem:[#allocation2 + $0x120] sm:$0xff] }
 0x1d3   : > { %v10528_v21 = vpop.permute.xlu1 %1596  ;;  %v10530_v1 = vpop.permute.xlu0 %1611 }
 0x1d4   : > { %15614 = vst [vmem:[#allocation129_spill] sm:$0xff] %v10528_v21  ;;  %2117 = vperm.xlu1 %8778, %v2031_v30   ;;  %15615 = vst [vmem:[#allocation130_spill] sm:$0xff] %v10530_v1  ;;  %2132 = vperm.xlu0 %8777, %v2034_v23   ;;  %v2037_v21 = vld [vmem:[#allocation2 + $0x110] sm:$0xff]  ;;  %v2040_v1 = vld [vmem:[#allocation2 + $0x138] sm:$0xff] }
 0x1d7   : > { %v10532_v24 = vpop.permute.xlu1 %1606  ;;  %v10534_v36 = vpop.permute.xlu0 %1621 }
 0x1d8   : > { %15616 = vst [vmem:[#allocation131_spill] sm:$0xff] %v10532_v24  ;;  %2127 = vperm.xlu1 %8778, %v2033_v2   ;;  %15617 = vst [vmem:[#allocation132_spill] sm:$0xff] %v10534_v36  ;;  %2142 = vperm.xlu0 %8777, %v2036_v38   ;;  %v2039_v24 = vld [vmem:[#allocation2 + $0x128] sm:$0xff]  ;;  %v10546_v36 = vld [vmem:[#allocation2 + $0x150] sm:$0xff]  ;;  %v15623_v38 = vmov 0.0  }
 0x1d9   : > { %2870 = vst.msk [vmem:[#allocation3] sm:$0xff] %vm2869_vm2, %v15623_v38  ;;  %2871 = vst.msk [vmem:[#allocation3 + $0x8] sm:$0xff] %vm2869_vm2, %v15623_v38 }
 0x1da   : > { %2873 = vst.msk [vmem:[#allocation3 + $0x10] sm:$0x3] %vm2872_vm3, %v15623_v38  ;;  %2876 = vst.msk [vmem:[#allocation3 + $0x28] sm:$0x3] %vm2872_vm3, %v15623_v38 }
 0x1db   : > { %v10536_v26 = vpop.permute.xlu1 %1616  ;;  %v10538_v25 = vpop.permute.xlu0 %1631  ;;  %2874 = vst.msk [vmem:[#allocation3 + $0x18] sm:$0xff] %vm2869_vm2, %v15623_v38  ;;  %2875 = vst.msk [vmem:[#allocation3 + $0x20] sm:$0xff] %vm2869_vm2, %v15623_v38 }
 0x1dc   : > { %15618 = vst [vmem:[#allocation133_spill] sm:$0xff] %v10536_v26  ;;  %2137 = vperm.xlu1 %8778, %v2035_v17   ;;  %15619 = vst [vmem:[#allocation134_spill] sm:$0xff] %v10538_v25  ;;  %2152 = vperm.xlu0 %8777, %v2038_v35   ;;  %v2041_v35 = vld [vmem:[#allocation2 + $0x140] sm:$0xff]  ;;  %v2045_v25 = vld [vmem:[#allocation2 + $0x170] sm:$0xff] }
 0x1dd   : > { %2877 = vst.msk [vmem:[#allocation3 + $0x30] sm:$0xff] %vm2869_vm2, %v15623_v38  ;;  %2878 = vst.msk [vmem:[#allocation3 + $0x38] sm:$0xff] %vm2869_vm2, %v15623_v38 }
 0x1de   : > { %2879 = vst.msk [vmem:[#allocation3 + $0x40] sm:$0x3] %vm2872_vm3, %v15623_v38  ;;  %2882 = vst.msk [vmem:[#allocation3 + $0x58] sm:$0x3] %vm2872_vm3, %v15623_v38 }
 0x1df   : > { %v10540_v30 = vpop.permute.xlu1 %1626  ;;  %v10542_v23 = vpop.permute.xlu0 %1641  ;;  %2880 = vst.msk [vmem:[#allocation3 + $0x48] sm:$0xff] %vm2869_vm2, %v15623_v38  ;;  %2881 = vst.msk [vmem:[#allocation3 + $0x50] sm:$0xff] %vm2869_vm2, %v15623_v38 }
 0x1e0   : > { %15620 = vst [vmem:[#allocation135_spill] sm:$0xff] %v10540_v30  ;;  %2147 = vperm.xlu1 %8778, %v2037_v21   ;;  %15621 = vst [vmem:[#allocation136_spill] sm:$0xff] %v10542_v23  ;;  %2162 = vperm.xlu0 %8777, %v2040_v1   ;;  %v2044_v1 = vld [vmem:[#allocation2 + $0x168] sm:$0xff]  ;;  %v2043_v30 = vld [vmem:[#allocation2 + $0x158] sm:$0xff] }
 0x1e1   : > { %2883 = vst.msk [vmem:[#allocation3 + $0x60] sm:$0xff] %vm2869_vm2, %v15623_v38  ;;  %2884 = vst.msk [vmem:[#allocation3 + $0x68] sm:$0xff] %vm2869_vm2, %v15623_v38 }
 0x1e2   : > { %2885 = vst.msk [vmem:[#allocation3 + $0x70] sm:$0x3] %vm2872_vm3, %v15623_v38  ;;  %2888 = vst.msk [vmem:[#allocation3 + $0x88] sm:$0x3] %vm2872_vm3, %v15623_v38 }
 0x1e3   : > { %v10544_v2 = vpop.permute.xlu1 %1636  ;;  %2886 = vst.msk [vmem:[#allocation3 + $0x78] sm:$0xff] %vm2869_vm2, %v15623_v38  ;;  %2887 = vst.msk [vmem:[#allocation3 + $0x80] sm:$0xff] %vm2869_vm2, %v15623_v38  ;;  %v10736_v17 = vpop.permute.xlu0 %1651 }
 0x1e4   : > { %15622 = vst [vmem:[#allocation137_spill] sm:$0xff] %v10544_v2  ;;  %2157 = vperm.xlu1 %8778, %v2039_v24   ;;  %2889 = vst.msk [vmem:[#allocation3 + $0x90] sm:$0xff] %vm2869_vm2, %v15623_v38  ;;  %2172 = vperm.xlu0 %8777, %v10546_v36   ;;  %v2279_v2 = vld [vmem:[#allocation2 + $0x39] sm:$0xff] }
 0x1e5   : > { %2890 = vst.msk [vmem:[#allocation3 + $0x98] sm:$0xff] %vm2869_vm2, %v15623_v38  ;;  %2892 = vst.msk [vmem:[#allocation3 + $0xa8] sm:$0xff] %vm2869_vm2, %v15623_v38 }
 0x1e6   : > { %2891 = vst.msk [vmem:[#allocation3 + $0xa0] sm:$0x3] %vm2872_vm3, %v15623_v38  ;;  %2894 = vst.msk [vmem:[#allocation3 + $0xb8] sm:$0x3] %vm2872_vm3, %v15623_v38 }
 0x1e7   : > { %2893 = vst.msk [vmem:[#allocation3 + $0xb0] sm:$0xff] %vm2869_vm2, %v15623_v38  ;;  %2895 = vst.msk [vmem:[#allocation3 + $0xc0] sm:$0xff] %vm2869_vm2, %v15623_v38  ;;  %v10739_v21 = vpop.permute.xlu1 %1646  ;;  %v10741_v24 = vpop.permute.xlu0 %1661 }
 0x1e8   : > { %2896 = vst.msk [vmem:[#allocation3 + $0xc8] sm:$0xff] %vm2869_vm2, %v15623_v38  ;;  %2898 = vst.msk [vmem:[#allocation3 + $0xd8] sm:$0xff] %vm2869_vm2, %v15623_v38  ;;  %2167 = vperm.xlu1 %8778, %v2041_v35   ;;  %2182 = vperm.xlu0 %8777, %v2044_v1  }
 0x1e9   : > { %2897 = vst.msk [vmem:[#allocation3 + $0xd0] sm:$0x3] %vm2872_vm3, %v15623_v38  ;;  %2900 = vst.msk [vmem:[#allocation3 + $0xe8] sm:$0x3] %vm2872_vm3, %v15623_v38 }
 0x1ea   : > { %2899 = vst.msk [vmem:[#allocation3 + $0xe0] sm:$0xff] %vm2869_vm2, %v15623_v38  ;;  %2901 = vst.msk [vmem:[#allocation3 + $0xf0] sm:$0xff] %vm2869_vm2, %v15623_v38 }
 0x1eb   : > { %2902 = vst.msk [vmem:[#allocation3 + $0xf8] sm:$0xff] %vm2869_vm2, %v15623_v38  ;;  %2904 = vst.msk [vmem:[#allocation3 + $0x108] sm:$0xff] %vm2869_vm2, %v15623_v38  ;;  %v10743_v26 = vpop.permute.xlu1 %1656  ;;  %v10745_v23 = vpop.permute.xlu0 %1671 }
 0x1ec   : > { %2903 = vst.msk [vmem:[#allocation3 + $0x100] sm:$0x3] %vm2872_vm3, %v15623_v38  ;;  %2906 = vst.msk [vmem:[#allocation3 + $0x118] sm:$0x3] %vm2872_vm3, %v15623_v38  ;;  %2177 = vperm.xlu1 %8778, %v2043_v30   ;;  %2192 = vperm.xlu0 %8777, %v10295_v52   ;;  %v2538_v30 = vld [vmem:[#allocation2 + $0x32] sm:$0xff] }
 0x1ed   : > { %2905 = vst.msk [vmem:[#allocation3 + $0x110] sm:$0xff] %vm2869_vm2, %v15623_v38  ;;  %2907 = vst.msk [vmem:[#allocation3 + $0x120] sm:$0xff] %vm2869_vm2, %v15623_v38 }
 0x1ee   : > { %2908 = vst.msk [vmem:[#allocation3 + $0x128] sm:$0xff] %vm2869_vm2, %v15623_v38  ;;  %2910 = vst.msk [vmem:[#allocation3 + $0x138] sm:$0xff] %vm2869_vm2, %v15623_v38 }
 0x1ef   : > { %2909 = vst.msk [vmem:[#allocation3 + $0x130] sm:$0x3] %vm2872_vm3, %v15623_v38  ;;  %2912 = vst.msk [vmem:[#allocation3 + $0x148] sm:$0x3] %vm2872_vm3, %v15623_v38  ;;  %v10750_v36 = vpop.permute.xlu0 %1681 }
 0x1f0   : > { %2911 = vst.msk [vmem:[#allocation3 + $0x140] sm:$0xff] %vm2869_vm2, %v15623_v38  ;;  %2913 = vst.msk [vmem:[#allocation3 + $0x150] sm:$0xff] %vm2869_vm2, %v15623_v38  ;;  %2187 = vperm.xlu1 %8778, %v2045_v25   ;;  %2317 = vperm.xlu0 %8777, %v2279_v2  }
 0x1f1   : > { %2914 = vst.msk [vmem:[#allocation3 + $0x158] sm:$0xff] %vm2869_vm2, %v15623_v38  ;;  %2916 = vst.msk [vmem:[#allocation3 + $0x168] sm:$0xff] %vm2869_vm2, %v15623_v38 }
 0x1f2   : > { %2915 = vst.msk [vmem:[#allocation3 + $0x160] sm:$0x3] %vm2872_vm3, %v15623_v38  ;;  %2918 = vst.msk [vmem:[#allocation3 + $0x178] sm:$0x3] %vm2872_vm3, %v15623_v38 }
 0x1f3   : > { %2917 = vst.msk [vmem:[#allocation3 + $0x170] sm:$0xff] %vm2869_vm2, %v15623_v38  ;;  %2919 = vst.msk [vmem:[#allocation3 + $0x180] sm:$0xff] %vm2869_vm2, %v15623_v38  ;;  %v10754_v1 = vpop.permute.xlu0 %1791 }
 0x1f4   : > { %2920 = vst.msk [vmem:[#allocation3 + $0x188] sm:$0xff] %vm2869_vm2, %v15623_v38  ;;  %2922 = vst.msk [vmem:[#allocation3 + $0x198] sm:$0xff] %vm2869_vm2, %v15623_v38 }
 0x1f5   : > { %2921 = vst.msk [vmem:[#allocation3 + $0x190] sm:$0x3] %vm2872_vm3, %v15623_v38  ;;  %2924 = vst.msk [vmem:[#allocation3 + $0x1a8] sm:$0x3] %vm2872_vm3, %v15623_v38  ;;  %vm8461_vm3 = vcmask 1046534  }
 0x1f6   : > { %2923 = vst.msk [vmem:[#allocation3 + $0x1a0] sm:$0xff] %vm2869_vm2, %v15623_v38  ;;  %5500 = vst.msk [vmem:[#allocation6] sm:$0xff] %vm2869_vm2, %v15623_v38 }
 0x1f7   : > { %5501 = vst.msk [vmem:[#allocation6 + $0x8] sm:$0xff] %vm2869_vm2, %v15623_v38  ;;  %5504 = vst.msk [vmem:[#allocation6 + $0x18] sm:$0xff] %vm2869_vm2, %v15623_v38  ;;  %v10758_v52 = vpop.permute.xlu0 %1801 }
 0x1f8   : > { %5505 = vst.msk [vmem:[#allocation6 + $0x20] sm:$0xff] %vm2869_vm2, %v15623_v38  ;;  %5507 = vst.msk [vmem:[#allocation6 + $0x30] sm:$0xff] %vm2869_vm2, %v15623_v38 }
 0x1f9   : > { %5508 = vst.msk [vmem:[#allocation6 + $0x38] sm:$0xff] %vm2869_vm2, %v15623_v38  ;;  %5510 = vst.msk [vmem:[#allocation6 + $0x48] sm:$0xff] %vm2869_vm2, %v15623_v38 }
 0x1fa   : > { %5511 = vst.msk [vmem:[#allocation6 + $0x50] sm:$0xff] %vm2869_vm2, %v15623_v38  ;;  %5513 = vst.msk [vmem:[#allocation6 + $0x60] sm:$0xff] %vm2869_vm2, %v15623_v38 }
 0x1fb   : > { %5514 = vst.msk [vmem:[#allocation6 + $0x68] sm:$0xff] %vm2869_vm2, %v15623_v38  ;;  %5516 = vst.msk [vmem:[#allocation6 + $0x78] sm:$0xff] %vm2869_vm2, %v15623_v38  ;;  %v10762_v2 = vpop.permute.xlu0 %1811 }
 0x1fc   : > { %5517 = vst.msk [vmem:[#allocation6 + $0x80] sm:$0xff] %vm2869_vm2, %v15623_v38  ;;  %5519 = vst.msk [vmem:[#allocation6 + $0x90] sm:$0xff] %vm2869_vm2, %v15623_v38 }
 0x1fd   : > { %5520 = vst.msk [vmem:[#allocation6 + $0x98] sm:$0xff] %vm2869_vm2, %v15623_v38  ;;  %5522 = vst.msk [vmem:[#allocation6 + $0xa8] sm:$0xff] %vm2869_vm2, %v15623_v38 }
 0x1fe   : > { %5523 = vst.msk [vmem:[#allocation6 + $0xb0] sm:$0xff] %vm2869_vm2, %v15623_v38  ;;  %5525 = vst.msk [vmem:[#allocation6 + $0xc0] sm:$0xff] %vm2869_vm2, %v15623_v38 }
 0x1ff   : > { %5526 = vst.msk [vmem:[#allocation6 + $0xc8] sm:$0xff] %vm2869_vm2, %v15623_v38  ;;  %5528 = vst.msk [vmem:[#allocation6 + $0xd8] sm:$0xff] %vm2869_vm2, %v15623_v38 }
 0x200   : > { %5529 = vst.msk [vmem:[#allocation6 + $0xe0] sm:$0xff] %vm2869_vm2, %v15623_v38  ;;  %5531 = vst.msk [vmem:[#allocation6 + $0xf0] sm:$0xff] %vm2869_vm2, %v15623_v38 }
 0x201   : > { %5532 = vst.msk [vmem:[#allocation6 + $0xf8] sm:$0xff] %vm2869_vm2, %v15623_v38  ;;  %5534 = vst.msk [vmem:[#allocation6 + $0x108] sm:$0xff] %vm2869_vm2, %v15623_v38 }
 0x202   : > { %5535 = vst.msk [vmem:[#allocation6 + $0x110] sm:$0xff] %vm2869_vm2, %v15623_v38  ;;  %5537 = vst.msk [vmem:[#allocation6 + $0x120] sm:$0xff] %vm2869_vm2, %v15623_v38 }
 0x203   : > { %5538 = vst.msk [vmem:[#allocation6 + $0x128] sm:$0xff] %vm2869_vm2, %v15623_v38  ;;  %5540 = vst.msk [vmem:[#allocation6 + $0x138] sm:$0xff] %vm2869_vm2, %v15623_v38 }
 0x204   : > { %5541 = vst.msk [vmem:[#allocation6 + $0x140] sm:$0xff] %vm2869_vm2, %v15623_v38  ;;  %5543 = vst.msk [vmem:[#allocation6 + $0x150] sm:$0xff] %vm2869_vm2, %v15623_v38 }
 0x205   : > { %5544 = vst.msk [vmem:[#allocation6 + $0x158] sm:$0xff] %vm2869_vm2, %v15623_v38  ;;  %5546 = vst.msk [vmem:[#allocation6 + $0x168] sm:$0xff] %vm2869_vm2, %v15623_v38 }
 0x206   : > { %5547 = vst.msk [vmem:[#allocation6 + $0x170] sm:$0xff] %vm2869_vm2, %v15623_v38  ;;  %5549 = vst.msk [vmem:[#allocation6 + $0x180] sm:$0xff] %vm2869_vm2, %v15623_v38 }
 0x207   : > { %5550 = vst.msk [vmem:[#allocation6 + $0x188] sm:$0xff] %vm2869_vm2, %v15623_v38  ;;  %5552 = vst.msk [vmem:[#allocation6 + $0x198] sm:$0xff] %vm2869_vm2, %v15623_v38 }
 0x208   : > { %5553 = vst.msk [vmem:[#allocation6 + $0x1a0] sm:$0xff] %vm2869_vm2, %v15623_v38  ;;  %5555 = vst.msk [vmem:[#allocation6 + $0x1b0] sm:$0xff] %vm2869_vm2, %v15623_v38 }
 0x209   : > { %5556 = vst.msk [vmem:[#allocation6 + $0x1b8] sm:$0xff] %vm2869_vm2, %v15623_v38  ;;  %5558 = vst.msk [vmem:[#allocation6 + $0x1c8] sm:$0xff] %vm2869_vm2, %v15623_v38 }
 0x20a   : > { %5559 = vst.msk [vmem:[#allocation6 + $0x1d0] sm:$0xff] %vm2869_vm2, %v15623_v38  ;;  %15624 = vst [vmem:[#allocation138_spill] sm:$0xff] %v10736_v17  ;;  %v10748_v17 = vpop.permute.xlu1 %1666  ;;  %v2283_v38 = vld [vmem:[#allocation2 + $0x69] sm:$0xff] }
 0x20b   : > { %15625 = vst [vmem:[#allocation139_spill] sm:$0xff] %v10739_v21  ;;  %15626 = vst [vmem:[#allocation140_spill] sm:$0xff] %v10741_v24  ;;  %v2278_v21 = vld [vmem:[#allocation2 + $0x31] sm:$0xff]  ;;  %v2539_v24 = vld [vmem:[#allocation2 + $0x3a] sm:$0xff] }
 0x20c   : > { %15627 = vst [vmem:[#allocation141_spill] sm:$0xff] %v10743_v26  ;;  %15628 = vst [vmem:[#allocation142_spill] sm:$0xff] %v10745_v23  ;;  %2312 = vperm.xlu1 %8778, %v2278_v21   ;;  %2577 = vperm.xlu0 %8777, %v2539_v24   ;;  %v2281_v26 = vld [vmem:[#allocation2 + $0x51] sm:$0xff]  ;;  %v10766_v24 = vpop.permute.xlu0 %1821 }
 0x20d   : > { %15629 = vst [vmem:[#allocation143_spill] sm:$0xff] %v10748_v17  ;;  %15630 = vst [vmem:[#allocation144_spill] sm:$0xff] %v10750_v36  ;;  %v2280_v17 = vld [vmem:[#allocation2 + $0x49] sm:$0xff]  ;;  %v2541_v36 = vld [vmem:[#allocation2 + $0x52] sm:$0xff] }
 0x20e   : > { %v10752_v35 = vpop.permute.xlu1 %1676  ;;  %15632 = vst [vmem:[#allocation146_spill] sm:$0xff] %v10754_v1  ;;  %15634 = vst [vmem:[#allocation148_spill] sm:$0xff] %v10758_v52  ;;  %v2543_v52 = vld [vmem:[#allocation2 + $0x6a] sm:$0xff]  ;;  %v2542_v1 = vld [vmem:[#allocation2 + $0x62] sm:$0xff] }
 0x20f   : > { %15631 = vst [vmem:[#allocation145_spill] sm:$0xff] %v10752_v35  ;;  %15636 = vst [vmem:[#allocation150_spill] sm:$0xff] %v10762_v2  ;;  %v2540_v35 = vld [vmem:[#allocation2 + $0x4a] sm:$0xff]  ;;  %v2285_v2 = vld [vmem:[#allocation2 + $0x81] sm:$0xff] }
 0x210   : > { %2572 = vperm.xlu1 %8778, %v2538_v30   ;;  %2327 = vperm.xlu0 %8777, %v2281_v26   ;;  %15638 = vst [vmem:[#allocation152_spill] sm:$0xff] %v10766_v24  ;;  %v10770_v26 = vpop.permute.xlu0 %1831  ;;  %v2545_v24 = vld [vmem:[#allocation2 + $0x82] sm:$0xff] }
 0x211   : > { %15640 = vst [vmem:[#allocation154_spill] sm:$0xff] %v10770_v26  ;;  %v2287_v26 = vld [vmem:[#allocation2 + $0x99] sm:$0xff] }
 0x212   : > { %v10756_v23 = vpop.permute.xlu1 %1686 }
 0x213   : > { %15633 = vst [vmem:[#allocation147_spill] sm:$0xff] %v10756_v23  ;;  %v2282_v23 = vld [vmem:[#allocation2 + $0x61] sm:$0xff] }
 0x214   : > { %2322 = vperm.xlu1 %8778, %v2280_v17   ;;  %2587 = vperm.xlu0 %8777, %v2541_v36   ;;  %v10774_v36 = vpop.permute.xlu0 %1841 }
 0x215   : > { %15642 = vst [vmem:[#allocation156_spill] sm:$0xff] %v10774_v36  ;;  %v2547_v36 = vld [vmem:[#allocation2 + $0x9a] sm:$0xff] }
 0x216   : > { %v10760_v25 = vpop.permute.xlu1 %1796 }
 0x217   : > { %15635 = vst [vmem:[#allocation149_spill] sm:$0xff] %v10760_v25  ;;  %v15684_v25 = vld [vmem:[#allocation18_spill] sm:$0xff] }
 0x218   : > { %2582 = vperm.xlu1 %8778, %v2540_v35   ;;  %2337 = vperm.xlu0 %8777, %v2283_v38   ;;  %v10778_v38 = vpop.permute.xlu0 %1851 }
 0x219   : > { %15644 = vst [vmem:[#allocation158_spill] sm:$0xff] %v10778_v38  ;;  %v2289_v38 = vld [vmem:[#allocation2 + $0xb1] sm:$0xff] }
 0x21a   : > { %v10764_v21 = vpop.permute.xlu1 %1806 }
 0x21b   : > { %15637 = vst [vmem:[#allocation151_spill] sm:$0xff] %v10764_v21  ;;  %v2284_v21 = vld [vmem:[#allocation2 + $0x79] sm:$0xff] }
 0x21c   : > { %2332 = vperm.xlu1 %8778, %v2282_v23   ;;  %2597 = vperm.xlu0 %8777, %v2543_v52   ;;  %v10782_v52 = vpop.permute.xlu0 %1861 }
 0x21d   : > { %15646 = vst [vmem:[#allocation160_spill] sm:$0xff] %v10782_v52  ;;  %v2549_v52 = vld [vmem:[#allocation2 + $0xb2] sm:$0xff] }
 0x21e   : > { %v10768_v30 = vpop.permute.xlu1 %1816 }
 0x21f   : > { %15639 = vst [vmem:[#allocation153_spill] sm:$0xff] %v10768_v30  ;;  %v2544_v30 = vld [vmem:[#allocation2 + $0x7a] sm:$0xff] }
 0x220   : > { %2592 = vperm.xlu1 %8778, %v2542_v1   ;;  %2347 = vperm.xlu0 %8777, %v2285_v2   ;;  %v10786_v2 = vpop.permute.xlu0 %1871 }
 0x221   : > { %15648 = vst [vmem:[#allocation162_spill] sm:$0xff] %v10786_v2  ;;  %v2291_v2 = vld [vmem:[#allocation2 + $0xc9] sm:$0xff] }
 0x222   : > { %v10772_v17 = vpop.permute.xlu1 %1826 }
 0x223   : > { %15641 = vst [vmem:[#allocation155_spill] sm:$0xff] %v10772_v17  ;;  %v2286_v17 = vld [vmem:[#allocation2 + $0x91] sm:$0xff] }
 0x224   : > { %2342 = vperm.xlu1 %8778, %v2284_v21   ;;  %2607 = vperm.xlu0 %8777, %v2545_v24   ;;  %v10790_v24 = vpop.permute.xlu0 %1881 }
 0x225   : > { %15650 = vst [vmem:[#allocation164_spill] sm:$0xff] %v10790_v24  ;;  %v2551_v24 = vld [vmem:[#allocation2 + $0xca] sm:$0xff] }
 0x226   : > { %v10776_v35 = vpop.permute.xlu1 %1836 }
 0x227   : > { %15643 = vst [vmem:[#allocation157_spill] sm:$0xff] %v10776_v35  ;;  %v2546_v35 = vld [vmem:[#allocation2 + $0x92] sm:$0xff] }
 0x228   : > { %2602 = vperm.xlu1 %8778, %v2544_v30   ;;  %2357 = vperm.xlu0 %8777, %v2287_v26   ;;  %v10794_v26 = vpop.permute.xlu0 %1891 }
 0x229   : > { %15652 = vst [vmem:[#allocation166_spill] sm:$0xff] %v10794_v26  ;;  %v2293_v26 = vld [vmem:[#allocation2 + $0xe1] sm:$0xff] }
 0x22a   : > { %v10780_v23 = vpop.permute.xlu1 %1846 }
 0x22b   : > { %15645 = vst [vmem:[#allocation159_spill] sm:$0xff] %v10780_v23  ;;  %v2288_v23 = vld [vmem:[#allocation2 + $0xa9] sm:$0xff] }
 0x22c   : > { %2352 = vperm.xlu1 %8778, %v2286_v17   ;;  %2617 = vperm.xlu0 %8777, %v2547_v36   ;;  %v10798_v36 = vpop.permute.xlu0 %1901 }
 0x22d   : > { %15654 = vst [vmem:[#allocation168_spill] sm:$0xff] %v10798_v36  ;;  %v2553_v36 = vld [vmem:[#allocation2 + $0xe2] sm:$0xff] }
 0x22e   : > { %v10784_v1 = vpop.permute.xlu1 %1856 }
 0x22f   : > { %15647 = vst [vmem:[#allocation161_spill] sm:$0xff] %v10784_v1  ;;  %v2548_v1 = vld [vmem:[#allocation2 + $0xaa] sm:$0xff] }
 0x230   : > { %2612 = vperm.xlu1 %8778, %v2546_v35   ;;  %2367 = vperm.xlu0 %8777, %v2289_v38   ;;  %v10802_v38 = vpop.permute.xlu0 %1911 }
 0x231   : > { %15656 = vst [vmem:[#allocation170_spill] sm:$0xff] %v10802_v38  ;;  %v2299_v38 = vld [vmem:[#allocation2 + $0x129] sm:$0xff] }
 0x232   : > { %v10788_v21 = vpop.permute.xlu1 %1866 }
 0x233   : > { %15649 = vst [vmem:[#allocation163_spill] sm:$0xff] %v10788_v21  ;;  %v2290_v21 = vld [vmem:[#allocation2 + $0xc1] sm:$0xff] }
 0x234   : > { %2362 = vperm.xlu1 %8778, %v2288_v23   ;;  %2627 = vperm.xlu0 %8777, %v2549_v52   ;;  %v10806_v52 = vpop.permute.xlu0 %1921 }
 0x235   : > { %15658 = vst [vmem:[#allocation172_spill] sm:$0xff] %v10806_v52  ;;  %v2301_v52 = vld [vmem:[#allocation2 + $0x141] sm:$0xff] }
 0x236   : > { %v10792_v30 = vpop.permute.xlu1 %1876 }
 0x237   : > { %15651 = vst [vmem:[#allocation165_spill] sm:$0xff] %v10792_v30  ;;  %v2550_v30 = vld [vmem:[#allocation2 + $0xc2] sm:$0xff] }
 0x238   : > { %2622 = vperm.xlu1 %8778, %v2548_v1   ;;  %2377 = vperm.xlu0 %8777, %v2291_v2   ;;  %v10810_v2 = vpop.permute.xlu0 %1931 }
 0x239   : > { %15660 = vst [vmem:[#allocation174_spill] sm:$0xff] %v10810_v2  ;;  %v2559_v2 = vld [vmem:[#allocation2 + $0x12a] sm:$0xff] }
 0x23a   : > { %v10796_v17 = vpop.permute.xlu1 %1886 }
 0x23b   : > { %15653 = vst [vmem:[#allocation167_spill] sm:$0xff] %v10796_v17  ;;  %v2292_v17 = vld [vmem:[#allocation2 + $0xd9] sm:$0xff] }
 0x23c   : > { %2372 = vperm.xlu1 %8778, %v2290_v21   ;;  %2637 = vperm.xlu0 %8777, %v2551_v24   ;;  %v10814_v24 = vpop.permute.xlu0 %1941 }
 0x23d   : > { %15662 = vst [vmem:[#allocation176_spill] sm:$0xff] %v10814_v24  ;;  %v2561_v24 = vld [vmem:[#allocation2 + $0x142] sm:$0xff] }
 0x23e   : > { %v10800_v35 = vpop.permute.xlu1 %1896 }
 0x23f   : > { %15655 = vst [vmem:[#allocation169_spill] sm:$0xff] %v10800_v35  ;;  %v2552_v35 = vld [vmem:[#allocation2 + $0xda] sm:$0xff] }
 0x240   : > { %2632 = vperm.xlu1 %8778, %v2550_v30   ;;  %2387 = vperm.xlu0 %8777, %v2293_v26   ;;  %v10818_v26 = vpop.permute.xlu0 %2052 }
 0x241   : > { %15664 = vst [vmem:[#allocation178_spill] sm:$0xff] %v10818_v26 }
 0x242   : > { %v10804_v23 = vpop.permute.xlu1 %1906 }
 0x243   : > { %15657 = vst [vmem:[#allocation171_spill] sm:$0xff] %v10804_v23  ;;  %v2298_v23 = vld [vmem:[#allocation2 + $0x121] sm:$0xff] }
 0x244   : > { %2382 = vperm.xlu1 %8778, %v2292_v17   ;;  %2647 = vperm.xlu0 %8777, %v2553_v36   ;;  %v10822_v36 = vpop.permute.xlu0 %2062 }
 0x245   : > { %15666 = vst [vmem:[#allocation180_spill] sm:$0xff] %v10822_v36  ;;  %v2294_v36 = vld [vmem:[#allocation2 + $0xf1] sm:$0xff] }
 0x246   : > { %v10808_v1 = vpop.permute.xlu1 %1916 }
 0x247   : > { %15659 = vst [vmem:[#allocation173_spill] sm:$0xff] %v10808_v1  ;;  %v2300_v1 = vld [vmem:[#allocation2 + $0x139] sm:$0xff] }
 0x248   : > { %2642 = vperm.xlu1 %8778, %v2552_v35   ;;  %2417 = vperm.xlu0 %8777, %v2299_v38   ;;  %v15231_v38 = vlaneseq }
 0x24a   : > { %v10812_v21 = vpop.permute.xlu1 %1926 }
 0x24b   : > { %15661 = vst [vmem:[#allocation175_spill] sm:$0xff] %v10812_v21  ;;  %v2558_v21 = vld [vmem:[#allocation2 + $0x122] sm:$0xff] }
 0x24c   : > { %2412 = vperm.xlu1 %8778, %v2298_v23   ;;  %2427 = vperm.xlu0 %8777, %v2301_v52   ;;  %v2560_v23 = vld [vmem:[#allocation2 + $0x13a] sm:$0xff] }
 0x24d   : > { %v2295_v52 = vld [vmem:[#allocation2 + $0xf9] sm:$0xff] }
 0x24e   : > { %v10816_v30 = vpop.permute.xlu1 %1936 }
 0x24f   : > { %15663 = vst [vmem:[#allocation177_spill] sm:$0xff] %v10816_v30  ;;  %v10826_v30 = vpop.permute.xlu0 %2072 }
 0x250   : > { %2422 = vperm.xlu1 %8778, %v2300_v1   ;;  %2677 = vperm.xlu0 %8777, %v2559_v2   ;;  %15668 = vst [vmem:[#allocation182_spill] sm:$0xff] %v10826_v30 }
 0x252   : > { %v10820_v17 = vpop.permute.xlu1 %1946 }
 0x253   : > { %15665 = vst [vmem:[#allocation179_spill] sm:$0xff] %v10820_v17  ;;  %v10831_v17 = vshrl.u32 %v15231_v38, 7  ;;  %v10833_v1 = vpop.permute.xlu0 %2082 }
 0x254   : > { %2672 = vperm.xlu1 %8778, %v2558_v21   ;;  %2687 = vperm.xlu0 %8777, %v2561_v24   ;;  %15671 = vst [vmem:[#allocation185_spill] sm:$0xff] %v10833_v1  ;;  %v2302_v24 = vld [vmem:[#allocation2 + $0x151] sm:$0xff]  ;;  %v2555_v1 = vld [vmem:[#allocation2 + $0xfa] sm:$0xff] }
 0x255   : > { %15670 = vst [vmem:[#allocation184_spill] sm:$0xff] %v10831_v17  ;;  %v10838_v21 = vsub.s32 0, %v10831_v17 }
 0x256   : > { %v10824_v35 = vpop.permute.xlu1 %2057 }
 0x257   : > { %15667 = vst [vmem:[#allocation181_spill] sm:$0xff] %v10824_v35  ;;  %v2303_v35 = vld [vmem:[#allocation2 + $0x159] sm:$0xff]  ;;  %15673 = vst [vmem:[#allocation187_spill] sm:$0xff] %v10838_v21  ;;  %v10840_v30 = vpop.permute.xlu0 %2092 }
 0x258   : > { %2682 = vperm.xlu1 %8778, %v2560_v23   ;;  %2397 = vperm.xlu0 %8777, %v2295_v52   ;;  %15674 = vst [vmem:[#allocation188_spill] sm:$0xff] %v10840_v30  ;;  %v10845_v23 = vld [vmem:[%s15186_s1] sm:$0xff]  ;;  %v10850_v52 = vsub.s32 1, %v10831_v17 }
 0x259   : > { %v10857_v30 = vrot.slane %v10845_v23, %v10838_v21 }
 0x25a   : > { %v10828_v26 = vpop.permute.xlu1 %2067  ;;  %15676 = vst [vmem:[#allocation190_spill] sm:$0xff] %v10850_v52 }
 0x25b   : > { %15669 = vst [vmem:[#allocation183_spill] sm:$0xff] %v10828_v26  ;;  %15678 = vst [vmem:[#allocation192_spill] sm:$0xff] %v10857_v30  ;;  %v2554_v26 = vld [vmem:[#allocation2 + $0xf2] sm:$0xff] }
 0x25c   : > { %2392 = vperm.xlu1 %8778, %v2294_v36   ;;  %2437 = vperm.xlu0 %8777, %v2303_v35   ;;  %v10853_v36 = vsub.s32 2, %v10831_v17  ;;  %v2563_v35 = vld [vmem:[#allocation2 + $0x15a] sm:$0xff] }
 0x25e   : > { %v10835_v2 = vpop.permute.xlu1 %2077  ;;  %15677 = vst [vmem:[#allocation191_spill] sm:$0xff] %v10853_v36  ;;  %v10869_v15 = vrot.slane %v10845_v23, %v10853_v36  ;;  %v656_v36 = vmul.f32 %v10857_v30, %v15688_v20  ;;  %v15694_v20 = vld [vmem:[#allocation35_spill] sm:$0xff] }
 0x25f   : > { %15672 = vst [vmem:[#allocation186_spill] sm:$0xff] %v10835_v2  ;;  %v10859_v2 = vpop.permute.xlu0 %2102 }
 0x260   : > { %2432 = vperm.xlu1 %8778, %v2302_v24   ;;  %15679 = vst [vmem:[#allocation193_spill] sm:$0xff] %v10859_v2  ;;  %2657 = vperm.xlu0 %8777, %v2555_v1   ;;  %15682 = vst [vmem:[#allocation196_spill] sm:$0xff] %v10869_v15  ;;  %v15683_v24 = vld [vmem:[#allocation16_spill] sm:$0xff]  ;;  %v654_v2 = vmul.f32 %v10857_v30, %v15684_v25  ;;  %v655_v1 = vmul.f32 %v10857_v30, %v15685_v62  ;;  %v15691_v25 = vld [vmem:[#allocation29_spill] sm:$0xff] }
 0x261   : > { %v653_v21 = vmul.f32 %v10857_v30, %v15683_v24  ;;  %v10887_v24 = vmul.f32 %v10857_v30, %v15690_v19  ;;  %v10891_v12 = vmul.f32 %v10857_v30, %v15691_v25  ;;  %v15692_v62 = vld [vmem:[#allocation31_spill] sm:$0xff]  ;;  %v10907_v19 = vmul.f32 %v10857_v30, %v15695_v11  ;;  %v2297_v25 = vld [vmem:[#allocation2 + $0x111] sm:$0xff] }
 0x262   : > { %v10847_v38 = vpop.permute.xlu1 %2087  ;;  %v15701_v11 = vld [vmem:[#allocation47_spill] sm:$0xff] }
 0x263   : > { %15675 = vst [vmem:[#allocation189_spill] sm:$0xff] %v10847_v38  ;;  %v10865_v38 = vrot.slane %v10845_v23, %v10850_v52  ;;  %v10879_v13 = vpop.permute.xlu0 %2112  ;;  %v2562_v52 = vld [vmem:[#allocation2 + $0x152] sm:$0xff] }
 0x264   : > { %2652 = vperm.xlu1 %8778, %v2554_v26   ;;  %15687 = vst [vmem:[#allocation16_spill] sm:$0xff] %v10879_v13  ;;  %v659_v26 = vmul.f32 %v10857_v30, %v15689_v22  ;;  %2697 = vperm.xlu0 %8777, %v2563_v35   ;;  %v15693_v13 = vld [vmem:[#allocation33_spill] sm:$0xff]  ;;  %v10903_v22 = vmul.f32 %v10857_v30, %v15694_v20  ;;  %v15697_v35 = vld [vmem:[#allocation39_spill] sm:$0xff] }
 0x265   : > { %15681 = vst [vmem:[#allocation195_spill] sm:$0xff] %v10865_v38  ;;  %v10899_v31 = vmul.f32 %v10857_v30, %v15693_v13  ;;  %v10913_v9 = vmul.f32 %v10857_v30, %v15697_v35  ;;  %v15699_v13 = vld [vmem:[#allocation43_spill] sm:$0xff]  ;;  %v15700_v20 = vld [vmem:[#allocation45_spill] sm:$0xff]  ;;  %v10933_v35 = vmul.f32 %v10857_v30, %v15702_v6 }
 0x266   : > { %v10861_v16 = vpop.permute.xlu1 %2097  ;;  %v10921_v7 = vmul.f32 %v10857_v30, %v15699_v13  ;;  %v10925_v18 = vmul.f32 %v10857_v30, %v15700_v20  ;;  %v10941_v13 = vmul.f32 %v10857_v30, %v15704_v4  ;;  %v2296_v20 = vld [vmem:[#allocation2 + $0x109] sm:$0xff]  ;;  %v15709_v6 = vld [vmem:[#allocation73_spill] sm:$0xff]  ;;  %v15711_v4 = vld [vmem:[#allocation59_spill] sm:$0xff] }
 0x267   : > { %15680 = vst [vmem:[#allocation194_spill] sm:$0xff] %v10861_v16  ;;  %v15686_v16 = vld [vmem:[#allocation21_spill] sm:$0xff]  ;;  %v10943_v3 = vpop.permute.xlu0 %2122  ;;  %v913_v57 = vmul.f32 %v10865_v38, %v15709_v6  ;;  %v10960_v15 = vmul.f32 %v10857_v30, %v15711_v4 }
 0x268   : > { %v657_v14 = vmul.f32 %v10857_v30, %v15686_v16  ;;  %v10895_v16 = vmul.f32 %v10857_v30, %v15692_v62  ;;  %v15698_v62 = vld [vmem:[#allocation41_spill] sm:$0xff]  ;;  %2692 = vperm.xlu1 %8778, %v2562_v52   ;;  %15705 = vst [vmem:[#allocation19_spill] sm:$0xff] %v10943_v3  ;;  %v15706_v52 = vld [vmem:[#allocation55_spill] sm:$0xff]  ;;  %2407 = vperm.xlu0 %8777, %v2297_v25  }
 0x269   : > { %v10917_v8 = vmul.f32 %v10857_v30, %v15698_v62  ;;  %v10937_v62 = vmul.f32 %v10857_v30, %v15703_v61  ;;  %v10947_v58 = vmul.f32 %v10857_v30, %v15706_v52  ;;  %v10956_v61 = vsub.s32 3, %v10831_v17  ;;  %15712 = vst [vmem:[#allocation25_spill] sm:$0xff] %v10960_v15  ;;  %v15713_v3 = vld [vmem:[#allocation61_spill] sm:$0xff]  ;;  %v15716_v17 = vld [vmem:[#allocation63_spill] sm:$0xff] }
 0x26a   : > { %v10909_v10 = vpop.permute.xlu1 %2107  ;;  %v10964_v60 = vmul.f32 %v10857_v30, %v15713_v3  ;;  %v915_v52 = vmul.f32 %v10865_v38, %v10212_v39  ;;  %v2305_v6 = vld [vmem:[#allocation2 + $0x171] sm:$0xff]  ;;  %v10974_v25 = vmul.f32 %v10857_v30, %v15716_v17  ;;  %v15720_v15 = vld [vmem:[#allocation67_spill] sm:$0xff]  ;;  %v917_v39 = vmul.f32 %v10865_v38, %v10218_v41 }
 0x26b   : > { %15696 = vst [vmem:[#allocation18_spill] sm:$0xff] %v10909_v10  ;;  %v10929_v10 = vmul.f32 %v10857_v30, %v15701_v11  ;;  %v15707_v11 = vld [vmem:[#allocation57_spill] sm:$0xff]  ;;  %15710 = vst [vmem:[#allocation23_spill] sm:$0xff] %v10956_v61  ;;  %v10982_v3 = vmul.f32 %v10857_v30, %v15720_v15  ;;  %v10998_v15 = vpop.permute.xlu0 %2132 }
 0x26c   : > { %v10951_v63 = vmul.f32 %v10857_v30, %v15707_v11  ;;  %15714 = vst [vmem:[#allocation27_spill] sm:$0xff] %v10964_v60  ;;  %v914_v11 = vmul.f32 %v10865_v38, %v10215_v37  ;;  %15717 = vst [vmem:[#allocation31_spill] sm:$0xff] %v10974_v25  ;;  %2402 = vperm.xlu1 %8778, %v2296_v20   ;;  %v15722_v37 = vld [vmem:[#allocation68_spill] sm:$0xff]  ;;  %v15723_v60 = vld [vmem:[#allocation70_spill] sm:$0xff]  ;;  %v11004_v20 = vadd.f32 %v913_v57, %v653_v21 }
 0x26d   : > { %15721 = vst [vmem:[#allocation35_spill] sm:$0xff] %v10982_v3  ;;  %v10992_v17 = vmul.f32 %v10857_v30, %v15723_v60  ;;  %15724 = vst [vmem:[#allocation37_spill] sm:$0xff] %v10998_v15  ;;  %v2304_v3 = vld [vmem:[#allocation2 + $0x169] sm:$0xff]  ;;  %v11010_v60 = vrot.slane %v10845_v23, %v10956_v61  ;;  %2447 = vperm.xlu0 %8777, %v2305_v6   ;;  %v921_v15 = vmul.f32 %v10865_v38, %v10230_v28  ;;  %v2557_v21 = vld [vmem:[#allocation2 + $0x112] sm:$0xff] }
 0x26e   : > { %15708 = vst [vmem:[#allocation21_spill] sm:$0xff] %v10951_v63  ;;  %v10970_v59 = vpop.permute.xlu1 %2117  ;;  %v15718_v63 = vld [vmem:[#allocation65_spill] sm:$0xff]  ;;  %v15725_v25 = vld [vmem:[#allocation72_spill] sm:$0xff] }
 0x26f   : > { %15715 = vst [vmem:[#allocation29_spill] sm:$0xff] %v10970_v59  ;;  %v10978_v4 = vmul.f32 %v10857_v30, %v15718_v63  ;;  %v10988_v59 = vmul.f32 %v10857_v30, %v15722_v37  ;;  %v916_v63 = vmul.f32 %v10865_v38, %v10221_v0  ;;  %v11002_v41 = vmul.f32 %v10857_v30, %v15725_v25  ;;  %v15759_v61 = vld [vmem:[#allocation92_spill] sm:$0xff] }
 0x270   : > { %v918_v37 = vmul.f32 %v10865_v38, %v10227_v5  ;;  %v11012_v0 = vadd.f32 %v915_v52, %v655_v1  ;;  %v920_v25 = vmul.f32 %v10865_v38, %v10233_v29  ;;  %v11022_v30 = vadd.f32 %v917_v39, %v657_v14  ;;  %2442 = vperm.xlu1 %8778, %v2304_v3  }
 0x271   : > { %15719 = vst [vmem:[#allocation33_spill] sm:$0xff] %v10978_v4  ;;  %v919_v4 = vmul.f32 %v10865_v38, %v10224_v27  ;;  %v11014_v27 = vadd.f32 %v914_v11, %v654_v2  ;;  %v923_v5 = vmul.f32 %v10865_v38, %v10236_v32  ;;  %v922_v1 = vmul.f32 %v10865_v38, %v10239_v33  ;;  %v11038_v11 = vpop.permute.xlu0 %2142  ;;  %v2556_v32 = vld [vmem:[#allocation2 + $0x10a] sm:$0xff] }
 0x272   : > { %v11020_v57 = vpop.permute.xlu1 %2127  ;;  %v925_v2 = vmul.f32 %v10865_v38, %v10242_v34  ;;  %v11030_v52 = vadd.f32 %v916_v63, %v656_v36  ;;  %v924_v29 = vmul.f32 %v10865_v38, %v10245_v40  ;;  %v927_v14 = vmul.f32 %v10865_v38, %v10248_v42  ;;  %15726 = vst [vmem:[#allocation39_spill] sm:$0xff] %v11038_v11  ;;  %v15728_v63 = vld [vmem:[#allocation75_spill] sm:$0xff]  ;;  %v15772_v11 = vld [vmem:[#allocation113_spill] sm:$0xff] }
 0x273   : > { %v11032_v28 = vadd.f32 %v919_v4, %v659_v26  ;;  %v11041_v6 = vadd.f32 %v918_v37, %v10887_v24  ;;  %v926_v33 = vmul.f32 %v10865_v38, %v10251_v43  ;;  %v929_v34 = vmul.f32 %v10865_v38, %v10254_v44  ;;  %2667 = vperm.xlu0 %8777, %v2557_v21   ;;  %v2565_v4 = vld [vmem:[#allocation2 + $0x172] sm:$0xff] }
 0x274   : > { %v928_v36 = vmul.f32 %v10865_v38, %v10257_v45  ;;  %v11050_v40 = vadd.f32 %v921_v15, %v10891_v12  ;;  %v11053_v42 = vadd.f32 %v920_v25, %v10895_v16  ;;  %v931_v26 = vmul.f32 %v10865_v38, %v10260_v46  ;;  %2662 = vperm.xlu1 %8778, %v2556_v32  }
 0x275   : > { %v930_v24 = vmul.f32 %v10865_v38, %v10263_v47  ;;  %v11062_v44 = vadd.f32 %v923_v5, %v10899_v31  ;;  %v11065_v45 = vadd.f32 %v922_v1, %v10903_v22  ;;  %v11068_v12 = vadd.f32 %v925_v2, %v10907_v19  ;;  %v11082_v3 = vpop.permute.xlu0 %2152  ;;  %v2564_v19 = vld [vmem:[#allocation2 + $0x16a] sm:$0xff] }
 0x276   : > { %v11059_v43 = vpop.permute.xlu1 %2137  ;;  %v933_v16 = vmul.f32 %v10865_v38, %v10266_v48  ;;  %v11073_v46 = vadd.f32 %v924_v29, %v10913_v9  ;;  %v11076_v47 = vadd.f32 %v927_v14, %v10917_v8  ;;  %v932_v31 = vmul.f32 %v10865_v38, %v10269_v49  ;;  %v15731_v5 = vld [vmem:[#allocation76_spill] sm:$0xff] }
 0x277   : > { %15727 = vst [vmem:[#allocation41_spill] sm:$0xff] %v11059_v43  ;;  %v935_v22 = vmul.f32 %v10865_v38, %v10272_v50  ;;  %v11085_v39 = vadd.f32 %v926_v33, %v10921_v7  ;;  %v11088_v48 = vadd.f32 %v929_v34, %v10925_v18  ;;  %v11091_v9 = vadd.f32 %v928_v36, %v10929_v10  ;;  %v2306_v10 = vld [vmem:[#allocation2 + $0x181] sm:$0xff]  ;;  %v15732_v1 = vld [vmem:[#allocation184_spill] sm:$0xff]  ;;  %v15738_v36 = vld [vmem:[#allocation81_spill] sm:$0xff] }
 0x278   : > { %v934_v8 = vmul.f32 %v10865_v38, %v10275_v51  ;;  %2707 = vperm.xlu0 %8777, %v2565_v4   ;;  %v11096_v49 = vadd.f32 %v931_v26, %v10933_v35  ;;  %v11099_v50 = vadd.f32 %v930_v24, %v10937_v62  ;;  %v937_v7 = vmul.f32 %v10865_v38, %v15728_v63  ;;  %v2047_v29 = vld [vmem:[#allocation2 + $0x188] sm:$0xff] }
 0x279   : > { %v936_v18 = vmul.f32 %v10865_v38, %v10281_v53  ;;  %v11108_v37 = vadd.f32 %v933_v16, %v10941_v13  ;;  %v939_v51 = vmul.f32 %v10865_v38, %v10284_v54  ;;  %v938_v35 = vmul.f32 %v10865_v38, %v10287_v55  ;;  %2702 = vperm.xlu1 %8778, %v2564_v19   ;;  %v15730_v53 = vld [vmem:[#allocation21_spill] sm:$0xff]  ;;  %v11127_v54 = vpop.permute.xlu0 %2162  ;;  %v15737_v33 = vld [vmem:[#allocation196_spill] sm:$0xff]  ;;  %v15739_v24 = vld [vmem:[#allocation27_spill] sm:$0xff] }
 0x27a   : > { %v11105_v15 = vpop.permute.xlu1 %2147  ;;  %v941_v62 = vmul.f32 %v10865_v38, %v10290_v56  ;;  %v11117_v25 = vadd.f32 %v932_v31, %v10947_v58  ;;  %v11120_v21 = vadd.f32 %v935_v22, %v15730_v53  ;;  %v940_v13 = vmul.f32 %v10865_v38, %v15731_v5  ;;  %v15734_v55 = vld [vmem:[#allocation25_spill] sm:$0xff]  ;;  %v15735_v56 = vld [vmem:[#allocation78_spill] sm:$0xff]  ;;  %v15736_v58 = vld [vmem:[#allocation79_spill] sm:$0xff] }
 0x27b   : > { %15729 = vst [vmem:[#allocation43_spill] sm:$0xff] %v11105_v15  ;;  %v11125_v2 = vsub.s32 4, %v15732_v1  ;;  %v11130_v14 = vadd.f32 %v934_v8, %v15734_v55  ;;  %v942_v32 = vmul.f32 %v10865_v38, %v15735_v56  ;;  %v1173_v34 = vmul.f32 %v15737_v33, %v15736_v58  ;;  %v15740_v16 = vld [vmem:[#allocation31_spill] sm:$0xff]  ;;  %v15741_v22 = vld [vmem:[#allocation82_spill] sm:$0xff]  ;;  %v15743_v5 = vld [vmem:[#allocation33_spill] sm:$0xff] }
 0x27c   : > { %v1175_v26 = vmul.f32 %v15737_v33, %v15738_v36  ;;  %2452 = vperm.xlu0 %8777, %v2306_v10   ;;  %v11139_v4 = vadd.f32 %v937_v7, %v15739_v24  ;;  %v11142_v31 = vadd.f32 %v936_v18, %v15740_v16  ;;  %v1174_v19 = vmul.f32 %v15737_v33, %v15741_v22  ;;  %v15742_v8 = vld [vmem:[#allocation83_spill] sm:$0xff]  ;;  %v15746_v10 = vld [vmem:[#allocation84_spill] sm:$0xff]  ;;  %v15748_v24 = vld [vmem:[#allocation85_spill] sm:$0xff] }
 0x27d   : > { %15733 = vst [vmem:[#allocation45_spill] sm:$0xff] %v11125_v2  ;;  %v1177_v63 = vmul.f32 %v15737_v33, %v15742_v8  ;;  %v11151_v55 = vadd.f32 %v939_v51, %v15743_v5  ;;  %v15744_v56 = vld [vmem:[#allocation35_spill] sm:$0xff]  ;;  %v11157_v7 = vadd.f32 %v941_v62, %v10988_v59  ;;  %v1176_v18 = vmul.f32 %v15737_v33, %v15746_v10  ;;  %v15749_v22 = vld [vmem:[#allocation86_spill] sm:$0xff]  ;;  %v11172_v8 = vpop.permute.xlu0 %2172  ;;  %v2307_v59 = vld [vmem:[#allocation2 + $0x189] sm:$0xff] }
 0x27e   : > { %v11148_v53 = vpop.permute.xlu1 %2157  ;;  %v11154_v58 = vadd.f32 %v938_v35, %v15744_v56  ;;  %2197 = vperm.xlu1 %8778, %v2047_v29   ;;  %v11162_v36 = vadd.f32 %v940_v13, %v10992_v17  ;;  %v1179_v16 = vmul.f32 %v15737_v33, %v15748_v24  ;;  %v1178_v51 = vmul.f32 %v15737_v33, %v15749_v22  ;;  %v15752_v13 = vld [vmem:[#allocation87_spill] sm:$0xff]  ;;  %v15753_v56 = vld [vmem:[#allocation110_spill] sm:$0xff]  ;;  %v15754_v22 = vld [vmem:[#allocation88_spill] sm:$0xff] }
 0x27f   : > { %15745 = vst [vmem:[#allocation47_spill] sm:$0xff] %v11157_v7  ;;  %v11170_v35 = vrot.slane %v10845_v23, %v11125_v2  ;;  %15750 = vst [vmem:[#allocation51_spill] sm:$0xff] %v11172_v8  ;;  %v11175_v62 = vadd.f32 %v942_v32, %v11002_v41  ;;  %v1205_v29 = vadd.f32 %v1173_v34, %v11004_v20  ;;  %v15755_v41 = vld [vmem:[#allocation89_spill] sm:$0xff]  ;;  %v15777_v7 = vld [vmem:[#allocation146_spill] sm:$0xff] }
 0x280   : > { %15747 = vst [vmem:[#allocation49_spill] sm:$0xff] %v11162_v36  ;;  %v11179_v17 = vadd.f32 %v1175_v26, %v11012_v0  ;;  %v1181_v5 = vmul.f32 %v15737_v33, %v15752_v13  ;;  %2712 = vperm.xlu0 %8777, %v15753_v56   ;;  %v1206_v10 = vadd.f32 %v1174_v19, %v11014_v27  ;;  %v2048_v0 = vld [vmem:[#allocation2 + $0x198] sm:$0xff]  ;;  %v15757_v19 = vld [vmem:[#allocation91_spill] sm:$0xff] }
 0x281   : > { %15751 = vst [vmem:[#allocation53_spill] sm:$0xff] %v11175_v62  ;;  %v11186_v24 = vadd.f32 %v1177_v63, %v11022_v30  ;;  %v1180_v2 = vmul.f32 %v15737_v33, %v15754_v22  ;;  %v1183_v32 = vmul.f32 %v15737_v33, %v15755_v41  ;;  %v2990_v34 = vld [vmem:[#allocation3 + $0x1] sm:$0xff]  ;;  %v2991_v26 = vld [vmem:[#allocation3 + $0x9] sm:$0xff]  ;;  %v11195_v13 = vadd.f32 %v1176_v18, %v11030_v52  ;;  %v15760_v18 = vld [vmem:[#allocation20_spill] sm:$0xff] }
 0x282   : > { %v11192_v20 = vpop.permute.xlu1 %2167  ;;  %v15756_v56 = vld [vmem:[#allocation90_spill] sm:$0xff]  ;;  %v1185_v30 = vmul.f32 %v15737_v33, %v15757_v19  ;;  %v11202_v63 = vsub.s32 5, %v15732_v1  ;;  %2457 = vperm.xlu1 %8778, %v2307_v59   ;;  %v11205_v22 = vadd.f32 %v1179_v16, %v11032_v28  ;;  %v11208_v41 = vadd.f32 %v1178_v51, %v11041_v6  ;;  %v15764_v51 = vld [vmem:[#allocation93_spill] sm:$0xff] }
 0x283   : > { %v1182_v27 = vmul.f32 %v15737_v33, %v15756_v56  ;;  %v1184_v52 = vmul.f32 %v15737_v33, %v15759_v61  ;;  %v1434_v38 = vmul.f32 %v11010_v60, %v15760_v18  ;;  %v11214_v56 = vpop.permute.xlu0 %2182  ;;  %v11217_v19 = vadd.f32 %v1181_v5, %v11050_v40  ;;  %v15765_v18 = vld [vmem:[#allocation106_spill] sm:$0xff]  ;;  %v15773_v15 = vld [vmem:[#allocation149_spill] sm:$0xff] }
 0x284   : > { %15758 = vst [vmem:[#allocation55_spill] sm:$0xff] %v11202_v63  ;;  %15761 = vst [vmem:[#allocation57_spill] sm:$0xff] %v11214_v56  ;;  %v11220_v62 = vsub.s32 6, %v15732_v1  ;;  %2202 = vperm.xlu0 %8777, %v2048_v0   ;;  %v8779_v28 = vpack.i.bf16 %v2991_v26, %v2990_v34  ;;  %v11223_v16 = vsub.s32 7, %v15732_v1  ;;  %v11226_v6 = vadd.f32 %v1180_v2, %v11053_v42  ;;  %v15767_v26 = vld [vmem:[#allocation117_spill] sm:$0xff]  ;;  %v15768_v2 = vld [vmem:[#allocation114_spill] sm:$0xff] }
 0x285   : > { %v11229_v61 = vadd.f32 %v1183_v32, %v11062_v44  ;;  %v1187_v59 = vmul.f32 %v15737_v33, %v15764_v51  ;;  %v1433_v40 = vmul.f32 %v11010_v60, %v15765_v18  ;;  %v11238_v0 = vadd.f32 %v1182_v27, %v11065_v45  ;;  %v15769_v51 = vld [vmem:[#allocation94_spill] sm:$0xff]  ;;  %v15770_v45 = vld [vmem:[#allocation95_spill] sm:$0xff]  ;;  %v15778_v8 = vld [vmem:[#allocation181_spill] sm:$0xff] }
 0x286   : > { %15762 = vst [vmem:[#allocation73_spill] sm:$0xff] %v11220_v62  ;;  %15763 = vst [vmem:[#allocation59_spill] sm:$0xff] %v11223_v16  ;;  %v11235_v5 = vpop.permute.xlu1 %2177  ;;  %v11241_v34 = vadd.f32 %v1185_v30, %v11068_v12  ;;  %v1694_v42 = vmul.f32 %v11170_v35, %v15767_v26  ;;  %v11247_v44 = vrot.slane %v10845_v23, %v11202_v63  ;;  %2717 = vperm.xlu1 %8778, %v15768_v2   ;;  %v2049_v1 = vld [vmem:[#allocation2 + $0x1a0] sm:$0xff]  ;;  %v3022_v26 = vld [vmem:[#allocation3 + $0x2] sm:$0xff] }
 0x287   : > { %15766 = vst [vmem:[#allocation61_spill] sm:$0xff] %v11235_v5  ;;  %v11251_v32 = vadd.f32 %v1184_v52, %v11073_v46  ;;  %v1186_v18 = vmul.f32 %v15737_v33, %v15769_v51  ;;  %v1189_v27 = vmul.f32 %v15737_v33, %v15770_v45  ;;  %v1466_v12 = vadd.f32 %v1434_v38, %v1206_v10  ;;  %v11257_v30 = vpop.permute.xlu0 %2192  ;;  %v3023_v56 = vld [vmem:[#allocation3 + $0xa] sm:$0xff]  ;;  %v15774_v52 = vld [vmem:[#allocation96_spill] sm:$0xff]  ;;  %v15775_v51 = vld [vmem:[#allocation97_spill] sm:$0xff] }
 0x288   : > { %15771 = vst [vmem:[#allocation63_spill] sm:$0xff] %v11257_v30  ;;  %v1693_v63 = vmul.f32 %v11170_v35, %v15772_v11  ;;  %v1954_v2 = vmul.f32 %v11247_v44, %v15773_v15  ;;  %v11265_v46 = vrot.slane %v10845_v23, %v11220_v62  ;;  %8780 = vrot.lane.b32.xlu0 %v8779_v28, %s9579_s29  ;;  %v2308_v62 = vld [vmem:[#allocation2 + $0x199] sm:$0xff] }
 0x289   : > { %v11270_v38 = vrot.slane %v10845_v23, %v11223_v16  ;;  %v11273_v10 = vadd.f32 %v1187_v59, %v11076_v47  ;;  %v1188_v11 = vmul.f32 %v15737_v33, %v15774_v52  ;;  %v1191_v15 = vmul.f32 %v15737_v33, %v15775_v51  ;;  %v15780_v51 = vld [vmem:[#allocation107_spill] sm:$0xff] }
 0x28a   : > { %v1465_v45 = vadd.f32 %v1433_v40, %v1205_v29  ;;  %v11279_v30 = vpop.permute.xlu1 %2187  ;;  %v1726_v36 = vadd.f32 %v1694_v42, %v1466_v12  ;;  %v1953_v28 = vmul.f32 %v11247_v44, %v15777_v7  ;;  %v2215_v23 = vmul.f32 %v11265_v46, %v15778_v8  ;;  %2207 = vperm.xlu1 %8778, %v2049_v1   ;;  %v15781_v40 = vld [vmem:[#allocation24_spill] sm:$0xff] }
 0x28b   : > { %15776 = vst [vmem:[#allocation65_spill] sm:$0xff] %v11279_v30  ;;  %v8784_v47 = vpack.i.bf16 %v3023_v56, %v3022_v26  ;;  %v11286_v59 = vadd.f32 %v1186_v18, %v11085_v39  ;;  %v11289_v52 = vadd.f32 %v1189_v27, %v11088_v48  ;;  %v1435_v29 = vmul.f32 %v11010_v60, %v15780_v51  ;;  %v2318_v12 = vpop.permute.xlu0 %2317  ;;  %v15782_v30 = vld [vmem:[#allocation178_spill] sm:$0xff]  ;;  %v15785_v27 = vld [vmem:[#allocation119_spill] sm:$0xff] }
 0x28c   : > { %v1436_v42 = vmul.f32 %v11010_v60, %v15781_v40  ;;  %v1725_v16 = vadd.f32 %v1693_v63, %v1465_v45  ;;  %v1986_v7 = vadd.f32 %v1954_v2, %v1726_v36  ;;  %v2214_v8 = vmul.f32 %v11265_v46, %v15782_v30  ;;  %2462 = vperm.xlu0 %8777, %v2308_v62   ;;  %v15784_v56 = vld [vmem:[#allocation98_spill] sm:$0xff]  ;;  %v11313_v30 = vld [vmem:[%s15186_s1 + $0x8] ss:$0 sm:$0xff] }
 0x28d   : > { %15779 = vst [vmem:[#allocation67_spill] sm:$0xff] %v11289_v52  ;;  %v2475_v1 = vmul.f32 %v11270_v38, %v2318_v12  ;;  %v11299_v39 = vadd.f32 %v1188_v11, %v11091_v9  ;;  %v11302_v48 = vadd.f32 %v1191_v15, %v11096_v49  ;;  %v11306_v18 = vmul.f32 %v15737_v33, %v15784_v56  ;;  %v15786_v11 = vld [vmem:[#allocation116_spill] sm:$0xff]  ;;  %v15787_v45 = vld [vmem:[#allocation151_spill] sm:$0xff] }
 0x28e   : > { %v1696_v63 = vmul.f32 %v11170_v35, %v15785_v27  ;;  %v2313_v36 = vpop.permute.xlu1 %2312  ;;  %v1985_v62 = vadd.f32 %v1953_v28, %v1725_v16  ;;  %v2247_v26 = vadd.f32 %v2215_v23, %v1986_v7  ;;  %8785 = vrot.lane.b32.xlu1 %v8784_v47, %s9580_s15  ;;  %v1467_v49 = vadd.f32 %v1435_v29, %v11179_v17  ;;  %v2309_v12 = vld [vmem:[#allocation2 + $0x1a1] sm:$0xff]  ;;  %v15789_v17 = vld [vmem:[#allocation22_spill] sm:$0xff]  ;;  %v15791_v7 = vld [vmem:[#allocation28_spill] sm:$0xff] }
 0x28f   : > { %15783 = vst [vmem:[#allocation68_spill] sm:$0xff] %v11302_v48  ;;  %v2474_v9 = vmul.f32 %v11270_v38, %v2313_v36  ;;  %v1468_v2 = vadd.f32 %v1436_v42, %v11195_v13  ;;  %v1695_v15 = vmul.f32 %v11170_v35, %v15786_v11  ;;  %v1956_v51 = vmul.f32 %v11247_v44, %v15787_v45  ;;  %v2578_v40 = vpop.permute.xlu0 %2577  ;;  %v15790_v29 = vld [vmem:[#allocation26_spill] sm:$0xff]  ;;  %v15792_v36 = vld [vmem:[#allocation148_spill] sm:$0xff] }
 0x290   : > { %v15788_v16 = vmov 0.0   ;;  %v1437_v13 = vmul.f32 %v11010_v60, %v15789_v17  ;;  %v2246_v28 = vadd.f32 %v2214_v8, %v1985_v62  ;;  %v2507_v23 = vadd.f32 %v2475_v1, %v2247_v26  ;;  %v11355_v45 = vld [vmem:[%s15187_s2] ss:$0 sm:$0xff]  ;;  %v15793_v1 = vld [vmem:[#allocation183_spill] sm:$0xff] }
 0x291   : > { %4844 = vst.msk [vmem:[#allocation5] sm:$0xff] %vm4175_vm4, %v15788_v16  ;;  %4847 = vst.msk [vmem:[#allocation5 + $0x10] sm:$0xff] %vm4175_vm4, %v15788_v16  ;;  %v2735_v47 = vmul.f32 %v11313_v30, %v2578_v40  ;;  %v1439_v42 = vmul.f32 %v11010_v60, %v15790_v29  ;;  %v1438_v56 = vmul.f32 %v11010_v60, %v15791_v7  ;;  %v9459_v8 = vld [vmem:[%s15188_s3] sm:$0xff]   ;;  %v15794_v7 = vld [vmem:[#allocation180_spill] sm:$0xff]  ;;  %v15795_v52 = vmov 0  }
 0x292   : > { %4849 = vst.msk [vmem:[#allocation5 + $0x20] sm:$0xff] %vm4175_vm4, %v15788_v16  ;;  %4851 = vst.msk [vmem:[#allocation5 + $0x30] sm:$0xff] %vm4175_vm4, %v15788_v16  ;;  %v1728_v27 = vadd.f32 %v1696_v63, %v1468_v2  ;;  %v1955_v11 = vmul.f32 %v11247_v44, %v15792_v36  ;;  %v2573_v17 = vpop.permute.xlu1 %2572  ;;  %v2217_v62 = vmul.f32 %v11265_v46, %v15793_v1  ;;  %2467 = vperm.xlu1 %8778, %v2309_v12  }
 0x293   : > { %4853 = vst.msk [vmem:[#allocation5 + $0x40] sm:$0xff] %vm4175_vm4, %v15788_v16  ;;  %4855 = vst.msk [vmem:[#allocation5 + $0x50] sm:$0xff] %vm4175_vm4, %v15788_v16  ;;  %v2506_v26 = vadd.f32 %v2474_v9, %v2246_v28  ;;  %v2767_v40 = vadd.f32 %v2735_v47, %v2507_v23  ;;  %v2734_v63 = vmul.f32 %v11313_v30, %v2573_v17  ;;  %4533 = vmatpush1.bf16.msra.mxu0 %v9459_v8  ;;  %v9460_v23 = vld [vmem:[%s15188_s3 + $0x8] sm:$0xff]  }
 0x294   : > { %4857 = vst.msk [vmem:[#allocation5 + $0x60] sm:$0xff] %vm4175_vm4, %v15788_v16  ;;  %4859 = vst.msk [vmem:[#allocation5 + $0x70] sm:$0xff] %vm4175_vm4, %v15788_v16  ;;  %v1727_v2 = vadd.f32 %v1695_v15, %v1467_v49  ;;  %v1988_v29 = vadd.f32 %v1956_v51, %v1728_v27  ;;  %v2216_v36 = vmul.f32 %v11265_v46, %v15794_v7  ;;  %8718 = vmatpush1.bf16.msra.mxu1 %v9459_v8  ;;  %v15796_v15 = vld [vmem:[#allocation121_spill] sm:$0xff] }
 0x295   : > { %4861 = vst.msk [vmem:[#allocation5 + $0x80] sm:$0xff] %vm4175_vm4, %v15788_v16  ;;  %4863 = vst.msk [vmem:[#allocation5 + $0x90] sm:$0xff] %vm4175_vm4, %v15788_v16  ;;  %v2328_v16 = vpop.permute.xlu0 %2327  ;;  %v2806_v48 = vadd.f32 %v11355_v45, %v2767_v40  ;;  %v2766_v5 = vadd.f32 %v2734_v63, %v2506_v26  ;;  %4534 = vmatprep.subr.bf16.mxu0 %v15795_v52  ;;  %8710 = vmatprep.subr.bf16.mxu1 %v15795_v52  ;;  %v15800_v26 = vld [vmem:[#allocation32_spill] sm:$0xff] }
 0x296   : > { %v2477_v43 = vmul.f32 %v11270_v38, %v2328_v16  ;;  %v1469_v9 = vadd.f32 %v1437_v13, %v11186_v24  ;;  %v11371_v49 = vadd.f32 %v1439_v42, %v11205_v22  ;;  %v1698_v51 = vmul.f32 %v11170_v35, %v15796_v15  ;;  %v2323_v28 = vpop.permute.xlu1 %2322  ;;  %v15797_v13 = vld [vmem:[#allocation118_spill] sm:$0xff]  ;;  %v15798_v42 = vld [vmem:[#allocation153_spill] sm:$0xff] }
 0x297   : > { %v1987_v12 = vadd.f32 %v1955_v11, %v1727_v2  ;;  %v2249_v47 = vadd.f32 %v2217_v62, %v1988_v29  ;;  %v2838_v16 = vmax.f32 %v2806_v48, 0.0  ;;  %v2805_v27 = vadd.f32 %v11355_v45, %v2766_v5  ;;  %4535 = vmatpush1.bf16.msra.mxu0 %v9460_v23  ;;  %v15801_v2 = vld [vmem:[#allocation150_spill] sm:$0xff] }
 0x298   : > { %v2476_v17 = vmul.f32 %v11270_v38, %v2323_v28  ;;  %v1470_v24 = vadd.f32 %v1438_v56, %v11208_v41  ;;  %v1697_v22 = vmul.f32 %v11170_v35, %v15797_v13  ;;  %v1958_v8 = vmul.f32 %v11247_v44, %v15798_v42  ;;  %8719 = vmatpush1.bf16.msra.mxu1 %v9460_v23  ;;  %v15799_v41 = vld [vmem:[#allocation30_spill] sm:$0xff] }
 0x299   : > { %v2588_v11 = vpop.permute.xlu0 %2587  ;;  %v2248_v1 = vadd.f32 %v2216_v36, %v1987_v12  ;;  %2927 = vst.msk [vmem:[#allocation3 + $0x21] sm:$0xff] %vm2869_vm2, %v2838_v16  ;;  %v2837_v62 = vmax.f32 %v2805_v27, 0.0  ;;  %v2509_v48 = vadd.f32 %v2477_v43, %v2249_v47  ;;  %4536 = vmatprep.subr.bf16.mxu0 %v15795_v52  ;;  %8711 = vmatprep.subr.bf16.mxu1 %v15795_v52  ;;  %v9461_v43 = vld [vmem:[%s15188_s3 + $0x10] sm:$0xff]   ;;  %v15802_v36 = vld [vmem:[#allocation186_spill] sm:$0xff] }
 0x29a   : > { %v2737_v5 = vmul.f32 %v11313_v30, %v2588_v11  ;;  %v1441_v56 = vmul.f32 %v11010_v60, %v15799_v41  ;;  %v1440_v40 = vmul.f32 %v11010_v60, %v15800_v26  ;;  %v1730_v63 = vadd.f32 %v1698_v51, %v1470_v24  ;;  %v2583_v7 = vpop.permute.xlu1 %2582  ;;  %v15803_v51 = vld [vmem:[#allocation182_spill] sm:$0xff] }
 0x29b   : > { %v1957_v29 = vmul.f32 %v11247_v44, %v15801_v2  ;;  %v2219_v15 = vmul.f32 %v11265_v46, %v15802_v36  ;;  %2926 = vst.msk [vmem:[#allocation3 + $0x19] sm:$0xff] %vm2869_vm2, %v2837_v62  ;;  %v2508_v12 = vadd.f32 %v2476_v17, %v2248_v1  ;;  %v2736_v23 = vmul.f32 %v11313_v30, %v2583_v7  ;;  %v15805_v2 = vld [vmem:[#allocation120_spill] sm:$0xff] }
 0x29c   : > { %v2769_v28 = vadd.f32 %v2737_v5, %v2509_v48  ;;  %v1729_v47 = vadd.f32 %v1697_v22, %v1469_v9  ;;  %v1990_v16 = vadd.f32 %v1958_v8, %v1730_v63  ;;  %v2218_v27 = vmul.f32 %v11265_v46, %v15803_v51  ;;  %4537 = vmatpush1.bf16.msra.mxu0 %v9461_v43  ;;  %v15804_v22 = vld [vmem:[#allocation123_spill] sm:$0xff]  ;;  %v9462_v48 = vld [vmem:[%s15188_s3 + $0x18] sm:$0xff]  }
 0x29d   : > { %v2338_v24 = vpop.permute.xlu0 %2337  ;;  %8720 = vmatpush1.bf16.msra.mxu1 %v9461_v43  ;;  %v2768_v42 = vadd.f32 %v2736_v23, %v2508_v12  ;;  %4538 = vmatprep.subr.bf16.mxu0 %v15795_v52  ;;  %v11409_v17 = vadd.f32 %v1441_v56, %v11217_v19  ;;  %v1472_v9 = vadd.f32 %v1440_v40, %v11226_v6  ;;  %v15806_v56 = vld [vmem:[#allocation155_spill] sm:$0xff]  ;;  %v15809_v51 = vld [vmem:[#allocation189_spill] sm:$0xff] }
 0x29e   : > { %v2808_v13 = vadd.f32 %v11355_v45, %v2769_v28  ;;  %v2479_v11 = vmul.f32 %v11270_v38, %v2338_v24  ;;  %8712 = vmatprep.subr.bf16.mxu1 %v15795_v52  ;;  %v1700_v8 = vmul.f32 %v11170_v35, %v15804_v22  ;;  %v1989_v1 = vadd.f32 %v1957_v29, %v1729_v47  ;;  %v2333_v62 = vpop.permute.xlu1 %2332  ;;  %v15807_v29 = vld [vmem:[#allocation36_spill] sm:$0xff] }
 0x29f   : > { %v2251_v5 = vadd.f32 %v2219_v15, %v1990_v16  ;;  %v2807_v26 = vadd.f32 %v11355_v45, %v2768_v42  ;;  %v2478_v63 = vmul.f32 %v11270_v38, %v2333_v62  ;;  %v1699_v19 = vmul.f32 %v11170_v35, %v15805_v2  ;;  %v15808_v47 = vld [vmem:[#allocation152_spill] sm:$0xff]  ;;  %v15811_v2 = vld [vmem:[#allocation185_spill] sm:$0xff] }
 0x2a0   : > { %v2840_v41 = vmax.f32 %v2808_v13, 0.0  ;;  %v1960_v6 = vmul.f32 %v11247_v44, %v15806_v56  ;;  %v2250_v40 = vadd.f32 %v2218_v27, %v1989_v1  ;;  %4539 = vmatpush1.bf16.msra.mxu0 %v9462_v48  ;;  %v1442_v43 = vmul.f32 %v11010_v60, %v15807_v29  ;;  %v3087_v28 = vld [vmem:[#allocation3 + $0x21] sm:$0xff] }
 0x2a1   : > { %v2598_v7 = vpop.permute.xlu0 %2597  ;;  %8721 = vmatpush1.bf16.msra.mxu1 %v9462_v48  ;;  %v2839_v36 = vmax.f32 %v2807_v26, 0.0  ;;  %v2511_v15 = vadd.f32 %v2479_v11, %v2251_v5  ;;  %4540 = vmatprep.subr.bf16.mxu0 %v15795_v52  ;;  %v1732_v23 = vadd.f32 %v1700_v8, %v1472_v9  ;;  %v1959_v16 = vmul.f32 %v11247_v44, %v15808_v47  ;;  %v9463_v9 = vld [vmem:[%s15188_s3 + $0x20] sm:$0xff]   ;;  %v9464_v47 = vld [vmem:[%s15188_s3 + $0x28] sm:$0xff]  }
 0x2a2   : > { %2929 = vst.msk [vmem:[#allocation3 + $0x39] sm:$0xff] %vm2869_vm2, %v2840_v41  ;;  %v2739_v12 = vmul.f32 %v11313_v30, %v2598_v7  ;;  %8713 = vmatprep.subr.bf16.mxu1 %v15795_v52  ;;  %v2221_v27 = vmul.f32 %v11265_v46, %v15809_v51  ;;  %v2510_v24 = vadd.f32 %v2478_v63, %v2250_v40  ;;  %v2593_v13 = vpop.permute.xlu1 %2592  ;;  %v3086_v42 = vld [vmem:[#allocation3 + $0x19] sm:$0xff]  ;;  %v15810_v41 = vld [vmem:[#allocation125_spill] sm:$0xff] }
 0x2a3   : > { %v3054_v22 = vld [vmem:[#allocation3 + $0x18] sm:$0xff]  ;;  %v3055_v1 = vld [vmem:[#allocation3 + $0x20] sm:$0xff]  ;;  %2928 = vst.msk [vmem:[#allocation3 + $0x31] sm:$0xff] %vm2869_vm2, %v2839_v36  ;;  %v2738_v62 = vmul.f32 %v11313_v30, %v2593_v13  ;;  %v11435_v48 = vpack.i.bf16 %v3087_v28, %v3086_v42  ;;  %v1731_v8 = vadd.f32 %v1699_v19, %v11371_v49  ;;  %v1702_v26 = vmul.f32 %v11170_v35, %v15810_v41  ;;  %v15812_v49 = vld [vmem:[#allocation34_spill] sm:$0xff] }
 0x2a4   : > { %v2771_v11 = vadd.f32 %v2739_v12, %v2511_v15  ;;  %v8789_v5 = vpack.i.bf16 %v3055_v1, %v3054_v22  ;;  %v1992_v63 = vadd.f32 %v1960_v6, %v1732_v23  ;;  %v2220_v56 = vmul.f32 %v11265_v46, %v15811_v2  ;;  %v2569_v28 = vld [vmem:[#allocation2 + $0x1a2] sm:$0xff]  ;;  %v2568_v23 = vld [vmem:[#allocation2 + $0x19a] sm:$0xff]  ;;  %4541 = vmatpush1.bf16.msra.mxu0 %v9463_v9  ;;  %v3118_v22 = vld [vmem:[#allocation3 + $0x1a] sm:$0xff] }
 0x2a5   : > { %v2348_v40 = vpop.permute.xlu0 %2347  ;;  %v2770_v29 = vadd.f32 %v2738_v62, %v2510_v24  ;;  %8795 = vrot.lane.b32.xlu1 %v11435_v48, %s9581_s18  ;;  %v11452_v19 = vmul.f32 %v11010_v60, %v15812_v49  ;;  %v1474_v6 = vadd.f32 %v1442_v43, %v11238_v0  ;;  %v1991_v15 = vadd.f32 %v1959_v16, %v1731_v8  ;;  %v15813_v0 = vld [vmem:[#allocation122_spill] sm:$0xff]  ;;  %v15814_v1 = vld [vmem:[#allocation157_spill] sm:$0xff] }
 0x2a6   : > { %v2810_v7 = vadd.f32 %v11355_v45, %v2771_v11  ;;  %v2481_v36 = vmul.f32 %v11270_v38, %v2348_v40  ;;  %8790 = vrot.lane.b32.xlu0 %v8789_v5, %s9582_s22  ;;  %v2343_v12 = vpop.permute.xlu1 %2342  ;;  %8722 = vmatpush1.bf16.msra.mxu1 %v9463_v9  ;;  %v2253_v51 = vadd.f32 %v2221_v27, %v1992_v63  ;;  %v15815_v27 = vld [vmem:[#allocation154_spill] sm:$0xff] }
 0x2a7   : > { %v2809_v13 = vadd.f32 %v11355_v45, %v2770_v29  ;;  %v2480_v42 = vmul.f32 %v11270_v38, %v2343_v12  ;;  %4542 = vmatprep.subr.bf16.mxu0 %v15795_v52  ;;  %8714 = vmatprep.subr.bf16.mxu1 %v15795_v52  ;;  %v1701_v43 = vmul.f32 %v11170_v35, %v15813_v0  ;;  %v3119_v2 = vld [vmem:[#allocation3 + $0x22] sm:$0xff]  ;;  %v15818_v0 = vld [vmem:[#allocation188_spill] sm:$0xff] }
 0x2a8   : > { %v2842_v24 = vmax.f32 %v2810_v7, 0.0  ;;  %v1734_v16 = vadd.f32 %v1702_v26, %v1474_v6  ;;  %v1962_v11 = vmul.f32 %v11247_v44, %v15814_v1  ;;  %v2252_v62 = vadd.f32 %v2220_v56, %v1991_v15  ;;  %v15816_v26 = vld [vmem:[#allocation194_spill] sm:$0xff]  ;;  %4543 = vmatpush1.bf16.msra.mxu0 %v9464_v47 }
 0x2a9   : > { %v2608_v5 = vpop.permute.xlu0 %2607  ;;  %v1961_v9 = vmul.f32 %v11247_v44, %v15815_v27  ;;  %v2841_v8 = vmax.f32 %v2809_v13, 0.0  ;;  %v2513_v41 = vadd.f32 %v2481_v36, %v2253_v51  ;;  %2727 = vperm.xlu1 %8778, %v2569_v28   ;;  %v11470_v40 = vld [vmem:[#allocation3 + $0x3a] sm:$0xff]  ;;  %v2223_v7 = vmul.f32 %v11265_v46, %v15816_v26  ;;  %4544 = vmatprep.subr.bf16.mxu0 %v15795_v52  ;;  %v9466_v26 = vld [vmem:[%s15188_s3 + $0x38] sm:$0xff]  }
 0x2aa   : > { %2931 = vst.msk [vmem:[#allocation3 + $0x51] sm:$0xff] %vm2869_vm2, %v2842_v24  ;;  %v2741_v63 = vmul.f32 %v11313_v30, %v2608_v5  ;;  %2722 = vperm.xlu0 %8777, %v2568_v23   ;;  %v2512_v29 = vadd.f32 %v2480_v42, %v2252_v62  ;;  %v2603_v56 = vpop.permute.xlu1 %2602  ;;  %v11474_v49 = vpack.i.bf16 %v3119_v2, %v3118_v22  ;;  %v11476_v6 = vld [vmem:[#allocation3 + $0x32] sm:$0xff]  ;;  %v9465_v24 = vld [vmem:[%s15188_s3 + $0x30] sm:$0xff]  }
 0x2ab   : > { %v3151_v15 = vld [vmem:[#allocation3 + $0x30] sm:$0xff]  ;;  %v3152_v12 = vld [vmem:[#allocation3 + $0x38] sm:$0xff]  ;;  %8723 = vmatpush1.bf16.msra.mxu1 %v9464_v47  ;;  %2930 = vst.msk [vmem:[#allocation3 + $0x49] sm:$0xff] %vm2869_vm2, %v2841_v8  ;;  %v2740_v28 = vmul.f32 %v11313_v30, %v2603_v56  ;;  %v4374_v23 = vpack.c.bf16 %v11470_v40, %v11476_v6  ;;  %v1733_v47 = vadd.f32 %v1701_v43, %v11409_v17 }
 0x2ac   : > { %v2773_v36 = vadd.f32 %v2741_v63, %v2513_v41  ;;  %v11482_v51 = vpack.i.bf16 %v3152_v12, %v3151_v15  ;;  %v15817_v13 = vld [vmem:[#allocation40_spill] sm:$0xff]  ;;  %v1994_v22 = vadd.f32 %v1962_v11, %v1734_v16  ;;  %v2222_v1 = vmul.f32 %v11265_v46, %v15818_v0  ;;  %v3183_v5 = vld [vmem:[#allocation3 + $0x31] sm:$0xff]  ;;  %8715 = vmatprep.subr.bf16.mxu1 %v15795_v52 }
 0x2ad   : > { %v1444_v42 = vmul.f32 %v11010_v60, %v15817_v13  ;;  %v2358_v62 = vpop.permute.xlu0 %2357  ;;  %v2772_v8 = vadd.f32 %v2740_v28, %v2512_v29  ;;  %8603 = vmatprep.mubr.msk.bf16.mxu0 %vm2869_vm2, %v4374_v23  ;;  %v15819_v17 = vld [vmem:[#allocation127_spill] sm:$0xff]  ;;  %v1993_v16 = vadd.f32 %v1961_v9, %v1733_v47  ;;  %v3184_v2 = vld [vmem:[#allocation3 + $0x39] sm:$0xff]  ;;  %4545 = vmatpush1.bf16.msra.mxu0 %v9465_v24 }
 0x2ae   : > { %v2812_v27 = vadd.f32 %v11355_v45, %v2773_v36  ;;  %v2483_v41 = vmul.f32 %v11270_v38, %v2358_v62  ;;  %8800 = vrot.lane.b32.xlu0 %v11474_v49, %s9583_s27  ;;  %v1704_v43 = vmul.f32 %v11170_v35, %v15819_v17  ;;  %v2255_v11 = vadd.f32 %v2223_v7, %v1994_v22  ;;  %v2353_v63 = vpop.permute.xlu1 %2352  ;;  %v15820_v36 = vld [vmem:[#allocation124_spill] sm:$0xff]  ;;  %v15821_v23 = vld [vmem:[#allocation159_spill] sm:$0xff] }
 0x2af   : > { %8805 = vrot.lane.b32.xlu1 %v11482_v51, %s9584_s28  ;;  %v2811_v56 = vadd.f32 %v11355_v45, %v2772_v8  ;;  %v2482_v15 = vmul.f32 %v11270_v38, %v2353_v63  ;;  %v11508_v12 = vpack.i.bf16 %v3184_v2, %v3183_v5  ;;  %4546 = vmatprep.subr.bf16.mxu0 %v15795_v52 }
 0x2b0   : > { %v2844_v29 = vmax.f32 %v2812_v27, 0.0  ;;  %8724 = vmatpush1.bf16.msra.mxu1 %v9465_v24  ;;  %v1475_v9 = vadd.f32 %v11452_v19, %v11229_v61  ;;  %v1476_v7 = vadd.f32 %v1444_v42, %v11251_v32  ;;  %v1703_v28 = vmul.f32 %v11170_v35, %v15820_v36  ;;  %v15822_v61 = vld [vmem:[#allocation44_spill] sm:$0xff]  ;;  %v15824_v27 = vld [vmem:[#allocation18_spill] sm:$0xff] }
 0x2b1   : > { %v1964_v13 = vmul.f32 %v11247_v44, %v15821_v23  ;;  %v2618_v47 = vpop.permute.xlu0 %2617  ;;  %8716 = vmatprep.subr.bf16.mxu1 %v15795_v52  ;;  %v2254_v22 = vadd.f32 %v2222_v1, %v1993_v16  ;;  %v2843_v0 = vmax.f32 %v2811_v56, 0.0  ;;  %v2515_v62 = vadd.f32 %v2483_v41, %v2255_v11  ;;  %v15823_v42 = vld [vmem:[#allocation156_spill] sm:$0xff]  ;;  %4547 = vmatpush1.bf16.msra.mxu0 %v9466_v26 }
 0x2b2   : > { %2933 = vst.msk [vmem:[#allocation3 + $0x69] sm:$0xff] %vm2869_vm2, %v2844_v29  ;;  %v2743_v24 = vmul.f32 %v11313_v30, %v2618_v47  ;;  %8810 = vrot.lane.b32.xlu0 %v11508_v12, %s9585_s17  ;;  %v1446_v32 = vmul.f32 %v11010_v60, %v15822_v61  ;;  %v1736_v19 = vadd.f32 %v1704_v43, %v1476_v7  ;;  %v2613_v1 = vpop.permute.xlu1 %2612  ;;  %v11533_v11 = vld [vmem:[#allocation3 + $0x4a] sm:$0xff]  ;;  %v11535_v43 = vld [vmem:[#allocation3 + $0x52] sm:$0xff]  ;;  %v15825_v29 = vld [vmem:[#allocation193_spill] sm:$0xff] }
 0x2b3   : > { %v1963_v5 = vmul.f32 %v11247_v44, %v15823_v42  ;;  %8815 = vrot.lane.b32.xlu1 %v11435_v48, %s9579_s29  ;;  %v2225_v8 = vmul.f32 %v11265_v46, %v15824_v27  ;;  %2932 = vst.msk [vmem:[#allocation3 + $0x61] sm:$0xff] %vm2869_vm2, %v2843_v0  ;;  %v2514_v41 = vadd.f32 %v2482_v15, %v2254_v22  ;;  %v9467_v48 = vld [vmem:[%s15188_s3 + $0x40] sm:$0xff]  }
 0x2b4   : > { %v2775_v17 = vadd.f32 %v2743_v24, %v2515_v62  ;;  %v2742_v16 = vmul.f32 %v11313_v30, %v2613_v1  ;;  %4548 = vmatprep.subr.bf16.mxu0 %v15795_v52  ;;  %v1735_v63 = vadd.f32 %v1703_v28, %v1475_v9  ;;  %v1996_v2 = vadd.f32 %v1964_v13, %v1736_v19  ;;  %v15826_v9 = vld [vmem:[#allocation38_spill] sm:$0xff]  ;;  %v15827_v13 = vld [vmem:[#allocation129_spill] sm:$0xff] }
 0x2b5   : > { %v2224_v56 = vmul.f32 %v11265_v46, %v15825_v29  ;;  %v2368_v7 = vpop.permute.xlu0 %2367  ;;  %v4376_v15 = vpack.c.bf16 %v11535_v43, %v11533_v11  ;;  %8725 = vmatpush1.bf16.msra.mxu1 %v9466_v26  ;;  %v1445_v28 = vmul.f32 %v11010_v60, %v15826_v9  ;;  %v1706_v22 = vmul.f32 %v11170_v35, %v15827_v13  ;;  %v15828_v19 = vld [vmem:[#allocation126_spill] sm:$0xff]  ;;  %v15829_v1 = vld [vmem:[#allocation161_spill] sm:$0xff]  ;;  %v3186_v9 = vld [vmem:[#allocation3 + $0x51] sm:$0xff] }
 0x2b6   : > { %v2814_v36 = vadd.f32 %v11355_v45, %v2775_v17  ;;  %v2774_v23 = vadd.f32 %v2742_v16, %v2514_v41  ;;  %v2485_v47 = vmul.f32 %v11270_v38, %v2368_v7  ;;  %8820 = vrot.lane.b32.xlu0 %v11474_v49, %s9580_s15  ;;  %8717 = vmatprep.subr.bf16.mxu1 %v15795_v52  ;;  %v2363_v26 = vpop.permute.xlu1 %2362  ;;  %v3153_v41 = vld [vmem:[#allocation3 + $0x48] sm:$0xff]  ;;  %v3154_v17 = vld [vmem:[#allocation3 + $0x50] sm:$0xff] }
 0x2b7   : > { %v1995_v0 = vadd.f32 %v1963_v5, %v1735_v63  ;;  %8825 = vrot.lane.b32.xlu1 %v11482_v51, %s9582_s22  ;;  %4549 = vmatpush1.bf16.msra.mxu0 %v9467_v48  ;;  %v2257_v62 = vadd.f32 %v2225_v8, %v1996_v2  ;;  %v2484_v49 = vmul.f32 %v11270_v38, %v2363_v26  ;;  %v15830_v7 = vld [vmem:[#allocation158_spill] sm:$0xff] }
 0x2b8   : > { %v2846_v24 = vmax.f32 %v2814_v36, 0.0  ;;  %v2813_v61 = vadd.f32 %v11355_v45, %v2774_v23  ;;  %v1478_v52 = vadd.f32 %v1446_v32, %v11286_v59  ;;  %v1705_v42 = vmul.f32 %v11170_v35, %v15828_v19  ;;  %v3185_v32 = vld [vmem:[#allocation3 + $0x49] sm:$0xff] }
 0x2b9   : > { %v1966_v27 = vmul.f32 %v11247_v44, %v15829_v1  ;;  %v2628_v5 = vpop.permute.xlu0 %2627  ;;  %v8834_v51 = vpack.i.bf16 %v11470_v40, %v11476_v6  ;;  %8726 = vmatpush1.bf16.msra.mxu1 %v9467_v48  ;;  %v2256_v8 = vadd.f32 %v2224_v56, %v1995_v0  ;;  %v2517_v63 = vadd.f32 %v2485_v47, %v2257_v62  ;;  %v15831_v6 = vld [vmem:[#allocation29_spill] sm:$0xff]  ;;  %v15832_v0 = vld [vmem:[#allocation48_spill] sm:$0xff]  ;;  %v15834_v1 = vld [vmem:[#allocation99_spill] sm:$0xff] }
 0x2ba   : > { %2935 = vst.msk [vmem:[#allocation3 + $0x81] sm:$0xff] %vm2869_vm2, %v2846_v24  ;;  %v2845_v16 = vmax.f32 %v2813_v61, 0.0  ;;  %v2745_v59 = vmul.f32 %v11313_v30, %v2628_v5  ;;  %8830 = vrot.lane.b32.xlu0 %v11508_v12, %s9581_s18  ;;  %v1477_v2 = vadd.f32 %v1445_v28, %v11241_v34  ;;  %v1738_v29 = vadd.f32 %v1706_v22, %v1478_v52  ;;  %v2623_v56 = vpop.permute.xlu1 %2622  ;;  %v15833_v24 = vld [vmem:[#allocation16_spill] sm:$0xff] }
 0x2bb   : > { %v1965_v40 = vmul.f32 %v11247_v44, %v15830_v7  ;;  %v2227_v48 = vmul.f32 %v11265_v46, %v15831_v6  ;;  %8835 = vrot.lane.b32.xlu1 %v8834_v51, %s9583_s27  ;;  %v2516_v36 = vadd.f32 %v2484_v49, %v2256_v8  ;;  %v2744_v47 = vmul.f32 %v11313_v30, %v2623_v56  ;;  %v15838_v56 = vld [vmem:[#allocation128_spill] sm:$0xff] }
 0x2bc   : > { %2934 = vst.msk [vmem:[#allocation3 + $0x79] sm:$0xff] %vm2869_vm2, %v2845_v16  ;;  %v2777_v23 = vadd.f32 %v2745_v59, %v2517_v63  ;;  %v8839_v13 = vpack.i.bf16 %v3154_v17, %v3153_v41  ;;  %v1448_v34 = vmul.f32 %v11010_v60, %v15832_v0  ;;  %v1737_v28 = vadd.f32 %v1705_v42, %v1477_v2  ;;  %v15835_v41 = vld [vmem:[#allocation42_spill] sm:$0xff] }
 0x2bd   : > { %v1998_v22 = vadd.f32 %v1966_v27, %v1738_v29  ;;  %v2378_v26 = vpop.permute.xlu0 %2377  ;;  %v11579_v62 = vpack.i.bf16 %v3186_v9, %v3185_v32  ;;  %v2226_v61 = vmul.f32 %v11265_v46, %v15833_v24  ;;  %v2776_v19 = vadd.f32 %v2744_v47, %v2516_v36  ;;  %v15836_v27 = vld [vmem:[#allocation131_spill] sm:$0xff]  ;;  %v15837_v29 = vld [vmem:[#allocation100_spill] sm:$0xff] }
 0x2be   : > { %v2816_v52 = vadd.f32 %v11355_v45, %v2777_v23  ;;  %v2487_v49 = vmul.f32 %v11270_v38, %v2378_v26  ;;  %8840 = vrot.lane.b32.xlu0 %v8839_v13, %s9584_s28  ;;  %v1193_v5 = vmul.f32 %v15737_v33, %v15834_v1  ;;  %v1447_v42 = vmul.f32 %v11010_v60, %v15835_v41  ;;  %v2373_v16 = vpop.permute.xlu1 %2372  ;;  %v15839_v23 = vld [vmem:[#allocation163_spill] sm:$0xff] }
 0x2bf   : > { %v1708_v17 = vmul.f32 %v11170_v35, %v15836_v27  ;;  %v1997_v8 = vadd.f32 %v1965_v40, %v1737_v28  ;;  %8845 = vrot.lane.b32.xlu1 %v11579_v62, %s9585_s17  ;;  %v2259_v63 = vadd.f32 %v2227_v48, %v1998_v22  ;;  %v2815_v32 = vadd.f32 %v11355_v45, %v2776_v19 }
 0x2c0   : > { %v2848_v59 = vmax.f32 %v2816_v52, 0.0  ;;  %v2486_v2 = vmul.f32 %v11270_v38, %v2373_v16  ;;  %v1192_v7 = vmul.f32 %v15737_v33, %v15837_v29  ;;  %v1480_v6 = vadd.f32 %v1448_v34, %v11299_v39  ;;  %v15840_v34 = vld [vmem:[#allocation160_spill] sm:$0xff]  ;;  %v3156_v16 = vld [vmem:[#allocation3 + $0x68] sm:$0xff] }
 0x2c1   : > { %v1707_v36 = vmul.f32 %v11170_v35, %v15838_v56  ;;  %v1968_v40 = vmul.f32 %v11247_v44, %v15839_v23  ;;  %v2638_v47 = vpop.permute.xlu0 %2637  ;;  %v2258_v9 = vadd.f32 %v2226_v61, %v1997_v8  ;;  %v2847_v48 = vmax.f32 %v2815_v32, 0.0  ;;  %v3155_v8 = vld [vmem:[#allocation3 + $0x60] sm:$0xff]  ;;  %v15844_v56 = vld [vmem:[#allocation103_spill] sm:$0xff] }
 0x2c2   : > { %2937 = vst.msk [vmem:[#allocation3 + $0x99] sm:$0xff] %vm2869_vm2, %v2848_v59  ;;  %v2519_v0 = vadd.f32 %v2487_v49, %v2259_v63  ;;  %v2747_v28 = vmul.f32 %v11313_v30, %v2638_v47  ;;  %8850 = vrot.lane.b32.xlu0 %v11508_v12, %s9579_s29  ;;  %v1479_v22 = vadd.f32 %v1447_v42, %v11273_v10  ;;  %v2633_v61 = vpop.permute.xlu1 %2632  ;;  %v15842_v63 = vld [vmem:[#allocation101_spill] sm:$0xff]  ;;  %v15845_v23 = vld [vmem:[#allocation104_spill] sm:$0xff] }
 0x2c3   : > { %v1740_v39 = vadd.f32 %v1708_v17, %v1480_v6  ;;  %v1967_v26 = vmul.f32 %v11247_v44, %v15840_v34  ;;  %v2229_v24 = vmul.f32 %v11265_v46, %v11020_v57  ;;  %8855 = vrot.lane.b32.xlu1 %v8834_v51, %s9580_s15  ;;  %v11615_v52 = vadd.f32 %v11306_v18, %v11099_v50  ;;  %v15841_v51 = vld [vmem:[#allocation19_spill] sm:$0xff]  ;;  %v15846_v47 = vld [vmem:[#allocation60_spill] sm:$0xff] }
 0x2c4   : > { %2936 = vst.msk [vmem:[#allocation3 + $0x91] sm:$0xff] %vm2869_vm2, %v2847_v48  ;;  %v2518_v19 = vadd.f32 %v2486_v2, %v2258_v9  ;;  %v2779_v12 = vadd.f32 %v2747_v28, %v2519_v0  ;;  %v2746_v10 = vmul.f32 %v11313_v30, %v2633_v61  ;;  %v1225_v49 = vadd.f32 %v1193_v5, %v11108_v37  ;;  %v3187_v28 = vld [vmem:[#allocation3 + $0x61] sm:$0xff] }
 0x2c5   : > { %v11621_v1 = vadd.f32 %v1192_v7, %v11117_v25  ;;  %v1739_v41 = vadd.f32 %v1707_v36, %v1479_v22  ;;  %v2000_v57 = vadd.f32 %v1968_v40, %v1740_v39  ;;  %v2388_v42 = vpop.permute.xlu0 %2387  ;;  %v2228_v27 = vmul.f32 %v11265_v46, %v15841_v51  ;;  %v15843_v25 = vld [vmem:[#allocation102_spill] sm:$0xff] }
 0x2c6   : > { %v2818_v50 = vadd.f32 %v11355_v45, %v2779_v12  ;;  %v2778_v18 = vadd.f32 %v2746_v10, %v2518_v19  ;;  %v2489_v17 = vmul.f32 %v11270_v38, %v2388_v42  ;;  %8860 = vrot.lane.b32.xlu0 %v8839_v13, %s9582_s22  ;;  %v1195_v37 = vmul.f32 %v15737_v33, %v15842_v63  ;;  %v2383_v2 = vpop.permute.xlu1 %2382  ;;  %v15847_v19 = vld [vmem:[#allocation54_spill] sm:$0xff]  ;;  %v15848_v10 = vld [vmem:[#allocation137_spill] sm:$0xff] }
 0x2c7   : > { %v1194_v5 = vmul.f32 %v15737_v33, %v15843_v25  ;;  %v1999_v59 = vadd.f32 %v1967_v26, %v1739_v41  ;;  %v2261_v32 = vadd.f32 %v2229_v24, %v2000_v57  ;;  %8865 = vrot.lane.b32.xlu1 %v11579_v62, %s9581_s18  ;;  %v2488_v6 = vmul.f32 %v11270_v38, %v2383_v2  ;;  %v3188_v42 = vld [vmem:[#allocation3 + $0x69] sm:$0xff] }
 0x2c8   : > { %v2850_v29 = vmax.f32 %v2818_v50, 0.0  ;;  %v2817_v7 = vadd.f32 %v11355_v45, %v2778_v18  ;;  %v8869_v13 = vpack.i.bf16 %v11535_v43, %v11533_v11  ;;  %v1197_v36 = vmul.f32 %v15737_v33, %v15844_v56  ;;  %v15853_v56 = vld [vmem:[#allocation139_spill] sm:$0xff] }
 0x2c9   : > { %v1196_v40 = vmul.f32 %v15737_v33, %v15845_v23  ;;  %v1454_v9 = vmul.f32 %v11010_v60, %v15846_v47  ;;  %v2648_v48 = vpop.permute.xlu0 %2647  ;;  %v8874_v0 = vpack.i.bf16 %v3156_v16, %v3155_v8  ;;  %v2260_v22 = vadd.f32 %v2228_v27, %v1999_v59  ;;  %v15850_v16 = vld [vmem:[#allocation134_spill] sm:$0xff] }
 0x2ca   : > { %2939 = vst.msk [vmem:[#allocation3 + $0xb1] sm:$0xff] %vm2869_vm2, %v2850_v29  ;;  %v2849_v39 = vmax.f32 %v2817_v7, 0.0  ;;  %v2521_v34 = vadd.f32 %v2489_v17, %v2261_v32  ;;  %v2749_v26 = vmul.f32 %v11313_v30, %v2648_v48  ;;  %8870 = vrot.lane.b32.xlu0 %v8869_v13, %s9583_s27  ;;  %v1227_v24 = vadd.f32 %v1195_v37, %v11120_v21  ;;  %v2643_v57 = vpop.permute.xlu1 %2642  ;;  %v15849_v17 = vld [vmem:[#allocation64_spill] sm:$0xff]  ;;  %v15852_v29 = vld [vmem:[#allocation58_spill] sm:$0xff] }
 0x2cb   : > { %v1226_v61 = vadd.f32 %v1194_v5, %v11130_v14  ;;  %v1453_v12 = vmul.f32 %v11010_v60, %v15847_v19  ;;  %v1714_v41 = vmul.f32 %v11170_v35, %v15848_v10  ;;  %8875 = vrot.lane.b32.xlu1 %v8874_v0, %s9584_s28  ;;  %v2520_v51 = vadd.f32 %v2488_v6, %v2260_v22  ;;  %v15851_v5 = vld [vmem:[#allocation169_spill] sm:$0xff]  ;;  %v15854_v23 = vld [vmem:[#allocation166_spill] sm:$0xff]  ;;  %v15855_v22 = vld [vmem:[#allocation136_spill] sm:$0xff] }
 0x2cc   : > { %2938 = vst.msk [vmem:[#allocation3 + $0xa9] sm:$0xff] %vm2869_vm2, %v2849_v39  ;;  %v2781_v27 = vadd.f32 %v2749_v26, %v2521_v34  ;;  %v2748_v50 = vmul.f32 %v11313_v30, %v2643_v57  ;;  %v11656_v18 = vpack.i.bf16 %v3188_v42, %v3187_v28  ;;  %v11659_v21 = vadd.f32 %v1197_v36, %v11139_v4  ;;  %v15856_v34 = vld [vmem:[#allocation171_spill] sm:$0xff]  ;;  %v3124_v10 = vld [vmem:[#allocation3 + $0x62] sm:$0xff]  ;;  %v15857_v42 = vld [vmem:[#allocation168_spill] sm:$0xff] }
 0x2cd   : > { %v1486_v14 = vadd.f32 %v1454_v9, %v1226_v61  ;;  %v1456_v8 = vmul.f32 %v11010_v60, %v15849_v17  ;;  %v1713_v63 = vmul.f32 %v11170_v35, %v15850_v16  ;;  %v2418_v37 = vpop.permute.xlu0 %2417  ;;  %v1228_v25 = vadd.f32 %v1196_v40, %v11142_v31 }
 0x2ce   : > { %v1974_v59 = vmul.f32 %v11247_v44, %v15851_v5  ;;  %v2820_v32 = vadd.f32 %v11355_v45, %v2781_v27  ;;  %v2780_v2 = vadd.f32 %v2748_v50, %v2520_v51  ;;  %8880 = vrot.lane.b32.xlu0 %v11656_v18, %s9585_s17  ;;  %v1485_v4 = vadd.f32 %v1453_v12, %v1225_v49  ;;  %v2413_v31 = vpop.permute.xlu1 %2412  ;;  %v3157_v5 = vld [vmem:[#allocation3 + $0x78] sm:$0xff] }
 0x2cf   : > { %v1455_v7 = vmul.f32 %v11010_v60, %v15852_v29  ;;  %v1746_v6 = vadd.f32 %v1714_v41, %v1486_v14  ;;  %v1716_v36 = vmul.f32 %v11170_v35, %v15853_v56  ;;  %8885 = vrot.lane.b32.xlu1 %v11579_v62, %s9579_s29  ;;  %v1973_v40 = vmul.f32 %v11247_v44, %v15854_v23  ;;  %v3189_v29 = vld [vmem:[#allocation3 + $0x79] sm:$0xff] }
 0x2d0   : > { %v2235_v47 = vmul.f32 %v11265_v46, %v11148_v53  ;;  %v2852_v9 = vmax.f32 %v2820_v32, 0.0  ;;  %v2819_v49 = vadd.f32 %v11355_v45, %v2780_v2  ;;  %v1488_v48 = vadd.f32 %v1456_v8, %v1228_v25 }
 0x2d1   : > { %v1745_v28 = vadd.f32 %v1713_v63, %v1485_v4  ;;  %v1715_v39 = vmul.f32 %v11170_v35, %v15855_v22  ;;  %v1976_v26 = vmul.f32 %v11247_v44, %v15856_v34  ;;  %v2428_v61 = vpop.permute.xlu0 %2427  ;;  %v2006_v62 = vadd.f32 %v1974_v59, %v1746_v6 }
 0x2d2   : > { %v2234_v19 = vmul.f32 %v11265_v46, %v11082_v3  ;;  %2941 = vst.msk [vmem:[#allocation3 + $0xc9] sm:$0xff] %vm2869_vm2, %v2852_v9  ;;  %v2851_v12 = vmax.f32 %v2819_v49, 0.0  ;;  %v2495_v53 = vmul.f32 %v11270_v38, %v2418_v37  ;;  %8890 = vrot.lane.b32.xlu0 %v8869_v13, %s9580_s15  ;;  %v1487_v41 = vadd.f32 %v1455_v7, %v1227_v24  ;;  %v2423_v50 = vpop.permute.xlu1 %2422  ;;  %v15858_v3 = vld [vmem:[#allocation11_spill] sm:$0xff]  ;;  %v15859_v7 = vld [vmem:[#allocation12_spill] sm:$0xff]  ;;  %v3190_v9 = vld [vmem:[#allocation3 + $0x81] sm:$0xff] }
 0x2d3   : > { %v1748_v57 = vadd.f32 %v1716_v36, %v1488_v48  ;;  %v1975_v51 = vmul.f32 %v11247_v44, %v15857_v42  ;;  %v2237_v27 = vmul.f32 %v11265_v46, %v11192_v20  ;;  %8895 = vrot.lane.b32.xlu1 %v8874_v0, %s9582_s22  ;;  %v1199_v14 = vmul.f32 %v15737_v33, %v15858_v3  ;;  %v3125_v24 = vld [vmem:[#allocation3 + $0x6a] sm:$0xff]  ;;  %v3158_v0 = vld [vmem:[#allocation3 + $0x80] sm:$0xff] }
 0x2d4   : > { %v2005_v17 = vadd.f32 %v1973_v40, %v1745_v28  ;;  %v2267_v8 = vadd.f32 %v2235_v47, %v2006_v62  ;;  %2940 = vst.msk [vmem:[#allocation3 + $0xc1] sm:$0xff] %vm2869_vm2, %v2851_v12  ;;  %v2494_v13 = vmul.f32 %v11270_v38, %v2413_v31  ;;  %v1747_v16 = vadd.f32 %v1715_v39, %v1487_v41  ;;  %v15860_v28 = vld [vmem:[#allocation52_spill] sm:$0xff]  ;;  %v15862_v41 = vld [vmem:[#allocation133_spill] sm:$0xff] }
 0x2d5   : > { %v2008_v63 = vadd.f32 %v1976_v26, %v1748_v57  ;;  %v2236_v37 = vmul.f32 %v11265_v46, %v11127_v54  ;;  %v2678_v25 = vpop.permute.xlu0 %2677  ;;  %v8904_v20 = vpack.i.bf16 %v3125_v24, %v3124_v10  ;;  %v2497_v2 = vmul.f32 %v11270_v38, %v2428_v61  ;;  %v15861_v10 = vld [vmem:[#allocation46_spill] sm:$0xff] }
 0x2d6   : > { %v2266_v59 = vadd.f32 %v2234_v19, %v2005_v17  ;;  %v2527_v32 = vadd.f32 %v2495_v53, %v2267_v8  ;;  %v2755_v4 = vmul.f32 %v11313_v30, %v2678_v25  ;;  %8900 = vrot.lane.b32.xlu0 %v11656_v18, %s9581_s18  ;;  %v1198_v6 = vmul.f32 %v15737_v33, %v15859_v7  ;;  %v2673_v31 = vpop.permute.xlu1 %2672  ;;  %v15863_v17 = vld [vmem:[#allocation13_spill] sm:$0xff] }
 0x2d7   : > { %v2007_v56 = vadd.f32 %v1975_v51, %v1747_v16  ;;  %v2269_v36 = vadd.f32 %v2237_v27, %v2008_v63  ;;  %v2496_v54 = vmul.f32 %v11270_v38, %v2423_v50  ;;  %8905 = vrot.lane.b32.xlu1 %v8904_v20, %s9583_s27  ;;  %v2754_v47 = vmul.f32 %v11313_v30, %v2673_v31  ;;  %v15865_v16 = vld [vmem:[#allocation130_spill] sm:$0xff]  ;;  %v15866_v25 = vld [vmem:[#allocation165_spill] sm:$0xff] }
 0x2d8   : > { %v2526_v23 = vadd.f32 %v2494_v13, %v2266_v59  ;;  %v2787_v40 = vadd.f32 %v2755_v4, %v2527_v32  ;;  %v8909_v49 = vpack.i.bf16 %v3158_v0, %v3157_v5  ;;  %v11712_v48 = vadd.f32 %v1199_v14, %v11151_v55  ;;  %v15864_v13 = vld [vmem:[#allocation108_spill] sm:$0xff]  ;;  %v15869_v7 = vld [vmem:[#allocation141_spill] sm:$0xff] }
 0x2d9   : > { %v1450_v22 = vmul.f32 %v11010_v60, %v15860_v28  ;;  %v2268_v39 = vadd.f32 %v2236_v37, %v2007_v56  ;;  %v2688_v34 = vpop.permute.xlu0 %2687  ;;  %v11716_v26 = vpack.i.bf16 %v3190_v9, %v3189_v29  ;;  %v2529_v61 = vadd.f32 %v2497_v2, %v2269_v36  ;;  %v15868_v2 = vld [vmem:[#allocation62_spill] sm:$0xff]  ;;  %v15871_v31 = vld [vmem:[#allocation41_spill] sm:$0xff] }
 0x2da   : > { %v2826_v62 = vadd.f32 %v11355_v45, %v2787_v40  ;;  %v2786_v19 = vadd.f32 %v2754_v47, %v2526_v23  ;;  %v2757_v12 = vmul.f32 %v11313_v30, %v2688_v34  ;;  %8910 = vrot.lane.b32.xlu0 %v8909_v49, %s9584_s28  ;;  %v1230_v53 = vadd.f32 %v1198_v6, %v11154_v58  ;;  %v2683_v51 = vpop.permute.xlu1 %2682  ;;  %v15870_v36 = vld [vmem:[#allocation162_spill] sm:$0xff] }
 0x2db   : > { %v1449_v55 = vmul.f32 %v11010_v60, %v15861_v10  ;;  %v1710_v57 = vmul.f32 %v11170_v35, %v15862_v41  ;;  %v2528_v42 = vadd.f32 %v2496_v54, %v2268_v39  ;;  %8915 = vrot.lane.b32.xlu1 %v11716_v26, %s9585_s17  ;;  %v2756_v14 = vmul.f32 %v11313_v30, %v2683_v51  ;;  %v15872_v28 = vld [vmem:[#allocation138_spill] sm:$0xff]  ;;  %v15873_v39 = vld [vmem:[#allocation173_spill] sm:$0xff] }
 0x2dc   : > { %v2858_v27 = vmax.f32 %v2826_v62, 0.0  ;;  %v2825_v50 = vadd.f32 %v11355_v45, %v2786_v19  ;;  %v2789_v3 = vadd.f32 %v2757_v12, %v2529_v61  ;;  %v1201_v58 = vmul.f32 %v15737_v33, %v15863_v17  ;;  %v3126_v61 = vld [vmem:[#allocation3 + $0x7a] sm:$0xff] }
 0x2dd   : > { %v1482_v8 = vadd.f32 %v1450_v22, %v11615_v52  ;;  %v1458_v24 = vmul.f32 %v11010_v60, %v15864_v13  ;;  %v1709_v63 = vmul.f32 %v11170_v35, %v15865_v16  ;;  %v2398_v37 = vpop.permute.xlu0 %2397  ;;  %v1970_v5 = vmul.f32 %v11247_v44, %v15866_v25  ;;  %v15867_v52 = vld [vmem:[#allocation67_spill] sm:$0xff]  ;;  %v15874_v19 = vld [vmem:[#allocation37_spill] sm:$0xff] }
 0x2de   : > { %2947 = vst.msk [vmem:[#allocation3 + $0x111] sm:$0xff] %vm2869_vm2, %v2858_v27  ;;  %v2857_v0 = vmax.f32 %v2825_v50, 0.0  ;;  %v2828_v30 = vadd.f32 %v11355_v45, %v2789_v3  ;;  %v2788_v59 = vadd.f32 %v2756_v14, %v2528_v42  ;;  %8920 = vrot.lane.b32.xlu0 %v11656_v18, %s9579_s29  ;;  %v1481_v32 = vadd.f32 %v1449_v55, %v15867_v52  ;;  %v2393_v56 = vpop.permute.xlu1 %2392  ;;  %v15875_v42 = vld [vmem:[#allocation170_spill] sm:$0xff]  ;;  %v15876_v27 = vld [vmem:[#allocation61_spill] sm:$0xff]  ;;  %v15877_v16 = vld [vmem:[#allocation51_spill] sm:$0xff] }
 0x2df   : > { %v1457_v4 = vmul.f32 %v11010_v60, %v15868_v2  ;;  %v1742_v29 = vadd.f32 %v1710_v57, %v1482_v8  ;;  %v1718_v6 = vmul.f32 %v11170_v35, %v15869_v7  ;;  %8925 = vrot.lane.b32.xlu1 %v8904_v20, %s9580_s15  ;;  %v1969_v54 = vmul.f32 %v11247_v44, %v15870_v36  ;;  %v3127_v14 = vld [vmem:[#allocation3 + $0x82] sm:$0xff]  ;;  %v11779_v52 = vld [vmem:[%s15186_s1 + $0x8] ss:$0 sm:$0xff]  ;;  %v3192_v36 = vld [vmem:[#allocation3 + $0x99] sm:$0xff] }
 0x2e0   : > { %v2231_v23 = vmul.f32 %v11265_v46, %v15871_v31  ;;  %2946 = vst.msk [vmem:[#allocation3 + $0x109] sm:$0xff] %vm2869_vm2, %v2857_v0  ;;  %v2860_v18 = vmax.f32 %v2828_v30, 0.0  ;;  %v2827_v40 = vadd.f32 %v11355_v45, %v2788_v59  ;;  %v1490_v47 = vadd.f32 %v1458_v24, %v1230_v53  ;;  %v3159_v45 = vld [vmem:[#allocation3 + $0x90] sm:$0xff]  ;;  %v3160_v53 = vld [vmem:[#allocation3 + $0x98] sm:$0xff] }
 0x2e1   : > { %v1741_v9 = vadd.f32 %v1709_v63, %v1481_v32  ;;  %v1717_v22 = vmul.f32 %v11170_v35, %v15872_v28  ;;  %v1978_v20 = vmul.f32 %v11247_v44, %v15873_v39  ;;  %v2438_v34 = vpop.permute.xlu0 %2437  ;;  %v2002_v62 = vadd.f32 %v1970_v5, %v1742_v29  ;;  %v3191_v5 = vld [vmem:[#allocation3 + $0x91] sm:$0xff]  ;;  %v15881_v28 = vld [vmem:[#allocation56_spill] sm:$0xff] }
 0x2e2   : > { %v2230_v12 = vmul.f32 %v11265_v46, %v15874_v19  ;;  %2949 = vst.msk [vmem:[#allocation3 + $0x129] sm:$0xff] %vm2869_vm2, %v2860_v18  ;;  %v2859_v10 = vmax.f32 %v2827_v40, 0.0  ;;  %v2491_v55 = vmul.f32 %v11270_v38, %v2398_v37  ;;  %8930 = vrot.lane.b32.xlu0 %v8909_v49, %s9582_s22  ;;  %v1489_v41 = vadd.f32 %v1457_v4, %v11659_v21  ;;  %v2433_v3 = vpop.permute.xlu1 %2432  ;;  %v15878_v2 = vld [vmem:[#allocation47_spill] sm:$0xff]  ;;  %v15879_v40 = vld [vmem:[#allocation14_spill] sm:$0xff] }
 0x2e3   : > { %v1750_v57 = vadd.f32 %v1718_v6, %v1490_v47  ;;  %v1977_v51 = vmul.f32 %v11247_v44, %v15875_v42  ;;  %v2239_v50 = vmul.f32 %v11265_v46, %v15876_v27  ;;  %8935 = vrot.lane.b32.xlu1 %v11716_v26, %s9581_s18  ;;  %v2001_v17 = vadd.f32 %v1969_v54, %v1741_v9  ;;  %v15880_v9 = vld [vmem:[#allocation50_spill] sm:$0xff] }
 0x2e4   : > { %v2263_v8 = vadd.f32 %v2231_v23, %v2002_v62  ;;  %2948 = vst.msk [vmem:[#allocation3 + $0x121] sm:$0xff] %vm2869_vm2, %v2859_v10  ;;  %v2490_v49 = vmul.f32 %v11270_v38, %v2393_v56  ;;  %v8939_v13 = vpack.i.bf16 %v3127_v14, %v3126_v61  ;;  %v1749_v21 = vadd.f32 %v1717_v22, %v1489_v41  ;;  %v11800_v61 = vld [vmem:[%s15187_s2] ss:$0 sm:$0xff]  ;;  %v15884_v41 = vld [vmem:[#allocation135_spill] sm:$0xff] }
 0x2e5   : > { %v2010_v24 = vadd.f32 %v1978_v20, %v1750_v57  ;;  %v2238_v63 = vmul.f32 %v11265_v46, %v15877_v16  ;;  %v2658_v37 = vpop.permute.xlu0 %2657  ;;  %v8944_v25 = vpack.i.bf16 %v3160_v53, %v3159_v45  ;;  %v2262_v0 = vadd.f32 %v2230_v12, %v2001_v17  ;;  %v15882_v10 = vld [vmem:[#allocation66_spill] sm:$0xff]  ;;  %v15883_v45 = vld [vmem:[#allocation109_spill] sm:$0xff]  ;;  %v15887_v16 = vld [vmem:[#allocation132_spill] sm:$0xff] }
 0x2e6   : > { %v2523_v30 = vadd.f32 %v2491_v55, %v2263_v8  ;;  %v2499_v59 = vmul.f32 %v11270_v38, %v2438_v34  ;;  %v2751_v32 = vmul.f32 %v11779_v52, %v2658_v37  ;;  %8940 = vrot.lane.b32.xlu0 %v8939_v13, %s9583_s27  ;;  %v11784_v4 = vadd.f32 %v1201_v58, %v15878_v2  ;;  %v2653_v56 = vpop.permute.xlu1 %2652  ;;  %v15885_v17 = vld [vmem:[#allocation49_spill] sm:$0xff] }
 0x2e7   : > { %v2009_v29 = vadd.f32 %v1977_v51, %v1749_v21  ;;  %v2271_v7 = vadd.f32 %v2239_v50, %v2010_v24  ;;  %v2498_v6 = vmul.f32 %v11270_v38, %v2433_v3  ;;  %8945 = vrot.lane.b32.xlu1 %v8944_v25, %s9584_s28  ;;  %v2522_v54 = vadd.f32 %v2490_v49, %v2262_v0  ;;  %v15886_v49 = vld [vmem:[#allocation68_spill] sm:$0xff] }
 0x2e8   : > { %v2783_v31 = vadd.f32 %v2751_v32, %v2523_v30  ;;  %v2750_v23 = vmul.f32 %v11779_v52, %v2653_v56  ;;  %v11789_v18 = vpack.i.bf16 %v3192_v36, %v3191_v5  ;;  %v1200_v47 = vmul.f32 %v15737_v33, %v15879_v40  ;;  %v15888_v5 = vld [vmem:[#allocation167_spill] sm:$0xff] }
 0x2e9   : > { %v1451_v58 = vmul.f32 %v11010_v60, %v15880_v9  ;;  %v1452_v22 = vmul.f32 %v11010_v60, %v15881_v28  ;;  %v2270_v39 = vadd.f32 %v2238_v63, %v2009_v29  ;;  %v2698_v20 = vpop.permute.xlu0 %2697  ;;  %v2531_v34 = vadd.f32 %v2499_v59, %v2271_v7  ;;  %v3128_v32 = vld [vmem:[#allocation3 + $0x92] sm:$0xff] }
 0x2ea   : > { %v2822_v62 = vadd.f32 %v11800_v61, %v2783_v31  ;;  %v2782_v19 = vadd.f32 %v2750_v23, %v2522_v54  ;;  %v2759_v12 = vmul.f32 %v11779_v52, %v2698_v20  ;;  %8950 = vrot.lane.b32.xlu0 %v11789_v18, %s9585_s17  ;;  %v1459_v55 = vmul.f32 %v11010_v60, %v15882_v10  ;;  %v2693_v51 = vpop.permute.xlu1 %2692  ;;  %v15891_v31 = vld [vmem:[#allocation43_spill] sm:$0xff]  ;;  %v15892_v9 = vld [vmem:[#allocation140_spill] sm:$0xff]  ;;  %v3161_v20 = vld [vmem:[#allocation3 + $0xa8] sm:$0xff] }
 0x2eb   : > { %v1460_v53 = vmul.f32 %v11010_v60, %v15883_v45  ;;  %v1712_v57 = vmul.f32 %v11170_v35, %v15884_v41  ;;  %v2530_v42 = vadd.f32 %v2498_v6, %v2270_v39  ;;  %8955 = vrot.lane.b32.xlu1 %v11716_v26, %s9579_s29  ;;  %v2758_v14 = vmul.f32 %v11779_v52, %v2693_v51  ;;  %v15890_v6 = vld [vmem:[#allocation164_spill] sm:$0xff]  ;;  %v15893_v28 = vld [vmem:[#allocation175_spill] sm:$0xff]  ;;  %v3193_v45 = vld [vmem:[#allocation3 + $0xa9] sm:$0xff] }
 0x2ec   : > { %v2854_v27 = vmax.f32 %v2822_v62, 0.0  ;;  %v2821_v50 = vadd.f32 %v11800_v61, %v2782_v19  ;;  %v2791_v3 = vadd.f32 %v2759_v12, %v2531_v34  ;;  %v1232_v8 = vadd.f32 %v1200_v47, %v15885_v17  ;;  %v3162_v34 = vld [vmem:[#allocation3 + $0xb0] sm:$0xff]  ;;  %v15896_v51 = vld [vmem:[#allocation172_spill] sm:$0xff] }
 0x2ed   : > { %v1483_v21 = vadd.f32 %v1451_v58, %v15886_v49  ;;  %v1484_v24 = vadd.f32 %v1452_v22, %v11621_v1  ;;  %v1711_v63 = vmul.f32 %v11170_v35, %v15887_v16  ;;  %v2408_v37 = vpop.permute.xlu0 %2407  ;;  %v1972_v26 = vmul.f32 %v11247_v44, %v15888_v5  ;;  %v15889_v1 = vld [vmem:[#allocation143_spill] sm:$0xff] }
 0x2ee   : > { %2943 = vst.msk [vmem:[#allocation3 + $0xe1] sm:$0xff] %vm2869_vm2, %v2854_v27  ;;  %v2853_v0 = vmax.f32 %v2821_v50, 0.0  ;;  %v2830_v30 = vadd.f32 %v11800_v61, %v2791_v3  ;;  %v2790_v59 = vadd.f32 %v2758_v14, %v2530_v42  ;;  %8960 = vrot.lane.b32.xlu0 %v8939_v13, %s9580_s15  ;;  %v1491_v2 = vadd.f32 %v1459_v55, %v11712_v48  ;;  %v2403_v36 = vpop.permute.xlu1 %2402  ;;  %v3129_v48 = vld [vmem:[#allocation3 + $0x9a] sm:$0xff]  ;;  %v15894_v19 = vld [vmem:[#allocation39_spill] sm:$0xff] }
 0x2ef   : > { %v1492_v29 = vadd.f32 %v1460_v53, %v1232_v8  ;;  %v1720_v7 = vmul.f32 %v11170_v35, %v15889_v1  ;;  %v1971_v56 = vmul.f32 %v11247_v44, %v15890_v6  ;;  %8965 = vrot.lane.b32.xlu1 %v8944_v25, %s9582_s22  ;;  %v1744_v54 = vadd.f32 %v1712_v57, %v1484_v24  ;;  %v15895_v53 = vld [vmem:[#allocation69_spill] sm:$0xff]  ;;  %v3194_v49 = vld [vmem:[#allocation3 + $0xb1] sm:$0xff] }
 0x2f0   : > { %v2233_v23 = vmul.f32 %v11265_v46, %v15891_v31  ;;  %2942 = vst.msk [vmem:[#allocation3 + $0xd9] sm:$0xff] %vm2869_vm2, %v2853_v0  ;;  %v2862_v13 = vmax.f32 %v2830_v30, 0.0  ;;  %v2829_v40 = vadd.f32 %v11800_v61, %v2790_v59  ;;  %v1743_v47 = vadd.f32 %v1711_v63, %v1483_v21  ;;  %v15897_v14 = vld [vmem:[#allocation65_spill] sm:$0xff] }
 0x2f1   : > { %v1719_v58 = vmul.f32 %v11170_v35, %v15892_v9  ;;  %v1980_v22 = vmul.f32 %v11247_v44, %v15893_v28  ;;  %v2448_v39 = vpop.permute.xlu0 %2447  ;;  %v8974_v25 = vpack.i.bf16 %v3129_v48, %v3128_v32  ;;  %v2004_v62 = vadd.f32 %v1972_v26, %v1744_v54  ;;  %v15898_v63 = vld [vmem:[#allocation57_spill] sm:$0xff]  ;;  %v15901_v9 = vld [vmem:[#allocation174_spill] sm:$0xff] }
 0x2f2   : > { %v2232_v12 = vmul.f32 %v11265_v46, %v15894_v19  ;;  %2951 = vst.msk [vmem:[#allocation3 + $0x141] sm:$0xff] %vm2869_vm2, %v2862_v13  ;;  %v2861_v10 = vmax.f32 %v2829_v40, 0.0  ;;  %v2493_v55 = vmul.f32 %v11270_v38, %v2408_v37  ;;  %8970 = vrot.lane.b32.xlu0 %v11789_v18, %s9581_s18  ;;  %v1461_v41 = vmul.f32 %v11010_v60, %v15895_v53  ;;  %v2443_v50 = vpop.permute.xlu1 %2442 }
 0x2f3   : > { %v1752_v57 = vadd.f32 %v1720_v7, %v1492_v29  ;;  %v2003_v42 = vadd.f32 %v1971_v56, %v1743_v47  ;;  %v1979_v27 = vmul.f32 %v11247_v44, %v15896_v51  ;;  %8975 = vrot.lane.b32.xlu1 %v8974_v25, %s9583_s27  ;;  %v2265_v3 = vadd.f32 %v2233_v23, %v2004_v62  ;;  %v15899_v29 = vld [vmem:[#allocation105_spill] sm:$0xff]  ;;  %v15900_v7 = vld [vmem:[#allocation142_spill] sm:$0xff] }
 0x2f4   : > { %v2241_v17 = vmul.f32 %v11265_v46, %v15897_v14  ;;  %2950 = vst.msk [vmem:[#allocation3 + $0x139] sm:$0xff] %vm2869_vm2, %v2861_v10  ;;  %v2492_v8 = vmul.f32 %v11270_v38, %v2403_v36  ;;  %v8979_v21 = vpack.i.bf16 %v3162_v34, %v3161_v20  ;;  %v1751_v24 = vadd.f32 %v1719_v58, %v1491_v2 }
 0x2f5   : > { %v2012_v16 = vadd.f32 %v1980_v22, %v1752_v57  ;;  %v2240_v37 = vmul.f32 %v11265_v46, %v15898_v63  ;;  %v2668_v5 = vpop.permute.xlu0 %2667  ;;  %v11857_v26 = vpack.i.bf16 %v3194_v49, %v3193_v45  ;;  %v2264_v0 = vadd.f32 %v2232_v12, %v2003_v42  ;;  %v11872_v48 = vld [vmem:[#allocation3 + $0xe2] sm:$0xff]  ;;  %v15902_v12 = vld [vmem:[#allocation112_spill] sm:$0xff] }
 0x2f6   : > { %v2525_v30 = vadd.f32 %v2493_v55, %v2265_v3  ;;  %v2501_v59 = vmul.f32 %v11270_v38, %v2448_v39  ;;  %v2753_v32 = vmul.f32 %v11779_v52, %v2668_v5  ;;  %8980 = vrot.lane.b32.xlu0 %v8979_v21, %s9584_s28  ;;  %v1202_v1 = vmul.f32 %v15737_v33, %v15899_v29  ;;  %v2663_v36 = vpop.permute.xlu1 %2662  ;;  %v15903_v55 = vld [vmem:[#allocation63_spill] sm:$0xff]  ;;  %v15904_v3 = vld [vmem:[#allocation53_spill] sm:$0xff] }
 0x2f7   : > { %v1721_v2 = vmul.f32 %v11170_v35, %v15900_v7  ;;  %v2011_v6 = vadd.f32 %v1979_v27, %v1751_v24  ;;  %v2500_v56 = vmul.f32 %v11270_v38, %v2443_v50  ;;  %8985 = vrot.lane.b32.xlu1 %v11857_v26, %s9585_s17  ;;  %v2273_v54 = vadd.f32 %v2241_v17, %v2012_v16  ;;  %v11870_v40 = vld [vmem:[#allocation3 + $0xda] sm:$0xff]  ;;  %v3130_v16 = vld [vmem:[#allocation3 + $0xaa] sm:$0xff] }
 0x2f8   : > { %v2524_v31 = vadd.f32 %v2492_v8, %v2264_v0  ;;  %v2785_v23 = vadd.f32 %v2753_v32, %v2525_v30  ;;  %v2752_v13 = vmul.f32 %v11779_v52, %v2663_v36  ;;  %v1493_v47 = vadd.f32 %v1461_v41, %v11784_v4  ;;  %v15905_v17 = vld [vmem:[#allocation145_spill] sm:$0xff] }
 0x2f9   : > { %v1981_v58 = vmul.f32 %v11247_v44, %v15901_v9  ;;  %v2272_v28 = vadd.f32 %v2240_v37, %v2011_v6  ;;  %v2708_v22 = vpop.permute.xlu0 %2707  ;;  %v4388_v39 = vpack.c.bf16 %v11872_v48, %v11870_v40  ;;  %v2533_v20 = vadd.f32 %v2501_v59, %v2273_v54  ;;  %v3163_v30 = vld [vmem:[#allocation3 + $0xc0] sm:$0xff]  ;;  %v3164_v59 = vld [vmem:[#allocation3 + $0xc8] sm:$0xff] }
 0x2fa   : > { %v2824_v34 = vadd.f32 %v11800_v61, %v2785_v23  ;;  %v2784_v62 = vadd.f32 %v2752_v13, %v2524_v31  ;;  %v2761_v19 = vmul.f32 %v11779_v52, %v2708_v22  ;;  %8990 = vrot.lane.b32.xlu0 %v11789_v18, %s9579_s29  ;;  %v1462_v4 = vmul.f32 %v11010_v60, %v15902_v12  ;;  %v2703_v41 = vpop.permute.xlu1 %2702  ;;  %v11892_v18 = vld [vmem:[#allocation3 + $0x142] sm:$0xff] }
 0x2fb   : > { %v1753_v10 = vadd.f32 %v1721_v2, %v1493_v47  ;;  %v2242_v45 = vmul.f32 %v11265_v46, %v15903_v55  ;;  %v2532_v53 = vadd.f32 %v2500_v56, %v2272_v28  ;;  %8995 = vrot.lane.b32.xlu1 %v8974_v25, %s9580_s15  ;;  %v11888_v57 = vld [vmem:[#allocation3 + $0x13a] sm:$0xff]  ;;  %v2760_v50 = vmul.f32 %v11779_v52, %v2703_v41  ;;  %v3131_v2 = vld [vmem:[#allocation3 + $0xb2] sm:$0xff] }
 0x2fc   : > { %v2856_v42 = vmax.f32 %v2824_v34, 0.0  ;;  %v2823_v51 = vadd.f32 %v11800_v61, %v2784_v62  ;;  %v2793_v27 = vadd.f32 %v2761_v19, %v2533_v20  ;;  %v1234_v14 = vadd.f32 %v1202_v1, %v15904_v3  ;;  %v15906_v29 = vld [vmem:[#allocation177_spill] sm:$0xff]  ;;  %v3196_v20 = vld [vmem:[#allocation3 + $0xc9] sm:$0xff] }
 0x2fd   : > { %v1722_v8 = vmul.f32 %v11170_v35, %v15905_v17  ;;  %v2013_v49 = vadd.f32 %v1981_v58, %v1753_v10  ;;  %v2453_v24 = vpop.permute.xlu0 %2452  ;;  %v4396_v25 = vpack.c.bf16 %v11892_v18, %v11888_v57  ;;  %v2792_v5 = vadd.f32 %v2760_v50, %v2532_v53  ;;  %v3195_v13 = vld [vmem:[#allocation3 + $0xc1] sm:$0xff]  ;;  %v3013_v53 = vld [vmem:[#allocation3 + $0x111] sm:$0xff] }
 0x2fe   : > { %2945 = vst.msk [vmem:[#allocation3 + $0xf9] sm:$0xff] %vm2869_vm2, %v2856_v42  ;;  %v2855_v63 = vmax.f32 %v2823_v51, 0.0  ;;  %v2832_v37 = vadd.f32 %v11800_v61, %v2793_v27  ;;  %v2502_v0 = vmul.f32 %v11270_v38, %v2453_v24  ;;  %9000 = vrot.lane.b32.xlu0 %v8979_v21, %s9582_s22  ;;  %v1494_v32 = vadd.f32 %v1462_v4, %v1234_v14  ;;  %v2198_v7 = vpop.permute.xlu1 %2197  ;;  %v3012_v4 = vld [vmem:[#allocation3 + $0x109] sm:$0xff] }
 0x2ff   : > { %v1982_v1 = vmul.f32 %v11247_v44, %v15906_v29  ;;  %9005 = vrot.lane.b32.xlu1 %v11857_v26, %s9581_s18  ;;  %8614 = vmatprep.mubr.msk.bf16.mxu1 %vm2869_vm2, %v4396_v25  ;;  %v2274_v6 = vadd.f32 %v2242_v45, %v2013_v49  ;;  %v2831_v36 = vadd.f32 %v11800_v61, %v2792_v5  ;;  %v3044_v14 = vld [vmem:[#allocation3 + $0x10a] sm:$0xff] }
 0x300   : > { %2944 = vst.msk [vmem:[#allocation3 + $0xf1] sm:$0xff] %vm2869_vm2, %v2855_v63  ;;  %v2864_v56 = vmax.f32 %v2832_v37, 0.0  ;;  %v9009_v21 = vpack.i.bf16 %v3131_v2, %v3130_v16  ;;  %v1754_v54 = vadd.f32 %v1722_v8, %v1494_v32  ;;  %v9014_v23 = vpack.i.bf16 %v3164_v59, %v3163_v30  ;;  %v3076_v63 = vld [vmem:[#allocation3 + $0x120] sm:$0xff]  ;;  %v3077_v37 = vld [vmem:[#allocation3 + $0x128] sm:$0xff] }
 0x301   : > { %v2713_v31 = vpop.permute.xlu0 %2712  ;;  %v2863_v47 = vmax.f32 %v2831_v36, 0.0  ;;  %v2534_v9 = vadd.f32 %v2502_v0, %v2274_v6  ;;  %v2243_v58 = vmul.f32 %v11265_v46, %v2198_v7  ;;  %v11917_v12 = vpack.i.bf16 %v3196_v20, %v3195_v13  ;;  %v3108_v59 = vld [vmem:[#allocation3 + $0x121] sm:$0xff]  ;;  %v3133_v7 = vld [vmem:[#allocation3 + $0xca] sm:$0xff] }
 0x302   : > { %2953 = vst.msk [vmem:[#allocation3 + $0x159] sm:$0xff] %vm2869_vm2, %v2864_v56  ;;  %v2762_v28 = vmul.f32 %v11779_v52, %v2713_v31  ;;  %9010 = vrot.lane.b32.xlu0 %v9009_v21, %s9583_s27  ;;  %v2458_v22 = vpop.permute.xlu1 %2457  ;;  %v2014_v34 = vadd.f32 %v1982_v1, %v1754_v54  ;;  %v11925_v27 = vpack.i.bf16 %v3013_v53, %v3012_v4  ;;  %v3132_v32 = vld [vmem:[#allocation3 + $0xc2] sm:$0xff]  ;;  %v3141_v31 = vld [vmem:[#allocation3 + $0x12a] sm:$0xff]  ;;  %v15911_v53 = vld [vmem:[#allocation192_spill] sm:$0xff] }
 0x303   : > { %9015 = vrot.lane.b32.xlu1 %v9014_v23, %s9584_s28  ;;  %2952 = vst.msk [vmem:[#allocation3 + $0x151] sm:$0xff] %vm2869_vm2, %v2863_v47  ;;  %v2503_v19 = vmul.f32 %v11270_v38, %v2458_v22  ;;  %v11950_v30 = vpack.i.bf16 %v3077_v37, %v3076_v63  ;;  %v3109_v1 = vld [vmem:[#allocation3 + $0x129] sm:$0xff]  ;;  %v11958_v56 = vpack.i.bf16 %v3133_v7, %v3132_v32  ;;  %v3166_v54 = vld [vmem:[#allocation3 + $0xe0] sm:$0xff]  ;;  %v15915_v32 = vld [vmem:[#allocation111_spill] sm:$0xff] }
 0x304   : > { %v2794_v62 = vadd.f32 %v2762_v28, %v2534_v9  ;;  %v2275_v10 = vadd.f32 %v2243_v58, %v2014_v34  ;;  %v11956_v2 = vpack.i.bf16 %v3109_v1, %v3108_v59  ;;  %v3140_v36 = vld [vmem:[#allocation3 + $0x122] sm:$0xff]  ;;  %v15908_v58 = vld [vmem:[#allocation195_spill] sm:$0xff]  ;;  %v1463_v1 = vmul.f32 %v11010_v60, %v15915_v32 }
 0x305   : > { %v11929_v3 = vld [vmem:[#allocation3 + $0xfa] sm:$0xff]  ;;  %v2203_v6 = vpop.permute.xlu0 %2202  ;;  %v11966_v13 = vpack.i.bf16 %v3141_v31, %v3140_v36 }
 0x306   : > { %v2833_v55 = vadd.f32 %v11800_v61, %v2794_v62  ;;  %9020 = vrot.lane.b32.xlu0 %v11917_v12, %s9585_s17  ;;  %v2718_v45 = vpop.permute.xlu1 %2717  ;;  %v2535_v42 = vadd.f32 %v2503_v19, %v2275_v10  ;;  %v15907_v9 = vld [vmem:[#allocation77_spill] sm:$0xff]  ;;  %v3173_v34 = vld [vmem:[#allocation3 + $0x138] sm:$0xff] }
 0x307   : > { %9025 = vrot.lane.b32.xlu1 %v11857_v26, %s9579_s29  ;;  %v2763_v51 = vmul.f32 %v11779_v52, %v2718_v45  ;;  %v11927_v50 = vld [vmem:[#allocation3 + $0xf2] sm:$0xff]  ;;  %v943_v28 = vmul.f32 %v15908_v58, %v15907_v9  ;;  %v3174_v62 = vld [vmem:[#allocation3 + $0x140] sm:$0xff] }
 0x308   : > { %v2865_v41 = vmax.f32 %v2833_v55, 0.0  ;;  %v4390_v17 = vpack.c.bf16 %v11929_v3, %v11927_v50  ;;  %v3045_v26 = vld [vmem:[#allocation3 + $0x112] sm:$0xff]  ;;  %v3198_v37 = vld [vmem:[#allocation3 + $0xe1] sm:$0xff] }
 0x309   : > { %v2795_v8 = vadd.f32 %v2763_v51, %v2535_v42  ;;  %v11938_v24 = vpack.i.bf16 %v3045_v26, %v3044_v14  ;;  %v11942_v16 = vld [vmem:[#allocation3 + $0x15a] sm:$0xff]  ;;  %v15910_v45 = vld [vmem:[#allocation71_spill] sm:$0xff]  ;;  %v8781_v14 = vpop.permute.xlu0 %8780 }
 0x30a   : > { %2954 = vst.msk [vmem:[#allocation3 + $0x169] sm:$0xff] %vm2869_vm2, %v2865_v41  ;;  %9030 = vrot.lane.b32.xlu0 %v11925_v27, %s9579_s29  ;;  %v11940_v25 = vld [vmem:[#allocation3 + $0x152] sm:$0xff]  ;;  %v2208_v29 = vpop.permute.xlu1 %2207  ;;  %v683_v41 = vmul.f32 %v15911_v53, %v15910_v45 }
 0x30b   : > { %9035 = vrot.lane.b32.xlu1 %v9009_v21, %s9580_s15  ;;  %v2834_v49 = vadd.f32 %v11800_v61, %v2795_v8  ;;  %v4398_v5 = vpack.c.bf16 %v11942_v16, %v11940_v25  ;;  %v3165_v21 = vld [vmem:[#allocation3 + $0xd8] sm:$0xff]  ;;  %v15913_v8 = vld [vmem:[#allocation74_spill] sm:$0xff]  ;;  %v2245_v32 = vmul.f32 %v11265_v46, %v2208_v29 }
 0x30c   : > { %v11974_v20 = vpack.i.bf16 %v3166_v54, %v3165_v21  ;;  %v15909_v19 = vld [vmem:[#allocation80_spill] sm:$0xff]  ;;  %v15912_v42 = vld [vmem:[#allocation15_spill] sm:$0xff]  ;;  %v684_v26 = vmul.f32 %v15911_v53, %v15913_v8  ;;  %v975_v59 = vadd.f32 %v943_v28, %v683_v41  ;;  %v3206_v28 = vld [vmem:[#allocation3 + $0x141] sm:$0xff] }
 0x30d   : > { %v2866_v0 = vmax.f32 %v2834_v49, 0.0  ;;  %v944_v4 = vmul.f32 %v15908_v58, %v15909_v19  ;;  %v3197_v10 = vld [vmem:[#allocation3 + $0xd9] sm:$0xff]  ;;  %v1203_v51 = vmul.f32 %v15737_v33, %v15912_v42  ;;  %v15914_v49 = vld [vmem:[#allocation17_spill] sm:$0xff]  ;;  %v15916_v54 = vld [vmem:[#allocation115_spill] sm:$0xff]  ;;  %v2463_v41 = vpop.permute.xlu0 %2462 }
 0x30e   : > { %9040 = vrot.lane.b32.xlu0 %v11938_v24, %s9580_s15  ;;  %v11972_v22 = vpop.permute.xlu1 %8785  ;;  %v1204_v63 = vmul.f32 %v15737_v33, %v15914_v49  ;;  %v11996_v7 = vpack.i.bf16 %v3198_v37, %v3197_v10  ;;  %v3205_v36 = vld [vmem:[#allocation3 + $0x139] sm:$0xff]  ;;  %v1464_v31 = vmul.f32 %v11010_v60, %v15916_v54  ;;  %v15918_v19 = vld [vmem:[#allocation147_spill] sm:$0xff]  ;;  %v2244_v49 = vmul.f32 %v11265_v46, %v2203_v6  ;;  %v2959_v37 = vld [vmem:[#allocation3 + $0x8] sm:$0xff] }
 0x30f   : > { %9045 = vrot.lane.b32.xlu1 %v9014_v23, %s9582_s22  ;;  %2955 = vst.msk [vmem:[#allocation3 + $0x171] sm:$0xff] %vm2869_vm2, %v2866_v0  ;;  %v11992_v0 = vpack.i.bf16 %v3174_v62, %v3173_v34  ;;  %v976_v21 = vadd.f32 %v944_v4, %v684_v26  ;;  %v1235_v9 = vadd.f32 %v1203_v51, %v975_v59  ;;  %v15917_v58 = vld [vmem:[#allocation144_spill] sm:$0xff]  ;;  %v15920_v51 = vld [vmem:[#allocation179_spill] sm:$0xff]  ;;  %v8782_v59 = vunpack.i.l.bf16 %v8781_v14 }
 0x310   : > { %v1723_v33 = vmul.f32 %v11170_v35, %v15917_v58  ;;  %v1724_v10 = vmul.f32 %v11170_v35, %v15918_v19  ;;  %v12008_v4 = vpack.i.bf16 %v3206_v28, %v3205_v36  ;;  %v15919_v60 = vld [vmem:[#allocation176_spill] sm:$0xff]  ;;  %v1984_v8 = vmul.f32 %v11247_v44, %v15920_v51 }
 0x311   : > { %v1236_v62 = vadd.f32 %v1204_v63, %v976_v21  ;;  %v1495_v45 = vadd.f32 %v1463_v1, %v1235_v9  ;;  %v1983_v53 = vmul.f32 %v11247_v44, %v15919_v60  ;;  %v8783_v63 = vunpack.i.h.bf16 %v8781_v14  ;;  %v2958_v36 = vld [vmem:[#allocation3] sm:$0xff] }
 0x312   : > { %9050 = vrot.lane.b32.xlu0 %v11950_v30, %s9582_s22  ;;  %v2468_v34 = vpop.permute.xlu1 %2467  ;;  %v8788_v58 = vunpack.i.h.bf16 %v11972_v22  ;;  %v8787_v14 = vunpack.i.l.bf16 %v11972_v22  ;;  %v4143_v46 = vsel %vm2869_vm2, %v2958_v36, %v8782_v59 }
 0x313   : > { %9055 = vrot.lane.b32.xlu1 %v11917_v12, %s9581_s18  ;;  %v1496_v42 = vadd.f32 %v1464_v31, %v1236_v62  ;;  %v1755_v26 = vadd.f32 %v1723_v33, %v1495_v45  ;;  %v2504_v31 = vmul.f32 %v11270_v38, %v2463_v41  ;;  %v2505_v9 = vmul.f32 %v11270_v38, %v2468_v34 }
 0x314   : > { %v4176_v22 = vsel %vm4175_vm4, %v4143_v46, %v8787_v14 }
 0x315   : > { %v1756_v35 = vadd.f32 %v1724_v10, %v1496_v42  ;;  %v2015_v1 = vadd.f32 %v1983_v53, %v1755_v26 }
 0x316   : > { %9060 = vrot.lane.b32.xlu0 %v11956_v2, %s9581_s18  ;;  %v11964_v23 = vld [vmem:[#allocation3 + $0x16a] sm:$0xff]  ;;  %v11968_v47 = vld [vmem:[#allocation3 + $0x172] sm:$0xff] }
 0x317   : > { %9065 = vrot.lane.b32.xlu1 %v11958_v56, %s9583_s27  ;;  %v4400_v55 = vpack.c.bf16 %v11968_v47, %v11964_v23  ;;  %v8796_v54 = vpop.permute.xlu1 %8795  ;;  %v2016_v44 = vadd.f32 %v1984_v8, %v1756_v35  ;;  %v2276_v6 = vadd.f32 %v2244_v49, %v2015_v1 }
 0x318   : > { %v8791_v21 = vpop.permute.xlu0 %8790  ;;  %v8798_v60 = vunpack.i.h.bf16 %v8796_v54  ;;  %v8797_v53 = vunpack.i.l.bf16 %v8796_v54 }
 0x319   : > { %v2277_v29 = vadd.f32 %v2245_v32, %v2016_v44  ;;  %v8793_v33 = vunpack.i.h.bf16 %v8791_v21  ;;  %v8792_v28 = vunpack.i.l.bf16 %v8791_v21  ;;  %v2536_v62 = vadd.f32 %v2504_v31, %v2276_v6  ;;  %v3167_v6 = vld [vmem:[#allocation3 + $0xf0] sm:$0xff] }
 0x31a   : > { %9070 = vrot.lane.b32.xlu0 %v11966_v13, %s9583_s27 }
 0x31b   : > { %9075 = vrot.lane.b32.xlu1 %v11974_v20, %s9584_s28  ;;  %v2537_v19 = vadd.f32 %v2505_v9, %v2277_v29  ;;  %v4209_v41 = vsel %vm4208_vm5, %v4176_v22, %v8792_v28  ;;  %v2960_v22 = vld [vmem:[#allocation3 + $0x18] sm:$0xff] }
 0x31e   : > { %9080 = vrot.lane.b32.xlu0 %v11992_v0, %s9584_s28 }
 0x31f   : > { %9085 = vrot.lane.b32.xlu1 %v11996_v7, %s9585_s17 }
 0x322   : > { %9090 = vrot.lane.b32.xlu0 %v12008_v4, %s9585_s17 }
 0x323   : > { %9095 = vrot.lane.b32.xlu1 %v11917_v12, %s9579_s29  ;;  %v4144_v12 = vsel %vm2869_vm2, %v2959_v37, %v8783_v63 }
 0x326   : > { %9100 = vrot.lane.b32.xlu0 %v11956_v2, %s9579_s29 }
 0x327   : > { %9105 = vrot.lane.b32.xlu1 %v11958_v56, %s9580_s15  ;;  %v4177_v56 = vsel %vm4175_vm4, %v4144_v12, %v8788_v58  ;;  %v3168_v12 = vld [vmem:[#allocation3 + $0xf8] sm:$0xff] }
 0x328   : > { %v2728_v34 = vpop.permute.xlu1 %2727  ;;  %v4210_v42 = vsel %vm4208_vm5, %v4177_v56, %v8793_v33  ;;  %v12064_v33 = vpack.i.bf16 %v11892_v18, %v11888_v57  ;;  %v3176_v56 = vld [vmem:[#allocation3 + $0x158] sm:$0xff] }
 0x329   : > { %v2723_v38 = vpop.permute.xlu0 %2722  ;;  %v2765_v45 = vmul.f32 %v11779_v52, %v2728_v34  ;;  %v4243_v37 = vsel %vm4241_vm6, %v4210_v42, %v8798_v60  ;;  %v2961_v60 = vld [vmem:[#allocation3 + $0x20] sm:$0xff]  ;;  %v3199_v57 = vld [vmem:[#allocation3 + $0xf1] sm:$0xff] }
 0x32a   : > { %v2764_v10 = vmul.f32 %v11779_v52, %v2723_v38  ;;  %9110 = vrot.lane.b32.xlu0 %v11966_v13, %s9580_s15 }
 0x32b   : > { %9115 = vrot.lane.b32.xlu1 %v11974_v20, %s9582_s22  ;;  %v2797_v8 = vadd.f32 %v2765_v45, %v2537_v19  ;;  %v4242_v20 = vsel %vm4241_vm6, %v4209_v41, %v8797_v53  ;;  %v12068_v19 = vpack.i.bf16 %v3168_v12, %v3167_v6  ;;  %v3175_v45 = vld [vmem:[#allocation3 + $0x150] sm:$0xff] }
 0x32c   : > { %v2796_v51 = vadd.f32 %v2764_v10, %v2536_v62  ;;  %v8806_v26 = vpop.permute.xlu1 %8805 }
 0x32d   : > { %v8801_v52 = vpop.permute.xlu0 %8800  ;;  %v2836_v49 = vadd.f32 %v11800_v61, %v2797_v8  ;;  %v8808_v59 = vunpack.i.h.bf16 %v8806_v26  ;;  %v8807_v32 = vunpack.i.l.bf16 %v8806_v26 }
 0x32e   : > { %v2835_v13 = vadd.f32 %v11800_v61, %v2796_v51  ;;  %v8803_v63 = vunpack.i.h.bf16 %v8801_v52  ;;  %v8802_v35 = vunpack.i.l.bf16 %v8801_v52  ;;  %9120 = vrot.lane.b32.xlu0 %v11992_v0, %s9582_s22  ;;  %v12052_v0 = vpack.i.bf16 %v11872_v48, %v11870_v40 }
 0x32f   : > { %9125 = vrot.lane.b32.xlu1 %v11996_v7, %s9581_s18  ;;  %v2868_v36 = vmax.f32 %v2836_v49, 0.0  ;;  %v12082_v49 = vpack.i.bf16 %v3176_v56, %v3175_v45 }
 0x330   : > { %v2867_v1 = vmax.f32 %v2835_v13, 0.0  ;;  %v4275_v21 = vsel %vm4274_vm7, %v4242_v20, %v8802_v35  ;;  %v4276_v61 = vsel %vm4274_vm7, %v4243_v37, %v8803_v63  ;;  %v8816_v44 = vpop.permute.xlu1 %8815  ;;  %v3200_v13 = vld [vmem:[#allocation3 + $0xf9] sm:$0xff]  ;;  %v3207_v37 = vld [vmem:[#allocation3 + $0x151] sm:$0xff] }
 0x331   : > { %v8811_v54 = vpop.permute.xlu0 %8810  ;;  %2957 = vst.msk [vmem:[#allocation3 + $0x189] sm:$0xff] %vm2869_vm2, %v2868_v36  ;;  %v8818_v58 = vunpack.i.h.bf16 %v8816_v44  ;;  %v8817_v14 = vunpack.i.l.bf16 %v8816_v44  ;;  %v4308_v46 = vsel %vm4307_vm8, %v4275_v21, %v8807_v32  ;;  %v4309_v29 = vsel %vm4307_vm8, %v4276_v61, %v8808_v59  ;;  %v3208_v61 = vld [vmem:[#allocation3 + $0x159] sm:$0xff] }
 0x332   : > { %2956 = vst.msk [vmem:[#allocation3 + $0x181] sm:$0xff] %vm2869_vm2, %v2867_v1  ;;  %v8813_v31 = vunpack.i.h.bf16 %v8811_v54  ;;  %v8812_v9 = vunpack.i.l.bf16 %v8811_v54  ;;  %9130 = vrot.lane.b32.xlu0 %v12008_v4, %s9581_s18  ;;  %v12084_v20 = vpack.i.bf16 %v3200_v13, %v3199_v57  ;;  %v2963_v57 = vld [vmem:[#allocation3 + $0x38] sm:$0xff] }
 0x333   : > { %9135 = vrot.lane.b32.xlu1 %v12052_v0, %s9583_s27  ;;  %v4146_v18 = vsel %vm2869_vm2, %v2961_v60, %v8818_v58  ;;  %v4145_v51 = vsel %vm2869_vm2, %v2960_v22, %v8817_v14  ;;  %v3219_v60 = vld [vmem:[#allocation3 + $0x62] sm:$0xff] }
 0x334   : > { %v4341_v28 = vsel %vm4340_vm9, %v4308_v46, %v8812_v9  ;;  %v4342_v38 = vsel %vm4340_vm9, %v4309_v29, %v8813_v31  ;;  %v8826_v62 = vpop.permute.xlu1 %8825  ;;  %v12100_v9 = vpack.i.bf16 %v3208_v61, %v3207_v37 }
 0x335   : > { %v8821_v34 = vpop.permute.xlu0 %8820  ;;  %v4373_v10 = vpack.c.bf16 %v4342_v38, %v4341_v28  ;;  %v8827_v42 = vunpack.i.l.bf16 %v8826_v62  ;;  %v8828_v8 = vunpack.i.h.bf16 %v8826_v62 }
 0x336   : > { %v8823_v53 = vunpack.i.h.bf16 %v8821_v34  ;;  %v8822_v41 = vunpack.i.l.bf16 %v8821_v34  ;;  %9140 = vrot.lane.b32.xlu0 %v12064_v33, %s9583_s27 }
 0x337   : > { %9145 = vrot.lane.b32.xlu1 %v12068_v19, %s9584_s28  ;;  %4565 = vmatmul.mubr.bf16.vlgmr.msra.gmra.mrb[0].mxu0 %v4373_v10 }
 0x338   : > { %v4178_v52 = vsel %vm4175_vm4, %v4145_v51, %v8822_v41  ;;  %v4179_v26 = vsel %vm4175_vm4, %v4146_v18, %v8823_v53  ;;  %8604 = vmatprep.mubr.msk.bf16.mxu0 %vm2869_vm2, %v4376_v15  ;;  %v8836_v35 = vpop.permute.xlu1 %8835  ;;  %v12091_v11 = vld [vmem:[#allocation3 + $0x18a] sm:$0xff] }
 0x339   : > { %v8831_v63 = vpop.permute.xlu0 %8830  ;;  %v4211_v59 = vsel %vm4208_vm5, %v4178_v52, %v8827_v42  ;;  %v12089_v36 = vld [vmem:[#allocation3 + $0x182] sm:$0xff]  ;;  %v4212_v43 = vsel %vm4208_vm5, %v4179_v26, %v8828_v8  ;;  %v8838_v15 = vunpack.i.h.bf16 %v8836_v35  ;;  %v8837_v21 = vunpack.i.l.bf16 %v8836_v35  ;;  %v2962_v42 = vld [vmem:[#allocation3 + $0x30] sm:$0xff] }
 0x33a   : > { %v8833_v32 = vunpack.i.h.bf16 %v8831_v63  ;;  %v8832_v1 = vunpack.i.l.bf16 %v8831_v63  ;;  %9150 = vrot.lane.b32.xlu0 %v12082_v49, %s9584_s28  ;;  %v4402_v54 = vpack.c.bf16 %v12091_v11, %v12089_v36  ;;  %v3220_v8 = vld [vmem:[#allocation3 + $0x6a] sm:$0xff] }
 0x33b   : > { %9155 = vrot.lane.b32.xlu1 %v12084_v20, %s9585_s17  ;;  %v4378_v13 = vpack.c.bf16 %v3220_v8, %v3219_v60  ;;  %v3221_v60 = vld [vmem:[#allocation3 + $0x7a] sm:$0xff]  ;;  %v3222_v8 = vld [vmem:[#allocation3 + $0x82] sm:$0xff] }
 0x33c   : > { %v4244_v44 = vsel %vm4241_vm6, %v4211_v59, %v8832_v1  ;;  %v4245_v31 = vsel %vm4241_vm6, %v4212_v43, %v8833_v32  ;;  %v8846_v12 = vpop.permute.xlu1 %8845 }
 0x33d   : > { %v8841_v6 = vpop.permute.xlu0 %8840  ;;  %v8848_v46 = vunpack.i.h.bf16 %v8846_v12  ;;  %v8847_v29 = vunpack.i.l.bf16 %v8846_v12  ;;  %v4277_v28 = vsel %vm4274_vm7, %v4244_v44, %v8837_v21  ;;  %v4278_v38 = vsel %vm4274_vm7, %v4245_v31, %v8838_v15 }
 0x33e   : > { %v8843_v58 = vunpack.i.h.bf16 %v8841_v6  ;;  %v8842_v14 = vunpack.i.l.bf16 %v8841_v6  ;;  %9160 = vrot.lane.b32.xlu0 %v12100_v9, %s9585_s17 }
 0x33f   : > { %9165 = vrot.lane.b32.xlu1 %v11996_v7, %s9579_s29 }
 0x340   : > { %v4310_v34 = vsel %vm4307_vm8, %v4277_v28, %v8842_v14  ;;  %v4311_v62 = vsel %vm4307_vm8, %v4278_v38, %v8843_v58  ;;  %v8856_v45 = vpop.permute.xlu1 %8855  ;;  %v12137_v28 = vpack.i.bf16 %v11929_v3, %v11927_v50 }
 0x341   : > { %v8851_v10 = vpop.permute.xlu0 %8850  ;;  %v4343_v56 = vsel %vm4340_vm9, %v4310_v34, %v8847_v29  ;;  %v4344_v22 = vsel %vm4340_vm9, %v4311_v62, %v8848_v46  ;;  %v8858_v18 = vunpack.i.h.bf16 %v8856_v45  ;;  %v8857_v7 = vunpack.i.l.bf16 %v8856_v45  ;;  %v12141_v34 = vld [vmem:[#allocation3 + $0x108] sm:$0xff]  ;;  %v12143_v62 = vld [vmem:[#allocation3 + $0x110] sm:$0xff] }
 0x342   : > { %v8853_v53 = vunpack.i.h.bf16 %v8851_v10  ;;  %v8852_v41 = vunpack.i.l.bf16 %v8851_v10  ;;  %9170 = vrot.lane.b32.xlu0 %v12008_v4, %s9579_s29  ;;  %v4375_v51 = vpack.c.bf16 %v4344_v22, %v4343_v56 }
 0x343   : > { %9175 = vrot.lane.b32.xlu1 %v12052_v0, %s9580_s15 }
 0x344   : > { %v4148_v52 = vsel %vm2869_vm2, %v2963_v57, %v8853_v53  ;;  %v4147_v26 = vsel %vm2869_vm2, %v2962_v42, %v8852_v41  ;;  %4573 = vmatmul.mubr.bf16.gmra.mrb[4].mxu0 %v4375_v51  ;;  %v8866_v35 = vpop.permute.xlu1 %8865  ;;  %v12151_v53 = vpack.i.bf16 %v11942_v16, %v11940_v25 }
 0x345   : > { %v8861_v63 = vpop.permute.xlu0 %8860  ;;  %8605 = vmatprep.mubr.msk.bf16.mxu0 %vm2869_vm2, %v4378_v13  ;;  %v4181_v4 = vsel %vm4175_vm4, %v4148_v52, %v8858_v18  ;;  %v4180_v0 = vsel %vm4175_vm4, %v4147_v26, %v8857_v7  ;;  %v8868_v32 = vunpack.i.h.bf16 %v8866_v35  ;;  %v8867_v1 = vunpack.i.l.bf16 %v8866_v35  ;;  %v3178_v52 = vld [vmem:[#allocation3 + $0x170] sm:$0xff]  ;;  %v2964_v26 = vld [vmem:[#allocation3 + $0x48] sm:$0xff] }
 0x346   : > { %v8863_v37 = vunpack.i.h.bf16 %v8861_v63  ;;  %v8862_v59 = vunpack.i.l.bf16 %v8861_v63  ;;  %9180 = vrot.lane.b32.xlu0 %v12064_v33, %s9580_s15  ;;  %v12157_v7 = vpack.i.bf16 %v12143_v62, %v12141_v34  ;;  %v2965_v13 = vld [vmem:[#allocation3 + $0x50] sm:$0xff] }
 0x347   : > { %9185 = vrot.lane.b32.xlu1 %v12068_v19, %s9582_s22 }
 0x348   : > { %v4213_v43 = vsel %vm4208_vm5, %v4180_v0, %v8862_v59  ;;  %v4214_v15 = vsel %vm4208_vm5, %v4181_v4, %v8863_v37  ;;  %v8876_v61 = vpop.permute.xlu1 %8875  ;;  %v4380_v37 = vpack.c.bf16 %v3222_v8, %v3221_v60 }
 0x349   : > { %v8871_v21 = vpop.permute.xlu0 %8870  ;;  %v4246_v33 = vsel %vm4241_vm6, %v4213_v43, %v8867_v1  ;;  %v4247_v6 = vsel %vm4241_vm6, %v4214_v15, %v8868_v32  ;;  %v8878_v12 = vunpack.i.h.bf16 %v8876_v61  ;;  %v8877_v58 = vunpack.i.l.bf16 %v8876_v61  ;;  %v3177_v1 = vld [vmem:[#allocation3 + $0x168] sm:$0xff] }
 0x34a   : > { %v8873_v44 = vunpack.i.h.bf16 %v8871_v21  ;;  %v8872_v31 = vunpack.i.l.bf16 %v8871_v21  ;;  %9190 = vrot.lane.b32.xlu0 %v12082_v49, %s9582_s22  ;;  %v12168_v21 = vpack.i.bf16 %v3178_v52, %v3177_v1  ;;  %v3224_v1 = vld [vmem:[#allocation3 + $0x9a] sm:$0xff] }
 0x34b   : > { %9195 = vrot.lane.b32.xlu1 %v12084_v20, %s9581_s18 }
 0x34c   : > { %v4279_v19 = vsel %vm4274_vm7, %v4246_v33, %v8872_v31  ;;  %v4280_v14 = vsel %vm4274_vm7, %v4247_v6, %v8873_v44  ;;  %v8886_v29 = vpop.permute.xlu1 %8885  ;;  %v3210_v31 = vld [vmem:[#allocation3 + $0x171] sm:$0xff] }
 0x34d   : > { %v8881_v46 = vpop.permute.xlu0 %8880  ;;  %v8888_v10 = vunpack.i.h.bf16 %v8886_v29  ;;  %v8887_v45 = vunpack.i.l.bf16 %v8886_v29  ;;  %v4312_v56 = vsel %vm4307_vm8, %v4279_v19, %v8877_v58  ;;  %v4313_v22 = vsel %vm4307_vm8, %v4280_v14, %v8878_v12 }
 0x34e   : > { %v8883_v49 = vunpack.i.h.bf16 %v8881_v46  ;;  %v8882_v38 = vunpack.i.l.bf16 %v8881_v46  ;;  %9200 = vrot.lane.b32.xlu0 %v12100_v9, %s9581_s18  ;;  %v3209_v46 = vld [vmem:[#allocation3 + $0x169] sm:$0xff] }
 0x34f   : > { %9205 = vrot.lane.b32.xlu1 %v12137_v28, %s9583_s27  ;;  %v4150_v59 = vsel %vm2869_vm2, %v2965_v13, %v8888_v10  ;;  %v4149_v4 = vsel %vm2869_vm2, %v2964_v26, %v8887_v45 }
 0x350   : > { %v4345_v41 = vsel %vm4340_vm9, %v4312_v56, %v8882_v38  ;;  %v4346_v42 = vsel %vm4340_vm9, %v4313_v22, %v8883_v49  ;;  %v8896_v18 = vpop.permute.xlu1 %8895  ;;  %v12178_v38 = vpack.i.bf16 %v3210_v31, %v3209_v46 }
 0x351   : > { %v8891_v57 = vpop.permute.xlu0 %8890  ;;  %v4377_v51 = vpack.c.bf16 %v4346_v42, %v4345_v41  ;;  %v8898_v0 = vunpack.i.h.bf16 %v8896_v18  ;;  %v8897_v32 = vunpack.i.l.bf16 %v8896_v18 }
 0x352   : > { %v8893_v63 = vunpack.i.h.bf16 %v8891_v57  ;;  %v8892_v35 = vunpack.i.l.bf16 %v8891_v57  ;;  %9210 = vrot.lane.b32.xlu0 %v12151_v53, %s9583_s27 }
 0x353   : > { %9215 = vrot.lane.b32.xlu1 %v12157_v7, %s9584_s28  ;;  %4581 = vmatmul.mubr.bf16.gmra.mrb[8].mxu0 %v4377_v51 }
 0x354   : > { %v4182_v43 = vsel %vm4175_vm4, %v4149_v4, %v8892_v35  ;;  %v4183_v15 = vsel %vm4175_vm4, %v4150_v59, %v8893_v63  ;;  %8606 = vmatprep.mubr.msk.bf16.mxu0 %vm2869_vm2, %v4380_v37  ;;  %v8906_v44 = vpop.permute.xlu1 %8905  ;;  %v3223_v63 = vld [vmem:[#allocation3 + $0x92] sm:$0xff]  ;;  %v2966_v59 = vld [vmem:[#allocation3 + $0x60] sm:$0xff]  ;;  %v2967_v4 = vld [vmem:[#allocation3 + $0x68] sm:$0xff] }
 0x355   : > { %v8901_v61 = vpop.permute.xlu0 %8900  ;;  %v4215_v12 = vsel %vm4208_vm5, %v4182_v43, %v8897_v32  ;;  %v4216_v58 = vsel %vm4208_vm5, %v4183_v15, %v8898_v0  ;;  %v8908_v19 = vunpack.i.h.bf16 %v8906_v44  ;;  %v8907_v14 = vunpack.i.l.bf16 %v8906_v44 }
 0x356   : > { %v8903_v33 = vunpack.i.h.bf16 %v8901_v61  ;;  %v8902_v6 = vunpack.i.l.bf16 %v8901_v61  ;;  %9220 = vrot.lane.b32.xlu0 %v12168_v21, %s9584_s28  ;;  %v4382_v61 = vpack.c.bf16 %v3224_v1, %v3223_v63 }
 0x357   : > { %9225 = vrot.lane.b32.xlu1 %v11925_v27, %s9585_s17 }
 0x358   : > { %v4248_v29 = vsel %vm4241_vm6, %v4215_v12, %v8902_v6  ;;  %v4249_v49 = vsel %vm4241_vm6, %v4216_v58, %v8903_v33  ;;  %v8916_v45 = vpop.permute.xlu1 %8915 }
 0x359   : > { %v8911_v10 = vpop.permute.xlu0 %8910  ;;  %v8918_v60 = vunpack.i.h.bf16 %v8916_v45  ;;  %v8917_v41 = vunpack.i.l.bf16 %v8916_v45  ;;  %v4281_v42 = vsel %vm4274_vm7, %v4248_v29, %v8907_v14  ;;  %v4282_v57 = vsel %vm4274_vm7, %v4249_v49, %v8908_v19 }
 0x35a   : > { %v8913_v56 = vunpack.i.h.bf16 %v8911_v10  ;;  %v8912_v22 = vunpack.i.l.bf16 %v8911_v10  ;;  %9230 = vrot.lane.b32.xlu0 %v12178_v38, %s9585_s17 }
 0x35b   : > { %9235 = vrot.lane.b32.xlu1 %v12084_v20, %s9579_s29 }
 0x35c   : > { %v4314_v18 = vsel %vm4307_vm8, %v4281_v42, %v8912_v22  ;;  %v4315_v51 = vsel %vm4307_vm8, %v4282_v57, %v8913_v56  ;;  %v8926_v52 = vpop.permute.xlu1 %8925 }
 0x35d   : > { %v8921_v8 = vpop.permute.xlu0 %8920  ;;  %v4347_v26 = vsel %vm4340_vm9, %v4314_v18, %v8917_v41  ;;  %v4348_v13 = vsel %vm4340_vm9, %v4315_v51, %v8918_v60  ;;  %v8928_v0 = vunpack.i.h.bf16 %v8926_v52  ;;  %v8927_v20 = vunpack.i.l.bf16 %v8926_v52  ;;  %v3225_v52 = vld [vmem:[#allocation3 + $0xaa] sm:$0xff] }
 0x35e   : > { %v8923_v35 = vunpack.i.h.bf16 %v8921_v8  ;;  %v8922_v37 = vunpack.i.l.bf16 %v8921_v8  ;;  %9240 = vrot.lane.b32.xlu0 %v12100_v9, %s9579_s29  ;;  %v4379_v32 = vpack.c.bf16 %v4348_v13, %v4347_v26  ;;  %v9279_v26 = vpack.i.bf16 %v11968_v47, %v11964_v23 }
 0x35f   : > { %9245 = vrot.lane.b32.xlu1 %v12137_v28, %s9580_s15 }
 0x360   : > { %v4152_v43 = vsel %vm2869_vm2, %v2967_v4, %v8923_v35  ;;  %v4151_v15 = vsel %vm2869_vm2, %v2966_v59, %v8922_v37  ;;  %4589 = vmatmul.mubr.bf16.gmra.mrb[12].mxu0 %v4379_v32  ;;  %v8936_v31 = vpop.permute.xlu1 %8935  ;;  %v3226_v4 = vld [vmem:[#allocation3 + $0xb2] sm:$0xff] }
 0x361   : > { %v8931_v44 = vpop.permute.xlu0 %8930  ;;  %8607 = vmatprep.mubr.msk.bf16.mxu0 %vm2869_vm2, %v4382_v61  ;;  %v4185_v9 = vsel %vm4175_vm4, %v4152_v43, %v8928_v0  ;;  %v4184_v28 = vsel %vm4175_vm4, %v4151_v15, %v8927_v20  ;;  %v8938_v12 = vunpack.i.h.bf16 %v8936_v31  ;;  %v8937_v58 = vunpack.i.l.bf16 %v8936_v31  ;;  %v3179_v0 = vld [vmem:[#allocation3 + $0x180] sm:$0xff]  ;;  %v3180_v20 = vld [vmem:[#allocation3 + $0x188] sm:$0xff]  ;;  %v2968_v32 = vld [vmem:[#allocation3 + $0x78] sm:$0xff] }
 0x362   : > { %v8933_v33 = vunpack.i.h.bf16 %v8931_v44  ;;  %v8932_v6 = vunpack.i.l.bf16 %v8931_v44  ;;  %9250 = vrot.lane.b32.xlu0 %v12151_v53, %s9580_s15  ;;  %v4384_v15 = vpack.c.bf16 %v3226_v4, %v3225_v52 }
 0x363   : > { %9255 = vrot.lane.b32.xlu1 %v12157_v7, %s9582_s22 }
 0x364   : > { %v4217_v19 = vsel %vm4208_vm5, %v4184_v28, %v8932_v6  ;;  %v4218_v14 = vsel %vm4208_vm5, %v4185_v9, %v8933_v33  ;;  %v8946_v29 = vpop.permute.xlu1 %8945  ;;  %v9289_v28 = vpack.i.bf16 %v3180_v20, %v3179_v0  ;;  %v3228_v20 = vld [vmem:[#allocation3 + $0xca] sm:$0xff] }
 0x365   : > { %v8941_v46 = vpop.permute.xlu0 %8940  ;;  %v4250_v53 = vsel %vm4241_vm6, %v4217_v19, %v8937_v58  ;;  %v4251_v45 = vsel %vm4241_vm6, %v4218_v14, %v8938_v12  ;;  %v8948_v56 = vunpack.i.h.bf16 %v8946_v29  ;;  %v8947_v22 = vunpack.i.l.bf16 %v8946_v29  ;;  %v3211_v19 = vld [vmem:[#allocation3 + $0x181] sm:$0xff]  ;;  %v3212_v14 = vld [vmem:[#allocation3 + $0x189] sm:$0xff] }
 0x366   : > { %v8943_v49 = vunpack.i.h.bf16 %v8941_v46  ;;  %v8942_v10 = vunpack.i.l.bf16 %v8941_v46  ;;  %9260 = vrot.lane.b32.xlu0 %v12168_v21, %s9582_s22 }
 0x367   : > { %9265 = vrot.lane.b32.xlu1 %v11925_v27, %s9581_s18 }
 0x368   : > { %v4283_v7 = vsel %vm4274_vm7, %v4250_v53, %v8942_v10  ;;  %v4284_v60 = vsel %vm4274_vm7, %v4251_v45, %v8943_v49  ;;  %v8956_v42 = vpop.permute.xlu1 %8955 }
 0x369   : > { %v8951_v41 = vpop.permute.xlu0 %8950  ;;  %v8958_v21 = vunpack.i.h.bf16 %v8956_v42  ;;  %v8957_v51 = vunpack.i.l.bf16 %v8956_v42  ;;  %v4316_v8 = vsel %vm4307_vm8, %v4283_v7, %v8947_v22  ;;  %v4317_v27 = vsel %vm4307_vm8, %v4284_v60, %v8948_v56 }
 0x36a   : > { %v8953_v57 = vunpack.i.h.bf16 %v8951_v41  ;;  %v8952_v18 = vunpack.i.l.bf16 %v8951_v41  ;;  %9270 = vrot.lane.b32.xlu0 %v12178_v38, %s9581_s18  ;;  %v9299_v22 = vpack.i.bf16 %v3212_v14, %v3211_v19 }
 0x36b   : > { %9275 = vrot.lane.b32.xlu1 %v11938_v24, %s9583_s27  ;;  %v2969_v24 = vld [vmem:[#allocation3 + $0x80] sm:$0xff]  ;;  %v4153_v44 = vsel %vm2869_vm2, %v2968_v32, %v8957_v51  ;;  %v3181_v32 = vld [vmem:[#allocation3 + $0x198] sm:$0xff] }
 0x36c   : > { %v4349_v13 = vsel %vm4340_vm9, %v4316_v8, %v8952_v18  ;;  %v4350_v63 = vsel %vm4340_vm9, %v4317_v27, %v8953_v57  ;;  %v8966_v37 = vpop.permute.xlu1 %8965  ;;  %v4154_v61 = vsel %vm2869_vm2, %v2969_v24, %v8958_v21  ;;  %v2970_v27 = vld [vmem:[#allocation3 + $0x90] sm:$0xff] }
 0x36d   : > { %v8961_v35 = vpop.permute.xlu0 %8960  ;;  %v4381_v59 = vpack.c.bf16 %v4350_v63, %v4349_v13  ;;  %v8968_v31 = vunpack.i.h.bf16 %v8966_v37  ;;  %v8967_v33 = vunpack.i.l.bf16 %v8966_v37  ;;  %v3227_v37 = vld [vmem:[#allocation3 + $0xc2] sm:$0xff] }
 0x36e   : > { %v8963_v1 = vunpack.i.h.bf16 %v8961_v35  ;;  %v8962_v43 = vunpack.i.l.bf16 %v8961_v35  ;;  %9280 = vrot.lane.b32.xlu0 %v9279_v26, %s9583_s27 }
 0x36f   : > { %9285 = vrot.lane.b32.xlu1 %v11950_v30, %s9584_s28  ;;  %4597 = vmatmul.mubr.bf16.gmra.mrb[16].mxu0 %v4381_v59  ;;  %v2971_v59 = vld [vmem:[#allocation3 + $0x98] sm:$0xff] }
 0x370   : > { %v4186_v6 = vsel %vm4175_vm4, %v4153_v44, %v8962_v43  ;;  %v4187_v9 = vsel %vm4175_vm4, %v4154_v61, %v8963_v1  ;;  %8608 = vmatprep.mubr.msk.bf16.mxu0 %vm2869_vm2, %v4384_v15  ;;  %v8976_v58 = vpop.permute.xlu1 %8975  ;;  %v3182_v43 = vld [vmem:[#allocation3 + $0x1a0] sm:$0xff] }
 0x371   : > { %v8971_v12 = vpop.permute.xlu0 %8970  ;;  %v4219_v49 = vsel %vm4208_vm5, %v4186_v6, %v8967_v33  ;;  %v4220_v30 = vsel %vm4208_vm5, %v4187_v9, %v8968_v31  ;;  %v8978_v10 = vunpack.i.h.bf16 %v8976_v58  ;;  %v8977_v53 = vunpack.i.l.bf16 %v8976_v58  ;;  %v3213_v15 = vld [vmem:[#allocation3 + $0x199] sm:$0xff]  ;;  %v3214_v61 = vld [vmem:[#allocation3 + $0x1a1] sm:$0xff] }
 0x372   : > { %v8973_v46 = vunpack.i.h.bf16 %v8971_v12  ;;  %v8972_v29 = vunpack.i.l.bf16 %v8971_v12  ;;  %9290 = vrot.lane.b32.xlu0 %v9289_v28, %s9584_s28  ;;  %v4386_v33 = vpack.c.bf16 %v3228_v20, %v3227_v37  ;;  %v9334_v19 = vpack.i.bf16 %v3214_v61, %v3213_v15 }
 0x373   : > { %9295 = vrot.lane.b32.xlu1 %v11956_v2, %s9585_s17 }
 0x374   : > { %v4252_v45 = vsel %vm4241_vm6, %v4219_v49, %v8972_v29  ;;  %v4253_v56 = vsel %vm4241_vm6, %v4220_v30, %v8973_v46  ;;  %v8986_v60 = vpop.permute.xlu1 %8985 }
 0x375   : > { %v8981_v7 = vpop.permute.xlu0 %8980  ;;  %v8988_v57 = vunpack.i.h.bf16 %v8986_v60  ;;  %v8987_v18 = vunpack.i.l.bf16 %v8986_v60  ;;  %v4285_v21 = vsel %vm4274_vm7, %v4252_v45, %v8977_v53  ;;  %v4286_v51 = vsel %vm4274_vm7, %v4253_v56, %v8978_v10 }
 0x376   : > { %v8983_v41 = vunpack.i.h.bf16 %v8981_v7  ;;  %v8982_v42 = vunpack.i.l.bf16 %v8981_v7  ;;  %9300 = vrot.lane.b32.xlu0 %v9299_v22, %s9585_s17 }
 0x377   : > { %9305 = vrot.lane.b32.xlu1 %v12178_v38, %s9579_s29  ;;  %s8650_s29 = sshll.u32 %s9663_s8, 8 }
 0x378   : > { %v4318_v2 = vsel %vm4307_vm8, %v4285_v21, %v8982_v42  ;;  %v4319_v8 = vsel %vm4307_vm8, %v4286_v51, %v8983_v41  ;;  %v8996_v13 = vpop.permute.xlu1 %8995  ;;  %s15130_s23 = scalar_lea.hbm %s15194_s9, %s8650_s29 }
 0x379   : > { %v8991_v52 = vpop.permute.xlu0 %8990  ;;  %v4351_v63 = vsel %vm4340_vm9, %v4318_v2, %v8987_v18  ;;  %v4352_v35 = vsel %vm4340_vm9, %v4319_v8, %v8988_v57  ;;  %v8998_v38 = vunpack.i.h.bf16 %v8996_v13  ;;  %v8997_v24 = vunpack.i.l.bf16 %v8996_v13 }
 0x37a   : > { %v8993_v4 = vunpack.i.h.bf16 %v8991_v52  ;;  %v8992_v0 = vunpack.i.l.bf16 %v8991_v52  ;;  %9310 = vrot.lane.b32.xlu0 %v9279_v26, %s9580_s15  ;;  %v4383_v1 = vpack.c.bf16 %v4352_v35, %v4351_v63  ;;  %v9324_v26 = vpack.i.bf16 %v12091_v11, %v12089_v36 }
 0x37b   : > { %9315 = vrot.lane.b32.xlu1 %v9289_v28, %s9582_s22  ;;  %v9329_v28 = vpack.i.bf16 %v3182_v43, %v3181_v32  ;;  %s327_s22 = scalar_lea.vmem [#allocation8], %s15076_s10 }
 0x37c   : > { %v4156_v44 = vsel %vm2869_vm2, %v2971_v59, %v8993_v4  ;;  %v4155_v31 = vsel %vm2869_vm2, %v2970_v27, %v8992_v0  ;;  %4605 = vmatmul.mubr.bf16.gmra.mrb[20].mxu0 %v4383_v1  ;;  %v9006_v9 = vpop.permute.xlu1 %9005 }
 0x37d   : > { %v9001_v6 = vpop.permute.xlu0 %9000  ;;  %8609 = vmatprep.mubr.msk.bf16.mxu0 %vm2869_vm2, %v4386_v33  ;;  %v4189_v14 = vsel %vm4175_vm4, %v4156_v44, %v8998_v38  ;;  %v4188_v46 = vsel %vm4175_vm4, %v4155_v31, %v8997_v24  ;;  %v9008_v29 = vunpack.i.h.bf16 %v9006_v9  ;;  %v9007_v49 = vunpack.i.l.bf16 %v9006_v9  ;;  %v2972_v9 = vld [vmem:[#allocation3 + $0xa8] sm:$0xff] }
 0x37e   : > { %v9003_v12 = vunpack.i.h.bf16 %v9001_v6  ;;  %v9002_v58 = vunpack.i.l.bf16 %v9001_v6  ;;  %9320 = vrot.lane.b32.xlu0 %v9299_v22, %s9581_s18 }
 0x37f   : > { %9325 = vrot.lane.b32.xlu1 %v9324_v26, %s9583_s27  ;;  %v2973_v26 = vld [vmem:[#allocation3 + $0xb0] sm:$0xff]  ;;  %s8490_s27 = sshll.u32 %s327_s22, 4  ;;  %s15132_s27 = int_to_ptr.vmem [resolvable:$true] %s8490_s27 }
 0x380   : > { %v4221_v30 = vsel %vm4208_vm5, %v4188_v46, %v9002_v58  ;;  %v4222_v10 = vsel %vm4208_vm5, %v4189_v14, %v9003_v12  ;;  %v9016_v45 = vpop.permute.xlu1 %9015  ;;  %s9513_s25 = scalar_lea.vmem %s15132_s27, 256 }
 0x381   : > { %v9011_v53 = vpop.permute.xlu0 %9010  ;;  %v4254_v22 = vsel %vm4241_vm6, %v4221_v30, %v9007_v49  ;;  %v4255_v60 = vsel %vm4241_vm6, %v4222_v10, %v9008_v29  ;;  %v9018_v41 = vunpack.i.h.bf16 %v9016_v45  ;;  %v9017_v42 = vunpack.i.l.bf16 %v9016_v45  ;;  %p9514_p11 = scmp.ne.s32.totalorder %s15132_s27, %s9513_s25 }
 0x382   : > { %v9013_v56 = vunpack.i.h.bf16 %v9011_v53  ;;  %v9012_v7 = vunpack.i.l.bf16 %v9011_v53  ;;  %9330 = vrot.lane.b32.xlu0 %v9329_v28, %s9584_s28 }
 0x383   : > { %9335 = vrot.lane.b32.xlu1 %v9334_v19, %s9585_s17  ;;  %p9515_p12 = pnand %p9514_p11, %p9680_p5 }
 0x384   : > { %v4287_v57 = vsel %vm4274_vm7, %v4254_v22, %v9012_v7  ;;  %v4288_v18 = vsel %vm4274_vm7, %v4255_v60, %v9013_v56  ;;  %v9026_v51 = vpop.permute.xlu1 %9025 }
 0x385   : > { %v9021_v21 = vpop.permute.xlu0 %9020  ;;  %v4320_v27 = vsel %vm4307_vm8, %v4287_v57, %v9017_v42  ;;  %v4321_v52 = vsel %vm4307_vm8, %v4288_v18, %v9018_v41  ;;  %v9028_v38 = vunpack.i.h.bf16 %v9026_v51  ;;  %v9027_v24 = vunpack.i.l.bf16 %v9026_v51  ;;  %p9516_p13 = pneg %p9515_p12 }
 0x386   : > { %v9023_v2 = vunpack.i.h.bf16 %v9021_v21  ;;  %v9022_v8 = vunpack.i.l.bf16 %v9021_v21 }
 0x387   : > { %v4158_v48 = vsel %vm2869_vm2, %v2973_v26, %v9028_v38 }
 0x388   : > { %v4353_v13 = vsel %vm4340_vm9, %v4320_v27, %v9022_v8  ;;  %v4354_v63 = vsel %vm4340_vm9, %v4321_v52, %v9023_v2  ;;  %v9036_v37 = vpop.permute.xlu1 %9035 }
 0x389   : > { %v9031_v35 = vpop.permute.xlu0 %9030  ;;  %v4385_v59 = vpack.c.bf16 %v4354_v63, %v4353_v13  ;;  %v9038_v44 = vunpack.i.h.bf16 %v9036_v37  ;;  %v9037_v31 = vunpack.i.l.bf16 %v9036_v37 }
 0x38a   : > { %v9033_v1 = vunpack.i.h.bf16 %v9031_v35  ;;  %v9032_v43 = vunpack.i.l.bf16 %v9031_v35 }
 0x38b   : > { %4613 = vmatmul.mubr.bf16.gmra.mrb[24].mxu0 %v4385_v59  ;;  %v4191_v53 = vsel %vm4175_vm4, %v4158_v48, %v9038_v44 }
 0x38c   : > { %8610 = vmatprep.mubr.msk.bf16.mxu0 %vm2869_vm2, %v4388_v39  ;;  %v9046_v0 = vpop.permute.xlu1 %9045  ;;  %v4157_v39 = vsel %vm2869_vm2, %v2972_v9, %v9027_v24  ;;  %v4165_v19 = vsel %vm2869_vm2, %v12141_v34, %v9032_v43  ;;  %v4166_v14 = vsel %vm2869_vm2, %v12143_v62, %v9033_v1 }
 0x38d   : > { %v9041_v4 = vpop.permute.xlu0 %9040  ;;  %v9048_v12 = vunpack.i.h.bf16 %v9046_v0  ;;  %v9047_v40 = vunpack.i.l.bf16 %v9046_v0  ;;  %v4190_v10 = vsel %vm4175_vm4, %v4157_v39, %v9037_v31 }
 0x38e   : > { %v9043_v33 = vunpack.i.h.bf16 %v9041_v4  ;;  %v9042_v6 = vunpack.i.l.bf16 %v9041_v4 }
 0x38f   : > { %v4223_v7 = vsel %vm4208_vm5, %v4190_v10, %v9047_v40  ;;  %v4224_v22 = vsel %vm4208_vm5, %v4191_v53, %v9048_v12 }
 0x390   : > { %v9056_v32 = vpop.permute.xlu1 %9055  ;;  %v4198_v45 = vsel %vm4175_vm4, %v4165_v19, %v9042_v6  ;;  %v4199_v56 = vsel %vm4175_vm4, %v4166_v14, %v9043_v33 }
 0x391   : > { %v9051_v20 = vpop.permute.xlu0 %9050  ;;  %v9058_v58 = vunpack.i.h.bf16 %v9056_v32  ;;  %v9057_v28 = vunpack.i.l.bf16 %v9056_v32 }
 0x392   : > { %v9053_v41 = vunpack.i.h.bf16 %v9051_v20  ;;  %v9052_v62 = vunpack.i.l.bf16 %v9051_v20 }
 0x393   : > { %v4256_v42 = vsel %vm4241_vm6, %v4223_v7, %v9057_v28  ;;  %v4257_v57 = vsel %vm4241_vm6, %v4224_v22, %v9058_v58  ;;  %v2975_v7 = vld [vmem:[#allocation3 + $0xc8] sm:$0xff] }
 0x394   : > { %v9066_v61 = vpop.permute.xlu1 %9065  ;;  %v4232_v20 = vsel %vm4208_vm5, %v4199_v56, %v9053_v41  ;;  %v4231_v32 = vsel %vm4208_vm5, %v4198_v45, %v9052_v62  ;;  %v2974_v56 = vld [vmem:[#allocation3 + $0xc0] sm:$0xff] }
 0x395   : > { %v9061_v15 = vpop.permute.xlu0 %9060  ;;  %v9068_v46 = vunpack.i.h.bf16 %v9066_v61  ;;  %v9067_v29 = vunpack.i.l.bf16 %v9066_v61  ;;  %v2982_v62 = vld [vmem:[#allocation3 + $0x120] sm:$0xff] }
 0x396   : > { %v9063_v18 = vunpack.i.h.bf16 %v9061_v15  ;;  %v9062_v21 = vunpack.i.l.bf16 %v9061_v15 }
 0x397   : > { %v4289_v51 = vsel %vm4274_vm7, %v4256_v42, %v9067_v29  ;;  %v4290_v2 = vsel %vm4274_vm7, %v4257_v57, %v9068_v46  ;;  %v15921_v46 = vmov 0.0   ;;  %v2983_v42 = vld [vmem:[#allocation3 + $0x128] sm:$0xff] }
 0x398   : > { %v9076_v30 = vpop.permute.xlu1 %9075  ;;  %v4264_v1 = vsel %vm4241_vm6, %v4231_v32, %v9062_v21  ;;  %v4265_v43 = vsel %vm4241_vm6, %v4232_v20, %v9063_v18  ;;  %4846 = vst.msk [vmem:[#allocation5 + $0x8] sm:$0x3] %vm4845_vm10, %v15921_v46  ;;  %4848 = vst.msk [vmem:[#allocation5 + $0x18] sm:$0x3] %vm4845_vm10, %v15921_v46 }
 0x399   : > { %v9071_v49 = vpop.permute.xlu0 %9070  ;;  %v9078_v34 = vunpack.i.h.bf16 %v9076_v30  ;;  %v9077_v60 = vunpack.i.l.bf16 %v9076_v30  ;;  %4850 = vst.msk [vmem:[#allocation5 + $0x28] sm:$0x3] %vm4845_vm10, %v15921_v46  ;;  %4852 = vst.msk [vmem:[#allocation5 + $0x38] sm:$0x3] %vm4845_vm10, %v15921_v46 }
 0x39a   : > { %v9073_v52 = vunpack.i.h.bf16 %v9071_v49  ;;  %v9072_v13 = vunpack.i.l.bf16 %v9071_v49  ;;  %4854 = vst.msk [vmem:[#allocation5 + $0x48] sm:$0x3] %vm4845_vm10, %v15921_v46  ;;  %4856 = vst.msk [vmem:[#allocation5 + $0x58] sm:$0x3] %vm4845_vm10, %v15921_v46 }
 0x39b   : > { %v4322_v4 = vsel %vm4307_vm8, %v4289_v51, %v9077_v60  ;;  %v4323_v0 = vsel %vm4307_vm8, %v4290_v2, %v9078_v34  ;;  %4858 = vst.msk [vmem:[#allocation5 + $0x68] sm:$0x3] %vm4845_vm10, %v15921_v46  ;;  %4860 = vst.msk [vmem:[#allocation5 + $0x78] sm:$0x3] %vm4845_vm10, %v15921_v46 }
 0x39c   : > { %v9086_v27 = vpop.permute.xlu1 %9085  ;;  %v4297_v31 = vsel %vm4274_vm7, %v4264_v1, %v9072_v13  ;;  %v4298_v33 = vsel %vm4274_vm7, %v4265_v43, %v9073_v52  ;;  %4862 = vst.msk [vmem:[#allocation5 + $0x88] sm:$0x3] %vm4845_vm10, %v15921_v46  ;;  %4864 = vst.msk [vmem:[#allocation5 + $0x98] sm:$0x3] %vm4845_vm10, %v15921_v46 }
 0x39d   : > { %v9081_v8 = vpop.permute.xlu0 %9080  ;;  %v9088_v63 = vunpack.i.h.bf16 %v9086_v27  ;;  %v9087_v35 = vunpack.i.l.bf16 %v9086_v27  ;;  %5521 = vst.msk [vmem:[#allocation6 + $0xa0] sm:$0xf] %vm5502_vm11, %v15921_v46  ;;  %5524 = vst.msk [vmem:[#allocation6 + $0xb8] sm:$0xf] %vm5502_vm11, %v15921_v46 }
 0x39e   : > { %v9083_v37 = vunpack.i.h.bf16 %v9081_v8  ;;  %v9082_v59 = vunpack.i.l.bf16 %v9081_v8  ;;  %5503 = vst.msk [vmem:[#allocation6 + $0x10] sm:$0xf] %vm5502_vm11, %v15921_v46  ;;  %5506 = vst.msk [vmem:[#allocation6 + $0x28] sm:$0xf] %vm5502_vm11, %v15921_v46 }
 0x39f   : > { %v4355_v38 = vsel %vm4340_vm9, %v4322_v4, %v9087_v35  ;;  %v4356_v24 = vsel %vm4340_vm9, %v4323_v0, %v9088_v63  ;;  %5509 = vst.msk [vmem:[#allocation6 + $0x40] sm:$0xf] %vm5502_vm11, %v15921_v46  ;;  %5512 = vst.msk [vmem:[#allocation6 + $0x58] sm:$0xf] %vm5502_vm11, %v15921_v46 }
 0x3a0   : > { %v9096_v61 = vpop.permute.xlu1 %9095  ;;  %v4387_v44 = vpack.c.bf16 %v4356_v24, %v4355_v38  ;;  %v4330_v26 = vsel %vm4307_vm8, %v4297_v31, %v9082_v59  ;;  %v4331_v12 = vsel %vm4307_vm8, %v4298_v33, %v9083_v37  ;;  %5515 = vst.msk [vmem:[#allocation6 + $0x70] sm:$0xf] %vm5502_vm11, %v15921_v46  ;;  %5518 = vst.msk [vmem:[#allocation6 + $0x88] sm:$0xf] %vm5502_vm11, %v15921_v46 }
 0x3a1   : > { %v9091_v15 = vpop.permute.xlu0 %9090  ;;  %v9097_v25 = vunpack.i.l.bf16 %v9096_v61  ;;  %5527 = vst.msk [vmem:[#allocation6 + $0xd0] sm:$0xf] %vm5502_vm11, %v15921_v46  ;;  %5530 = vst.msk [vmem:[#allocation6 + $0xe8] sm:$0xf] %vm5502_vm11, %v15921_v46 }
 0x3a2   : > { %v9093_v6 = vunpack.i.h.bf16 %v9091_v15  ;;  %v9092_v9 = vunpack.i.l.bf16 %v9091_v15  ;;  %4621 = vmatmul.mubr.bf16.gmra.mrb[28].mxu0 %v4387_v44  ;;  %5533 = vst.msk [vmem:[#allocation6 + $0x100] sm:$0xf] %vm5502_vm11, %v15921_v46  ;;  %5536 = vst.msk [vmem:[#allocation6 + $0x118] sm:$0xf] %vm5502_vm11, %v15921_v46 }
 0x3a3   : > { %8611 = vmatprep.mubr.msk.bf16.mxu0 %vm2869_vm2, %v4390_v17  ;;  %v9098_v17 = vunpack.i.h.bf16 %v9096_v61  ;;  %v4159_v41 = vsel %vm2869_vm2, %v2974_v56, %v9097_v25  ;;  %5539 = vst.msk [vmem:[#allocation6 + $0x130] sm:$0xf] %vm5502_vm11, %v15921_v46  ;;  %5542 = vst.msk [vmem:[#allocation6 + $0x148] sm:$0xf] %vm5502_vm11, %v15921_v46 }
 0x3a4   : > { %v4363_v40 = vsel %vm4340_vm9, %v4330_v26, %v9092_v9  ;;  %v4364_v48 = vsel %vm4340_vm9, %v4331_v12, %v9093_v6  ;;  %v9106_v58 = vpop.permute.xlu1 %9105  ;;  %5545 = vst.msk [vmem:[#allocation6 + $0x160] sm:$0xf] %vm5502_vm11, %v15921_v46  ;;  %5548 = vst.msk [vmem:[#allocation6 + $0x178] sm:$0xf] %vm5502_vm11, %v15921_v46 }
 0x3a5   : > { %v9101_v39 = vpop.permute.xlu0 %9100  ;;  %v4395_v28 = vpack.c.bf16 %v4364_v48, %v4363_v40  ;;  %v9108_v30 = vunpack.i.h.bf16 %v9106_v58  ;;  %v9107_v10 = vunpack.i.l.bf16 %v9106_v58  ;;  %v4160_v60 = vsel %vm2869_vm2, %v2975_v7, %v9098_v17  ;;  %v3233_v40 = vld [vmem:[#allocation3 + $0x10a] sm:$0xff]  ;;  %v3234_v17 = vld [vmem:[#allocation3 + $0x112] sm:$0xff]  ;;  %5551 = vst.msk [vmem:[#allocation6 + $0x190] sm:$0xf] %vm5502_vm11, %v15921_v46  ;;  %5554 = vst.msk [vmem:[#allocation6 + $0x1a8] sm:$0xf] %vm5502_vm11, %v15921_v46 }
 0x3a6   : > { %v9103_v16 = vunpack.i.h.bf16 %v9101_v39  ;;  %5557 = vst.msk [vmem:[#allocation6 + $0x1c0] sm:$0xf] %vm5502_vm11, %v15921_v46  ;;  %5560 = vst.msk [vmem:[#allocation6 + $0x1d8] sm:$0xf] %vm5502_vm11, %v15921_v46 }
 0x3a7   : > { %4653 = vmatmul.mubr.bf16.vlgmr.msra.gmra.mrb[0].mxu1 %v4395_v28  ;;  %v4192_v13 = vsel %vm4175_vm4, %v4159_v41, %v9107_v10  ;;  %v4193_v63 = vsel %vm4175_vm4, %v4160_v60, %v9108_v30  ;;  %v4392_v30 = vpack.c.bf16 %v3234_v17, %v3233_v40 }
 0x3a8   : > { %8615 = vmatprep.mubr.msk.bf16.mxu1 %vm2869_vm2, %v4398_v5  ;;  %v9116_v14 = vpop.permute.xlu1 %9115  ;;  %v9102_v5 = vunpack.i.l.bf16 %v9101_v39  ;;  %v4168_v21 = vsel %vm2869_vm2, %v2983_v42, %v9103_v16 }
 0x3a9   : > { %v9111_v19 = vpop.permute.xlu0 %9110  ;;  %v9118_v22 = vunpack.i.h.bf16 %v9116_v14  ;;  %v9117_v34 = vunpack.i.l.bf16 %v9116_v14 }
 0x3aa   : > { %v9113_v53 = vunpack.i.h.bf16 %v9111_v19  ;;  %v9112_v45 = vunpack.i.l.bf16 %v9111_v19  ;;  %v4167_v51 = vsel %vm2869_vm2, %v2982_v62, %v9102_v5 }
 0x3ab   : > { %v4225_v59 = vsel %vm4208_vm5, %v4192_v13, %v9117_v34  ;;  %v4226_v4 = vsel %vm4208_vm5, %v4193_v63, %v9118_v22 }
 0x3ac   : > { %v9126_v3 = vpop.permute.xlu1 %9125  ;;  %v4200_v35 = vsel %vm4175_vm4, %v4167_v51, %v9112_v45  ;;  %v4201_v37 = vsel %vm4175_vm4, %v4168_v21, %v9113_v53 }
 0x3ad   : > { %v9121_v50 = vpop.permute.xlu0 %9120  ;;  %v9128_v57 = vunpack.i.h.bf16 %v9126_v3  ;;  %v9127_v18 = vunpack.i.l.bf16 %v9126_v3 }
 0x3ae   : > { %v9123_v32 = vunpack.i.h.bf16 %v9121_v50  ;;  %v9122_v38 = vunpack.i.l.bf16 %v9121_v50 }
 0x3af   : > { %v4258_v24 = vsel %vm4241_vm6, %v4225_v59, %v9127_v18  ;;  %v4259_v1 = vsel %vm4241_vm6, %v4226_v4, %v9128_v57 }
 0x3b0   : > { %v9136_v49 = vpop.permute.xlu1 %9135  ;;  %v4234_v19 = vsel %vm4208_vm5, %v4201_v37, %v9123_v32  ;;  %v4233_v14 = vsel %vm4208_vm5, %v4200_v35, %v9122_v38  ;;  %v2984_v38 = vld [vmem:[#allocation3 + $0x138] sm:$0xff] }
 0x3b1   : > { %v9131_v29 = vpop.permute.xlu0 %9130  ;;  %v9138_v2 = vunpack.i.h.bf16 %v9136_v49  ;;  %v9137_v8 = vunpack.i.l.bf16 %v9136_v49 }
 0x3b2   : > { %v9133_v43 = vunpack.i.h.bf16 %v9131_v29  ;;  %v9132_v15 = vunpack.i.l.bf16 %v9131_v29 }
 0x3b3   : > { %v4291_v61 = vsel %vm4274_vm7, %v4258_v24, %v9137_v8  ;;  %v4292_v44 = vsel %vm4274_vm7, %v4259_v1, %v9138_v2  ;;  %v2985_v24 = vld [vmem:[#allocation3 + $0x140] sm:$0xff] }
 0x3b4   : > { %v9146_v52 = vpop.permute.xlu1 %9145  ;;  %v4266_v25 = vsel %vm4241_vm6, %v4233_v14, %v9132_v15  ;;  %v4267_v16 = vsel %vm4241_vm6, %v4234_v19, %v9133_v43 }
 0x3b5   : > { %v9141_v27 = vpop.permute.xlu0 %9140  ;;  %v9148_v0 = vunpack.i.h.bf16 %v9146_v52  ;;  %v9147_v20 = vunpack.i.l.bf16 %v9146_v52 }
 0x3b6   : > { %v9143_v6 = vunpack.i.h.bf16 %v9141_v27  ;;  %v9142_v9 = vunpack.i.l.bf16 %v9141_v27 }
 0x3b7   : > { %v4324_v48 = vsel %vm4307_vm8, %v4291_v61, %v9147_v20  ;;  %v4325_v39 = vsel %vm4307_vm8, %v4292_v44, %v9148_v0  ;;  %v2976_v0 = vld [vmem:[#allocation3 + $0xd8] sm:$0xff]  ;;  %v2977_v20 = vld [vmem:[#allocation3 + $0xe0] sm:$0xff] }
 0x3b8   : > { %v9156_v33 = vpop.permute.xlu1 %9155  ;;  %v4299_v10 = vsel %vm4274_vm7, %v4266_v25, %v9142_v9  ;;  %v4300_v53 = vsel %vm4274_vm7, %v4267_v16, %v9143_v6 }
 0x3b9   : > { %v9151_v31 = vpop.permute.xlu0 %9150  ;;  %v9158_v26 = vunpack.i.h.bf16 %v9156_v33  ;;  %v9157_v12 = vunpack.i.l.bf16 %v9156_v33 }
 0x3ba   : > { %v9153_v58 = vunpack.i.h.bf16 %v9151_v31  ;;  %v9152_v28 = vunpack.i.l.bf16 %v9151_v31 }
 0x3bb   : > { %v4357_v50 = vsel %vm4340_vm9, %v4324_v48, %v9157_v12  ;;  %v4358_v3 = vsel %vm4340_vm9, %v4325_v39, %v9158_v26 }
 0x3bc   : > { %v9166_v29 = vpop.permute.xlu1 %9165  ;;  %v4389_v49 = vpack.c.bf16 %v4358_v3, %v4357_v50  ;;  %v4333_v7 = vsel %vm4307_vm8, %v4300_v53, %v9153_v58  ;;  %v4332_v22 = vsel %vm4307_vm8, %v4299_v10, %v9152_v28 }
 0x3bd   : > { %v9161_v5 = vpop.permute.xlu0 %9160  ;;  %v9168_v2 = vunpack.i.h.bf16 %v9166_v29  ;;  %v9167_v8 = vunpack.i.l.bf16 %v9166_v29 }
 0x3be   : > { %v9163_v45 = vunpack.i.h.bf16 %v9161_v5  ;;  %v9162_v56 = vunpack.i.l.bf16 %v9161_v5  ;;  %4629 = vmatmul.mubr.bf16.gmra.mrb[32].mxu0 %v4389_v49 }
 0x3bf   : > { %8612 = vmatprep.mubr.msk.bf16.mxu0 %vm2869_vm2, %v4392_v30  ;;  %v4162_v47 = vsel %vm2869_vm2, %v2977_v20, %v9168_v2 }
 0x3c0   : > { %v4365_v34 = vsel %vm4340_vm9, %v4332_v22, %v9162_v56  ;;  %v4366_v60 = vsel %vm4340_vm9, %v4333_v7, %v9163_v45  ;;  %v9176_v62 = vpop.permute.xlu1 %9175  ;;  %v3235_v56 = vld [vmem:[#allocation3 + $0x122] sm:$0xff] }
 0x3c1   : > { %v9171_v41 = vpop.permute.xlu0 %9170  ;;  %v4397_v42 = vpack.c.bf16 %v4366_v60, %v4365_v34  ;;  %v9178_v35 = vunpack.i.h.bf16 %v9176_v62  ;;  %v9177_v37 = vunpack.i.l.bf16 %v9176_v62 }
 0x3c2   : > { %v9173_v27 = vunpack.i.h.bf16 %v9171_v41  ;;  %v9172_v52 = vunpack.i.l.bf16 %v9171_v41 }
 0x3c3   : > { %4661 = vmatmul.mubr.bf16.gmra.mrb[4].mxu1 %v4397_v42  ;;  %v4195_v26 = vsel %vm4175_vm4, %v4162_v47, %v9178_v35 }
 0x3c4   : > { %8616 = vmatprep.mubr.msk.bf16.mxu1 %vm2869_vm2, %v4400_v55  ;;  %v9186_v18 = vpop.permute.xlu1 %9185  ;;  %v4161_v55 = vsel %vm2869_vm2, %v2976_v0, %v9167_v8  ;;  %v4170_v15 = vsel %vm2869_vm2, %v2985_v24, %v9173_v27  ;;  %v4169_v61 = vsel %vm2869_vm2, %v2984_v38, %v9172_v52 }
 0x3c5   : > { %v9181_v57 = vpop.permute.xlu0 %9180  ;;  %v9188_v32 = vunpack.i.h.bf16 %v9186_v18  ;;  %v9187_v23 = vunpack.i.l.bf16 %v9186_v18  ;;  %v4194_v9 = vsel %vm4175_vm4, %v4161_v55, %v9177_v37  ;;  %v3236_v18 = vld [vmem:[#allocation3 + $0x12a] sm:$0xff] }
 0x3c6   : > { %v9183_v59 = vunpack.i.h.bf16 %v9181_v57  ;;  %v9182_v4 = vunpack.i.l.bf16 %v9181_v57  ;;  %v4394_v52 = vpack.c.bf16 %v3236_v18, %v3235_v56 }
 0x3c7   : > { %v4227_v48 = vsel %vm4208_vm5, %v4194_v9, %v9187_v23  ;;  %v4228_v39 = vsel %vm4208_vm5, %v4195_v26, %v9188_v32 }
 0x3c8   : > { %v9196_v51 = vpop.permute.xlu1 %9195  ;;  %v4202_v12 = vsel %vm4175_vm4, %v4169_v61, %v9182_v4  ;;  %v4203_v40 = vsel %vm4175_vm4, %v4170_v15, %v9183_v59 }
 0x3c9   : > { %v9191_v21 = vpop.permute.xlu0 %9190  ;;  %v9198_v1 = vunpack.i.h.bf16 %v9196_v51  ;;  %v9197_v43 = vunpack.i.l.bf16 %v9196_v51 }
 0x3ca   : > { %v9193_v19 = vunpack.i.h.bf16 %v9191_v21  ;;  %v9192_v14 = vunpack.i.l.bf16 %v9191_v21 }
 0x3cb   : > { %v4260_v50 = vsel %vm4241_vm6, %v4227_v48, %v9197_v43  ;;  %v4261_v3 = vsel %vm4241_vm6, %v4228_v39, %v9198_v1  ;;  %v2979_v48 = vld [vmem:[#allocation3 + $0xf8] sm:$0xff] }
 0x3cc   : > { %v9206_v63 = vpop.permute.xlu1 %9205  ;;  %v4236_v41 = vsel %vm4208_vm5, %v4203_v40, %v9193_v19  ;;  %v4235_v62 = vsel %vm4208_vm5, %v4202_v12, %v9192_v14  ;;  %v2978_v40 = vld [vmem:[#allocation3 + $0xf0] sm:$0xff] }
 0x3cd   : > { %v9201_v13 = vpop.permute.xlu0 %9200  ;;  %v9208_v44 = vunpack.i.h.bf16 %v9206_v63  ;;  %v9207_v31 = vunpack.i.l.bf16 %v9206_v63 }
 0x3ce   : > { %v9203_v17 = vunpack.i.h.bf16 %v9201_v13  ;;  %v9202_v25 = vunpack.i.l.bf16 %v9201_v13 }
 0x3cf   : > { %v4293_v16 = vsel %vm4274_vm7, %v4260_v50, %v9207_v31  ;;  %v4294_v5 = vsel %vm4274_vm7, %v4261_v3, %v9208_v44 }
 0x3d0   : > { %v9216_v6 = vpop.permute.xlu1 %9215  ;;  %v4268_v21 = vsel %vm4241_vm6, %v4235_v62, %v9202_v25  ;;  %v4269_v51 = vsel %vm4241_vm6, %v4236_v41, %v9203_v17 }
 0x3d1   : > { %v9211_v33 = vpop.permute.xlu0 %9210  ;;  %v9218_v58 = vunpack.i.h.bf16 %v9216_v6  ;;  %v9217_v28 = vunpack.i.l.bf16 %v9216_v6 }
 0x3d2   : > { %v9213_v30 = vunpack.i.h.bf16 %v9211_v33  ;;  %v9212_v10 = vunpack.i.l.bf16 %v9211_v33 }
 0x3d3   : > { %v4326_v7 = vsel %vm4307_vm8, %v4293_v16, %v9217_v28  ;;  %v4327_v22 = vsel %vm4307_vm8, %v4294_v5, %v9218_v58  ;;  %v2986_v58 = vld [vmem:[#allocation3 + $0x150] sm:$0xff]  ;;  %v2987_v28 = vld [vmem:[#allocation3 + $0x158] sm:$0xff] }
 0x3d4   : > { %v9226_v49 = vpop.permute.xlu1 %9225  ;;  %v4301_v13 = vsel %vm4274_vm7, %v4268_v21, %v9212_v10  ;;  %v4302_v63 = vsel %vm4274_vm7, %v4269_v51, %v9213_v30 }
 0x3d5   : > { %v9221_v29 = vpop.permute.xlu0 %9220  ;;  %v9228_v53 = vunpack.i.h.bf16 %v9226_v49  ;;  %v9227_v45 = vunpack.i.l.bf16 %v9226_v49 }
 0x3d6   : > { %v9223_v34 = vunpack.i.h.bf16 %v9221_v29  ;;  %v9222_v60 = vunpack.i.l.bf16 %v9221_v29 }
 0x3d7   : > { %v4359_v42 = vsel %vm4340_vm9, %v4326_v7, %v9227_v45  ;;  %v4360_v57 = vsel %vm4340_vm9, %v4327_v22, %v9228_v53 }
 0x3d8   : > { %v9236_v8 = vpop.permute.xlu1 %9235  ;;  %v4391_v27 = vpack.c.bf16 %v4360_v57, %v4359_v42  ;;  %v4335_v59 = vsel %vm4307_vm8, %v4302_v63, %v9223_v34  ;;  %v4334_v4 = vsel %vm4307_vm8, %v4301_v13, %v9222_v60 }
 0x3d9   : > { %v9231_v2 = vpop.permute.xlu0 %9230  ;;  %v9238_v43 = vunpack.i.h.bf16 %v9236_v8  ;;  %v9237_v15 = vunpack.i.l.bf16 %v9236_v8 }
 0x3da   : > { %v9233_v35 = vunpack.i.h.bf16 %v9231_v2  ;;  %v9232_v37 = vunpack.i.l.bf16 %v9231_v2  ;;  %4637 = vmatmul.mubr.bf16.gmra.mrb[36].mxu0 %v4391_v27 }
 0x3db   : > { %8613 = vmatprep.mubr.msk.bf16.mxu0 %vm2869_vm2, %v4394_v52  ;;  %v4164_v11 = vsel %vm2869_vm2, %v2979_v48, %v9238_v43 }
 0x3dc   : > { %v4367_v0 = vsel %vm4340_vm9, %v4334_v4, %v9232_v37  ;;  %v4368_v20 = vsel %vm4340_vm9, %v4335_v59, %v9233_v35  ;;  %v9246_v23 = vpop.permute.xlu1 %9245 }
 0x3dd   : > { %v9241_v32 = vpop.permute.xlu0 %9240  ;;  %v4399_v47 = vpack.c.bf16 %v4368_v20, %v4367_v0  ;;  %v9248_v6 = vunpack.i.h.bf16 %v9246_v23  ;;  %v9247_v9 = vunpack.i.l.bf16 %v9246_v23 }
 0x3de   : > { %v9243_v61 = vunpack.i.h.bf16 %v9241_v32  ;;  %v9242_v44 = vunpack.i.l.bf16 %v9241_v32 }
 0x3df   : > { %4669 = vmatmul.mubr.bf16.gmra.mrb[8].mxu1 %v4399_v47  ;;  %v4197_v49 = vsel %vm4175_vm4, %v4164_v11, %v9248_v6  ;;  %v2988_v11 = vld [vmem:[#allocation3 + $0x168] sm:$0xff] }
 0x3e0   : > { %8617 = vmatprep.mubr.msk.bf16.mxu1 %vm2869_vm2, %v4402_v54  ;;  %v9256_v38 = vpop.permute.xlu1 %9255  ;;  %v4163_v54 = vsel %vm2869_vm2, %v2978_v40, %v9237_v15  ;;  %v4172_v50 = vsel %vm2869_vm2, %v2987_v28, %v9243_v61  ;;  %v4171_v3 = vsel %vm2869_vm2, %v2986_v58, %v9242_v44 }
 0x3e1   : > { %v9251_v55 = vpop.permute.xlu0 %9250  ;;  %v9258_v39 = vunpack.i.h.bf16 %v9256_v38  ;;  %v9257_v36 = vunpack.i.l.bf16 %v9256_v38  ;;  %v4196_v29 = vsel %vm4175_vm4, %v4163_v54, %v9247_v9  ;;  %v2989_v54 = vld [vmem:[#allocation3 + $0x170] sm:$0xff] }
 0x3e2   : > { %v9253_v26 = vunpack.i.h.bf16 %v9251_v55  ;;  %v9252_v12 = vunpack.i.l.bf16 %v9251_v55 }
 0x3e3   : > { %v4229_v53 = vsel %vm4208_vm5, %v4196_v29, %v9257_v36  ;;  %v4230_v45 = vsel %vm4208_vm5, %v4197_v49, %v9258_v39 }
 0x3e4   : > { %v9266_v1 = vpop.permute.xlu1 %9265  ;;  %v4204_v30 = vsel %vm4175_vm4, %v4171_v3, %v9252_v12  ;;  %v4205_v10 = vsel %vm4175_vm4, %v4172_v50, %v9253_v26 }
 0x3e5   : > { %v9261_v24 = vpop.permute.xlu0 %9260  ;;  %v9268_v19 = vunpack.i.h.bf16 %v9266_v1  ;;  %v9267_v14 = vunpack.i.l.bf16 %v9266_v1  ;;  %v3246_v1 = vld [vmem:[#allocation3 + $0x1a2] sm:$0xff] }
 0x3e6   : > { %v9263_v22 = vunpack.i.h.bf16 %v9261_v24  ;;  %v9262_v34 = vunpack.i.l.bf16 %v9261_v24  ;;  %v3245_v24 = vld [vmem:[#allocation3 + $0x19a] sm:$0xff] }
 0x3e7   : > { %v4262_v60 = vsel %vm4241_vm6, %v4229_v53, %v9267_v14  ;;  %v4263_v41 = vsel %vm4241_vm6, %v4230_v45, %v9268_v19  ;;  %v4404_v40 = vpack.c.bf16 %v3246_v1, %v3245_v24 }
 0x3e8   : > { %v9276_v33 = vpop.permute.xlu1 %9275  ;;  %v4238_v59 = vsel %vm4208_vm5, %v4205_v10, %v9263_v22  ;;  %v4237_v4 = vsel %vm4208_vm5, %v4204_v30, %v9262_v34 }
 0x3e9   : > { %v9271_v31 = vpop.permute.xlu0 %9270  ;;  %v9278_v17 = vunpack.i.h.bf16 %v9276_v33  ;;  %v9277_v25 = vunpack.i.l.bf16 %v9276_v33 }
 0x3ea   : > { %v9273_v62 = vunpack.i.h.bf16 %v9271_v31  ;;  %v9272_v42 = vunpack.i.l.bf16 %v9271_v31 }
 0x3eb   : > { %v4295_v57 = vsel %vm4274_vm7, %v4262_v60, %v9277_v25  ;;  %v4296_v18 = vsel %vm4274_vm7, %v4263_v41, %v9278_v17 }
 0x3ec   : > { %v9286_v5 = vpop.permute.xlu1 %9285  ;;  %v4270_v32 = vsel %vm4241_vm6, %v4237_v4, %v9272_v42  ;;  %v4271_v23 = vsel %vm4241_vm6, %v4238_v59, %v9273_v62 }
 0x3ed   : > { %v9281_v16 = vpop.permute.xlu0 %9280  ;;  %v9288_v56 = vunpack.i.h.bf16 %v9286_v5  ;;  %v9287_v7 = vunpack.i.l.bf16 %v9286_v5 }
 0x3ee   : > { %v9283_v2 = vunpack.i.h.bf16 %v9281_v16  ;;  %v9282_v8 = vunpack.i.l.bf16 %v9281_v16 }
 0x3ef   : > { %v4328_v13 = vsel %vm4307_vm8, %v4295_v57, %v9287_v7  ;;  %v4329_v63 = vsel %vm4307_vm8, %v4296_v18, %v9288_v56 }
 0x3f0   : > { %v9296_v51 = vpop.permute.xlu1 %9295  ;;  %v4303_v43 = vsel %vm4274_vm7, %v4270_v32, %v9282_v8  ;;  %v4304_v15 = vsel %vm4274_vm7, %v4271_v23, %v9283_v2 }
 0x3f1   : > { %v9291_v21 = vpop.permute.xlu0 %9290  ;;  %v9298_v27 = vunpack.i.h.bf16 %v9296_v51  ;;  %v9297_v52 = vunpack.i.l.bf16 %v9296_v51 }
 0x3f2   : > { %v9293_v35 = vunpack.i.h.bf16 %v9291_v21  ;;  %v9292_v37 = vunpack.i.l.bf16 %v9291_v21 }
 0x3f3   : > { %v4361_v0 = vsel %vm4340_vm9, %v4328_v13, %v9297_v52  ;;  %v4362_v20 = vsel %vm4340_vm9, %v4329_v63, %v9298_v27  ;;  %v12434_v52 = vld [vmem:[%s15189_s4] ss:$0 sm:$0xff] }
 0x3f4   : > { %v9306_v55 = vpop.permute.xlu1 %9305  ;;  %v4393_v38 = vpack.c.bf16 %v4362_v20, %v4361_v0  ;;  %v4337_v31 = vsel %vm4307_vm8, %v4304_v15, %v9293_v35  ;;  %v4336_v33 = vsel %vm4307_vm8, %v4303_v43, %v9292_v37 }
 0x3f5   : > { %v9301_v47 = vpop.permute.xlu0 %9300  ;;  %v9308_v6 = vunpack.i.h.bf16 %v9306_v55  ;;  %v9307_v9 = vunpack.i.l.bf16 %v9306_v55 }
 0x3f6   : > { %v9303_v61 = vunpack.i.h.bf16 %v9301_v47  ;;  %v9302_v44 = vunpack.i.l.bf16 %v9301_v47  ;;  %4645 = vmatmul.mubr.bf16.gmra.mrb[40].mxu0 %v4393_v38 }
 0x3f7   : > { %v4174_v19 = vsel %vm2869_vm2, %v2989_v54, %v9308_v6  ;;  %v4173_v14 = vsel %vm2869_vm2, %v2988_v11, %v9307_v9 }
 0x3f8   : > { %v4369_v26 = vsel %vm4340_vm9, %v4336_v33, %v9302_v44  ;;  %v4370_v12 = vsel %vm4340_vm9, %v4337_v31, %v9303_v61  ;;  %v9316_v39 = vpop.permute.xlu1 %9315 }
 0x3f9   : > { %v9311_v48 = vpop.permute.xlu0 %9310  ;;  %v4401_v36 = vpack.c.bf16 %v4370_v12, %v4369_v26  ;;  %v9318_v50 = vunpack.i.h.bf16 %v9316_v39  ;;  %v9317_v3 = vunpack.i.l.bf16 %v9316_v39 }
 0x3fa   : > { %v9313_v58 = vunpack.i.h.bf16 %v9311_v48  ;;  %v9312_v28 = vunpack.i.l.bf16 %v9311_v48 }
 0x3fb   : > { %4677 = vmatmul.mubr.bf16.gmra.mrb[12].mxu1 %v4401_v36 }
 0x3fc   : > { %v4206_v17 = vsel %vm4175_vm4, %v4173_v14, %v9312_v28  ;;  %v4207_v25 = vsel %vm4175_vm4, %v4174_v19, %v9313_v58  ;;  %8618 = vmatprep.mubr.msk.bf16.mxu1 %vm2869_vm2, %v4404_v40  ;;  %v9326_v5 = vpop.permute.xlu1 %9325  ;;  %v4882_v58 = vld [vmem:[#allocation5 + $0x1] sm:$0xff] }
 0x3fd   : > { %v9321_v16 = vpop.permute.xlu0 %9320  ;;  %v4239_v30 = vsel %vm4208_vm5, %v4206_v17, %v9317_v3  ;;  %v4240_v10 = vsel %vm4208_vm5, %v4207_v25, %v9318_v50  ;;  %v9328_v53 = vunpack.i.h.bf16 %v9326_v5  ;;  %v9327_v45 = vunpack.i.l.bf16 %v9326_v5  ;;  %v4890_v50 = vld [vmem:[#allocation5 + $0x2] sm:$0xff] }
 0x3fe   : > { %v9323_v29 = vunpack.i.h.bf16 %v9321_v16  ;;  %v9322_v49 = vunpack.i.l.bf16 %v9321_v16 }
 0x400   : > { %v4272_v56 = vsel %vm4241_vm6, %v4239_v30, %v9322_v49  ;;  %v4273_v7 = vsel %vm4241_vm6, %v4240_v10, %v9323_v29  ;;  %v9336_v34 = vpop.permute.xlu1 %9335 }
 0x401   : > { %v9331_v22 = vpop.permute.xlu0 %9330  ;;  %v9338_v62 = vunpack.i.h.bf16 %v9336_v34  ;;  %v9337_v42 = vunpack.i.l.bf16 %v9336_v34  ;;  %v4305_v57 = vsel %vm4274_vm7, %v4272_v56, %v9327_v45  ;;  %v4306_v18 = vsel %vm4274_vm7, %v4273_v7, %v9328_v53 }
 0x402   : > { %v9333_v60 = vunpack.i.h.bf16 %v9331_v22  ;;  %v9332_v41 = vunpack.i.l.bf16 %v9331_v22 }
 0x404   : > { %v4338_v21 = vsel %vm4307_vm8, %v4305_v57, %v9332_v41  ;;  %v4339_v51 = vsel %vm4307_vm8, %v4306_v18, %v9333_v60 }
 0x405   : > { %v4371_v2 = vsel %vm4340_vm9, %v4338_v21, %v9337_v42  ;;  %v4372_v8 = vsel %vm4340_vm9, %v4339_v51, %v9338_v62 }
 0x406   : > { %v4403_v27 = vpack.c.bf16 %v4372_v8, %v4371_v2  ;;  %v9468_v8 = vld [vmem:[%s15190_s5 + $0x40] sm:$0xff]  }
 0x407   : > { %8651 = vmatprep.subr.bf16.mxu1 %v9468_v8 }
 0x408   : > { %4685 = vmatmul.mubr.bf16.gmra.mrb[16].mxu1 %v4403_v27  ;;  %v9469_v27 = vld [vmem:[%s15190_s5] sm:$0xff]  }
 0x409   : > { %8652 = vmatpush3.bf16.msra.mxu1 %v9469_v27 }
 0x40a   : > { %v4566_v13 = vpop.f32.mrb[0].mxu0 }
 0x40b   : > { %v4567_v63 = vadd.f32 %v12434_v52, %v4566_v13  ;;  %v4568_v35 = vpop.f32.mrb[1].mxu0 }
 0x40c   : > { %v4569_v37 = vpop.f32.mrb[2].mxu0 }
 0x40d   : > { %v4693_v59 = vmax.f32 %v4567_v63, 0.0  ;;  %v4570_v4 = vadd.f32 %v12434_v52, %v4569_v37  ;;  %v4571_v0 = vpop.f32.mrb[3].mxu0 }
 0x40e   : > { %v9471_v0 = vld [vmem:[%s15190_s5 + $0x8] sm:$0xff]  }
 0x40f   : > { %4725 = vst.msk [vmem:[#allocation4] sm:$0xff] %vm4175_vm4, %v4693_v59  ;;  %v4694_v20 = vmax.f32 %v4570_v4, 0.0  ;;  %v9470_v4 = vld [vmem:[%s15190_s5 + $0x48] sm:$0xff]  }
 0x410   : > { %8653 = vmatprep.subr.bf16.mxu1 %v9470_v4 }
 0x411   : > { %4726 = vst.msk [vmem:[#allocation4 + $0x8] sm:$0xff] %vm4175_vm4, %v4694_v20  ;;  %8654 = vmatpush3.bf16.msra.mxu1 %v9471_v0 }
 0x417   : > { %v4574_v32 = vpop.f32.mrb[4].mxu0 }
 0x418   : > { %v4575_v23 = vadd.f32 %v12434_v52, %v4574_v32  ;;  %v4576_v47 = vpop.f32.mrb[5].mxu0  ;;  %v4757_v15 = vld [vmem:[#allocation4] ss:$2 sm:$0xff]  ;;  %v4789_v61 = vld [vmem:[#allocation4 + $0x1] ss:$2 sm:$0xff] }
 0x419   : > { %v4577_v55 = vpop.f32.mrb[6].mxu0  ;;  %v4820_v6 = vmax.f32 %v4757_v15, %v4789_v61  ;;  %v9474_v61 = vld [vmem:[%s15190_s5 + $0x58] sm:$0xff]  }
 0x41a   : > { %v4695_v38 = vmax.f32 %v4575_v23, 0.0  ;;  %v4578_v24 = vadd.f32 %v12434_v52, %v4577_v55  ;;  %v4579_v1 = vpop.f32.mrb[7].mxu0  ;;  %v9472_v55 = vld [vmem:[%s15190_s5 + $0x50] sm:$0xff]  }
 0x41b   : > { %8655 = vmatprep.subr.bf16.mxu1 %v9472_v55 }
 0x41c   : > { %4727 = vst.msk [vmem:[#allocation4 + $0x10] sm:$0xff] %vm4175_vm4, %v4695_v38  ;;  %v4696_v43 = vmax.f32 %v4578_v24, 0.0 }
 0x41e   : > { %4728 = vst.msk [vmem:[#allocation4 + $0x18] sm:$0xff] %vm4175_vm4, %v4696_v43  ;;  %v9473_v43 = vld [vmem:[%s15190_s5 + $0x10] sm:$0xff]  }
 0x41f   : > { %8656 = vmatpush3.bf16.msra.mxu1 %v9473_v43 }
 0x420   : > { %8657 = vmatprep.subr.bf16.mxu1 %v9474_v61 }
 0x425   : > { %v4759_v44 = vld [vmem:[#allocation4 + $0x10] ss:$2 sm:$0xff]  ;;  %v4791_v31 = vld [vmem:[#allocation4 + $0x11] ss:$2 sm:$0xff] }
 0x426   : > { %v4582_v33 = vpop.f32.mrb[8].mxu0  ;;  %v4821_v9 = vmax.f32 %v4759_v44, %v4791_v31  ;;  %v9475_v44 = vld [vmem:[%s15190_s5 + $0x18] sm:$0xff]   ;;  %v9476_v31 = vld [vmem:[%s15190_s5 + $0x60] sm:$0xff]  }
 0x427   : > { %v4583_v26 = vadd.f32 %v12434_v52, %v4582_v33  ;;  %v4584_v12 = vpop.f32.mrb[9].mxu0  ;;  %8658 = vmatpush3.bf16.msra.mxu1 %v9475_v44  ;;  %v9477_v33 = vld [vmem:[%s15190_s5 + $0x20] sm:$0xff]  }
 0x428   : > { %v4585_v40 = vpop.f32.mrb[10].mxu0  ;;  %v4836_v48 = vmax.f32 %v4820_v6, %v4821_v9  ;;  %8659 = vmatprep.subr.bf16.mxu1 %v9476_v31 }
 0x429   : > { %v4697_v39 = vmax.f32 %v4583_v26, 0.0  ;;  %v4586_v36 = vadd.f32 %v12434_v52, %v4585_v40  ;;  %v4587_v11 = vpop.f32.mrb[11].mxu0 }
 0x42a   : > { %4866 = vst.msk [vmem:[#allocation5 + $0x11] sm:$0xff] %vm4175_vm4, %v4836_v48  ;;  %v9478_v48 = vld [vmem:[%s15190_s5 + $0x68] sm:$0xff]  }
 0x42b   : > { %4729 = vst.msk [vmem:[#allocation4 + $0x20] sm:$0xff] %vm4175_vm4, %v4697_v39  ;;  %v4698_v54 = vmax.f32 %v4586_v36, 0.0  ;;  %8660 = vmatpush3.bf16.msra.mxu1 %v9477_v33 }
 0x42c   : > { %8661 = vmatprep.subr.bf16.mxu1 %v9478_v48 }
 0x42d   : > { %4730 = vst.msk [vmem:[#allocation4 + $0x28] sm:$0xff] %vm4175_vm4, %v4698_v54 }
 0x431   : > { %v12449_v28 = vld [vmem:[#allocation5 + $0x11] sm:$0xff] }
 0x432   : > { %v9344_v19 = vpack.i.bf16 %v12449_v28, %v4882_v58  ;;  %v4891_v3 = vld [vmem:[#allocation5 + $0x12] sm:$0xff]  ;;  %v9479_v58 = vld [vmem:[%s15190_s5 + $0x28] sm:$0xff]  }
 0x433   : > { %v4590_v14 = vpop.f32.mrb[12].mxu0  ;;  %v9354_v30 = vpack.i.bf16 %v4891_v3, %v4890_v50  ;;  %v12471_v63 = vld [vmem:[#allocation5 + $0x10] sm:$0xff]  ;;  %8662 = vmatpush3.bf16.msra.mxu1 %v9479_v58 }
 0x434   : > { %v4591_v17 = vadd.f32 %v12434_v52, %v4590_v14  ;;  %v4592_v25 = vpop.f32.mrb[13].mxu0  ;;  %9345 = vrot.lane.b32.xlu1 %v9344_v19, %s9580_s15  ;;  %v4761_v53 = vld [vmem:[#allocation4 + $0x20] ss:$2 sm:$0xff]  ;;  %v4793_v45 = vld [vmem:[#allocation4 + $0x21] ss:$2 sm:$0xff] }
 0x435   : > { %v4593_v16 = vpop.f32.mrb[14].mxu0  ;;  %v4822_v34 = vmax.f32 %v4761_v53, %v4793_v45  ;;  %v9480_v25 = vld [vmem:[%s15190_s5 + $0x70] sm:$0xff]  }
 0x436   : > { %v4699_v5 = vmax.f32 %v4591_v17, 0.0  ;;  %v4594_v29 = vadd.f32 %v12434_v52, %v4593_v16  ;;  %v4595_v49 = vpop.f32.mrb[15].mxu0  ;;  %8663 = vmatprep.subr.bf16.mxu1 %v9480_v25 }
 0x437   : > { %v9483_v49 = vld [vmem:[%s15190_s5 + $0x38] sm:$0xff]  }
 0x438   : > { %4731 = vst.msk [vmem:[#allocation4 + $0x30] sm:$0xff] %vm4175_vm4, %v4699_v5  ;;  %v4700_v10 = vmax.f32 %v4594_v29, 0.0  ;;  %9355 = vrot.lane.b32.xlu1 %v9354_v30, %s9581_s18  ;;  %v9481_v5 = vld [vmem:[%s15190_s5 + $0x30] sm:$0xff]   ;;  %v9482_v29 = vld [vmem:[%s15190_s5 + $0x78] sm:$0xff]  }
 0x439   : > { %8664 = vmatpush3.bf16.msra.mxu1 %v9481_v5 }
 0x43a   : > { %4732 = vst.msk [vmem:[#allocation4 + $0x38] sm:$0xff] %vm4175_vm4, %v4700_v10  ;;  %8665 = vmatprep.subr.bf16.mxu1 %v9482_v29 }
 0x43d   : > { %8666 = vmatpush3.bf16.msra.mxu1 %v9483_v49 }
 0x441   : > { %v4763_v56 = vld [vmem:[#allocation4 + $0x30] ss:$2 sm:$0xff]  ;;  %v4795_v7 = vld [vmem:[#allocation4 + $0x31] ss:$2 sm:$0xff] }
 0x442   : > { %v4598_v22 = vpop.f32.mrb[16].mxu0  ;;  %v4823_v60 = vmax.f32 %v4763_v56, %v4795_v7 }
 0x443   : > { %v4599_v41 = vadd.f32 %v12434_v52, %v4598_v22  ;;  %v4600_v62 = vpop.f32.mrb[17].mxu0 }
 0x444   : > { %v4601_v42 = vpop.f32.mrb[18].mxu0  ;;  %v4837_v57 = vmax.f32 %v4822_v34, %v4823_v60 }
 0x445   : > { %v4701_v18 = vmax.f32 %v4599_v41, 0.0  ;;  %v4602_v21 = vadd.f32 %v12434_v52, %v4601_v42  ;;  %v4603_v51 = vpop.f32.mrb[19].mxu0 }
 0x446   : > { %4867 = vst.msk [vmem:[#allocation5 + $0x21] sm:$0xff] %vm4175_vm4, %v4837_v57 }
 0x447   : > { %4733 = vst.msk [vmem:[#allocation4 + $0x40] sm:$0xff] %vm4175_vm4, %v4701_v18  ;;  %v4702_v2 = vmax.f32 %v4602_v21, 0.0 }
 0x449   : > { %4734 = vst.msk [vmem:[#allocation4 + $0x48] sm:$0xff] %vm4175_vm4, %v4702_v2 }
 0x44d   : > { %v12469_v13 = vld [vmem:[#allocation5 + $0x22] sm:$0xff] }
 0x44e   : > { %v12473_v35 = vld [vmem:[#allocation5 + $0x20] sm:$0xff]  ;;  %v9339_v37 = vpack.i.bf16 %v12469_v13, %v4891_v3 }
 0x44f   : > { %v9364_v59 = vpack.i.bf16 %v12473_v35, %v12471_v63  ;;  %v4606_v20 = vpop.f32.mrb[20].mxu0  ;;  %v12531_v30 = vld [vmem:[#allocation5 + $0x21] sm:$0xff] }
 0x450   : > { %v4607_v32 = vadd.f32 %v12434_v52, %v4606_v20  ;;  %v4608_v23 = vpop.f32.mrb[21].mxu0  ;;  %9340 = vrot.lane.b32.xlu0 %v9339_v37, %s9580_s15  ;;  %v4765_v6 = vld [vmem:[#allocation4 + $0x40] ss:$2 sm:$0xff]  ;;  %v4797_v9 = vld [vmem:[#allocation4 + $0x41] ss:$2 sm:$0xff] }
 0x451   : > { %9365 = vrot.lane.b32.xlu1 %v9364_v59, %s9584_s28  ;;  %v4609_v47 = vpop.f32.mrb[22].mxu0  ;;  %v4824_v39 = vmax.f32 %v4765_v6, %v4797_v9 }
 0x452   : > { %v4703_v38 = vmax.f32 %v4607_v32, 0.0  ;;  %v4610_v24 = vadd.f32 %v12434_v52, %v4609_v47  ;;  %v4611_v1 = vpop.f32.mrb[23].mxu0 }
 0x454   : > { %4735 = vst.msk [vmem:[#allocation4 + $0x50] sm:$0xff] %vm4175_vm4, %v4703_v38  ;;  %v4704_v15 = vmax.f32 %v4610_v24, 0.0 }
 0x456   : > { %4736 = vst.msk [vmem:[#allocation4 + $0x58] sm:$0xff] %vm4175_vm4, %v4704_v15 }
 0x45d   : > { %v4767_v26 = vld [vmem:[#allocation4 + $0x50] ss:$2 sm:$0xff]  ;;  %v4799_v12 = vld [vmem:[#allocation4 + $0x51] ss:$2 sm:$0xff] }
 0x45e   : > { %v4614_v40 = vpop.f32.mrb[24].mxu0  ;;  %v4825_v36 = vmax.f32 %v4767_v26, %v4799_v12 }
 0x45f   : > { %v4615_v11 = vadd.f32 %v12434_v52, %v4614_v40  ;;  %v4616_v54 = vpop.f32.mrb[25].mxu0 }
 0x460   : > { %v4617_v19 = vpop.f32.mrb[26].mxu0  ;;  %v4838_v14 = vmax.f32 %v4824_v39, %v4825_v36 }
 0x461   : > { %v4705_v50 = vmax.f32 %v4615_v11, 0.0  ;;  %v4618_v3 = vadd.f32 %v12434_v52, %v4617_v19  ;;  %v4619_v17 = vpop.f32.mrb[27].mxu0 }
 0x462   : > { %4868 = vst.msk [vmem:[#allocation5 + $0x31] sm:$0xff] %vm4175_vm4, %v4838_v14 }
 0x463   : > { %4737 = vst.msk [vmem:[#allocation4 + $0x60] sm:$0xff] %vm4175_vm4, %v4705_v50  ;;  %v4706_v16 = vmax.f32 %v4618_v3, 0.0 }
 0x465   : > { %4738 = vst.msk [vmem:[#allocation4 + $0x68] sm:$0xff] %vm4175_vm4, %v4706_v16 }
 0x469   : > { %v12533_v10 = vld [vmem:[#allocation5 + $0x30] sm:$0xff] }
 0x46a   : > { %v12535_v53 = vld [vmem:[#allocation5 + $0x31] sm:$0xff]  ;;  %v9349_v56 = vpack.i.bf16 %v12533_v10, %v12473_v35 }
 0x46b   : > { %v12537_v45 = vld [vmem:[#allocation5 + $0x32] sm:$0xff]  ;;  %v9374_v7 = vpack.i.bf16 %v12535_v53, %v12531_v30 }
 0x46c   : > { %v5189_v22 = vpack.c.bf16 %v12537_v45, %v12469_v13  ;;  %9350 = vrot.lane.b32.xlu0 %v9349_v56, %s9581_s18  ;;  %v9384_v34 = vpack.i.bf16 %v12537_v45, %v12469_v13  ;;  %v4769_v32 = vld [vmem:[#allocation4 + $0x60] ss:$2 sm:$0xff]  ;;  %v4801_v23 = vld [vmem:[#allocation4 + $0x61] ss:$2 sm:$0xff] }
 0x46d   : > { %9375 = vrot.lane.b32.xlu1 %v9374_v7, %s9580_s15  ;;  %v4826_v38 = vmax.f32 %v4769_v32, %v4801_v23 }
 0x470   : > { %9360 = vrot.lane.b32.xlu0 %v9374_v7, %s9584_s28 }
 0x471   : > { %9385 = vrot.lane.b32.xlu1 %v9384_v34, %s9581_s18 }
 0x475   : > { %v4622_v60 = vpop.f32.mrb[28].mxu0 }
 0x476   : > { %v4623_v41 = vadd.f32 %v12434_v52, %v4622_v60  ;;  %v4624_v62 = vpop.f32.mrb[29].mxu0 }
 0x477   : > { %v4625_v42 = vpop.f32.mrb[30].mxu0 }
 0x478   : > { %v4707_v57 = vmax.f32 %v4623_v41, 0.0  ;;  %v4626_v18 = vadd.f32 %v12434_v52, %v4625_v42  ;;  %v4627_v21 = vpop.f32.mrb[31].mxu0 }
 0x47a   : > { %v4654_v51 = vpop.f32.mrb[0].mxu1  ;;  %4739 = vst.msk [vmem:[#allocation4 + $0x70] sm:$0xff] %vm4175_vm4, %v4707_v57  ;;  %v4708_v2 = vmax.f32 %v4626_v18, 0.0 }
 0x47b   : > { %v4655_v8 = vadd.f32 %v12434_v52, %v4654_v51  ;;  %v4656_v27 = vpop.f32.mrb[1].mxu1 }
 0x47c   : > { %v4657_v37 = vpop.f32.mrb[2].mxu1  ;;  %4740 = vst.msk [vmem:[#allocation4 + $0x78] sm:$0xff] %vm4175_vm4, %v4708_v2 }
 0x47d   : > { %v4715_v59 = vmax.f32 %v4655_v8, 0.0  ;;  %v4658_v4 = vadd.f32 %v12434_v52, %v4657_v37  ;;  %v4659_v0 = vpop.f32.mrb[3].mxu1 }
 0x47f   : > { %4747 = vst.msk [vmem:[#allocation4 + $0xb0] sm:$0xff] %vm4175_vm4, %v4715_v59  ;;  %v4716_v20 = vmax.f32 %v4658_v4, 0.0 }
 0x481   : > { %4748 = vst.msk [vmem:[#allocation4 + $0xb8] sm:$0xff] %vm4175_vm4, %v4716_v20 }
 0x483   : > { %v4771_v47 = vld [vmem:[#allocation4 + $0x70] ss:$2 sm:$0xff]  ;;  %v4803_v55 = vld [vmem:[#allocation4 + $0x71] ss:$2 sm:$0xff] }
 0x484   : > { %v4827_v24 = vmax.f32 %v4771_v47, %v4803_v55 }
 0x486   : > { %v4839_v1 = vmax.f32 %v4826_v38, %v4827_v24 }
 0x488   : > { %4869 = vst.msk [vmem:[#allocation5 + $0x41] sm:$0xff] %vm4175_vm4, %v4839_v1 }
 0x48f   : > { %v12560_v43 = vld [vmem:[#allocation5 + $0x42] sm:$0xff] }
 0x490   : > { %v12562_v15 = vld [vmem:[#allocation5 + $0x40] sm:$0xff]  ;;  %v9369_v61 = vpack.i.bf16 %v12560_v43, %v12537_v45 }
 0x491   : > { %v9394_v44 = vpack.i.bf16 %v12562_v15, %v12533_v10  ;;  %v4630_v31 = vpop.f32.mrb[32].mxu0  ;;  %v12588_v38 = vld [vmem:[#allocation5 + $0x41] sm:$0xff] }
 0x492   : > { %v4631_v33 = vadd.f32 %v12434_v52, %v4630_v31  ;;  %v4632_v6 = vpop.f32.mrb[33].mxu0  ;;  %9370 = vrot.lane.b32.xlu0 %v9369_v61, %s9580_s15 }
 0x493   : > { %9395 = vrot.lane.b32.xlu1 %v9394_v44, %s9584_s28  ;;  %v4633_v9 = vpop.f32.mrb[34].mxu0 }
 0x494   : > { %v4709_v26 = vmax.f32 %v4631_v33, 0.0  ;;  %v4634_v12 = vadd.f32 %v12434_v52, %v4633_v9  ;;  %v4635_v40 = vpop.f32.mrb[35].mxu0 }
 0x496   : > { %v4662_v48 = vpop.f32.mrb[4].mxu1  ;;  %4741 = vst.msk [vmem:[#allocation4 + $0x80] sm:$0xff] %vm4175_vm4, %v4709_v26  ;;  %v4710_v39 = vmax.f32 %v4634_v12, 0.0 }
 0x497   : > { %v4663_v36 = vadd.f32 %v12434_v52, %v4662_v48  ;;  %v4664_v11 = vpop.f32.mrb[5].mxu1 }
 0x498   : > { %v4665_v54 = vpop.f32.mrb[6].mxu1  ;;  %4742 = vst.msk [vmem:[#allocation4 + $0x88] sm:$0xff] %vm4175_vm4, %v4710_v39 }
 0x499   : > { %v4717_v58 = vmax.f32 %v4663_v36, 0.0  ;;  %v4666_v19 = vadd.f32 %v12434_v52, %v4665_v54  ;;  %v4667_v14 = vpop.f32.mrb[7].mxu1 }
 0x49b   : > { %4749 = vst.msk [vmem:[#allocation4 + $0xc0] sm:$0xff] %vm4175_vm4, %v4717_v58  ;;  %v4718_v50 = vmax.f32 %v4666_v19, 0.0 }
 0x49d   : > { %4750 = vst.msk [vmem:[#allocation4 + $0xc8] sm:$0xff] %vm4175_vm4, %v4718_v50 }
 0x49f   : > { %v4773_v21 = vld [vmem:[#allocation4 + $0x80] ss:$2 sm:$0xff]  ;;  %v4805_v51 = vld [vmem:[#allocation4 + $0x81] ss:$2 sm:$0xff] }
 0x4a0   : > { %v4828_v27 = vmax.f32 %v4773_v21, %v4805_v51 }
 0x4a4   : > { %v4781_v59 = vld [vmem:[#allocation4 + $0xc0] ss:$2 sm:$0xff]  ;;  %v4813_v4 = vld [vmem:[#allocation4 + $0xc1] ss:$2 sm:$0xff] }
 0x4a5   : > { %v4832_v23 = vmax.f32 %v4781_v59, %v4813_v4  ;;  %v4874_v4 = vld [vmem:[#allocation5] sm:$0xff] }
 0x4ad   : > { %v4638_v3 = vpop.f32.mrb[36].mxu0 }
 0x4ae   : > { %v4639_v17 = vadd.f32 %v12434_v52, %v4638_v3  ;;  %v4640_v25 = vpop.f32.mrb[37].mxu0 }
 0x4af   : > { %v4641_v16 = vpop.f32.mrb[38].mxu0  ;;  %v9346_v25 = vpop.permute.xlu1 %9345 }
 0x4b0   : > { %v4711_v5 = vmax.f32 %v4639_v17, 0.0  ;;  %v4642_v29 = vadd.f32 %v12434_v52, %v4641_v16  ;;  %v4643_v49 = vpop.f32.mrb[39].mxu0 }
 0x4b2   : > { %v4670_v56 = vpop.f32.mrb[8].mxu1  ;;  %4743 = vst.msk [vmem:[#allocation4 + $0x90] sm:$0xff] %vm4175_vm4, %v4711_v5  ;;  %v4712_v7 = vmax.f32 %v4642_v29, 0.0  ;;  %v4779_v5 = vld [vmem:[#allocation4 + $0xb0] ss:$2 sm:$0xff] }
 0x4b3   : > { %v4671_v34 = vadd.f32 %v12434_v52, %v4670_v56  ;;  %v4672_v60 = vpop.f32.mrb[9].mxu1  ;;  %v4811_v29 = vld [vmem:[#allocation4 + $0xb1] ss:$2 sm:$0xff] }
 0x4b4   : > { %v4673_v41 = vpop.f32.mrb[10].mxu1  ;;  %4744 = vst.msk [vmem:[#allocation4 + $0x98] sm:$0xff] %vm4175_vm4, %v4712_v7  ;;  %v4831_v7 = vmax.f32 %v4779_v5, %v4811_v29 }
 0x4b5   : > { %v4719_v62 = vmax.f32 %v4671_v34, 0.0  ;;  %v4674_v42 = vadd.f32 %v12434_v52, %v4673_v41  ;;  %v4675_v57 = vpop.f32.mrb[11].mxu1  ;;  %v9356_v34 = vpop.permute.xlu1 %9355 }
 0x4b7   : > { %4751 = vst.msk [vmem:[#allocation4 + $0xd0] sm:$0xff] %vm4175_vm4, %v4719_v62  ;;  %v4720_v18 = vmax.f32 %v4674_v42, 0.0 }
 0x4b9   : > { %4752 = vst.msk [vmem:[#allocation4 + $0xd8] sm:$0xff] %vm4175_vm4, %v4720_v18 }
 0x4bb   : > { %v4775_v2 = vld [vmem:[#allocation4 + $0x90] ss:$2 sm:$0xff]  ;;  %v4807_v8 = vld [vmem:[#allocation4 + $0x91] ss:$2 sm:$0xff] }
 0x4bc   : > { %v4829_v37 = vmax.f32 %v4775_v2, %v4807_v8  ;;  %v9348_v2 = vunpack.i.h.bf16 %v9346_v25  ;;  %v9347_v8 = vunpack.i.l.bf16 %v9346_v25 }
 0x4be   : > { %v4840_v0 = vmax.f32 %v4828_v27, %v4829_v37 }
 0x4c0   : > { %v4783_v20 = vld [vmem:[#allocation4 + $0xd0] ss:$2 sm:$0xff]  ;;  %v4815_v32 = vld [vmem:[#allocation4 + $0xd1] ss:$2 sm:$0xff]  ;;  %4870 = vst.msk [vmem:[#allocation5 + $0x51] sm:$0xff] %vm4175_vm4, %v4840_v0  ;;  %v9358_v0 = vunpack.i.h.bf16 %v9356_v34 }
 0x4c1   : > { %v4833_v47 = vmax.f32 %v4783_v20, %v4815_v32  ;;  %v9357_v20 = vunpack.i.l.bf16 %v9356_v34 }
 0x4c2   : > { %v9341_v41 = vpop.permute.xlu0 %9340 }
 0x4c3   : > { %v4842_v55 = vmax.f32 %v4832_v23, %v4833_v47  ;;  %v9366_v21 = vpop.permute.xlu1 %9365  ;;  %v9343_v32 = vunpack.i.h.bf16 %v9341_v41  ;;  %v9342_v23 = vunpack.i.l.bf16 %v9341_v41 }
 0x4c5   : > { %4872 = vst.msk [vmem:[#allocation5 + $0x71] sm:$0xff] %vm4175_vm4, %v4842_v55  ;;  %v9368_v55 = vunpack.i.h.bf16 %v9366_v21 }
 0x4c7   : > { %v12590_v24 = vld [vmem:[#allocation5 + $0x50] sm:$0xff] }
 0x4c8   : > { %v12592_v1 = vld [vmem:[#allocation5 + $0x51] sm:$0xff]  ;;  %v9379_v44 = vpack.i.bf16 %v12590_v24, %v12562_v15 }
 0x4c9   : > { %v12594_v61 = vld [vmem:[#allocation5 + $0x52] sm:$0xff]  ;;  %v9404_v31 = vpack.i.bf16 %v12592_v1, %v12588_v38  ;;  %v4646_v6 = vpop.f32.mrb[40].mxu0 }
 0x4ca   : > { %v5192_v33 = vpack.c.bf16 %v12594_v61, %v12560_v43  ;;  %v4647_v9 = vadd.f32 %v12434_v52, %v4646_v6  ;;  %v4648_v26 = vpop.f32.mrb[41].mxu0  ;;  %9380 = vrot.lane.b32.xlu0 %v9379_v44, %s9581_s18  ;;  %v9414_v36 = vpack.i.bf16 %v12594_v61, %v12560_v43  ;;  %v9367_v44 = vunpack.i.l.bf16 %v9366_v21  ;;  %v9484_v6 = vld [vmem:[%s15190_s5 + $0x80] sm:$0xff]  }
 0x4cb   : > { %9405 = vrot.lane.b32.xlu1 %v9404_v31, %s9580_s15  ;;  %v4649_v12 = vpop.f32.mrb[42].mxu0  ;;  %8697 = vmatprep.subr.bf16.mxu1 %v9484_v6 }
 0x4cc   : > { %v4713_v40 = vmax.f32 %v4647_v9, 0.0  ;;  %v4650_v48 = vadd.f32 %v12434_v52, %v4649_v12  ;;  %v4651_v39 = vpop.f32.mrb[43].mxu0  ;;  %v5140_v12 = vsel %vm4175_vm4, %v12471_v63, %v9348_v2  ;;  %v12649_v29 = vld [vmem:[#allocation5 + $0x72] sm:$0xff] }
 0x4cd   : > { %v5164_v39 = vsel %vm4175_vm4, %v12531_v30, %v9343_v32  ;;  %v12655_v41 = vld [vmem:[#allocation5 + $0x70] sm:$0xff] }
 0x4ce   : > { %v4678_v11 = vpop.f32.mrb[12].mxu1  ;;  %4745 = vst.msk [vmem:[#allocation4 + $0xa0] sm:$0xff] %vm4175_vm4, %v4713_v40  ;;  %v4714_v54 = vmax.f32 %v4650_v48, 0.0  ;;  %9390 = vrot.lane.b32.xlu0 %v9404_v31, %s9584_s28  ;;  %v5148_v48 = vsel %vm4241_vm6, %v5140_v12, %v9358_v0  ;;  %v4930_v32 = vld [vmem:[#allocation5 + $0x90] sm:$0xff] }
 0x4cf   : > { %v4679_v58 = vadd.f32 %v12434_v52, %v4678_v11  ;;  %v4680_v19 = vpop.f32.mrb[13].mxu1  ;;  %9415 = vrot.lane.b32.xlu1 %v9414_v36, %s9581_s18  ;;  %v5163_v36 = vsel %vm4175_vm4, %v12449_v28, %v9342_v23 }
 0x4d0   : > { %v4681_v14 = vpop.f32.mrb[14].mxu1  ;;  %4746 = vst.msk [vmem:[#allocation4 + $0xa8] sm:$0xff] %vm4175_vm4, %v4714_v54 }
 0x4d1   : > { %v4721_v50 = vmax.f32 %v4679_v58, 0.0  ;;  %v4682_v3 = vadd.f32 %v12434_v52, %v4681_v14  ;;  %v4683_v17 = vpop.f32.mrb[15].mxu1  ;;  %v5156_v58 = vsel %vm4307_vm8, %v5148_v48, %v9368_v55  ;;  %v4938_v55 = vld [vmem:[#allocation5 + $0x91] sm:$0xff] }
 0x4d3   : > { %4753 = vst.msk [vmem:[#allocation4 + $0xe0] sm:$0xff] %vm4175_vm4, %v4721_v50  ;;  %v4722_v16 = vmax.f32 %v4682_v3, 0.0 }
 0x4d5   : > { %4754 = vst.msk [vmem:[#allocation4 + $0xe8] sm:$0xff] %vm4175_vm4, %v4722_v16 }
 0x4d7   : > { %v4777_v49 = vld [vmem:[#allocation4 + $0xa0] ss:$2 sm:$0xff]  ;;  %v4809_v56 = vld [vmem:[#allocation4 + $0xa1] ss:$2 sm:$0xff] }
 0x4d8   : > { %v4830_v60 = vmax.f32 %v4777_v49, %v4809_v56 }
 0x4da   : > { %v4841_v62 = vmax.f32 %v4830_v60, %v4831_v7 }
 0x4db   : > { %v4686_v42 = vpop.f32.mrb[16].mxu1 }
 0x4dc   : > { %v4687_v57 = vadd.f32 %v12434_v52, %v4686_v42  ;;  %v4688_v18 = vpop.f32.mrb[17].mxu1  ;;  %4871 = vst.msk [vmem:[#allocation5 + $0x61] sm:$0xff] %vm4175_vm4, %v4841_v62  ;;  %v4785_v49 = vld [vmem:[#allocation4 + $0xe0] ss:$2 sm:$0xff]  ;;  %v4817_v56 = vld [vmem:[#allocation4 + $0xe1] ss:$2 sm:$0xff] }
 0x4dd   : > { %v4689_v51 = vpop.f32.mrb[18].mxu1  ;;  %v12657_v62 = vld [vmem:[#allocation5 + $0x71] sm:$0xff] }
 0x4de   : > { %v4723_v27 = vmax.f32 %v4687_v57, 0.0  ;;  %v4690_v37 = vadd.f32 %v12434_v52, %v4689_v51  ;;  %v4691_v59 = vpop.f32.mrb[19].mxu1  ;;  %v9351_v47 = vpop.permute.xlu0 %9350  ;;  %v5139_v52 = vsel %vm4175_vm4, %v4874_v4, %v9347_v8  ;;  %v4834_v51 = vmax.f32 %v4785_v49, %v4817_v56 }
 0x4df   : > { %v9353_v9 = vunpack.i.h.bf16 %v9351_v47  ;;  %v9352_v26 = vunpack.i.l.bf16 %v9351_v47  ;;  %v5147_v40 = vsel %vm4241_vm6, %v5139_v52, %v9357_v20 }
 0x4e0   : > { %4755 = vst.msk [vmem:[#allocation4 + $0xf0] sm:$0xff] %vm4175_vm4, %v4723_v27  ;;  %v4724_v31 = vmax.f32 %v4690_v37, 0.0  ;;  %v5155_v54 = vsel %vm4307_vm8, %v5147_v40, %v9367_v44  ;;  %v9485_v37 = vld [vmem:[%s15190_s5 + $0x88] sm:$0xff]  }
 0x4e1   : > { %v5171_v3 = vsel %vm4241_vm6, %v5163_v36, %v9352_v26  ;;  %v5172_v17 = vsel %vm4241_vm6, %v5164_v39, %v9353_v9  ;;  %v5187_v60 = vpack.c.bf16 %v5156_v58, %v5155_v54 }
 0x4e2   : > { %4756 = vst.msk [vmem:[#allocation4 + $0xf8] sm:$0xff] %vm4175_vm4, %v4724_v31  ;;  %v9361_v11 = vpop.permute.xlu0 %9360  ;;  %v9376_v31 = vpop.permute.xlu1 %9375 }
 0x4e3   : > { %v9363_v19 = vunpack.i.h.bf16 %v9361_v11  ;;  %v9362_v63 = vunpack.i.l.bf16 %v9361_v11  ;;  %v12635_v14 = vld [vmem:[#allocation5 + $0x62] sm:$0xff]  ;;  %v9378_v26 = vunpack.i.h.bf16 %v9376_v31  ;;  %v9377_v52 = vunpack.i.l.bf16 %v9376_v31 }
 0x4e4   : > { %v12637_v50 = vld [vmem:[#allocation5 + $0x60] sm:$0xff]  ;;  %v9399_v30 = vpack.i.bf16 %v12635_v14, %v12594_v61  ;;  %v5195_v34 = vpack.c.bf16 %v12649_v29, %v12635_v14  ;;  %v9444_v27 = vpack.i.bf16 %v12649_v29, %v12635_v14 }
 0x4e5   : > { %v9424_v28 = vpack.i.bf16 %v12637_v50, %v12590_v24  ;;  %v5179_v25 = vsel %vm4307_vm8, %v5171_v3, %v9362_v63  ;;  %v5180_v16 = vsel %vm4307_vm8, %v5172_v17, %v9363_v19  ;;  %v12647_v5 = vld [vmem:[#allocation5 + $0x61] sm:$0xff]  ;;  %v9409_v18 = vpack.i.bf16 %v12655_v41, %v12637_v50 }
 0x4e6   : > { %9400 = vrot.lane.b32.xlu0 %v9399_v30, %s9580_s15  ;;  %v5188_v7 = vpack.c.bf16 %v5180_v16, %v5179_v25  ;;  %v9434_v21 = vpack.i.bf16 %v12657_v62, %v12647_v5  ;;  %v5142_v3 = vsel %vm4175_vm4, %v12533_v10, %v9378_v26  ;;  %v5141_v17 = vsel %vm4175_vm4, %v12473_v35, %v9377_v52 }
 0x4e7   : > { %9425 = vrot.lane.b32.xlu1 %v9424_v28, %s9584_s28 }
 0x4e8   : > { %5394 = vmatprep.mubr.bf16.mxu1 %v5188_v7 }
 0x4e9   : > { %v4787_v42 = vld [vmem:[#allocation4 + $0xf0] ss:$2 sm:$0xff]  ;;  %v4819_v57 = vld [vmem:[#allocation4 + $0xf1] ss:$2 sm:$0xff]  ;;  %5395 = vmatmul.mubr.bf16.vlgmr.msra.gmra.mrb[20].mxu1 %v5187_v60 }
 0x4ea   : > { %v4835_v2 = vmax.f32 %v4787_v42, %v4819_v57  ;;  %9410 = vrot.lane.b32.xlu0 %v9409_v18, %s9581_s18  ;;  %8698 = vmatpush3.bf16.msra.mxu1 %v9484_v6  ;;  %v9386_v6 = vpop.permute.xlu1 %9385 }
 0x4eb   : > { %9435 = vrot.lane.b32.xlu1 %v9434_v21, %s9580_s15  ;;  %8699 = vmatprep.subr.bf16.mxu1 %v9485_v37  ;;  %v9388_v40 = vunpack.i.h.bf16 %v9386_v6  ;;  %v9387_v48 = vunpack.i.l.bf16 %v9386_v6 }
 0x4ec   : > { %v4843_v8 = vmax.f32 %v4834_v51, %v4835_v2 }
 0x4ed   : > { %v5149_v30 = vsel %vm4241_vm6, %v5141_v17, %v9387_v48  ;;  %v5150_v28 = vsel %vm4241_vm6, %v5142_v3, %v9388_v40 }
 0x4ee   : > { %4873 = vst.msk [vmem:[#allocation5 + $0x81] sm:$0xff] %vm4175_vm4, %v4843_v8  ;;  %9420 = vrot.lane.b32.xlu0 %v9434_v21, %s9584_s28  ;;  %8700 = vmatpush3.bf16.msra.mxu1 %v9485_v37 }
 0x4ef   : > { %9445 = vrot.lane.b32.xlu1 %v9444_v27, %s9581_s18 }
 0x4f5   : > { %v12673_v59 = vld [vmem:[#allocation5 + $0x82] sm:$0xff] }
 0x4f6   : > { %v4905_v4 = vld [vmem:[#allocation5 + $0x80] sm:$0xff]  ;;  %v9429_v0 = vpack.i.bf16 %v12673_v59, %v12649_v29 }
 0x4f7   : > { %v9454_v20 = vpack.i.bf16 %v4905_v4, %v12655_v41  ;;  %v9439_v23 = vpack.i.bf16 %v4930_v32, %v4905_v4  ;;  %v12680_v47 = vld [vmem:[#allocation5 + $0x81] sm:$0xff] }
 0x4f8   : > { %9430 = vrot.lane.b32.xlu0 %v9429_v0, %s9580_s15  ;;  %v9449_v44 = vpack.i.bf16 %v4938_v55, %v12680_v47  ;;  %s9517_s15 = sshll.u32 %s9586_s26, 4  ;;  %s9518_s15 = int_to_ptr.vmem [resolvable:$false] %s9517_s15 }
 0x4f9   : > { %9455 = vrot.lane.b32.xlu1 %v9454_v20, %s9584_s28  ;;  %p9520_p0 = scmp.lt.s32.totalorder %s15132_s27, %s9518_s15 }
 0x4fc   : > { %9440 = vrot.lane.b32.xlu0 %v9439_v23, %s9581_s18  ;;  %s9519_s18 = scalar_lea.vmem %s9518_s15, 512 }
 0x4fd   : > { %p9521_p1 = scmp.lt.s32.totalorder %s9519_s18, %s9513_s25 }
 0x4ff   : > { %p9522_p2 = por %p9521_p1, %p9520_p0 }
 0x500   : > { %9450 = vrot.lane.b32.xlu0 %v9449_v44, %s9584_s28 }
 0x501   : > { %p9523_p3 = pnand %p9522_p2, %p9516_p13 }
 0x504   : > { %v9371_v9 = vpop.permute.xlu0 %9370 }
 0x505   : > { %v9396_v12 = vpop.permute.xlu1 %9395  ;;  %v9373_v36 = vunpack.i.h.bf16 %v9371_v9  ;;  %v9372_v11 = vunpack.i.l.bf16 %v9371_v9 }
 0x506   : > { %v9398_v54 = vunpack.i.h.bf16 %v9396_v12  ;;  %v9397_v58 = vunpack.i.l.bf16 %v9396_v12 }
 0x507   : > { %v5166_v16 = vsel %vm4175_vm4, %v12588_v38, %v9373_v36  ;;  %v5165_v49 = vsel %vm4175_vm4, %v12535_v53, %v9372_v11 }
 0x508   : > { %v5157_v42 = vsel %vm4307_vm8, %v5149_v30, %v9397_v58  ;;  %v5158_v35 = vsel %vm4307_vm8, %v5150_v28, %v9398_v54 }
 0x509   : > { %v5190_v51 = vpack.c.bf16 %v5158_v35, %v5157_v42 }
 0x53c   : > { %v9381_v39 = vpop.permute.xlu0 %9380 }
 0x53d   : > { %v9383_v19 = vunpack.i.h.bf16 %v9381_v39  ;;  %v9382_v63 = vunpack.i.l.bf16 %v9381_v39  ;;  %v9406_v38 = vpop.permute.xlu1 %9405 }
 0x53e   : > { %v9408_v8 = vunpack.i.h.bf16 %v9406_v38  ;;  %v9407_v27 = vunpack.i.l.bf16 %v9406_v38 }
 0x53f   : > { %v5173_v60 = vsel %vm4241_vm6, %v5165_v49, %v9382_v63  ;;  %v5174_v10 = vsel %vm4241_vm6, %v5166_v16, %v9383_v19 }
 0x540   : > { %v9391_v25 = vpop.permute.xlu0 %9390  ;;  %v5144_v9 = vsel %vm4175_vm4, %v12590_v24, %v9408_v8  ;;  %v5143_v26 = vsel %vm4175_vm4, %v12562_v15, %v9407_v27 }
 0x541   : > { %v9393_v56 = vunpack.i.h.bf16 %v9391_v25  ;;  %v9392_v7 = vunpack.i.l.bf16 %v9391_v25  ;;  %v9416_v53 = vpop.permute.xlu1 %9415 }
 0x542   : > { %v9418_v4 = vunpack.i.h.bf16 %v9416_v53  ;;  %v9417_v0 = vunpack.i.l.bf16 %v9416_v53 }
 0x543   : > { %v5181_v57 = vsel %vm4307_vm8, %v5173_v60, %v9392_v7  ;;  %v5182_v18 = vsel %vm4307_vm8, %v5174_v10, %v9393_v56 }
 0x544   : > { %v5191_v21 = vpack.c.bf16 %v5182_v18, %v5181_v57  ;;  %v5151_v52 = vsel %vm4241_vm6, %v5143_v26, %v9417_v0  ;;  %v5152_v12 = vsel %vm4241_vm6, %v5144_v9, %v9418_v4  ;;  %v15922_v26 = vld [vmem:[#allocation187_spill] sm:$0xff] }
 0x546   : > { %5402 = vmatprep.mubr.bf16.mxu1 %v5191_v21 }
 0x547   : > { %5403 = vmatmul.mubr.bf16.gmra.mrb[24].mxu1 %v5190_v51 }
 0x558   : > { %v9401_v2 = vpop.permute.xlu0 %9400 }
 0x559   : > { %v9426_v37 = vpop.permute.xlu1 %9425  ;;  %v9403_v32 = vunpack.i.h.bf16 %v9401_v2  ;;  %v9402_v23 = vunpack.i.l.bf16 %v9401_v2 }
 0x55a   : > { %v9428_v55 = vunpack.i.h.bf16 %v9426_v37  ;;  %v9427_v44 = vunpack.i.l.bf16 %v9426_v37 }
 0x55b   : > { %v5168_v48 = vsel %vm4175_vm4, %v12647_v5, %v9403_v32  ;;  %v5167_v39 = vsel %vm4175_vm4, %v12592_v1, %v9402_v23 }
 0x55c   : > { %v9411_v20 = vpop.permute.xlu0 %9410  ;;  %v5159_v15 = vsel %vm4307_vm8, %v5151_v52, %v9427_v44  ;;  %v5160_v19 = vsel %vm4307_vm8, %v5152_v12, %v9428_v55  ;;  %v15924_v12 = vld [vmem:[#allocation190_spill] sm:$0xff] }
 0x55d   : > { %v9413_v31 = vunpack.i.h.bf16 %v9411_v20  ;;  %v9412_v6 = vunpack.i.l.bf16 %v9411_v20  ;;  %v9436_v58 = vpop.permute.xlu1 %9435  ;;  %v5193_v5 = vpack.c.bf16 %v5160_v19, %v5159_v15 }
 0x55e   : > { %v9438_v28 = vunpack.i.h.bf16 %v9436_v58  ;;  %v9437_v25 = vunpack.i.l.bf16 %v9436_v58 }
 0x55f   : > { %v5175_v54 = vsel %vm4241_vm6, %v5167_v39, %v9412_v6  ;;  %v5176_v24 = vsel %vm4241_vm6, %v5168_v48, %v9413_v31  ;;  %v5631_v48 = vld [vmem:[#allocation6 + $0x8] sm:$0xff] }
 0x560   : > { %v9421_v40 = vpop.permute.xlu0 %9420  ;;  %v5146_v21 = vsel %vm4175_vm4, %v12655_v41, %v9438_v28  ;;  %v5145_v51 = vsel %vm4175_vm4, %v12637_v50, %v9437_v25  ;;  %v5731_v39 = vld [vmem:[#allocation6 + $0x9] sm:$0xff]  ;;  %v5630_v25 = vld [vmem:[#allocation6] sm:$0xff] }
 0x561   : > { %v9423_v36 = vunpack.i.h.bf16 %v9421_v40  ;;  %v9422_v11 = vunpack.i.l.bf16 %v9421_v40  ;;  %v9446_v1 = vpop.permute.xlu1 %9445 }
 0x562   : > { %v9448_v49 = vunpack.i.h.bf16 %v9446_v1  ;;  %v9447_v56 = vunpack.i.l.bf16 %v9446_v1 }
 0x563   : > { %v5183_v63 = vsel %vm4307_vm8, %v5175_v54, %v9422_v11  ;;  %v5184_v3 = vsel %vm4307_vm8, %v5176_v24, %v9423_v36  ;;  %v15926_v11 = vld [vmem:[#allocation191_spill] sm:$0xff] }
 0x564   : > { %v5194_v17 = vpack.c.bf16 %v5184_v3, %v5183_v63  ;;  %v5153_v38 = vsel %vm4241_vm6, %v5145_v51, %v9447_v56  ;;  %v5154_v53 = vsel %vm4241_vm6, %v5146_v21, %v9448_v49  ;;  %v5831_v63 = vld [vmem:[#allocation6 + $0xa] sm:$0xff] }
 0x565   : > { %v5931_v49 = vld [vmem:[#allocation6 + $0xb] sm:$0xff] }
 0x566   : > { %5410 = vmatprep.mubr.bf16.mxu1 %v5194_v17 }
 0x567   : > { %5411 = vmatmul.mubr.bf16.gmra.mrb[28].mxu1 %v5193_v5  ;;  %v15928_v5 = vld [vmem:[#allocation23_spill] sm:$0xff] }
 0x56a   : > { %v9431_v30 = vpop.permute.xlu0 %9430 }
 0x56b   : > { %v9456_v16 = vpop.permute.xlu1 %9455  ;;  %v9433_v60 = vunpack.i.h.bf16 %v9431_v30  ;;  %v9432_v10 = vunpack.i.l.bf16 %v9431_v30 }
 0x56c   : > { %v9458_v42 = vunpack.i.h.bf16 %v9456_v16  ;;  %v9457_v35 = vunpack.i.l.bf16 %v9456_v16  ;;  %v5730_v16 = vld [vmem:[#allocation6 + $0x1] sm:$0xff] }
 0x56d   : > { %v5170_v8 = vsel %vm4175_vm4, %v12680_v47, %v9433_v60  ;;  %v5169_v27 = vsel %vm4175_vm4, %v12657_v62, %v9432_v10  ;;  %v4946_v62 = vld [vmem:[#allocation5 + $0x92] sm:$0xff] }
 0x56e   : > { %v9441_v7 = vpop.permute.xlu0 %9440  ;;  %v5161_v20 = vsel %vm4307_vm8, %v5153_v38, %v9457_v35  ;;  %v5162_v50 = vsel %vm4307_vm8, %v5154_v53, %v9458_v42  ;;  %v5198_v47 = vpack.c.bf16 %v4946_v62, %v12673_v59  ;;  %v5626_v59 = vld [vmem:[%s15192_s7] sm:$0xff]  ;;  %v15930_v60 = vld [vmem:[#allocation45_spill] sm:$0xff] }
 0x56f   : > { %v9443_v57 = vunpack.i.h.bf16 %v9441_v7  ;;  %v9442_v18 = vunpack.i.l.bf16 %v9441_v7  ;;  %v5196_v44 = vpack.c.bf16 %v5162_v50, %v5161_v20  ;;  %v12797_v52 = vrot.slane %v5626_v59, %v15922_v26  ;;  %v15932_v38 = vld [vmem:[#allocation55_spill] sm:$0xff] }
 0x570   : > { %v12800_v40 = vrot.slane %v5626_v59, %v15924_v12  ;;  %v12803_v54 = vrot.slane %v5626_v59, %v15926_v11  ;;  %v12812_v1 = vrot.slane %v5626_v59, %v15928_v5  ;;  %v12818_v10 = vrot.slane %v5626_v59, %v15930_v60  ;;  %v6232_v62 = vld [vmem:[#allocation6 + $0x21] sm:$0xff] }
 0x571   : > { %v5177_v0 = vsel %vm4241_vm6, %v5169_v27, %v9442_v18  ;;  %v5178_v41 = vsel %vm4241_vm6, %v5170_v8, %v9443_v57  ;;  %15923 = vst [vmem:[#allocation70_spill] sm:$0xff] %v12797_v52  ;;  %v5667_v24 = vmul.f32 %v12797_v52, %v5631_v48  ;;  %v5666_v56 = vmul.f32 %v12797_v52, %v5630_v25  ;;  %v5830_v57 = vld [vmem:[#allocation6 + $0x2] sm:$0xff]  ;;  %v6031_v18 = vld [vmem:[#allocation6 + $0xc] sm:$0xff]  ;;  %v12841_v48 = vld [vmem:[%s15191_s6] ss:$0 sm:$0xff] }
 0x572   : > { %v9451_v2 = vpop.permute.xlu0 %9450  ;;  %15925 = vst [vmem:[#allocation72_spill] sm:$0xff] %v12800_v40  ;;  %15927 = vst [vmem:[#allocation75_spill] sm:$0xff] %v12803_v54  ;;  %v5767_v58 = vmul.f32 %v12800_v40, %v5731_v39  ;;  %v5867_v28 = vmul.f32 %v12803_v54, %v5831_v63  ;;  %v5766_v7 = vmul.f32 %v12800_v40, %v5730_v16  ;;  %v5930_v27 = vld [vmem:[#allocation6 + $0x3] sm:$0xff]  ;;  %v6231_v25 = vld [vmem:[#allocation6 + $0x19] sm:$0xff] }
 0x573   : > { %v9453_v37 = vunpack.i.h.bf16 %v9451_v2  ;;  %v9452_v4 = vunpack.i.l.bf16 %v9451_v2  ;;  %15929 = vst [vmem:[#allocation21_spill] sm:$0xff] %v12812_v1  ;;  %15931 = vst [vmem:[#allocation76_spill] sm:$0xff] %v12818_v10  ;;  %v5967_v35 = vmul.f32 %v12812_v1, %v5931_v49  ;;  %v5866_v51 = vmul.f32 %v12803_v54, %v5830_v57  ;;  %v15934_v39 = vld [vmem:[#allocation59_spill] sm:$0xff] }
 0x574   : > { %v5799_v30 = vadd.f32 %v5767_v58, %v5667_v24  ;;  %v5798_v21 = vadd.f32 %v5766_v7, %v5666_v56  ;;  %v12823_v53 = vrot.slane %v5626_v59, %v15932_v38  ;;  %v6067_v8 = vmul.f32 %v12818_v10, %v6031_v18  ;;  %v12851_v24 = vld [vmem:[#allocation6 + $0x22] sm:$0xff] }
 0x575   : > { %v5185_v32 = vsel %vm4307_vm8, %v5177_v0, %v9452_v4  ;;  %v5186_v23 = vsel %vm4307_vm8, %v5178_v41, %v9453_v37  ;;  %v12826_v37 = vld [vmem:[#allocation6 + $0x20] sm:$0xff]  ;;  %v5966_v0 = vmul.f32 %v12812_v1, %v5930_v27 }
 0x576   : > { %v5197_v55 = vpack.c.bf16 %v5186_v23, %v5185_v32  ;;  %v5899_v42 = vadd.f32 %v5867_v28, %v5799_v30  ;;  %v5898_v4 = vadd.f32 %v5866_v51, %v5798_v21  ;;  %v6168_v50 = vmul.f32 %v12823_v53, %v12826_v37  ;;  %v15933_v32 = vld [vmem:[#allocation73_spill] sm:$0xff]  ;;  %v6331_v27 = vld [vmem:[#allocation6 + $0x1a] sm:$0xff] }
 0x577   : > { %v12832_v23 = vrot.slane %v5626_v59, %v15933_v32 }
 0x578   : > { %5418 = vmatprep.mubr.bf16.mxu1 %v5197_v55  ;;  %v5999_v2 = vadd.f32 %v5967_v35, %v5899_v42  ;;  %v6030_v55 = vld [vmem:[#allocation6 + $0x4] sm:$0xff] }
 0x579   : > { %5419 = vmatmul.mubr.bf16.gmra.mrb[32].mxu1 %v5196_v44 }
 0x57a   : > { %8701 = vmatprep.mubr.msk.bf16.mxu1 %vm4175_vm4, %v5189_v22  ;;  %v6099_v20 = vadd.f32 %v6067_v8, %v5999_v2 }
 0x581   : > { %8702 = vmatmul.mubr.msk.bf16.vlgmr.msra.gmra.mrb[36].mxu1 %vm4175_vm4, %v5192_v33 }
 0x582   : > { %8705 = vmatprep.mubr.msk.bf16.mxu1 %vm4175_vm4, %v5195_v34 }
 0x589   : > { %8706 = vmatmul.mubr.msk.bf16.gmra.mrb[40].mxu1 %vm4175_vm4, %v5198_v47  ;;  %vm8463_vm4 = vcmask 1047559  }
 0x5bc   : > { %v8667_v31 = vpop.f32.mrb[20].mxu1 }
 0x5bd   : > { %v8668_v6 = vpop.f32.mrb[21].mxu1 }
 0x5be   : > { %v12747_v13 = vadd.f32 %v8668_v6, %v8667_v31  ;;  %v8670_v45 = vpop.f32.mrb[22].mxu1 }
 0x5bf   : > { %v8671_v22 = vpop.f32.mrb[23].mxu1 }
 0x5c0   : > { %v12749_v9 = vadd.f32 %v8671_v22, %v8670_v45  ;;  %v5998_v45 = vadd.f32 %v5966_v0, %v5898_v4  ;;  %v6066_v22 = vmul.f32 %v12818_v10, %v6030_v55  ;;  %v5397_v30 = vadd.f32 %v12747_v13, %v12841_v48  ;;  %v12867_v13 = vld [vmem:[#allocation6 + $0x23] sm:$0xff] }
 0x5c1   : > { %v5768_v0 = vmul.f32 %v6231_v25, %v12800_v40 }
 0x5c2   : > { %v5400_v35 = vadd.f32 %v12749_v9, %v12841_v48 }
 0x61a   : > { %v8673_v43 = vpop.f32.mrb[24].mxu1 }
 0x61b   : > { %v8674_v61 = vpop.f32.mrb[25].mxu1 }
 0x61c   : > { %v8675_v33 = vadd.f32 %v8674_v61, %v8673_v43  ;;  %v8676_v14 = vpop.f32.mrb[26].mxu1  ;;  %v6200_v61 = vadd.f32 %v6168_v50, %v6099_v20 }
 0x61d   : > { %v8677_v29 = vpop.f32.mrb[27].mxu1 }
 0x61e   : > { %v12791_v34 = vadd.f32 %v8677_v29, %v8676_v14  ;;  %v6268_v14 = vmul.f32 %v12832_v23, %v6232_v62  ;;  %v6131_v29 = vld [vmem:[#allocation6 + $0x18] sm:$0xff]  ;;  %v5405_v58 = vadd.f32 %v8675_v33, %v12841_v48 }
 0x61f   : > { %v6167_v63 = vmul.f32 %v12823_v53, %v6131_v29  ;;  %v5668_v4 = vmul.f32 %v6131_v29, %v12797_v52 }
 0x620   : > { %v6300_v28 = vadd.f32 %v6268_v14, %v6200_v61  ;;  %v5408_v49 = vadd.f32 %v12791_v34, %v12841_v48  ;;  %v6267_v34 = vmul.f32 %v12832_v23, %v6231_v25 }
 0x63a   : > { %v8679_v46 = vpop.f32.mrb[28].mxu1 }
 0x63b   : > { %v8680_v36 = vpop.f32.mrb[29].mxu1 }
 0x63c   : > { %v12807_v15 = vadd.f32 %v8680_v36, %v8679_v46  ;;  %v8682_v19 = vpop.f32.mrb[30].mxu1  ;;  %v12844_v46 = vrot.slane %v5626_v59, %v15934_v39  ;;  %v12849_v36 = vld [vmem:[%s15192_s7 + $0x8] sm:$0xff] }
 0x63d   : > { %v8683_v3 = vpop.f32.mrb[31].mxu1  ;;  %v12863_v33 = vrot.slane %v12849_v36, %v15922_v26  ;;  %v12876_v50 = vrot.slane %v12849_v36, %v15924_v12  ;;  %v12893_v29 = vrot.slane %v12849_v36, %v15928_v5 }
 0x63e   : > { %v12809_v17 = vadd.f32 %v8683_v3, %v8682_v19  ;;  %v6098_v19 = vadd.f32 %v6066_v22, %v5998_v45  ;;  %v6368_v56 = vmul.f32 %v12844_v46, %v12851_v24  ;;  %v12886_v22 = vrot.slane %v12849_v36, %v15926_v11 }
 0x63f   : > { %v6468_v20 = vmul.f32 %v12863_v33, %v12867_v13  ;;  %v6367_v14 = vmul.f32 %v12844_v46, %v6331_v27 }
 0x640   : > { %v6199_v51 = vadd.f32 %v6167_v63, %v6098_v19  ;;  %v5868_v19 = vmul.f32 %v6331_v27, %v12803_v54  ;;  %v12923_v27 = vrot.slane %v12849_v36, %v15933_v32 }
 0x642   : > { %v6299_v61 = vadd.f32 %v6267_v34, %v6199_v51  ;;  %v12908_v51 = vld [vmem:[%s15192_s7 + $0x10] sm:$0xff] }
 0x64c   : > { %v8685_v41 = vpop.f32.mrb[32].mxu1 }
 0x64d   : > { %v8686_v44 = vpop.f32.mrb[33].mxu1 }
 0x64e   : > { %v8687_v47 = vadd.f32 %v8686_v44, %v8685_v41  ;;  %v8688_v31 = vpop.f32.mrb[34].mxu1  ;;  %v6400_v41 = vadd.f32 %v6368_v56, %v6300_v28  ;;  %v12878_v44 = vld [vmem:[#allocation6 + $0x24] sm:$0xff]  ;;  %v5869_v56 = vmul.f32 %v12851_v24, %v12803_v54 }
 0x64f   : > { %v8689_v6 = vpop.f32.mrb[35].mxu1  ;;  %v6568_v25 = vmul.f32 %v12876_v50, %v12878_v44 }
 0x650   : > { %v12835_v43 = vadd.f32 %v8689_v6, %v8688_v31  ;;  %v5669_v31 = vmul.f32 %v12826_v37, %v12797_v52  ;;  %v5769_v6 = vmul.f32 %v6232_v62, %v12800_v40  ;;  %v5421_v45 = vadd.f32 %v8687_v47, %v12841_v48  ;;  %v6431_v47 = vld [vmem:[#allocation6 + $0x1b] sm:$0xff] }
 0x651   : > { %v5413_v62 = vadd.f32 %v12807_v15, %v12841_v48  ;;  %v6500_v28 = vadd.f32 %v6468_v20, %v6400_v41  ;;  %v5416_v15 = vadd.f32 %v12809_v17, %v12841_v48  ;;  %v5968_v17 = vmul.f32 %v6431_v47, %v12812_v1 }
 0x652   : > { %v12933_v20 = vrot.slane %v12849_v36, %v15934_v39 }
 0x654   : > { %v8703_v3 = vpop.f32.mrb[36].mxu1 }
 0x655   : > { %v5470_v59 = vadd.f32 %v8703_v3, %v5405_v58  ;;  %v5461_v16 = vpop.f32.mrb[37].mxu1  ;;  %v5800_v58 = vadd.f32 %v5768_v0, %v5668_v4  ;;  %v6531_v4 = vld [vmem:[#allocation6 + $0x1c] sm:$0xff] }
 0x656   : > { %v5462_v7 = vadd.f32 %v5461_v16, %v5397_v30  ;;  %v8704_v42 = vpop.f32.mrb[38].mxu1  ;;  %v5424_v30 = vadd.f32 %v12835_v43, %v12841_v48 }
 0x657   : > { %v5494_v57 = vmax.f32 %v5470_v59, 0.0  ;;  %v5473_v18 = vadd.f32 %v8704_v42, %v5408_v49  ;;  %v5464_v21 = vpop.f32.mrb[39].mxu1  ;;  %v5801_v49 = vadd.f32 %v5769_v6, %v5669_v31  ;;  %v5900_v34 = vadd.f32 %v5868_v19, %v5800_v58 }
 0x658   : > { %v5492_v2 = vmax.f32 %v5462_v7, 0.0  ;;  %v5465_v8 = vadd.f32 %v5464_v21, %v5400_v35  ;;  %v5969_v31 = vmul.f32 %v12867_v13, %v12812_v1  ;;  %v6068_v19 = vmul.f32 %v6531_v4, %v12818_v10 }
 0x659   : > { %5571 = vst [vmem:[#allocation6 + $0x92] ss:$2 sm:$0xff] %v5494_v57  ;;  %5573 = vst [vmem:[#allocation6 + $0xaa] ss:$2 sm:$0xff] %v5494_v57  ;;  %v5495_v9 = vmax.f32 %v5473_v18, 0.0  ;;  %v6467_v18 = vmul.f32 %v12863_v33, %v6431_v47  ;;  %v6567_v47 = vmul.f32 %v12876_v50, %v6531_v4  ;;  %v6000_v58 = vadd.f32 %v5968_v17, %v5900_v34 }
 0x65a   : > { %5603 = vst [vmem:[#allocation6 + $0x93] ss:$2 sm:$0xff] %v5494_v57  ;;  %5605 = vst [vmem:[#allocation6 + $0xab] ss:$2 sm:$0xff] %v5494_v57  ;;  %v5493_v55 = vmax.f32 %v5465_v8, 0.0  ;;  %v6399_v57 = vadd.f32 %v6367_v14, %v6299_v61  ;;  %v12919_v8 = vrot.slane %v12849_v36, %v15932_v38  ;;  %v6600_v14 = vadd.f32 %v6568_v25, %v6500_v28 }
 0x65b   : > { %5563 = vst [vmem:[#allocation6 + $0x32] ss:$2 sm:$0xff] %v5492_v2  ;;  %5565 = vst [vmem:[#allocation6 + $0x4a] ss:$2 sm:$0xff] %v5492_v2  ;;  %v6100_v4 = vadd.f32 %v6068_v19, %v6000_v58 }
 0x65c   : > { %5595 = vst [vmem:[#allocation6 + $0x33] ss:$2 sm:$0xff] %v5492_v2  ;;  %5597 = vst [vmem:[#allocation6 + $0x4b] ss:$2 sm:$0xff] %v5492_v2  ;;  %v8707_v37 = vpop.f32.mrb[40].mxu1  ;;  %v12915_v2 = vrot.slane %v12849_v36, %v15930_v60  ;;  %v12947_v36 = vrot.slane %v12908_v51, %v15924_v12 }
 0x65d   : > { %5575 = vst [vmem:[#allocation6 + $0xc2] ss:$2 sm:$0xff] %v5495_v9  ;;  %5577 = vst [vmem:[#allocation6 + $0xda] ss:$2 sm:$0xff] %v5495_v9  ;;  %v5486_v63 = vadd.f32 %v8707_v37, %v5421_v45  ;;  %v5477_v3 = vpop.f32.mrb[41].mxu1  ;;  %v12943_v37 = vrot.slane %v12908_v51, %v15922_v26 }
 0x65e   : > { %5607 = vst [vmem:[#allocation6 + $0xc3] ss:$2 sm:$0xff] %v5495_v9  ;;  %5609 = vst [vmem:[#allocation6 + $0xdb] ss:$2 sm:$0xff] %v5495_v9  ;;  %v5478_v59 = vadd.f32 %v5477_v3, %v5413_v62  ;;  %v8708_v16 = vpop.f32.mrb[42].mxu1  ;;  %v6499_v62 = vadd.f32 %v6467_v18, %v6399_v57 }
 0x65f   : > { %5567 = vst [vmem:[#allocation6 + $0x62] ss:$2 sm:$0xff] %v5493_v55  ;;  %5569 = vst [vmem:[#allocation6 + $0x7a] ss:$2 sm:$0xff] %v5493_v55  ;;  %v5498_v7 = vmax.f32 %v5486_v63, 0.0  ;;  %v5489_v42 = vadd.f32 %v8708_v16, %v5424_v30  ;;  %v5480_v35 = vpop.f32.mrb[43].mxu1 }
 0x660   : > { %5599 = vst [vmem:[#allocation6 + $0x63] ss:$2 sm:$0xff] %v5493_v55  ;;  %5601 = vst [vmem:[#allocation6 + $0x7b] ss:$2 sm:$0xff] %v5493_v55  ;;  %v5496_v43 = vmax.f32 %v5478_v59, 0.0  ;;  %v5481_v21 = vadd.f32 %v5480_v35, %v5416_v15  ;;  %v5901_v55 = vadd.f32 %v5869_v56, %v5801_v49  ;;  %v6069_v59 = vmul.f32 %v12878_v44, %v12818_v10 }
 0x661   : > { %5587 = vst [vmem:[#allocation6 + $0x152] ss:$2 sm:$0xff] %v5498_v7  ;;  %5589 = vst [vmem:[#allocation6 + $0x16a] ss:$2 sm:$0xff] %v5498_v7  ;;  %v5499_v24 = vmax.f32 %v5489_v42, 0.0  ;;  %v12972_v42 = vrot.slane %v12908_v51, %v15928_v5  ;;  %v12976_v44 = vrot.slane %v12908_v51, %v15930_v60  ;;  %v12980_v35 = vrot.slane %v12908_v51, %v15932_v38  ;;  %v5642_v34 = vld [vmem:[#allocation6 + $0x90] sm:$0xff] }
 0x662   : > { %5619 = vst [vmem:[#allocation6 + $0x153] ss:$2 sm:$0xff] %v5498_v7  ;;  %5621 = vst [vmem:[#allocation6 + $0x16b] ss:$2 sm:$0xff] %v5498_v7  ;;  %v5497_v30 = vmax.f32 %v5481_v21, 0.0  ;;  %v6001_v25 = vadd.f32 %v5969_v31, %v5901_v55  ;;  %v12968_v7 = vrot.slane %v12908_v51, %v15926_v11  ;;  %v6599_v21 = vadd.f32 %v6567_v47, %v6499_v62  ;;  %v5742_v17 = vld [vmem:[#allocation6 + $0x91] sm:$0xff] }
 0x663   : > { %v12911_v48 = vld [vmem:[#allocation6 + $0x38] sm:$0xff]  ;;  %5579 = vst [vmem:[#allocation6 + $0xf2] ss:$2 sm:$0xff] %v5496_v43  ;;  %5581 = vst [vmem:[#allocation6 + $0x10a] ss:$2 sm:$0xff] %v5496_v43  ;;  %v5634_v6 = vld [vmem:[#allocation6 + $0x30] sm:$0xff]  ;;  %v12990_v60 = vrot.slane %v12908_v51, %v15933_v32  ;;  %v12994_v38 = vrot.slane %v12908_v51, %v15934_v39  ;;  %v13006_v39 = vmul.f32 %v12797_v52, %v5642_v34 }
 0x664   : > { %v5671_v0 = vmul.f32 %v12797_v52, %v12911_v48  ;;  %v12927_v9 = vld [vmem:[#allocation6 + $0x39] sm:$0xff]  ;;  %5611 = vst [vmem:[#allocation6 + $0xf3] ss:$2 sm:$0xff] %v5496_v43  ;;  %5613 = vst [vmem:[#allocation6 + $0x10b] ss:$2 sm:$0xff] %v5496_v43  ;;  %v12937_v45 = vld [vmem:[#allocation6 + $0x31] sm:$0xff]  ;;  %v6668_v26 = vmul.f32 %v12886_v22, %v12911_v48  ;;  %v5670_v28 = vmul.f32 %v12797_v52, %v5634_v6 }
 0x665   : > { %v12929_v41 = vld [vmem:[#allocation6 + $0x3a] sm:$0xff]  ;;  %v5771_v61 = vmul.f32 %v12800_v40, %v12927_v9  ;;  %5591 = vst [vmem:[#allocation6 + $0x182] ss:$2 sm:$0xff] %v5499_v24  ;;  %5593 = vst [vmem:[#allocation6 + $0x19a] ss:$2 sm:$0xff] %v5499_v24  ;;  %v5770_v12 = vmul.f32 %v12800_v40, %v12937_v45  ;;  %v6768_v56 = vmul.f32 %v12893_v29, %v12927_v9  ;;  %v5834_v57 = vld [vmem:[#allocation6 + $0x32] sm:$0xff] }
 0x666   : > { %5623 = vst [vmem:[#allocation6 + $0x183] ss:$2 sm:$0xff] %v5499_v24  ;;  %5625 = vst [vmem:[#allocation6 + $0x19b] ss:$2 sm:$0xff] %v5499_v24  ;;  %v12949_v13 = vld [vmem:[#allocation6 + $0x3b] sm:$0xff]  ;;  %v5871_v3 = vmul.f32 %v12803_v54, %v12929_v41  ;;  %v6700_v49 = vadd.f32 %v6668_v26, %v6600_v14  ;;  %v6868_v11 = vmul.f32 %v12915_v2, %v12929_v41  ;;  %v5842_v62 = vld [vmem:[#allocation6 + $0x92] sm:$0xff] }
 0x667   : > { %v5803_v63 = vadd.f32 %v5771_v61, %v5671_v0  ;;  %v5971_v15 = vmul.f32 %v12812_v1, %v12949_v13  ;;  %5583 = vst [vmem:[#allocation6 + $0x122] ss:$2 sm:$0xff] %v5497_v30  ;;  %5585 = vst [vmem:[#allocation6 + $0x13a] ss:$2 sm:$0xff] %v5497_v30  ;;  %v5802_v5 = vadd.f32 %v5770_v12, %v5670_v28  ;;  %v12986_v24 = vld [vmem:[#allocation6 + $0x3c] sm:$0xff]  ;;  %v5934_v0 = vld [vmem:[#allocation6 + $0x33] sm:$0xff] }
 0x668   : > { %5615 = vst [vmem:[#allocation6 + $0x123] ss:$2 sm:$0xff] %v5497_v30  ;;  %5617 = vst [vmem:[#allocation6 + $0x13b] ss:$2 sm:$0xff] %v5497_v30  ;;  %v6800_v43 = vadd.f32 %v6768_v56, %v6700_v49  ;;  %v6968_v31 = vmul.f32 %v12919_v8, %v12949_v13  ;;  %v6667_v61 = vmul.f32 %v12886_v22, %v5634_v6  ;;  %v6034_v58 = vld [vmem:[#allocation6 + $0x34] sm:$0xff] }
 0x669   : > { %v5903_v16 = vadd.f32 %v5871_v3, %v5803_v63  ;;  %v12999_v14 = vadd.f32 %v6069_v59, %v6001_v25  ;;  %v5870_v47 = vmul.f32 %v12803_v54, %v5834_v57  ;;  %v6169_v32 = vmul.f32 %v12823_v53, %v5634_v6  ;;  %v13003_v63 = vld [vmem:[#allocation6 + $0x50] sm:$0xff] }
 0x66a   : > { %v6900_v55 = vadd.f32 %v6868_v11, %v6800_v43  ;;  %v13009_v51 = vmul.f32 %v12800_v40, %v5742_v17  ;;  %v7068_v3 = vmul.f32 %v12923_v27, %v12986_v24  ;;  %v6699_v30 = vadd.f32 %v6667_v61, %v6599_v21  ;;  %v13018_v25 = vld [vmem:[#allocation6 + $0x51] sm:$0xff]  ;;  %v13043_v61 = vld [vmem:[#allocation6 + $0x68] sm:$0xff] }
 0x66b   : > { %v12982_v18 = vadd.f32 %v5971_v15, %v5903_v16  ;;  %v6767_v26 = vmul.f32 %v12893_v29, %v12937_v45  ;;  %v5902_v28 = vadd.f32 %v5870_v47, %v5802_v5  ;;  %v5970_v6 = vmul.f32 %v12812_v1, %v5934_v0  ;;  %v13025_v49 = vld [vmem:[#allocation6 + $0x52] sm:$0xff] }
 0x66c   : > { %v7000_v19 = vadd.f32 %v6968_v31, %v6900_v55  ;;  %v6170_v12 = vmul.f32 %v12823_v53, %v12911_v48  ;;  %v13021_v59 = vmul.f32 %v12803_v54, %v5842_v62  ;;  %v7169_v15 = vmul.f32 %v12933_v20, %v13003_v63  ;;  %v13035_v21 = vld [vmem:[#allocation6 + $0x53] sm:$0xff]  ;;  %v13079_v54 = vld [vmem:[#allocation6 + $0x4a] sm:$0xff] }
 0x66d   : > { %15935 = vst [vmem:[#allocation25_spill] sm:$0xff] %v12982_v18  ;;  %v6799_v56 = vadd.f32 %v6767_v26, %v6699_v30  ;;  %v6867_v43 = vmul.f32 %v12915_v2, %v5834_v57  ;;  %v13029_v11 = vmul.f32 %v12818_v10, %v6034_v58  ;;  %v13033_v48 = vmul.f32 %v12818_v10, %v12986_v24  ;;  %v13041_v31 = vld [vmem:[#allocation6 + $0x54] sm:$0xff]  ;;  %v13071_v18 = vld [vmem:[#allocation6 + $0x6c] sm:$0xff] }
 0x66e   : > { %v7100_v16 = vadd.f32 %v7068_v3, %v7000_v19  ;;  %v6201_v34 = vadd.f32 %v6169_v32, %v6100_v4  ;;  %v6269_v17 = vmul.f32 %v12832_v23, %v12937_v45  ;;  %v7269_v55 = vmul.f32 %v12943_v37, %v13018_v25  ;;  %v13050_v4 = vld [vmem:[#allocation6 + $0x69] sm:$0xff]  ;;  %15944 = vst [vmem:[#allocation33_spill] sm:$0xff] %v13071_v18 }
 0x66f   : > { %15936 = vst [vmem:[#allocation78_spill] sm:$0xff] %v13029_v11  ;;  %15937 = vst [vmem:[#allocation79_spill] sm:$0xff] %v13033_v48  ;;  %v6899_v62 = vadd.f32 %v6867_v43, %v6799_v56  ;;  %v6967_v47 = vmul.f32 %v12919_v8, %v5934_v0  ;;  %v13046_v19 = vadd.f32 %v5970_v6, %v5902_v28  ;;  %v13052_v32 = vld [vmem:[#allocation6 + $0x48] sm:$0xff] }
 0x670   : > { %v7201_v5 = vadd.f32 %v7169_v15, %v7100_v16  ;;  %v7369_v3 = vmul.f32 %v12947_v36, %v13025_v49  ;;  %15939 = vst [vmem:[#allocation81_spill] sm:$0xff] %v13050_v4  ;;  %15940 = vst [vmem:[#allocation27_spill] sm:$0xff] %v13052_v32  ;;  %v6301_v45 = vadd.f32 %v6269_v17, %v6201_v34  ;;  %v13057_v15 = vld [vmem:[#allocation6 + $0x6a] sm:$0xff] }
 0x671   : > { %15938 = vst [vmem:[#allocation196_spill] sm:$0xff] %v13046_v19  ;;  %v6369_v30 = vmul.f32 %v12844_v46, %v5834_v57  ;;  %v7469_v16 = vmul.f32 %v12968_v7, %v13035_v21  ;;  %15941 = vst [vmem:[#allocation31_spill] sm:$0xff] %v13057_v15  ;;  %v13059_v56 = vld [vmem:[#allocation6 + $0x6b] sm:$0xff]  ;;  %v6999_v28 = vadd.f32 %v6967_v47, %v6899_v62 }
 0x672   : > { %v7301_v26 = vadd.f32 %v7269_v55, %v7201_v5  ;;  %15942 = vst [vmem:[#allocation82_spill] sm:$0xff] %v13059_v56  ;;  %v7067_v6 = vmul.f32 %v12923_v27, %v6034_v58  ;;  %v7569_v43 = vmul.f32 %v12972_v42, %v13041_v31  ;;  %v7670_v48 = vmul.f32 %v12976_v44, %v13043_v61  ;;  %v13066_v34 = vld [vmem:[#allocation6 + $0x49] sm:$0xff] }
 0x673   : > { %15943 = vst [vmem:[#allocation83_spill] sm:$0xff] %v13066_v34  ;;  %v6401_v57 = vadd.f32 %v6369_v30, %v6301_v45  ;;  %v6469_v17 = vmul.f32 %v12863_v33, %v5934_v0  ;;  %v7770_v55 = vmul.f32 %v12980_v35, %v13050_v4  ;;  %v7168_v47 = vmul.f32 %v12933_v20, %v13052_v32  ;;  %v13081_v45 = vld [vmem:[#allocation6 + $0x4b] sm:$0xff]  ;;  %v13087_v30 = vld [vmem:[%s15192_s7 + $0x18] ss:$0 sm:$0xff] }
 0x674   : > { %v7401_v5 = vadd.f32 %v7369_v3, %v7301_v26  ;;  %v7099_v62 = vadd.f32 %v7067_v6, %v6999_v28  ;;  %v7870_v11 = vmul.f32 %v12990_v60, %v13057_v15  ;;  %v7970_v19 = vmul.f32 %v12994_v38, %v13059_v56  ;;  %15945 = vst [vmem:[#allocation35_spill] sm:$0xff] %v13079_v54  ;;  %v13094_v40 = vld [vmem:[#allocation6 + $0x4c] sm:$0xff]  ;;  %v13120_v4 = vld [vmem:[#allocation6 + $0x64] sm:$0xff] }
 0x675   : > { %15946 = vst [vmem:[#allocation84_spill] sm:$0xff] %v13081_v45  ;;  %v6501_v0 = vadd.f32 %v6469_v17, %v6401_v57  ;;  %v6569_v3 = vmul.f32 %v12876_v50, %v6034_v58  ;;  %v7268_v6 = vmul.f32 %v12943_v37, %v13066_v34  ;;  %v6202_v15 = vadd.f32 %v6170_v12, %v12999_v14  ;;  %v13096_v57 = vld [vmem:[#allocation6 + $0x60] sm:$0xff] }
 0x676   : > { %v7501_v26 = vadd.f32 %v7469_v16, %v7401_v5  ;;  %v7200_v28 = vadd.f32 %v7168_v47, %v7099_v62  ;;  %v8070_v56 = vmul.f32 %v13087_v30, %v13071_v18  ;;  %15947 = vst [vmem:[#allocation85_spill] sm:$0xff] %v13094_v40  ;;  %15948 = vst [vmem:[#allocation86_spill] sm:$0xff] %v13096_v57  ;;  %v13106_v12 = vld [vmem:[#allocation6 + $0x61] sm:$0xff] }
 0x677   : > { %v6601_v58 = vadd.f32 %v6569_v3, %v6501_v0  ;;  %v6669_v17 = vmul.f32 %v13052_v32, %v12886_v22  ;;  %v6270_v16 = vmul.f32 %v12832_v23, %v12927_v9  ;;  %v7368_v47 = vmul.f32 %v12947_v36, %v13079_v54  ;;  %15949 = vst [vmem:[#allocation87_spill] sm:$0xff] %v13106_v12  ;;  %v13108_v18 = vld [vmem:[#allocation6 + $0x62] sm:$0xff] }
 0x678   : > { %v7601_v5 = vadd.f32 %v7569_v43, %v7501_v26  ;;  %v7300_v62 = vadd.f32 %v7268_v6, %v7200_v28  ;;  %v7468_v14 = vmul.f32 %v12968_v7, %v13081_v45  ;;  %15950 = vst [vmem:[#allocation110_spill] sm:$0xff] %v13108_v18  ;;  %v6769_v0 = vmul.f32 %v13066_v34, %v12893_v29  ;;  %v13118_v32 = vld [vmem:[#allocation6 + $0x63] sm:$0xff] }
 0x679   : > { %v6701_v52 = vadd.f32 %v6669_v17, %v6601_v58  ;;  %v6302_v3 = vadd.f32 %v6270_v16, %v6202_v15  ;;  %v6370_v9 = vmul.f32 %v12844_v46, %v12929_v41  ;;  %v7568_v28 = vmul.f32 %v12972_v42, %v13094_v40  ;;  %15951 = vst [vmem:[#allocation88_spill] sm:$0xff] %v13118_v32 }
 0x67a   : > { %v7702_v43 = vadd.f32 %v7670_v48, %v7601_v5  ;;  %v7400_v26 = vadd.f32 %v7368_v47, %v7300_v62  ;;  %v7669_v6 = vmul.f32 %v12976_v44, %v13096_v57  ;;  %15952 = vst [vmem:[#allocation89_spill] sm:$0xff] %v13120_v4  ;;  %v6869_v17 = vmul.f32 %v13079_v54, %v12915_v2 }
 0x67b   : > { %v6801_v58 = vadd.f32 %v6769_v0, %v6701_v52  ;;  %v6402_v15 = vadd.f32 %v6370_v9, %v6302_v3  ;;  %v6470_v41 = vmul.f32 %v12863_v33, %v12949_v13  ;;  %v7769_v5 = vmul.f32 %v12980_v35, %v13106_v12 }
 0x67c   : > { %v7802_v48 = vadd.f32 %v7770_v55, %v7702_v43  ;;  %v7500_v16 = vadd.f32 %v7468_v14, %v7400_v26  ;;  %v7869_v62 = vmul.f32 %v12990_v60, %v13108_v18  ;;  %v6969_v34 = vmul.f32 %v13081_v45, %v12919_v8  ;;  %v13312_v45 = vld [vmem:[#allocation6 + $0xb3] sm:$0xff] }
 0x67d   : > { %v6901_v47 = vadd.f32 %v6869_v17, %v6801_v58  ;;  %v6502_v52 = vadd.f32 %v6470_v41, %v6402_v15  ;;  %v6570_v0 = vmul.f32 %v12876_v50, %v12986_v24  ;;  %v7969_v13 = vmul.f32 %v12994_v38, %v13118_v32  ;;  %v13142_v17 = vld [vmem:[#allocation6 + $0x93] sm:$0xff]  ;;  %15992 = vst [vmem:[#allocation30_spill] sm:$0xff] %v13312_v45 }
 0x67e   : > { %v7902_v3 = vadd.f32 %v7870_v11, %v7802_v48  ;;  %v7600_v9 = vadd.f32 %v7568_v28, %v7500_v16  ;;  %v8069_v55 = vmul.f32 %v13087_v30, %v13120_v4  ;;  %v7069_v43 = vmul.f32 %v13094_v40, %v12923_v27  ;;  %15953 = vst [vmem:[#allocation90_spill] sm:$0xff] %v13142_v17  ;;  %v13299_v40 = vld [vmem:[#allocation6 + $0xdb] sm:$0xff] }
 0x67f   : > { %v7001_v14 = vadd.f32 %v6969_v34, %v6901_v47  ;;  %v6602_v26 = vadd.f32 %v6570_v0, %v6502_v52  ;;  %v6670_v58 = vmul.f32 %v13003_v63, %v12886_v22  ;;  %v7170_v11 = vmul.f32 %v13096_v57, %v12933_v20  ;;  %v13152_v47 = vld [vmem:[#allocation6 + $0x94] sm:$0xff]  ;;  %15989 = vst [vmem:[#allocation121_spill] sm:$0xff] %v13299_v40 }
 0x680   : > { %v8002_v15 = vadd.f32 %v7970_v19, %v7902_v3  ;;  %v7701_v24 = vadd.f32 %v7669_v6, %v7600_v9  ;;  %v5810_v28 = vadd.f32 %v13009_v51, %v13006_v39  ;;  %v7270_v34 = vmul.f32 %v13106_v12, %v12943_v37  ;;  %15954 = vst [vmem:[#allocation91_spill] sm:$0xff] %v13152_v47  ;;  %v13161_v9 = vld [vmem:[#allocation6 + $0xa8] sm:$0xff]  ;;  %v13265_v12 = vld [vmem:[#allocation6 + $0xb0] sm:$0xff] }
 0x681   : > { %v7101_v41 = vadd.f32 %v7069_v43, %v7001_v14  ;;  %v6702_v48 = vadd.f32 %v6670_v58, %v6602_v26  ;;  %v6770_v16 = vmul.f32 %v13018_v25, %v12893_v29  ;;  %v5978_v6 = vmul.f32 %v12812_v1, %v13142_v17  ;;  %15955 = vst [vmem:[#allocation92_spill] sm:$0xff] %v13161_v9  ;;  %v13170_v58 = vld [vmem:[#allocation6 + $0x79] sm:$0xff] }
 0x682   : > { %v8102_v63 = vadd.f32 %v8070_v56, %v8002_v15  ;;  %v7801_v52 = vadd.f32 %v7769_v5, %v7701_v24  ;;  %v5910_v19 = vadd.f32 %v13021_v59, %v5810_v28  ;;  %v7370_v39 = vmul.f32 %v13108_v18, %v12947_v36  ;;  %v13164_v56 = vld [vmem:[#allocation6 + $0x78] sm:$0xff]  ;;  %15957 = vst [vmem:[#allocation93_spill] sm:$0xff] %v13170_v58  ;;  %v13174_v24 = vld [vmem:[#allocation6 + $0xa9] sm:$0xff] }
 0x683   : > { %v7202_v0 = vadd.f32 %v7170_v11, %v7101_v41  ;;  %v6802_v51 = vadd.f32 %v6770_v16, %v6702_v48  ;;  %v6870_v3 = vmul.f32 %v13025_v49, %v12915_v2  ;;  %15956 = vst [vmem:[#allocation20_spill] sm:$0xff] %v13164_v56  ;;  %v6078_v59 = vmul.f32 %v12818_v10, %v13152_v47  ;;  %v13178_v28 = vld [vmem:[#allocation6 + $0x7a] sm:$0xff] }
 0x684   : > { %v8136_v25 = vsel %vm2869_vm2, %v8102_v63, 0.0  ;;  %v7901_v14 = vadd.f32 %v7869_v62, %v7801_v52  ;;  %v6010_v5 = vadd.f32 %v5978_v6, %v5910_v19  ;;  %v7470_v26 = vmul.f32 %v13118_v32, %v12968_v7  ;;  %15958 = vst [vmem:[#allocation106_spill] sm:$0xff] %v13174_v24  ;;  %15959 = vst [vmem:[#allocation117_spill] sm:$0xff] %v13178_v28  ;;  %v13184_v63 = vld [vmem:[#allocation6 + $0x7b] sm:$0xff] }
 0x685   : > { %8137 = vadd.xlane.f32.xlu1 %v8136_v25  ;;  %v7302_v43 = vadd.f32 %v7270_v34, %v7202_v0  ;;  %v6902_v15 = vadd.f32 %v6870_v3, %v6802_v51  ;;  %v6970_v49 = vmul.f32 %v13035_v21, %v12919_v8  ;;  %v7570_v11 = vmul.f32 %v13120_v4, %v12972_v42  ;;  %v13192_v0 = vld [vmem:[#allocation6 + $0x7c] sm:$0xff] }
 0x686   : > { %v8001_v62 = vadd.f32 %v7969_v13, %v7901_v14  ;;  %v6110_v41 = vadd.f32 %v6078_v59, %v6010_v5  ;;  %v6179_v34 = vmul.f32 %v12823_v53, %v13161_v9  ;;  %v7671_v16 = vmul.f32 %v12976_v44, %v13164_v56  ;;  %15960 = vst [vmem:[#allocation114_spill] sm:$0xff] %v13184_v63  ;;  %v13188_v13 = vld [vmem:[#allocation6 + $0xaa] sm:$0xff]  ;;  %v13204_v59 = vld [vmem:[#allocation6 + $0x99] sm:$0xff]  ;;  %v13247_v32 = vld [vmem:[#allocation6 + $0xc1] sm:$0xff] }
 0x687   : > { %v7402_v48 = vadd.f32 %v7370_v39, %v7302_v43  ;;  %v7002_v52 = vadd.f32 %v6970_v49, %v6902_v15  ;;  %v7070_v21 = vmul.f32 %v13041_v31, %v12923_v27  ;;  %15961 = vst [vmem:[#allocation94_spill] sm:$0xff] %v13188_v13  ;;  %v7771_v6 = vmul.f32 %v12980_v35, %v13170_v58  ;;  %v13200_v5 = vld [vmem:[#allocation6 + $0xab] sm:$0xff]  ;;  %v13237_v58 = vld [vmem:[#allocation6 + $0x82] sm:$0xff] }
 0x688   : > { %v8101_v19 = vadd.f32 %v8069_v55, %v8001_v62  ;;  %15962 = vst [vmem:[#allocation95_spill] sm:$0xff] %v13192_v0  ;;  %v6211_v51 = vadd.f32 %v6179_v34, %v6110_v41  ;;  %v6279_v39 = vmul.f32 %v12832_v23, %v13174_v24  ;;  %v7871_v25 = vmul.f32 %v12990_v60, %v13178_v28  ;;  %v13202_v55 = vld [vmem:[#allocation6 + $0x98] sm:$0xff]  ;;  %v13231_v28 = vld [vmem:[#allocation6 + $0xc0] sm:$0xff] }
 0x689   : > { %v7502_v3 = vadd.f32 %v7470_v26, %v7402_v48  ;;  %v7102_v14 = vadd.f32 %v7070_v21, %v7002_v52  ;;  %v7171_v31 = vmul.f32 %v13043_v61, %v12933_v20  ;;  %15963 = vst [vmem:[#allocation113_spill] sm:$0xff] %v13200_v5  ;;  %15964 = vst [vmem:[#allocation149_spill] sm:$0xff] %v13202_v55  ;;  %v15966_v34 = vld [vmem:[#allocation81_spill] sm:$0xff]  ;;  %v13217_v21 = vld [vmem:[#allocation6 + $0x9a] sm:$0xff] }
 0x68a   : > { %15965 = vst [vmem:[#allocation96_spill] sm:$0xff] %v13204_v59  ;;  %v8133_v43 = vsel %vm2869_vm2, %v8101_v19, 0.0  ;;  %v7971_v15 = vmul.f32 %v12994_v38, %v13184_v63  ;;  %v6311_v49 = vadd.f32 %v6279_v39, %v6211_v51  ;;  %v6379_v26 = vmul.f32 %v12844_v46, %v13188_v13  ;;  %v13215_v52 = vld [vmem:[#allocation6 + $0xac] sm:$0xff]  ;;  %15968 = vst [vmem:[#allocation146_spill] sm:$0xff] %v13217_v21  ;;  %v13219_v19 = vld [vmem:[#allocation6 + $0x80] sm:$0xff] }
 0x68b   : > { %8134 = vadd.xlane.f32.xlu0 %v8133_v43  ;;  %v7602_v62 = vadd.f32 %v7570_v11, %v7502_v3  ;;  %v8071_v61 = vmul.f32 %v13087_v30, %v13192_v0  ;;  %v7203_v41 = vadd.f32 %v7171_v31, %v7102_v14  ;;  %v7271_v48 = vmul.f32 %v15966_v34, %v12943_v37  ;;  %v15970_v39 = vld [vmem:[#allocation70_spill] sm:$0xff]  ;;  %v15971_v3 = vld [vmem:[#allocation72_spill] sm:$0xff]  ;;  %v15972_v34 = vld [vmem:[#allocation31_spill] sm:$0xff] }
 0x68c   : > { %15967 = vst [vmem:[#allocation97_spill] sm:$0xff] %v13215_v52  ;;  %15969 = vst [vmem:[#allocation181_spill] sm:$0xff] %v13219_v19  ;;  %v6411_v47 = vadd.f32 %v6379_v26, %v6311_v49  ;;  %v6479_v51 = vmul.f32 %v12863_v33, %v13200_v5  ;;  %v5679_v11 = vmul.f32 %v15970_v39, %v13202_v55  ;;  %v15973_v0 = vld [vmem:[#allocation82_spill] sm:$0xff]  ;;  %v13235_v26 = vld [vmem:[#allocation6 + $0x81] sm:$0xff] }
 0x68d   : > { %v5779_v43 = vmul.f32 %v15971_v3, %v13204_v59  ;;  %v7703_v14 = vadd.f32 %v7671_v16, %v7602_v62  ;;  %v7303_v31 = vadd.f32 %v7271_v48, %v7203_v41  ;;  %v7371_v17 = vmul.f32 %v15972_v34, %v12947_v36  ;;  %v13233_v49 = vld [vmem:[#allocation6 + $0x9b] sm:$0xff]  ;;  %15975 = vst [vmem:[#allocation24_spill] sm:$0xff] %v13235_v26 }
 0x68e   : > { %v7471_v63 = vmul.f32 %v15973_v0, %v12968_v7  ;;  %15974 = vst [vmem:[#allocation107_spill] sm:$0xff] %v13233_v49  ;;  %15976 = vst [vmem:[#allocation178_spill] sm:$0xff] %v13237_v58  ;;  %v6511_v55 = vadd.f32 %v6479_v51, %v6411_v47  ;;  %v6579_v59 = vmul.f32 %v12876_v50, %v13215_v52  ;;  %v15977_v62 = vld [vmem:[#allocation75_spill] sm:$0xff]  ;;  %v15978_v0 = vld [vmem:[#allocation33_spill] sm:$0xff] }
 0x68f   : > { %v5811_v16 = vadd.f32 %v5779_v43, %v5679_v11  ;;  %v5879_v41 = vmul.f32 %v15977_v62, %v13217_v21  ;;  %v7803_v48 = vadd.f32 %v7771_v6, %v7703_v14  ;;  %v7403_v34 = vadd.f32 %v7371_v17, %v7303_v31  ;;  %v13249_v18 = vld [vmem:[#allocation6 + $0x9c] sm:$0xff]  ;;  %v13253_v51 = vld [vmem:[#allocation6 + $0x84] sm:$0xff]  ;;  %15982 = vst [vmem:[#allocation151_spill] sm:$0xff] %v13265_v12 }
 0x690   : > { %v7571_v56 = vmul.f32 %v15978_v0, %v12972_v42  ;;  %v7672_v4 = vmul.f32 %v12976_v44, %v13219_v19  ;;  %15979 = vst [vmem:[#allocation98_spill] sm:$0xff] %v13249_v18  ;;  %v13251_v47 = vld [vmem:[#allocation6 + $0x83] sm:$0xff]  ;;  %15981 = vst [vmem:[#allocation116_spill] sm:$0xff] %v13253_v51  ;;  %v6611_v11 = vadd.f32 %v6579_v59, %v6511_v55 }
 0x691   : > { %15980 = vst [vmem:[#allocation119_spill] sm:$0xff] %v13251_v47  ;;  %v6679_v43 = vmul.f32 %v12886_v22, %v13231_v28  ;;  %v5911_v6 = vadd.f32 %v5879_v41, %v5811_v16  ;;  %v5979_v17 = vmul.f32 %v12812_v1, %v13233_v49  ;;  %v7903_v14 = vadd.f32 %v7871_v25, %v7803_v48  ;;  %v13263_v19 = vld [vmem:[#allocation6 + $0xc2] sm:$0xff] }
 0x692   : > { %v7503_v31 = vadd.f32 %v7471_v63, %v7403_v34  ;;  %v7772_v0 = vmul.f32 %v12980_v35, %v13235_v26  ;;  %v7872_v21 = vmul.f32 %v12990_v60, %v13237_v58  ;;  %v6779_v59 = vmul.f32 %v12893_v29, %v13247_v32  ;;  %v13269_v16 = vld [vmem:[#allocation6 + $0xc3] sm:$0xff] }
 0x693   : > { %v6711_v55 = vadd.f32 %v6679_v43, %v6611_v11  ;;  %v13271_v41 = vld [vmem:[#allocation6 + $0xc4] sm:$0xff]  ;;  %v6011_v25 = vadd.f32 %v5979_v17, %v5911_v6  ;;  %v6079_v63 = vmul.f32 %v12818_v10, %v13249_v18  ;;  %v8003_v48 = vadd.f32 %v7971_v15, %v7903_v14  ;;  %v13279_v11 = vld [vmem:[#allocation6 + $0xd8] sm:$0xff] }
 0x694   : > { %15983 = vst [vmem:[#allocation22_spill] sm:$0xff] %v13271_v41  ;;  %v7603_v34 = vadd.f32 %v7571_v56, %v7503_v31  ;;  %v7972_v49 = vmul.f32 %v12994_v38, %v13251_v47  ;;  %v8072_v58 = vmul.f32 %v13087_v30, %v13253_v51  ;;  %15984 = vst [vmem:[#allocation26_spill] sm:$0xff] %v13279_v11  ;;  %v13281_v43 = vld [vmem:[#allocation6 + $0xb1] sm:$0xff]  ;;  %v13285_v6 = vld [vmem:[#allocation6 + $0xd9] sm:$0xff] }
 0x695   : > { %15985 = vst [vmem:[#allocation28_spill] sm:$0xff] %v13281_v43  ;;  %v6811_v26 = vadd.f32 %v6779_v59, %v6711_v55  ;;  %v6879_v57 = vmul.f32 %v12915_v2, %v13263_v19  ;;  %15986 = vst [vmem:[#allocation148_spill] sm:$0xff] %v13285_v6  ;;  %v13287_v17 = vld [vmem:[#allocation6 + $0xda] sm:$0xff]  ;;  %v6111_v15 = vadd.f32 %v6079_v63, %v6011_v25  ;;  %v13295_v55 = vld [vmem:[#allocation6 + $0xb2] sm:$0xff] }
 0x696   : > { %15987 = vst [vmem:[#allocation183_spill] sm:$0xff] %v13287_v17  ;;  %v6180_v56 = vmul.f32 %v12823_v53, %v13265_v12  ;;  %v8103_v14 = vadd.f32 %v8071_v61, %v8003_v48  ;;  %v7704_v31 = vadd.f32 %v7672_v4, %v7603_v34  ;;  %v6979_v18 = vmul.f32 %v12919_v8, %v13269_v16  ;;  %v13301_v25 = vld [vmem:[#allocation6 + $0xdc] sm:$0xff] }
 0x697   : > { %v7079_v51 = vmul.f32 %v12923_v27, %v13271_v41  ;;  %15988 = vst [vmem:[#allocation180_spill] sm:$0xff] %v13295_v55  ;;  %v6911_v59 = vadd.f32 %v6879_v57, %v6811_v26  ;;  %v7180_v47 = vmul.f32 %v12933_v20, %v13279_v11  ;;  %15990 = vst [vmem:[#allocation118_spill] sm:$0xff] %v13301_v25  ;;  %v13310_v26 = vld [vmem:[#allocation6 + $0xf0] sm:$0xff]  ;;  %v13344_v41 = vld [vmem:[#allocation6 + $0xc8] sm:$0xff] }
 0x698   : > { %v6212_v63 = vadd.f32 %v6180_v56, %v6111_v15  ;;  %v6280_v4 = vmul.f32 %v12832_v23, %v13281_v43  ;;  %v8139_v61 = vsel %vm2869_vm2, %v8103_v14, 0.0  ;;  %v7804_v48 = vadd.f32 %v7772_v0, %v7704_v31  ;;  %15991 = vst [vmem:[#allocation153_spill] sm:$0xff] %v13310_v26  ;;  %v13314_v11 = vld [vmem:[#allocation6 + $0xf1] sm:$0xff] }
 0x699   : > { %v7280_v34 = vmul.f32 %v12943_v37, %v13285_v6  ;;  %v7380_v57 = vmul.f32 %v12947_v36, %v13287_v17  ;;  %8140 = vadd.xlane.f32.xlu0 %v8139_v61  ;;  %v7011_v54 = vadd.f32 %v6979_v18, %v6911_v59  ;;  %15993 = vst [vmem:[#allocation32_spill] sm:$0xff] %v13314_v11  ;;  %v13324_v6 = vld [vmem:[#allocation6 + $0xf2] sm:$0xff] }
 0x69a   : > { %v6312_v15 = vadd.f32 %v6280_v4, %v6212_v63  ;;  %v6380_v56 = vmul.f32 %v12844_v46, %v13295_v55  ;;  %v5680_v0 = vmul.f32 %v13161_v9, %v15970_v39  ;;  %v7904_v14 = vadd.f32 %v7872_v21, %v7804_v48  ;;  %15994 = vst [vmem:[#allocation150_spill] sm:$0xff] %v13324_v6  ;;  %v13326_v61 = vld [vmem:[#allocation6 + $0xb4] sm:$0xff] }
 0x69b   : > { %v7480_v31 = vmul.f32 %v12968_v7, %v13299_v40  ;;  %v7580_v17 = vmul.f32 %v12972_v42, %v13301_v25  ;;  %15995 = vst [vmem:[#allocation186_spill] sm:$0xff] %v13326_v61  ;;  %v5780_v18 = vmul.f32 %v13174_v24, %v15971_v3  ;;  %v7111_v59 = vadd.f32 %v7079_v51, %v7011_v54  ;;  %v13334_v4 = vld [vmem:[#allocation6 + $0xf3] sm:$0xff] }
 0x69c   : > { %v13332_v63 = vmul.f32 %v12976_v44, %v13310_v26  ;;  %15996 = vst [vmem:[#allocation182_spill] sm:$0xff] %v13334_v4  ;;  %v6412_v21 = vadd.f32 %v6380_v56, %v6312_v15  ;;  %v6480_v48 = vmul.f32 %v12863_v33, %v13312_v45  ;;  %v8004_v9 = vadd.f32 %v7972_v49, %v7904_v14  ;;  %v13342_v40 = vld [vmem:[#allocation6 + $0xf4] sm:$0xff]  ;;  %v13354_v14 = vld [vmem:[#allocation6 + $0xc9] sm:$0xff] }
 0x69d   : > { %v13340_v25 = vmul.f32 %v12980_v35, %v13314_v11  ;;  %15997 = vst [vmem:[#allocation123_spill] sm:$0xff] %v13342_v40  ;;  %v5812_v54 = vadd.f32 %v5780_v18, %v5680_v0  ;;  %v5880_v51 = vmul.f32 %v13188_v13, %v15977_v62  ;;  %v7212_v24 = vadd.f32 %v7180_v47, %v7111_v59  ;;  %v13360_v0 = vld [vmem:[#allocation6 + $0xca] sm:$0xff] }
 0x69e   : > { %v13350_v15 = vmul.f32 %v12990_v60, %v13324_v6  ;;  %v6512_v56 = vadd.f32 %v6480_v48, %v6412_v21  ;;  %v6580_v49 = vmul.f32 %v12876_v50, %v13326_v61  ;;  %15998 = vst [vmem:[#allocation120_spill] sm:$0xff] %v13354_v14  ;;  %v8104_v11 = vadd.f32 %v8072_v58, %v8004_v9  ;;  %v13362_v18 = vld [vmem:[#allocation6 + $0xcb] sm:$0xff] }
 0x69f   : > { %v13358_v26 = vmul.f32 %v12994_v38, %v13334_v4  ;;  %15999 = vst [vmem:[#allocation155_spill] sm:$0xff] %v13360_v0  ;;  %16000 = vst [vmem:[#allocation36_spill] sm:$0xff] %v13362_v18  ;;  %v5912_v47 = vadd.f32 %v5880_v51, %v5812_v54  ;;  %v5980_v59 = vmul.f32 %v13200_v5, %v12812_v1  ;;  %v13372_v58 = vld [vmem:[#allocation6 + $0xcc] sm:$0xff]  ;;  %v13374_v4 = vld [vmem:[#allocation6 + $0xe0] sm:$0xff] }
 0x6a0   : > { %v7312_v13 = vadd.f32 %v7280_v34, %v7212_v24  ;;  %v13368_v21 = vmul.f32 %v13087_v30, %v13342_v40  ;;  %v6612_v48 = vadd.f32 %v6580_v49, %v6512_v56  ;;  %v6680_v9 = vmul.f32 %v12886_v22, %v13344_v41  ;;  %16002 = vst [vmem:[#allocation189_spill] sm:$0xff] %v13372_v58  ;;  %v13379_v51 = vld [vmem:[#allocation6 + $0xe1] sm:$0xff] }
 0x6a1   : > { %16003 = vst [vmem:[#allocation125_spill] sm:$0xff] %v13374_v4  ;;  %v8142_v6 = vsel %vm2869_vm2, %v8104_v11, 0.0  ;;  %v6780_v54 = vmul.f32 %v12893_v29, %v13354_v14  ;;  %v13381_v24 = vld [vmem:[#allocation6 + $0xe2] sm:$0xff]  ;;  %v6012_v34 = vadd.f32 %v5980_v59, %v5912_v47  ;;  %v6080_v56 = vmul.f32 %v13215_v52, %v12818_v10 }
 0x6a2   : > { %16001 = vst [vmem:[#allocation152_spill] sm:$0xff] %v13368_v21  ;;  %16004 = vst [vmem:[#allocation185_spill] sm:$0xff] %v13381_v24  ;;  %8143 = vadd.xlane.f32.xlu0 %v8142_v6  ;;  %v7412_v49 = vadd.f32 %v7380_v57, %v7312_v13  ;;  %v6712_v5 = vadd.f32 %v6680_v9, %v6612_v48  ;;  %v6880_v40 = vmul.f32 %v12915_v2, %v13360_v0  ;;  %v13389_v21 = vld [vmem:[#allocation6 + $0xe3] sm:$0xff] }
 0x6a3   : > { %v6980_v11 = vmul.f32 %v12919_v8, %v13362_v18  ;;  %v7080_v14 = vmul.f32 %v12923_v27, %v13372_v58  ;;  %v7181_v47 = vmul.f32 %v12933_v20, %v13374_v4  ;;  %v13395_v59 = vld [vmem:[#allocation6 + $0xe4] sm:$0xff]  ;;  %v6112_v52 = vadd.f32 %v6080_v56, %v6012_v34  ;;  %v13403_v18 = vld [vmem:[#allocation6 + $0xf8] sm:$0xff] }
 0x6a4   : > { %v6181_v13 = vmul.f32 %v13231_v28, %v12823_v53  ;;  %v7512_v6 = vadd.f32 %v7480_v31, %v7412_v49  ;;  %v6812_v57 = vadd.f32 %v6780_v54, %v6712_v5  ;;  %v7281_v48 = vmul.f32 %v12943_v37, %v13379_v51  ;;  %v13405_v58 = vld [vmem:[#allocation6 + $0xf9] sm:$0xff] }
 0x6a5   : > { %v7381_v9 = vmul.f32 %v12947_v36, %v13381_v24  ;;  %v7481_v4 = vmul.f32 %v12968_v7, %v13389_v21  ;;  %v6281_v34 = vmul.f32 %v13247_v32, %v12832_v23  ;;  %v5681_v28 = vmul.f32 %v13265_v12, %v15970_v39  ;;  %v13415_v56 = vld [vmem:[#allocation6 + $0xfa] sm:$0xff] }
 0x6a6   : > { %v6213_v0 = vadd.f32 %v6181_v13, %v6112_v52  ;;  %v7612_v5 = vadd.f32 %v7580_v17, %v7512_v6  ;;  %v6912_v31 = vadd.f32 %v6880_v40, %v6812_v57  ;;  %v7581_v54 = vmul.f32 %v12972_v42, %v13395_v59  ;;  %v13417_v49 = vld [vmem:[#allocation6 + $0xfb] sm:$0xff] }
 0x6a7   : > { %v5781_v24 = vmul.f32 %v13281_v43, %v15971_v3  ;;  %v13423_v52 = vmul.f32 %v12976_v44, %v13403_v18  ;;  %v13427_v32 = vmul.f32 %v12980_v35, %v13405_v58  ;;  %v6381_v40 = vmul.f32 %v13263_v19, %v12844_v46  ;;  %v13432_v57 = vld [vmem:[#allocation6 + $0xfc] sm:$0xff] }
 0x6a8   : > { %v6313_v17 = vadd.f32 %v6281_v34, %v6213_v0  ;;  %v7713_v13 = vadd.f32 %v13332_v63, %v7612_v5  ;;  %v7012_v6 = vadd.f32 %v6980_v11, %v6912_v31  ;;  %v5881_v43 = vmul.f32 %v13295_v55, %v15977_v62  ;;  %v16005_v31 = vld [vmem:[#allocation22_spill] sm:$0xff] }
 0x6a9   : > { %v5813_v12 = vadd.f32 %v5781_v24, %v5681_v28  ;;  %v13438_v3 = vmul.f32 %v12990_v60, %v13415_v56  ;;  %v13442_v39 = vmul.f32 %v12994_v38, %v13417_v49  ;;  %v6481_v19 = vmul.f32 %v13269_v16, %v12863_v33 }
 0x6aa   : > { %v6413_v0 = vadd.f32 %v6381_v40, %v6313_v17  ;;  %v7813_v63 = vadd.f32 %v13340_v25, %v7713_v13  ;;  %v7112_v11 = vadd.f32 %v7080_v14, %v7012_v6  ;;  %v5981_v24 = vmul.f32 %v13312_v45, %v12812_v1  ;;  %v16006_v17 = vld [vmem:[#allocation26_spill] sm:$0xff]  ;;  %v16007_v14 = vld [vmem:[#allocation148_spill] sm:$0xff]  ;;  %v16008_v6 = vld [vmem:[#allocation183_spill] sm:$0xff] }
 0x6ab   : > { %v5913_v34 = vadd.f32 %v5881_v43, %v5813_v12  ;;  %v13451_v28 = vmul.f32 %v13087_v30, %v13432_v57  ;;  %v6581_v55 = vmul.f32 %v16005_v31, %v12876_v50  ;;  %v6681_v40 = vmul.f32 %v16006_v17, %v12886_v22 }
 0x6ac   : > { %v6513_v5 = vadd.f32 %v6481_v19, %v6413_v0  ;;  %v7913_v16 = vadd.f32 %v13350_v15, %v7813_v63  ;;  %v7213_v62 = vadd.f32 %v7181_v47, %v7112_v11  ;;  %v6081_v12 = vmul.f32 %v13326_v61, %v12818_v10  ;;  %v16009_v19 = vld [vmem:[#allocation121_spill] sm:$0xff]  ;;  %v16010_v63 = vld [vmem:[#allocation118_spill] sm:$0xff]  ;;  %v13485_v10 = vld [vmem:[#allocation6 + $0x108] sm:$0xff] }
 0x6ad   : > { %v6013_v25 = vadd.f32 %v5981_v24, %v5913_v34  ;;  %v6781_v13 = vmul.f32 %v16007_v14, %v12893_v29  ;;  %v6881_v0 = vmul.f32 %v16008_v6, %v12915_v2  ;;  %v6981_v31 = vmul.f32 %v16009_v19, %v12919_v8  ;;  %v16011_v11 = vld [vmem:[#allocation153_spill] sm:$0xff]  ;;  %v16012_v24 = vld [vmem:[#allocation32_spill] sm:$0xff]  ;;  %16019 = vst [vmem:[#allocation34_spill] sm:$0xff] %v13485_v10 }
 0x6ae   : > { %v6613_v43 = vadd.f32 %v6581_v55, %v6513_v5  ;;  %v8013_v45 = vadd.f32 %v13358_v26, %v7913_v16  ;;  %v7313_v17 = vadd.f32 %v7281_v48, %v7213_v62  ;;  %v6182_v15 = vmul.f32 %v13344_v41, %v12823_v53  ;;  %v16013_v14 = vld [vmem:[#allocation152_spill] sm:$0xff]  ;;  %v16015_v41 = vld [vmem:[#allocation150_spill] sm:$0xff]  ;;  %v16016_v16 = vld [vmem:[#allocation155_spill] sm:$0xff] }
 0x6af   : > { %v6113_v1 = vadd.f32 %v6081_v12, %v6013_v25  ;;  %v7081_v55 = vmul.f32 %v16010_v63, %v12923_v27  ;;  %v7182_v34 = vmul.f32 %v16011_v11, %v12933_v20  ;;  %v7282_v5 = vmul.f32 %v16012_v24, %v12943_v37  ;;  %v16014_v62 = vld [vmem:[#allocation120_spill] sm:$0xff] }
 0x6b0   : > { %v6713_v47 = vadd.f32 %v6681_v40, %v6613_v43  ;;  %v8113_v6 = vadd.f32 %v16013_v14, %v8013_v45  ;;  %v7413_v19 = vadd.f32 %v7381_v9, %v7313_v17  ;;  %v6282_v26 = vmul.f32 %v16014_v62, %v12832_v23  ;;  %v16017_v12 = vld [vmem:[#allocation196_spill] sm:$0xff]  ;;  %v16018_v43 = vld [vmem:[#allocation78_spill] sm:$0xff]  ;;  %v16021_v9 = vld [vmem:[#allocation27_spill] sm:$0xff] }
 0x6b1   : > { %v6214_v61 = vadd.f32 %v6182_v15, %v6113_v1  ;;  %v7382_v40 = vmul.f32 %v16015_v41, %v12947_v36  ;;  %v6382_v25 = vmul.f32 %v16016_v16, %v12844_v46  ;;  %v6102_v63 = vadd.f32 %v16018_v43, %v16017_v12  ;;  %v13487_v45 = vld [vmem:[#allocation6 + $0x109] sm:$0xff]  ;;  %v16022_v15 = vld [vmem:[#allocation182_spill] sm:$0xff]  ;;  %v16023_v14 = vld [vmem:[#allocation123_spill] sm:$0xff] }
 0x6b2   : > { %v6813_v48 = vadd.f32 %v6781_v13, %v6713_v47  ;;  %v8169_v11 = vsel %vm2869_vm2, %v8113_v6, 0.0  ;;  %v7513_v24 = vadd.f32 %v7481_v4, %v7413_v19  ;;  %16020 = vst [vmem:[#allocation122_spill] sm:$0xff] %v13487_v45  ;;  %v6171_v13 = vmul.f32 %v16021_v9, %v12823_v53  ;;  %v16024_v6 = vld [vmem:[#allocation36_spill] sm:$0xff]  ;;  %v16027_v12 = vld [vmem:[#allocation83_spill] sm:$0xff] }
 0x6b3   : > { %v6314_v1 = vadd.f32 %v6282_v26, %v6214_v61  ;;  %8170 = vadd.xlane.f32.xlu1 %v8169_v11  ;;  %v7482_v47 = vmul.f32 %v16022_v15, %v12968_v7  ;;  %v13495_v62 = vmul.f32 %v16023_v14, %v12972_v42  ;;  %v6482_v4 = vmul.f32 %v16024_v6, %v12863_v33  ;;  %v13499_v41 = vld [vmem:[#allocation6 + $0x10a] sm:$0xff] }
 0x6b4   : > { %v6913_v17 = vadd.f32 %v6881_v0, %v6813_v48  ;;  %v7613_v19 = vadd.f32 %v7581_v54, %v7513_v24  ;;  %16025 = vst [vmem:[#allocation157_spill] sm:$0xff] %v13499_v41  ;;  %v13501_v16 = vld [vmem:[#allocation6 + $0x10b] sm:$0xff]  ;;  %v6203_v26 = vadd.f32 %v6171_v13, %v6102_v63  ;;  %v6271_v0 = vmul.f32 %v16027_v12, %v12832_v23 }
 0x6b5   : > { %16026 = vst [vmem:[#allocation154_spill] sm:$0xff] %v13501_v16  ;;  %v6414_v61 = vadd.f32 %v6382_v25, %v6314_v1  ;;  %v13507_v43 = vmul.f32 %v12976_v44, %v13485_v10  ;;  %v13511_v11 = vmul.f32 %v12980_v35, %v13487_v45  ;;  %v16028_v54 = vld [vmem:[#allocation189_spill] sm:$0xff]  ;;  %v16030_v1 = vld [vmem:[#allocation35_spill] sm:$0xff]  ;;  %v13526_v14 = vmul.f32 %v12994_v38, %v13501_v16 }
 0x6b6   : > { %v7013_v48 = vadd.f32 %v6981_v31, %v6913_v17  ;;  %v6582_v24 = vmul.f32 %v16028_v54, %v12876_v50  ;;  %v7714_v9 = vadd.f32 %v13423_v52, %v7613_v19  ;;  %v13516_v15 = vld [vmem:[#allocation6 + $0x10c] sm:$0xff]  ;;  %v6303_v63 = vadd.f32 %v6271_v0, %v6203_v26 }
 0x6b7   : > { %16029 = vst [vmem:[#allocation194_spill] sm:$0xff] %v13516_v15  ;;  %v6514_v25 = vadd.f32 %v6482_v4, %v6414_v61  ;;  %v6371_v31 = vmul.f32 %v16030_v1, %v12844_v46  ;;  %v13522_v17 = vmul.f32 %v12990_v60, %v13499_v41  ;;  %v16031_v6 = vld [vmem:[#allocation125_spill] sm:$0xff]  ;;  %v16032_v61 = vld [vmem:[#allocation84_spill] sm:$0xff] }
 0x6b8   : > { %v7113_v13 = vadd.f32 %v7081_v55, %v7013_v48  ;;  %v6682_v12 = vmul.f32 %v16031_v6, %v12886_v22  ;;  %v7814_v52 = vadd.f32 %v13427_v32, %v7714_v9  ;;  %v6471_v26 = vmul.f32 %v16032_v61, %v12863_v33  ;;  %v16033_v54 = vld [vmem:[#allocation185_spill] sm:$0xff] }
 0x6b9   : > { %v6614_v19 = vadd.f32 %v6582_v24, %v6514_v25  ;;  %v6403_v4 = vadd.f32 %v6371_v31, %v6303_v63  ;;  %v13535_v55 = vmul.f32 %v13087_v30, %v13516_v15  ;;  %v6782_v48 = vmul.f32 %v13379_v51, %v12893_v29  ;;  %v16034_v24 = vld [vmem:[#allocation85_spill] sm:$0xff]  ;;  %v16035_v51 = vld [vmem:[#allocation86_spill] sm:$0xff] }
 0x6ba   : > { %v7214_v0 = vadd.f32 %v7182_v34, %v7113_v13  ;;  %v6882_v1 = vmul.f32 %v16033_v54, %v12915_v2  ;;  %v7914_v6 = vadd.f32 %v13438_v3, %v7814_v52  ;;  %v6571_v9 = vmul.f32 %v16034_v24, %v12876_v50  ;;  %v13544_v25 = vld [vmem:[#allocation6 + $0x50] sm:$0xff] }
 0x6bb   : > { %v6714_v16 = vadd.f32 %v6682_v12, %v6614_v19  ;;  %v6503_v32 = vadd.f32 %v6471_v26, %v6403_v4  ;;  %v6982_v63 = vmul.f32 %v13389_v21, %v12919_v8  ;;  %v7082_v31 = vmul.f32 %v13395_v59, %v12923_v27  ;;  %v16036_v52 = vld [vmem:[#allocation25_spill] sm:$0xff]  ;;  %v16037_v19 = vld [vmem:[#allocation79_spill] sm:$0xff] }
 0x6bc   : > { %v7314_v34 = vadd.f32 %v7282_v5, %v7214_v0  ;;  %v6671_v13 = vmul.f32 %v16035_v51, %v12886_v22  ;;  %v8014_v61 = vadd.f32 %v13442_v39, %v7914_v6  ;;  %v6103_v4 = vadd.f32 %v16037_v19, %v16036_v52  ;;  %v13555_v26 = vld [vmem:[#allocation6 + $0x51] sm:$0xff] }
 0x6bd   : > { %v6814_v3 = vadd.f32 %v6782_v48, %v6714_v16  ;;  %v6603_v12 = vadd.f32 %v6571_v9, %v6503_v32  ;;  %v7183_v5 = vmul.f32 %v13403_v18, %v12933_v20  ;;  %v7283_v21 = vmul.f32 %v13405_v58, %v12943_v37  ;;  %v16038_v48 = vld [vmem:[#allocation87_spill] sm:$0xff]  ;;  %v13566_v32 = vld [vmem:[#allocation6 + $0x52] sm:$0xff] }
 0x6be   : > { %v7414_v54 = vadd.f32 %v7382_v40, %v7314_v34  ;;  %v6172_v59 = vmul.f32 %v12823_v53, %v13544_v25  ;;  %v8114_v0 = vadd.f32 %v13451_v28, %v8014_v61  ;;  %v6771_v6 = vmul.f32 %v16038_v48, %v12893_v29  ;;  %v13573_v51 = vld [vmem:[#allocation6 + $0x110] sm:$0xff] }
 0x6bf   : > { %v6914_v39 = vadd.f32 %v6882_v1, %v6814_v3  ;;  %v6703_v16 = vadd.f32 %v6671_v13, %v6603_v12  ;;  %v7383_v40 = vmul.f32 %v13415_v56, %v12947_v36  ;;  %v6272_v58 = vmul.f32 %v12832_v23, %v13555_v26  ;;  %16039 = vst [vmem:[#allocation40_spill] sm:$0xff] %v13573_v51  ;;  %v16040_v1 = vld [vmem:[#allocation110_spill] sm:$0xff]  ;;  %v13582_v3 = vld [vmem:[#allocation6 + $0x111] sm:$0xff] }
 0x6c0   : > { %v7514_v24 = vadd.f32 %v7482_v47, %v7414_v54  ;;  %v6204_v18 = vadd.f32 %v6172_v59, %v6103_v4  ;;  %v8172_v9 = vsel %vm2869_vm2, %v8114_v0, 0.0  ;;  %v6871_v13 = vmul.f32 %v16040_v1, %v12915_v2  ;;  %v13577_v61 = vld [vmem:[#allocation6 + $0x53] sm:$0xff]  ;;  %16041 = vst [vmem:[#allocation188_spill] sm:$0xff] %v13582_v3  ;;  %v16043_v59 = vld [vmem:[#allocation88_spill] sm:$0xff] }
 0x6c1   : > { %v7014_v34 = vadd.f32 %v6982_v63, %v6914_v39  ;;  %v6803_v28 = vadd.f32 %v6771_v6, %v6703_v16  ;;  %8173 = vadd.xlane.f32.xlu0 %v8172_v9  ;;  %v7483_v56 = vmul.f32 %v13417_v49, %v12968_v7  ;;  %v6372_v63 = vmul.f32 %v12844_v46, %v13566_v32  ;;  %v13588_v4 = vld [vmem:[#allocation6 + $0x112] sm:$0xff]  ;;  %v13605_v9 = vld [vmem:[#allocation6 + $0x68] sm:$0xff] }
 0x6c2   : > { %v7614_v47 = vadd.f32 %v13495_v62, %v7514_v24  ;;  %v6304_v12 = vadd.f32 %v6272_v58, %v6204_v18  ;;  %v7583_v19 = vmul.f32 %v13432_v57, %v12972_v42  ;;  %16042 = vst [vmem:[#allocation127_spill] sm:$0xff] %v13588_v4  ;;  %v6971_v0 = vmul.f32 %v16043_v59, %v12919_v8  ;;  %v13592_v62 = vld [vmem:[#allocation6 + $0x54] sm:$0xff]  ;;  %v13620_v59 = vld [vmem:[#allocation6 + $0x69] sm:$0xff] }
 0x6c3   : > { %v7114_v52 = vadd.f32 %v7082_v31, %v7014_v34  ;;  %v6903_v54 = vadd.f32 %v6871_v13, %v6803_v28  ;;  %v7684_v39 = vmul.f32 %v12976_v44, %v13573_v51  ;;  %v13597_v16 = vld [vmem:[#allocation6 + $0x113] sm:$0xff]  ;;  %v6472_v31 = vmul.f32 %v12863_v33, %v13577_v61  ;;  %v5736_v13 = vld [vmem:[#allocation6 + $0x49] sm:$0xff] }
 0x6c4   : > { %v7715_v49 = vadd.f32 %v13507_v43, %v7614_v47  ;;  %16044 = vst [vmem:[#allocation124_spill] sm:$0xff] %v13597_v16  ;;  %v6404_v48 = vadd.f32 %v6372_v63, %v6304_v12  ;;  %v7784_v6 = vmul.f32 %v12980_v35, %v13582_v3  ;;  %v16045_v18 = vld [vmem:[#allocation89_spill] sm:$0xff]  ;;  %v5636_v43 = vld [vmem:[#allocation6 + $0x48] sm:$0xff]  ;;  %v13610_v28 = vmul.f32 %v12990_v60, %v13588_v4 }
 0x6c5   : > { %v7215_v57 = vadd.f32 %v7183_v5, %v7114_v52  ;;  %v7003_v24 = vadd.f32 %v6971_v0, %v6903_v54  ;;  %v7071_v58 = vmul.f32 %v16045_v18, %v12923_v27  ;;  %v6572_v5 = vmul.f32 %v12876_v50, %v13592_v62  ;;  %v16046_v52 = vld [vmem:[#allocation20_spill] sm:$0xff]  ;;  %v13644_v41 = vld [vmem:[#allocation6 + $0x114] sm:$0xff] }
 0x6c6   : > { %v7815_v34 = vadd.f32 %v13511_v11, %v7715_v49  ;;  %v6504_v1 = vadd.f32 %v6472_v31, %v6404_v48  ;;  %v13616_v12 = vmul.f32 %v12994_v38, %v13597_v16  ;;  %v7172_v54 = vmul.f32 %v16046_v52, %v12933_v20  ;;  %v16047_v48 = vld [vmem:[#allocation70_spill] sm:$0xff]  ;;  %v5836_v18 = vld [vmem:[#allocation6 + $0x4a] sm:$0xff]  ;;  %16053 = vst [vmem:[#allocation159_spill] sm:$0xff] %v13644_v41 }
 0x6c7   : > { %v7315_v47 = vadd.f32 %v7283_v21, %v7215_v57  ;;  %v7103_v63 = vadd.f32 %v7071_v58, %v7003_v24  ;;  %v6672_v49 = vmul.f32 %v12886_v22, %v13605_v9  ;;  %v5672_v31 = vmul.f32 %v16047_v48, %v5636_v43  ;;  %v16048_v16 = vld [vmem:[#allocation93_spill] sm:$0xff]  ;;  %v16049_v58 = vld [vmem:[#allocation72_spill] sm:$0xff] }
 0x6c8   : > { %v7915_v11 = vadd.f32 %v13522_v17, %v7815_v34  ;;  %v6604_v0 = vadd.f32 %v6572_v5, %v6504_v1  ;;  %v7272_v4 = vmul.f32 %v16048_v16, %v12943_v37  ;;  %v13628_v24 = vld [vmem:[#allocation6 + $0x6a] sm:$0xff]  ;;  %v5772_v52 = vmul.f32 %v16049_v58, %v5736_v13  ;;  %v16051_v16 = vld [vmem:[#allocation75_spill] sm:$0xff]  ;;  %v16052_v13 = vld [vmem:[#allocation114_spill] sm:$0xff] }
 0x6c9   : > { %v7415_v21 = vadd.f32 %v7383_v40, %v7315_v47  ;;  %v7204_v57 = vadd.f32 %v7172_v54, %v7103_v63  ;;  %v16050_v17 = vld [vmem:[#allocation117_spill] sm:$0xff]  ;;  %v6772_v5 = vmul.f32 %v12893_v29, %v13620_v59  ;;  %v5872_v54 = vmul.f32 %v16051_v16, %v5836_v18 }
 0x6ca   : > { %v8015_v3 = vadd.f32 %v13526_v14, %v7915_v11  ;;  %v7372_v34 = vmul.f32 %v16050_v17, %v12947_v36  ;;  %v6704_v1 = vadd.f32 %v6672_v49, %v6604_v0  ;;  %v5936_v43 = vld [vmem:[#allocation6 + $0x4b] sm:$0xff]  ;;  %v5804_v63 = vadd.f32 %v5772_v52, %v5672_v31 }
 0x6cb   : > { %v7515_v51 = vadd.f32 %v7483_v56, %v7415_v21  ;;  %v7304_v40 = vadd.f32 %v7272_v4, %v7204_v57  ;;  %v13636_v47 = vld [vmem:[#allocation6 + $0x6b] sm:$0xff]  ;;  %v7472_v14 = vmul.f32 %v16052_v13, %v12968_v7  ;;  %v6872_v0 = vmul.f32 %v12915_v2, %v13628_v24 }
 0x6cc   : > { %v8115_v15 = vadd.f32 %v13535_v55, %v8015_v3  ;;  %v6804_v11 = vadd.f32 %v6772_v5, %v6704_v1  ;;  %v6036_v49 = vld [vmem:[#allocation6 + $0x4c] sm:$0xff]  ;;  %v5904_v21 = vadd.f32 %v5872_v54, %v5804_v63  ;;  %v16055_v55 = vld [vmem:[#allocation95_spill] sm:$0xff]  ;;  %v6972_v1 = vmul.f32 %v12919_v8, %v13636_v47 }
 0x6cd   : > { %v7615_v17 = vadd.f32 %v7583_v19, %v7515_v51  ;;  %v7404_v56 = vadd.f32 %v7372_v34, %v7304_v40  ;;  %v13646_v4 = vld [vmem:[#allocation6 + $0x6c] sm:$0xff]  ;;  %v7572_v3 = vmul.f32 %v16055_v55, %v12972_v42  ;;  %v13654_v5 = vld [vmem:[#allocation6 + $0x60] sm:$0xff] }
 0x6ce   : > { %v16054_v31 = vld [vmem:[#allocation21_spill] sm:$0xff]  ;;  %v8175_v18 = vsel %vm2869_vm2, %v8115_v15, 0.0  ;;  %v6904_v52 = vadd.f32 %v6872_v0, %v6804_v11  ;;  %16056 = vst [vmem:[#allocation44_spill] sm:$0xff] %v13654_v5  ;;  %v16057_v40 = vld [vmem:[#allocation76_spill] sm:$0xff]  ;;  %v7072_v11 = vmul.f32 %v12923_v27, %v13646_v4  ;;  %v13665_v0 = vld [vmem:[#allocation6 + $0x61] sm:$0xff] }
 0x6cf   : > { %v5972_v57 = vmul.f32 %v16054_v31, %v5936_v43  ;;  %8176 = vadd.xlane.f32.xlu1 %v8175_v18  ;;  %v7716_v51 = vadd.f32 %v7684_v39, %v7615_v17  ;;  %v7504_v19 = vadd.f32 %v7472_v14, %v7404_v56  ;;  %v6072_v13 = vmul.f32 %v16057_v40, %v6036_v49  ;;  %v13659_v63 = vld [vmem:[#allocation6 + $0x90] sm:$0xff] }
 0x6d0   : > { %v8084_v43 = vmul.f32 %v13087_v30, %v13644_v41  ;;  %v7673_v15 = vmul.f32 %v13659_v63, %v12976_v44  ;;  %v7004_v54 = vadd.f32 %v6972_v1, %v6904_v52  ;;  %16058 = vst [vmem:[#allocation156_spill] sm:$0xff] %v13665_v0  ;;  %v6173_v49 = vmul.f32 %v12823_v53, %v13654_v5  ;;  %v13669_v17 = vld [vmem:[#allocation6 + $0x91] sm:$0xff]  ;;  %v16063_v41 = vld [vmem:[#allocation91_spill] sm:$0xff] }
 0x6d1   : > { %v6004_v34 = vadd.f32 %v5972_v57, %v5904_v21  ;;  %v7816_v18 = vadd.f32 %v7784_v6, %v7716_v51  ;;  %v7604_v39 = vadd.f32 %v7572_v3, %v7504_v19  ;;  %v7773_v56 = vmul.f32 %v13669_v17, %v12980_v35  ;;  %v13673_v21 = vld [vmem:[#allocation6 + $0x92] sm:$0xff]  ;;  %v13679_v6 = vld [vmem:[#allocation6 + $0x62] sm:$0xff] }
 0x6d2   : > { %16059 = vst [vmem:[#allocation18_spill] sm:$0xff] %v13673_v21  ;;  %v7873_v57 = vmul.f32 %v13673_v21, %v12990_v60  ;;  %v7104_v55 = vadd.f32 %v7072_v11, %v7004_v54  ;;  %v16060_v52 = vld [vmem:[#allocation181_spill] sm:$0xff]  ;;  %16061 = vst [vmem:[#allocation193_spill] sm:$0xff] %v13679_v6  ;;  %v8073_v45 = vmul.f32 %v13087_v30, %v16063_v41  ;;  %v16064_v54 = vld [vmem:[#allocation24_spill] sm:$0xff] }
 0x6d3   : > { %v6104_v14 = vadd.f32 %v6072_v13, %v6004_v34  ;;  %v7173_v1 = vmul.f32 %v16060_v52, %v12933_v20  ;;  %v7916_v3 = vadd.f32 %v13610_v28, %v7816_v18  ;;  %v7705_v51 = vadd.f32 %v7673_v15, %v7604_v39  ;;  %v16062_v13 = vld [vmem:[#allocation90_spill] sm:$0xff]  ;;  %v13690_v52 = vld [vmem:[#allocation6 + $0x63] sm:$0xff] }
 0x6d4   : > { %v6273_v34 = vmul.f32 %v12832_v23, %v13665_v0  ;;  %v7973_v5 = vmul.f32 %v12994_v38, %v16062_v13  ;;  %v7273_v11 = vmul.f32 %v16064_v54, %v12943_v37  ;;  %16065 = vst [vmem:[#allocation38_spill] sm:$0xff] %v13690_v52  ;;  %v6373_v18 = vmul.f32 %v12844_v46, %v13679_v6  ;;  %v13697_v0 = vld [vmem:[#allocation6 + $0x64] sm:$0xff] }
 0x6d5   : > { %v6205_v19 = vadd.f32 %v6173_v49, %v6104_v14  ;;  %v7205_v10 = vadd.f32 %v7173_v1, %v7104_v55  ;;  %v8016_v21 = vadd.f32 %v13616_v12, %v7916_v3  ;;  %v7805_v28 = vadd.f32 %v7773_v56, %v7705_v51  ;;  %v16066_v14 = vld [vmem:[#allocation178_spill] sm:$0xff]  ;;  %16067 = vst [vmem:[#allocation129_spill] sm:$0xff] %v13697_v0 }
 0x6d6   : > { %v7373_v49 = vmul.f32 %v16066_v14, %v12947_v36  ;;  %v5673_v30 = vmul.f32 %v13544_v25, %v16047_v48  ;;  %v5773_v55 = vmul.f32 %v13555_v26, %v16049_v58  ;;  %v6473_v56 = vmul.f32 %v12863_v33, %v13690_v52 }
 0x6d7   : > { %v6305_v15 = vadd.f32 %v6273_v34, %v6205_v19  ;;  %v7305_v39 = vadd.f32 %v7273_v11, %v7205_v10  ;;  %v8116_v1 = vadd.f32 %v8084_v43, %v8016_v21  ;;  %v7905_v54 = vadd.f32 %v7873_v57, %v7805_v28  ;;  %v16068_v10 = vld [vmem:[#allocation119_spill] sm:$0xff]  ;;  %v13707_v19 = vld [vmem:[#allocation6 + $0x78] sm:$0xff]  ;;  %v16070_v57 = vld [vmem:[#allocation116_spill] sm:$0xff] }
 0x6d8   : > { %v7473_v51 = vmul.f32 %v16068_v10, %v12968_v7  ;;  %16069 = vst [vmem:[#allocation126_spill] sm:$0xff] %v13707_v19  ;;  %v5805_v34 = vadd.f32 %v5773_v55, %v5673_v30  ;;  %v5873_v11 = vmul.f32 %v13566_v32, %v16051_v16  ;;  %v6573_v43 = vmul.f32 %v12876_v50, %v13697_v0  ;;  %v16072_v55 = vld [vmem:[#allocation149_spill] sm:$0xff] }
 0x6d9   : > { %v6405_v12 = vadd.f32 %v6373_v18, %v6305_v15  ;;  %v7405_v3 = vadd.f32 %v7373_v49, %v7305_v39  ;;  %v8178_v25 = vsel %vm2869_vm2, %v8116_v1, 0.0  ;;  %v8005_v14 = vadd.f32 %v7973_v5, %v7905_v54  ;;  %v13716_v15 = vld [vmem:[#allocation6 + $0x79] sm:$0xff] }
 0x6da   : > { %8179 = vadd.xlane.f32.xlu0 %v8178_v25  ;;  %v7573_v28 = vmul.f32 %v16070_v57, %v12972_v42  ;;  %16071 = vst [vmem:[#allocation161_spill] sm:$0xff] %v13716_v15  ;;  %v5905_v18 = vadd.f32 %v5873_v11, %v5805_v34  ;;  %v5973_v39 = vmul.f32 %v13577_v61, %v16054_v31  ;;  %v13724_v54 = vld [vmem:[#allocation6 + $0x7a] sm:$0xff] }
 0x6db   : > { %v6505_v26 = vadd.f32 %v6473_v56, %v6405_v12  ;;  %v7505_v21 = vadd.f32 %v7473_v51, %v7405_v3  ;;  %v8105_v49 = vadd.f32 %v8073_v45, %v8005_v14  ;;  %v6673_v5 = vmul.f32 %v12886_v22, %v13707_v19  ;;  %16073 = vst [vmem:[#allocation158_spill] sm:$0xff] %v13724_v54  ;;  %v16074_v51 = vld [vmem:[#allocation96_spill] sm:$0xff]  ;;  %v13733_v11 = vld [vmem:[#allocation6 + $0x7b] sm:$0xff] }
 0x6dc   : > { %v7674_v1 = vmul.f32 %v12976_v44, %v16072_v55  ;;  %v6005_v12 = vadd.f32 %v5973_v39, %v5905_v18  ;;  %v6073_v56 = vmul.f32 %v13592_v62, %v16057_v40  ;;  %v6773_v45 = vmul.f32 %v12893_v29, %v13716_v15  ;;  %16075 = vst [vmem:[#allocation29_spill] sm:$0xff] %v13733_v11  ;;  %v16077_v57 = vld [vmem:[#allocation146_spill] sm:$0xff] }
 0x6dd   : > { %v6605_v32 = vadd.f32 %v6573_v43, %v6505_v26  ;;  %v7605_v30 = vadd.f32 %v7573_v28, %v7505_v21  ;;  %v8145_v3 = vsel %vm2869_vm2, %v8105_v49, 0.0  ;;  %v7774_v34 = vmul.f32 %v12980_v35, %v16074_v51  ;;  %v13739_v43 = vld [vmem:[#allocation6 + $0xc0] sm:$0xff]  ;;  %v13893_v15 = vld [vmem:[#allocation6 + $0xf2] sm:$0xff] }
 0x6de   : > { %8146 = vadd.xlane.f32.xlu1 %v8145_v3  ;;  %v6105_v25 = vadd.f32 %v6073_v56, %v6005_v12  ;;  %v6174_v14 = vmul.f32 %v13605_v9, %v12823_v53  ;;  %v6873_v62 = vmul.f32 %v12915_v2, %v13724_v54  ;;  %16076 = vst [vmem:[#allocation48_spill] sm:$0xff] %v13739_v43  ;;  %v13743_v18 = vld [vmem:[#allocation6 + $0x7c] sm:$0xff]  ;;  %v13839_v54 = vld [vmem:[#allocation6 + $0xca] sm:$0xff] }
 0x6df   : > { %v6705_v10 = vadd.f32 %v6673_v5, %v6605_v32  ;;  %v7706_v61 = vadd.f32 %v7674_v1, %v7605_v30  ;;  %v7874_v28 = vmul.f32 %v12990_v60, %v16077_v57  ;;  %16078 = vst [vmem:[#allocation16_spill] sm:$0xff] %v13743_v18  ;;  %v6274_v49 = vmul.f32 %v13620_v59, %v12832_v23  ;;  %v13747_v32 = vld [vmem:[#allocation6 + $0xc1] sm:$0xff] }
 0x6e0   : > { %v6206_v39 = vadd.f32 %v6174_v14, %v6105_v25  ;;  %16079 = vst [vmem:[#allocation99_spill] sm:$0xff] %v13747_v32  ;;  %v16080_v5 = vld [vmem:[#allocation107_spill] sm:$0xff]  ;;  %v6973_v1 = vmul.f32 %v12919_v8, %v13733_v11  ;;  %v6374_v3 = vmul.f32 %v13628_v24, %v12844_v46  ;;  %v13766_v14 = vld [vmem:[%s15192_s7 + $0x18] ss:$0 sm:$0xff]  ;;  %16101 = vst [vmem:[#allocation137_spill] sm:$0xff] %v13839_v54 }
 0x6e1   : > { %v6805_v26 = vadd.f32 %v6773_v45, %v6705_v10  ;;  %v7806_v21 = vadd.f32 %v7774_v34, %v7706_v61  ;;  %v7974_v9 = vmul.f32 %v12994_v38, %v16080_v5  ;;  %v5682_v10 = vmul.f32 %v16047_v48, %v13739_v43  ;;  %v13757_v45 = vld [vmem:[#allocation6 + $0xc2] sm:$0xff] }
 0x6e2   : > { %v6306_v56 = vadd.f32 %v6274_v49, %v6206_v39  ;;  %16081 = vst [vmem:[#allocation42_spill] sm:$0xff] %v13757_v45  ;;  %v7073_v61 = vmul.f32 %v12923_v27, %v13743_v18  ;;  %v5782_v34 = vmul.f32 %v16049_v58, %v13747_v32  ;;  %v7174_v49 = vmul.f32 %v13659_v63, %v12933_v20  ;;  %v13788_v43 = vld [vmem:[#allocation6 + $0x81] sm:$0xff] }
 0x6e3   : > { %v6905_v30 = vadd.f32 %v6873_v62, %v6805_v26  ;;  %v7906_v12 = vadd.f32 %v7874_v28, %v7806_v21  ;;  %v16082_v26 = vld [vmem:[#allocation98_spill] sm:$0xff]  ;;  %v6474_v21 = vmul.f32 %v13636_v47, %v12863_v33  ;;  %v13772_v28 = vld [vmem:[#allocation6 + $0xc3] sm:$0xff]  ;;  %v7274_v32 = vmul.f32 %v13669_v17, %v12943_v37  ;;  %16087 = vst [vmem:[#allocation163_spill] sm:$0xff] %v13788_v43 }
 0x6e4   : > { %v8074_v24 = vmul.f32 %v13766_v14, %v16082_v26  ;;  %v6406_v62 = vadd.f32 %v6374_v3, %v6306_v56  ;;  %16083 = vst [vmem:[#allocation131_spill] sm:$0xff] %v13772_v28  ;;  %v6574_v47 = vmul.f32 %v13646_v4, %v12876_v50  ;;  %v13784_v3 = vld [vmem:[#allocation6 + $0xc4] sm:$0xff]  ;;  %v7474_v17 = vmul.f32 %v12968_v7, %v16062_v13 }
 0x6e5   : > { %v7005_v59 = vadd.f32 %v6973_v1, %v6905_v30  ;;  %v8006_v25 = vadd.f32 %v7974_v9, %v7906_v12  ;;  %v13776_v30 = vld [vmem:[#allocation6 + $0x80] sm:$0xff]  ;;  %v5814_v9 = vadd.f32 %v5782_v34, %v5682_v10  ;;  %v5882_v1 = vmul.f32 %v16051_v16, %v13757_v45  ;;  %16085 = vst [vmem:[#allocation128_spill] sm:$0xff] %v13784_v3 }
 0x6e6   : > { %16084 = vst [vmem:[#allocation100_spill] sm:$0xff] %v13776_v30  ;;  %v6506_v56 = vadd.f32 %v6474_v21, %v6406_v62  ;;  %v5982_v34 = vmul.f32 %v16054_v31, %v13772_v28  ;;  %v6674_v4 = vmul.f32 %v12886_v22, %v13776_v30  ;;  %v13797_v62 = vld [vmem:[#allocation6 + $0xd8] sm:$0xff] }
 0x6e7   : > { %v7105_v39 = vadd.f32 %v7073_v61, %v7005_v59  ;;  %v8106_v12 = vadd.f32 %v8074_v24, %v8006_v25  ;;  %v16086_v61 = vld [vmem:[#allocation18_spill] sm:$0xff]  ;;  %v5914_v10 = vadd.f32 %v5882_v1, %v5814_v9  ;;  %16088 = vst [vmem:[#allocation160_spill] sm:$0xff] %v13797_v62  ;;  %v6082_v1 = vmul.f32 %v16057_v40, %v13784_v3  ;;  %v13819_v3 = vld [vmem:[#allocation6 + $0x84] sm:$0xff] }
 0x6e8   : > { %v7374_v63 = vmul.f32 %v16086_v61, %v12947_v36  ;;  %v6606_v24 = vadd.f32 %v6574_v47, %v6506_v56  ;;  %v16091_v56 = vld [vmem:[#allocation106_spill] sm:$0xff]  ;;  %16096 = vst [vmem:[#allocation104_spill] sm:$0xff] %v13819_v3 }
 0x6e9   : > { %v7206_v59 = vadd.f32 %v7174_v49, %v7105_v39  ;;  %v8148_v25 = vsel %vm2869_vm2, %v8106_v12, 0.0  ;;  %v7574_v39 = vmul.f32 %v12972_v42, %v16063_v41  ;;  %v13801_v49 = vld [vmem:[#allocation6 + $0x82] sm:$0xff]  ;;  %v6014_v9 = vadd.f32 %v5982_v34, %v5914_v10  ;;  %v16094_v28 = vld [vmem:[#allocation94_spill] sm:$0xff] }
 0x6ea   : > { %8149 = vadd.xlane.f32.xlu0 %v8148_v25  ;;  %16089 = vst [vmem:[#allocation19_spill] sm:$0xff] %v13801_v49  ;;  %v16090_v12 = vld [vmem:[#allocation92_spill] sm:$0xff]  ;;  %v7775_v47 = vmul.f32 %v12980_v35, %v16091_v56  ;;  %v6706_v61 = vadd.f32 %v6674_v4, %v6606_v24  ;;  %v6774_v25 = vmul.f32 %v12893_v29, %v13788_v43  ;;  %v16098_v4 = vld [vmem:[#allocation113_spill] sm:$0xff] }
 0x6eb   : > { %v7306_v21 = vadd.f32 %v7274_v32, %v7206_v59  ;;  %v7675_v13 = vmul.f32 %v12976_v44, %v16090_v12  ;;  %v13811_v32 = vld [vmem:[#allocation6 + $0xd9] sm:$0xff]  ;;  %v13813_v59 = vld [vmem:[#allocation6 + $0xc8] sm:$0xff]  ;;  %v7875_v10 = vmul.f32 %v12990_v60, %v16094_v28  ;;  %v6114_v12 = vadd.f32 %v6082_v1, %v6014_v9  ;;  %v16099_v43 = vld [vmem:[#allocation97_spill] sm:$0xff] }
 0x6ec   : > { %16092 = vst [vmem:[#allocation101_spill] sm:$0xff] %v13811_v32  ;;  %16093 = vst [vmem:[#allocation102_spill] sm:$0xff] %v13813_v59  ;;  %v13817_v34 = vld [vmem:[#allocation6 + $0x83] sm:$0xff]  ;;  %v6183_v56 = vmul.f32 %v12823_v53, %v13797_v62  ;;  %v7975_v45 = vmul.f32 %v12994_v38, %v16098_v4  ;;  %v13829_v30 = vmul.f32 %v13766_v14, %v16099_v43 }
 0x6ed   : > { %v7406_v41 = vadd.f32 %v7374_v63, %v7306_v21  ;;  %16095 = vst [vmem:[#allocation103_spill] sm:$0xff] %v13817_v34  ;;  %v13823_v24 = vld [vmem:[#allocation6 + $0xc9] sm:$0xff]  ;;  %v6806_v63 = vadd.f32 %v6774_v25, %v6706_v61  ;;  %v6874_v28 = vmul.f32 %v12915_v2, %v13801_v49  ;;  %v13833_v21 = vld [vmem:[#allocation6 + $0xda] sm:$0xff]  ;;  %v6283_v1 = vmul.f32 %v12832_v23, %v13811_v32 }
 0x6ee   : > { %16097 = vst [vmem:[#allocation60_spill] sm:$0xff] %v13823_v24  ;;  %16100 = vst [vmem:[#allocation54_spill] sm:$0xff] %v13833_v21  ;;  %v6215_v9 = vadd.f32 %v6183_v56, %v6114_v12  ;;  %v5683_v11 = vmul.f32 %v16047_v48, %v13813_v59  ;;  %v6974_v43 = vmul.f32 %v12919_v8, %v13817_v34  ;;  %v13845_v25 = vld [vmem:[#allocation6 + $0xdb] sm:$0xff] }
 0x6ef   : > { %v7506_v18 = vadd.f32 %v7474_v17, %v7406_v41  ;;  %v6906_v4 = vadd.f32 %v6874_v28, %v6806_v63  ;;  %v7074_v61 = vmul.f32 %v12923_v27, %v13819_v3  ;;  %16102 = vst [vmem:[#allocation64_spill] sm:$0xff] %v13845_v25  ;;  %v5783_v17 = vmul.f32 %v16049_v58, %v13823_v24  ;;  %v13853_v63 = vld [vmem:[#allocation6 + $0xcb] sm:$0xff]  ;;  %v13857_v3 = vld [vmem:[#allocation6 + $0xdc] sm:$0xff] }
 0x6f0   : > { %v7175_v12 = vmul.f32 %v12933_v20, %v16072_v55  ;;  %v6315_v56 = vadd.f32 %v6283_v1, %v6215_v9  ;;  %v6383_v59 = vmul.f32 %v12844_v46, %v13833_v21  ;;  %16103 = vst [vmem:[#allocation134_spill] sm:$0xff] %v13853_v63  ;;  %v7275_v34 = vmul.f32 %v12943_v37, %v16074_v51  ;;  %v13865_v1 = vld [vmem:[#allocation6 + $0xcc] sm:$0xff] }
 0x6f1   : > { %v7606_v41 = vadd.f32 %v7574_v39, %v7506_v18  ;;  %v7006_v28 = vadd.f32 %v6974_v43, %v6906_v4  ;;  %16104 = vst [vmem:[#allocation169_spill] sm:$0xff] %v13857_v3  ;;  %v5815_v49 = vadd.f32 %v5783_v17, %v5683_v11  ;;  %v5883_v24 = vmul.f32 %v16051_v16, %v13839_v54  ;;  %v13869_v43 = vld [vmem:[#allocation6 + $0xf0] sm:$0xff] }
 0x6f2   : > { %v7375_v55 = vmul.f32 %v12947_v36, %v16077_v57  ;;  %v6415_v39 = vadd.f32 %v6383_v59, %v6315_v56  ;;  %v6483_v9 = vmul.f32 %v12863_v33, %v13845_v25  ;;  %16105 = vst [vmem:[#allocation58_spill] sm:$0xff] %v13865_v1  ;;  %v7475_v51 = vmul.f32 %v12968_v7, %v16080_v5  ;;  %v13877_v56 = vld [vmem:[#allocation6 + $0xe0] sm:$0xff]  ;;  %v13881_v54 = vld [vmem:[#allocation6 + $0xf1] sm:$0xff] }
 0x6f3   : > { %v7707_v18 = vadd.f32 %v7675_v13, %v7606_v41  ;;  %v7106_v4 = vadd.f32 %v7074_v61, %v7006_v28  ;;  %v5915_v11 = vadd.f32 %v5883_v24, %v5815_v49  ;;  %v5983_v17 = vmul.f32 %v16054_v31, %v13853_v63  ;;  %v16106_v28 = vld [vmem:[#allocation151_spill] sm:$0xff] }
 0x6f4   : > { %v7575_v57 = vmul.f32 %v12972_v42, %v16082_v26  ;;  %v6515_v59 = vadd.f32 %v6483_v9, %v6415_v39  ;;  %v6583_v41 = vmul.f32 %v12876_v50, %v13857_v3  ;;  %v7676_v5 = vmul.f32 %v12976_v44, %v16106_v28  ;;  %v13889_v63 = vld [vmem:[#allocation6 + $0xe1] sm:$0xff] }
 0x6f5   : > { %v7807_v13 = vadd.f32 %v7775_v47, %v7707_v18  ;;  %v7207_v61 = vadd.f32 %v7175_v12, %v7106_v4  ;;  %v6015_v49 = vadd.f32 %v5983_v17, %v5915_v11  ;;  %v6083_v24 = vmul.f32 %v16057_v40, %v13865_v1  ;;  %v16107_v18 = vld [vmem:[#allocation28_spill] sm:$0xff] }
 0x6f6   : > { %v7776_v26 = vmul.f32 %v12980_v35, %v16107_v18  ;;  %v6615_v39 = vadd.f32 %v6583_v41, %v6515_v59  ;;  %v6683_v9 = vmul.f32 %v12886_v22, %v13869_v43  ;;  %v16108_v4 = vld [vmem:[#allocation180_spill] sm:$0xff]  ;;  %v6184_v17 = vmul.f32 %v12823_v53, %v13877_v56 }
 0x6f7   : > { %v7907_v47 = vadd.f32 %v7875_v10, %v7807_v13  ;;  %v7307_v12 = vadd.f32 %v7275_v34, %v7207_v61  ;;  %v7876_v28 = vmul.f32 %v12990_v60, %v16108_v4  ;;  %v6115_v11 = vadd.f32 %v6083_v24, %v6015_v49  ;;  %v16109_v13 = vld [vmem:[#allocation30_spill] sm:$0xff]  ;;  %v13903_v1 = vld [vmem:[#allocation6 + $0xe2] sm:$0xff] }
 0x6f8   : > { %v13899_v18 = vmul.f32 %v12994_v38, %v16109_v13  ;;  %v6715_v59 = vadd.f32 %v6683_v9, %v6615_v39  ;;  %v6783_v41 = vmul.f32 %v12893_v29, %v13881_v54  ;;  %16110 = vst [vmem:[#allocation139_spill] sm:$0xff] %v13903_v1  ;;  %v16111_v61 = vld [vmem:[#allocation186_spill] sm:$0xff]  ;;  %v6883_v13 = vmul.f32 %v12915_v2, %v13893_v15 }
 0x6f9   : > { %v8007_v10 = vadd.f32 %v7975_v45, %v7907_v47  ;;  %v7407_v34 = vadd.f32 %v7375_v55, %v7307_v12  ;;  %v13907_v4 = vmul.f32 %v13766_v14, %v16111_v61  ;;  %v13909_v49 = vld [vmem:[#allocation6 + $0xf3] sm:$0xff]  ;;  %v6216_v24 = vadd.f32 %v6184_v17, %v6115_v11  ;;  %v13913_v47 = vld [vmem:[#allocation6 + $0xe3] sm:$0xff] }
 0x6fa   : > { %v6284_v45 = vmul.f32 %v12832_v23, %v13889_v63  ;;  %v6815_v9 = vadd.f32 %v6783_v41, %v6715_v59  ;;  %v5684_v55 = vmul.f32 %v13797_v62, %v16047_v48  ;;  %v13920_v61 = vld [vmem:[#allocation6 + $0xf4] sm:$0xff]  ;;  %v6384_v11 = vmul.f32 %v12844_v46, %v13903_v1  ;;  %v13924_v17 = vld [vmem:[#allocation6 + $0xe4] sm:$0xff] }
 0x6fb   : > { %v8107_v39 = vadd.f32 %v13829_v30, %v8007_v10  ;;  %v7507_v12 = vadd.f32 %v7475_v51, %v7407_v34  ;;  %v5784_v0 = vmul.f32 %v13811_v32, %v16049_v58  ;;  %v6983_v59 = vmul.f32 %v12919_v8, %v13909_v49 }
 0x6fc   : > { %v6316_v19 = vadd.f32 %v6284_v45, %v6216_v24  ;;  %v6915_v10 = vadd.f32 %v6883_v13, %v6815_v9  ;;  %v6484_v51 = vmul.f32 %v12863_v33, %v13913_v47  ;;  %v13933_v24 = vld [vmem:[#allocation6 + $0xf8] sm:$0xff]  ;;  %v5884_v62 = vmul.f32 %v13833_v21, %v16051_v16  ;;  %v13953_v21 = vld [vmem:[#allocation6 + $0x120] sm:$0xff] }
 0x6fd   : > { %v8151_v30 = vsel %vm2869_vm2, %v8107_v39, 0.0  ;;  %v7607_v41 = vadd.f32 %v7575_v57, %v7507_v12  ;;  %16112 = vst [vmem:[#allocation166_spill] sm:$0xff] %v13933_v24  ;;  %v5816_v45 = vadd.f32 %v5784_v0, %v5684_v55  ;;  %v7083_v39 = vmul.f32 %v12923_v27, %v13920_v61  ;;  %v16113_v9 = vld [vmem:[#allocation34_spill] sm:$0xff] }
 0x6fe   : > { %8152 = vadd.xlane.f32.xlu1 %v8151_v30  ;;  %v6416_v34 = vadd.f32 %v6384_v11, %v6316_v19  ;;  %v7015_v52 = vadd.f32 %v6983_v59, %v6915_v10  ;;  %v7184_v13 = vmul.f32 %v16113_v9, %v12933_v20  ;;  %v6584_v32 = vmul.f32 %v12876_v50, %v13924_v17  ;;  %v16114_v55 = vld [vmem:[#allocation122_spill] sm:$0xff] }
 0x6ff   : > { %v7708_v6 = vadd.f32 %v7676_v5, %v7607_v41  ;;  %v5916_v57 = vadd.f32 %v5884_v62, %v5816_v45  ;;  %v5984_v19 = vmul.f32 %v13845_v25, %v16054_v31  ;;  %v7284_v12 = vmul.f32 %v16114_v55, %v12943_v37  ;;  %v13949_v10 = vld [vmem:[#allocation6 + $0xf9] sm:$0xff]  ;;  %v13955_v5 = vld [vmem:[#allocation6 + $0x121] sm:$0xff]  ;;  %v16115_v45 = vld [vmem:[#allocation157_spill] sm:$0xff] }
 0x700   : > { %v6516_v30 = vadd.f32 %v6484_v51, %v6416_v34  ;;  %v7115_v0 = vadd.f32 %v7083_v39, %v7015_v52  ;;  %v6684_v11 = vmul.f32 %v12886_v22, %v13933_v24  ;;  %v6084_v59 = vmul.f32 %v13857_v3, %v16057_v40  ;;  %v13957_v51 = vld [vmem:[#allocation6 + $0xfa] sm:$0xff]  ;;  %v13967_v24 = vld [vmem:[#allocation6 + $0x122] sm:$0xff] }
 0x701   : > { %v7808_v9 = vadd.f32 %v7776_v26, %v7708_v6  ;;  %v6016_v52 = vadd.f32 %v5984_v19, %v5916_v57  ;;  %v6185_v41 = vmul.f32 %v13869_v43, %v12823_v53  ;;  %v7384_v39 = vmul.f32 %v16115_v45, %v12947_v36  ;;  %v16116_v55 = vld [vmem:[#allocation154_spill] sm:$0xff] }
 0x702   : > { %v6616_v62 = vadd.f32 %v6584_v32, %v6516_v30  ;;  %v7216_v34 = vadd.f32 %v7184_v13, %v7115_v0  ;;  %v7484_v25 = vmul.f32 %v16116_v55, %v12968_v7  ;;  %v16117_v6 = vld [vmem:[#allocation194_spill] sm:$0xff]  ;;  %v6784_v30 = vmul.f32 %v12893_v29, %v13949_v10 }
 0x703   : > { %v7584_v26 = vmul.f32 %v16117_v6, %v12972_v42  ;;  %v7908_v3 = vadd.f32 %v7876_v28, %v7808_v9  ;;  %v13971_v57 = vld [vmem:[#allocation6 + $0xfb] sm:$0xff]  ;;  %v6116_v43 = vadd.f32 %v6084_v59, %v6016_v52  ;;  %v7685_v19 = vmul.f32 %v12976_v44, %v13953_v21  ;;  %v13980_v9 = vld [vmem:[#allocation6 + $0x123] sm:$0xff] }
 0x704   : > { %v6716_v32 = vadd.f32 %v6684_v11, %v6616_v62  ;;  %v7316_v13 = vadd.f32 %v7284_v12, %v7216_v34  ;;  %v7785_v0 = vmul.f32 %v12980_v35, %v13955_v5  ;;  %v6884_v45 = vmul.f32 %v12915_v2, %v13957_v51  ;;  %16118 = vst [vmem:[#allocation136_spill] sm:$0xff] %v13980_v9  ;;  %v13982_v62 = vld [vmem:[#allocation6 + $0xfc] sm:$0xff] }
 0x705   : > { %v8008_v28 = vadd.f32 %v13899_v18, %v7908_v3  ;;  %v6217_v55 = vadd.f32 %v6185_v41, %v6116_v43  ;;  %v6285_v12 = vmul.f32 %v13881_v54, %v12832_v23  ;;  %v7885_v52 = vmul.f32 %v12990_v60, %v13967_v24  ;;  %v13993_v18 = vld [vmem:[#allocation6 + $0x124] sm:$0xff] }
 0x706   : > { %v6816_v11 = vadd.f32 %v6784_v30, %v6716_v32  ;;  %v7416_v59 = vadd.f32 %v7384_v39, %v7316_v13  ;;  %v6984_v34 = vmul.f32 %v12919_v8, %v13971_v57  ;;  %v6385_v6 = vmul.f32 %v13893_v15, %v12844_v46 }
 0x707   : > { %v8108_v3 = vadd.f32 %v13907_v4, %v8008_v28  ;;  %v6317_v30 = vadd.f32 %v6285_v12, %v6217_v55  ;;  %v5685_v41 = vmul.f32 %v13877_v56, %v16047_v48  ;;  %v7985_v39 = vmul.f32 %v12994_v38, %v13980_v9  ;;  %v6649_v56 = vld [vmem:[#allocation6 + $0x108] sm:$0xff] }
 0x708   : > { %v6916_v32 = vadd.f32 %v6884_v45, %v6816_v11  ;;  %v7516_v54 = vadd.f32 %v7484_v25, %v7416_v59  ;;  %v7084_v43 = vmul.f32 %v12923_v27, %v13982_v62  ;;  %v5785_v13 = vmul.f32 %v13889_v63, %v16049_v58  ;;  %v16119_v63 = vld [vmem:[#allocation40_spill] sm:$0xff] }
 0x709   : > { %v8154_v15 = vsel %vm2869_vm2, %v8108_v3, 0.0  ;;  %v6417_v28 = vadd.f32 %v6385_v6, %v6317_v30  ;;  %v6485_v45 = vmul.f32 %v13909_v49, %v12863_v33  ;;  %v8085_v25 = vmul.f32 %v13766_v14, %v13993_v18  ;;  %v16120_v49 = vld [vmem:[#allocation188_spill] sm:$0xff] }
 0x70a   : > { %v7016_v4 = vadd.f32 %v6984_v34, %v6916_v32  ;;  %8155 = vadd.xlane.f32.xlu0 %v8154_v15  ;;  %v7616_v11 = vadd.f32 %v7584_v26, %v7516_v54  ;;  %v5817_v55 = vadd.f32 %v5785_v13, %v5685_v41  ;;  %v5885_v12 = vmul.f32 %v13903_v1, %v16051_v16  ;;  %v6749_v32 = vld [vmem:[#allocation6 + $0x109] sm:$0xff]  ;;  %v16121_v13 = vld [vmem:[#allocation127_spill] sm:$0xff]  ;;  %v14233_v1 = vld [vmem:[#allocation6 + $0xb4] sm:$0xff] }
 0x70b   : > { %v7185_v9 = vmul.f32 %v16119_v63, %v12933_v20  ;;  %v6517_v3 = vadd.f32 %v6485_v45, %v6417_v28  ;;  %v6585_v34 = vmul.f32 %v13920_v61, %v12876_v50  ;;  %v7285_v26 = vmul.f32 %v16120_v49, %v12943_v37  ;;  %v14020_v15 = vld [vmem:[#allocation6 + $0x128] sm:$0xff] }
 0x70c   : > { %v7116_v59 = vadd.f32 %v7084_v43, %v7016_v4  ;;  %v7717_v6 = vadd.f32 %v7685_v19, %v7616_v11  ;;  %v5917_v30 = vadd.f32 %v5885_v12, %v5817_v55  ;;  %v5985_v41 = vmul.f32 %v13913_v47, %v16054_v31  ;;  %v14023_v61 = vld [vmem:[#allocation6 + $0x129] sm:$0xff]  ;;  %v16122_v12 = vld [vmem:[#allocation166_spill] sm:$0xff] }
 0x70d   : > { %v7385_v43 = vmul.f32 %v16121_v13, %v12947_v36  ;;  %v6617_v4 = vadd.f32 %v6585_v34, %v6517_v3  ;;  %v6685_v28 = vmul.f32 %v12886_v22, %v6649_v56  ;;  %v6849_v19 = vld [vmem:[#allocation6 + $0x10a] sm:$0xff]  ;;  %v6085_v55 = vmul.f32 %v13924_v17, %v16057_v40  ;;  %v16124_v34 = vld [vmem:[#allocation159_spill] sm:$0xff] }
 0x70e   : > { %v7217_v54 = vadd.f32 %v7185_v9, %v7116_v59  ;;  %v7817_v45 = vadd.f32 %v7785_v0, %v7717_v6  ;;  %v6017_v11 = vadd.f32 %v5985_v41, %v5917_v30  ;;  %v6186_v47 = vmul.f32 %v16122_v12, %v12823_v53  ;;  %v16123_v59 = vld [vmem:[#allocation124_spill] sm:$0xff] }
 0x70f   : > { %v7485_v63 = vmul.f32 %v16123_v59, %v12968_v7  ;;  %v14031_v49 = vld [vmem:[#allocation6 + $0x12a] sm:$0xff]  ;;  %v6717_v3 = vadd.f32 %v6685_v28, %v6617_v4  ;;  %v6785_v56 = vmul.f32 %v12893_v29, %v6749_v32  ;;  %v7585_v6 = vmul.f32 %v16124_v34, %v12972_v42 }
 0x710   : > { %v7317_v9 = vadd.f32 %v7285_v26, %v7217_v54  ;;  %v7917_v0 = vadd.f32 %v7885_v52, %v7817_v45  ;;  %v7686_v30 = vmul.f32 %v12976_v44, %v14020_v15  ;;  %v6949_v17 = vld [vmem:[#allocation6 + $0x10b] sm:$0xff]  ;;  %v6117_v41 = vadd.f32 %v6085_v55, %v6017_v11 }
 0x711   : > { %v7786_v26 = vmul.f32 %v12980_v35, %v14023_v61  ;;  %v6817_v54 = vadd.f32 %v6785_v56, %v6717_v3  ;;  %v6885_v12 = vmul.f32 %v12915_v2, %v6849_v19  ;;  %v7886_v32 = vmul.f32 %v12990_v60, %v14031_v49  ;;  %v7049_v52 = vld [vmem:[#allocation6 + $0x10c] sm:$0xff] }
 0x712   : > { %v7417_v13 = vadd.f32 %v7385_v43, %v7317_v9  ;;  %v8017_v59 = vadd.f32 %v7985_v39, %v7917_v0  ;;  %v6218_v4 = vadd.f32 %v6186_v47, %v6117_v41  ;;  %v6286_v28 = vmul.f32 %v13949_v10, %v12832_v23  ;;  %v14048_v9 = vld [vmem:[#allocation6 + $0x12b] sm:$0xff] }
 0x713   : > { %v6917_v34 = vadd.f32 %v6885_v12, %v6817_v54  ;;  %v6985_v11 = vmul.f32 %v12919_v8, %v6949_v17  ;;  %v6386_v43 = vmul.f32 %v13957_v51, %v12844_v46  ;;  %v16125_v39 = vld [vmem:[#allocation44_spill] sm:$0xff]  ;;  %v7085_v10 = vmul.f32 %v12923_v27, %v7049_v52  ;;  %v16127_v54 = vld [vmem:[#allocation193_spill] sm:$0xff] }
 0x714   : > { %v7517_v45 = vadd.f32 %v7485_v63, %v7417_v13  ;;  %v8117_v55 = vadd.f32 %v8085_v25, %v8017_v59  ;;  %v6318_v19 = vadd.f32 %v6286_v28, %v6218_v4  ;;  %v5674_v3 = vmul.f32 %v16125_v39, %v16047_v48  ;;  %v16126_v56 = vld [vmem:[#allocation156_spill] sm:$0xff] }
 0x715   : > { %v5774_v47 = vmul.f32 %v16126_v56, %v16049_v58  ;;  %v7017_v41 = vadd.f32 %v6985_v11, %v6917_v34  ;;  %v6486_v63 = vmul.f32 %v13971_v57, %v12863_v33  ;;  %v14058_v51 = vld [vmem:[#allocation6 + $0x12c] sm:$0xff]  ;;  %v5874_v12 = vmul.f32 %v16127_v54, %v16051_v16  ;;  %v16128_v11 = vld [vmem:[#allocation38_spill] sm:$0xff] }
 0x716   : > { %v7617_v0 = vadd.f32 %v7585_v6, %v7517_v45  ;;  %v8181_v17 = vsel %vm2869_vm2, %v8117_v55, 0.0  ;;  %v6418_v25 = vadd.f32 %v6386_v43, %v6318_v19  ;;  %v7986_v6 = vmul.f32 %v12994_v38, %v14048_v9  ;;  %v6650_v28 = vld [vmem:[#allocation6 + $0x110] sm:$0xff]  ;;  %v7651_v56 = vld [vmem:[#allocation6 + $0x138] sm:$0xff] }
 0x717   : > { %v5806_v13 = vadd.f32 %v5774_v47, %v5674_v3  ;;  %8182 = vadd.xlane.f32.xlu1 %v8181_v17  ;;  %v7117_v4 = vadd.f32 %v7085_v10, %v7017_v41  ;;  %v7186_v52 = vmul.f32 %v13953_v21, %v12933_v20  ;;  %v6586_v45 = vmul.f32 %v13982_v62, %v12876_v50  ;;  %v6750_v3 = vld [vmem:[#allocation6 + $0x111] sm:$0xff]  ;;  %v16130_v17 = vld [vmem:[#allocation136_spill] sm:$0xff]  ;;  %v7751_v54 = vld [vmem:[#allocation6 + $0x139] sm:$0xff] }
 0x718   : > { %v7718_v59 = vadd.f32 %v7686_v30, %v7617_v0  ;;  %v6518_v57 = vadd.f32 %v6486_v63, %v6418_v25  ;;  %v5974_v43 = vmul.f32 %v16128_v11, %v16054_v31  ;;  %v8086_v30 = vmul.f32 %v13766_v14, %v14058_v51  ;;  %v16129_v62 = vld [vmem:[#allocation129_spill] sm:$0xff] }
 0x719   : > { %v5906_v34 = vadd.f32 %v5874_v12, %v5806_v13  ;;  %v7218_v19 = vadd.f32 %v7186_v52, %v7117_v4  ;;  %v7286_v39 = vmul.f32 %v13955_v5, %v12943_v37  ;;  %v6686_v47 = vmul.f32 %v12886_v22, %v6650_v28  ;;  %v6850_v13 = vld [vmem:[#allocation6 + $0x112] sm:$0xff]  ;;  %v7851_v5 = vld [vmem:[#allocation6 + $0x13a] sm:$0xff] }
 0x71a   : > { %v7818_v55 = vadd.f32 %v7786_v26, %v7718_v59  ;;  %v6618_v21 = vadd.f32 %v6586_v45, %v6518_v57  ;;  %v6074_v41 = vmul.f32 %v16129_v62, %v16057_v40  ;;  %v7386_v26 = vmul.f32 %v13967_v24, %v12947_v36  ;;  %v16131_v52 = vld [vmem:[#allocation126_spill] sm:$0xff] }
 0x71b   : > { %v6006_v0 = vadd.f32 %v5974_v43, %v5906_v34  ;;  %v7318_v63 = vadd.f32 %v7286_v39, %v7218_v19  ;;  %v7486_v25 = vmul.f32 %v16130_v17, %v12968_v7  ;;  %v6786_v59 = vmul.f32 %v12893_v29, %v6750_v3  ;;  %v6950_v34 = vld [vmem:[#allocation6 + $0x113] sm:$0xff]  ;;  %v5639_v3 = vld [vmem:[#allocation6 + $0x68] sm:$0xff] }
 0x71c   : > { %v7918_v10 = vadd.f32 %v7886_v32, %v7818_v55  ;;  %v6718_v12 = vadd.f32 %v6686_v47, %v6618_v21  ;;  %v6175_v28 = vmul.f32 %v16131_v52, %v12823_v53  ;;  %v7586_v32 = vmul.f32 %v13993_v18, %v12972_v42  ;;  %v16132_v19 = vld [vmem:[#allocation161_spill] sm:$0xff]  ;;  %v5739_v21 = vld [vmem:[#allocation6 + $0x69] sm:$0xff]  ;;  %v7951_v18 = vld [vmem:[#allocation6 + $0x13b] sm:$0xff] }
 0x71d   : > { %v6106_v4 = vadd.f32 %v6074_v41, %v6006_v0  ;;  %v7418_v45 = vadd.f32 %v7386_v26, %v7318_v63  ;;  %v7687_v24 = vmul.f32 %v12976_v44, %v7651_v56  ;;  %v6886_v43 = vmul.f32 %v12915_v2, %v6850_v13  ;;  %v7050_v41 = vld [vmem:[#allocation6 + $0x114] sm:$0xff]  ;;  %v5839_v13 = vld [vmem:[#allocation6 + $0x6a] sm:$0xff] }
 0x71e   : > { %v8018_v57 = vadd.f32 %v7986_v6, %v7918_v10  ;;  %v6818_v11 = vadd.f32 %v6786_v59, %v6718_v12  ;;  %v6275_v39 = vmul.f32 %v16132_v19, %v12832_v23  ;;  %v7787_v6 = vmul.f32 %v12980_v35, %v7751_v54  ;;  %v16133_v26 = vld [vmem:[#allocation158_spill] sm:$0xff] }
 0x71f   : > { %v6207_v55 = vadd.f32 %v6175_v28, %v6106_v4  ;;  %v7518_v0 = vadd.f32 %v7486_v25, %v7418_v45  ;;  %v7887_v62 = vmul.f32 %v12990_v60, %v7851_v5  ;;  %v6986_v56 = vmul.f32 %v12919_v8, %v6950_v34  ;;  %v8051_v54 = vld [vmem:[#allocation6 + $0x13c] sm:$0xff]  ;;  %v16134_v28 = vld [vmem:[#allocation29_spill] sm:$0xff] }
 0x720   : > { %v8118_v47 = vadd.f32 %v8086_v30, %v8018_v57  ;;  %v6918_v10 = vadd.f32 %v6886_v43, %v6818_v11  ;;  %v6375_v17 = vmul.f32 %v16133_v26, %v12844_v46  ;;  %v5675_v30 = vmul.f32 %v16047_v48, %v5639_v3  ;;  %v5939_v45 = vld [vmem:[#allocation6 + $0x6b] sm:$0xff] }
 0x721   : > { %v6307_v63 = vadd.f32 %v6275_v39, %v6207_v55  ;;  %v7618_v59 = vadd.f32 %v7586_v32, %v7518_v0  ;;  %v5775_v25 = vmul.f32 %v16049_v58, %v5739_v21  ;;  %v7086_v4 = vmul.f32 %v12923_v27, %v7050_v41  ;;  %v14102_v43 = vld [vmem:[#allocation6 + $0x90] sm:$0xff] }
 0x722   : > { %v8184_v12 = vsel %vm2869_vm2, %v8118_v47, 0.0  ;;  %v7018_v5 = vadd.f32 %v6986_v56, %v6918_v10  ;;  %v6475_v57 = vmul.f32 %v16134_v28, %v12863_v33  ;;  %v7987_v11 = vmul.f32 %v12994_v38, %v7951_v18  ;;  %v16135_v21 = vld [vmem:[#allocation16_spill] sm:$0xff] }
 0x723   : > { %8185 = vadd.xlane.f32.xlu0 %v8184_v12  ;;  %v6407_v52 = vadd.f32 %v6375_v17, %v6307_v63  ;;  %v7719_v34 = vadd.f32 %v7687_v24, %v7618_v59  ;;  %v5807_v32 = vadd.f32 %v5775_v25, %v5675_v30  ;;  %v5875_v55 = vmul.f32 %v16051_v16, %v5839_v13  ;;  %v6039_v0 = vld [vmem:[#allocation6 + $0x6c] sm:$0xff] }
 0x724   : > { %v7118_v19 = vadd.f32 %v7086_v4, %v7018_v5  ;;  %v7187_v39 = vmul.f32 %v14020_v15, %v12933_v20  ;;  %v6575_v47 = vmul.f32 %v16135_v21, %v12876_v50  ;;  %v8087_v10 = vmul.f32 %v13766_v14, %v8051_v54  ;;  %v14110_v24 = vld [vmem:[#allocation6 + $0x91] sm:$0xff]  ;;  %v7752_v4 = vld [vmem:[#allocation6 + $0x141] sm:$0xff] }
 0x725   : > { %v6507_v3 = vadd.f32 %v6475_v57, %v6407_v52  ;;  %v7819_v41 = vadd.f32 %v7787_v6, %v7719_v34  ;;  %v5907_v18 = vadd.f32 %v5875_v55, %v5807_v32  ;;  %v5975_v56 = vmul.f32 %v16054_v31, %v5939_v45  ;;  %v7652_v6 = vld [vmem:[#allocation6 + $0x140] sm:$0xff]  ;;  %v14119_v59 = vld [vmem:[#allocation6 + $0x92] sm:$0xff]  ;;  %v16136_v34 = vld [vmem:[#allocation100_spill] sm:$0xff] }
 0x726   : > { %v7219_v63 = vadd.f32 %v7187_v39, %v7118_v19  ;;  %v7287_v26 = vmul.f32 %v14023_v61, %v12943_v37  ;;  %v6675_v15 = vmul.f32 %v12886_v22, %v14102_v43  ;;  %v7387_v12 = vmul.f32 %v14031_v49, %v12947_v36  ;;  %v7852_v49 = vld [vmem:[#allocation6 + $0x142] sm:$0xff]  ;;  %v14128_v57 = vld [vmem:[#allocation6 + $0x93] sm:$0xff] }
 0x727   : > { %v6607_v17 = vadd.f32 %v6575_v47, %v6507_v3  ;;  %v7919_v13 = vadd.f32 %v7887_v62, %v7819_v41  ;;  %v6007_v30 = vadd.f32 %v5975_v56, %v5907_v18  ;;  %v6075_v25 = vmul.f32 %v16057_v40, %v6039_v0  ;;  %v5640_v3 = vld [vmem:[#allocation6 + $0x78] sm:$0xff]  ;;  %v16137_v0 = vld [vmem:[#allocation163_spill] sm:$0xff] }
 0x728   : > { %v7319_v54 = vadd.f32 %v7287_v26, %v7219_v63  ;;  %v7487_v5 = vmul.f32 %v14048_v9, %v12968_v7  ;;  %v6775_v52 = vmul.f32 %v12893_v29, %v14110_v24  ;;  %v7587_v62 = vmul.f32 %v14058_v51, %v12972_v42  ;;  %v14136_v47 = vld [vmem:[#allocation6 + $0x94] sm:$0xff]  ;;  %v7952_v26 = vld [vmem:[#allocation6 + $0x143] sm:$0xff] }
 0x729   : > { %v6707_v61 = vadd.f32 %v6675_v15, %v6607_v17  ;;  %v8019_v28 = vadd.f32 %v7987_v11, %v7919_v13  ;;  %v6107_v45 = vadd.f32 %v6075_v25, %v6007_v30  ;;  %v6176_v32 = vmul.f32 %v16136_v34, %v12823_v53  ;;  %v5740_v18 = vld [vmem:[#allocation6 + $0x79] sm:$0xff]  ;;  %v14143_v13 = vld [vmem:[#allocation6 + $0xa8] sm:$0xff] }
 0x72a   : > { %v7419_v55 = vadd.f32 %v7387_v12, %v7319_v54  ;;  %v7688_v19 = vmul.f32 %v12976_v44, %v7652_v6  ;;  %v6875_v39 = vmul.f32 %v12915_v2, %v14119_v59  ;;  %v7788_v11 = vmul.f32 %v12980_v35, %v7752_v4  ;;  %v16138_v6 = vld [vmem:[#allocation19_spill] sm:$0xff] }
 0x72b   : > { %v6807_v9 = vadd.f32 %v6775_v52, %v6707_v61  ;;  %v8119_v21 = vadd.f32 %v8087_v10, %v8019_v28  ;;  %v6208_v51 = vadd.f32 %v6176_v32, %v6107_v45  ;;  %v6276_v41 = vmul.f32 %v16137_v0, %v12832_v23  ;;  %v5840_v54 = vld [vmem:[#allocation6 + $0x7a] sm:$0xff]  ;;  %v8052_v4 = vld [vmem:[#allocation6 + $0x144] sm:$0xff] }
 0x72c   : > { %v7519_v56 = vadd.f32 %v7487_v5, %v7419_v55  ;;  %v7888_v63 = vmul.f32 %v12990_v60, %v7852_v49  ;;  %v6975_v15 = vmul.f32 %v12919_v8, %v14128_v57  ;;  %v6376_v30 = vmul.f32 %v16138_v6, %v12844_v46  ;;  %v14151_v28 = vld [vmem:[#allocation6 + $0xa9] sm:$0xff]  ;;  %v16139_v55 = vld [vmem:[#allocation103_spill] sm:$0xff]  ;;  %v14163_v0 = vld [vmem:[#allocation6 + $0x98] sm:$0xff] }
 0x72d   : > { %v6907_v17 = vadd.f32 %v6875_v39, %v6807_v9  ;;  %v8187_v10 = vsel %vm2869_vm2, %v8119_v21, 0.0  ;;  %v6308_v12 = vadd.f32 %v6276_v41, %v6208_v51  ;;  %v5676_v25 = vmul.f32 %v16047_v48, %v5640_v3  ;;  %v5940_v39 = vld [vmem:[#allocation6 + $0x7b] sm:$0xff]  ;;  %v14159_v21 = vld [vmem:[#allocation6 + $0xaa] sm:$0xff] }
 0x72e   : > { %8188 = vadd.xlane.f32.xlu1 %v8187_v10  ;;  %v7619_v5 = vadd.f32 %v7587_v62, %v7519_v56  ;;  %v7075_v52 = vmul.f32 %v12923_v27, %v14136_v47  ;;  %v5776_v49 = vmul.f32 %v16049_v58, %v5740_v18  ;;  %v7988_v45 = vmul.f32 %v12994_v38, %v7952_v26  ;;  %v14161_v51 = vld [vmem:[#allocation6 + $0xab] sm:$0xff] }
 0x72f   : > { %v7007_v61 = vadd.f32 %v6975_v15, %v6907_v17  ;;  %v7176_v34 = vmul.f32 %v12933_v20, %v14143_v13  ;;  %v6408_v32 = vadd.f32 %v6376_v30, %v6308_v12  ;;  %v6476_v9 = vmul.f32 %v16139_v55, %v12863_v33  ;;  %v16140_v15 = vld [vmem:[#allocation104_spill] sm:$0xff] }
 0x730   : > { %v7720_v62 = vadd.f32 %v7688_v19, %v7619_v5  ;;  %v5808_v41 = vadd.f32 %v5776_v49, %v5676_v25  ;;  %v5876_v18 = vmul.f32 %v16051_v16, %v5840_v54  ;;  %v8088_v56 = vmul.f32 %v13766_v14, %v8052_v4  ;;  %v6040_v19 = vld [vmem:[#allocation6 + $0x7c] sm:$0xff]  ;;  %v14171_v30 = vld [vmem:[#allocation6 + $0xac] sm:$0xff] }
 0x731   : > { %v7107_v3 = vadd.f32 %v7075_v52, %v7007_v61  ;;  %v7276_v26 = vmul.f32 %v12943_v37, %v14151_v28  ;;  %v6508_v17 = vadd.f32 %v6476_v9, %v6408_v32  ;;  %v6576_v10 = vmul.f32 %v16140_v15, %v12876_v50  ;;  %v14173_v5 = vld [vmem:[#allocation6 + $0x99] sm:$0xff] }
 0x732   : > { %v7820_v12 = vadd.f32 %v7788_v11, %v7720_v62  ;;  %v5908_v61 = vadd.f32 %v5876_v18, %v5808_v41  ;;  %v5976_v25 = vmul.f32 %v16054_v31, %v5940_v39  ;;  %v7376_v54 = vmul.f32 %v12947_v36, %v14159_v21  ;;  %v16141_v62 = vld [vmem:[#allocation48_spill] sm:$0xff] }
 0x733   : > { %v7208_v6 = vadd.f32 %v7176_v34, %v7107_v3  ;;  %v7476_v4 = vmul.f32 %v12968_v7, %v14161_v51  ;;  %v6608_v52 = vadd.f32 %v6576_v10, %v6508_v17  ;;  %v6676_v49 = vmul.f32 %v12886_v22, %v14163_v0  ;;  %v14182_v34 = vld [vmem:[#allocation6 + $0x9a] sm:$0xff] }
 0x734   : > { %v7920_v32 = vadd.f32 %v7888_v63, %v7820_v12  ;;  %v6008_v55 = vadd.f32 %v5976_v25, %v5908_v61  ;;  %v6076_v9 = vmul.f32 %v16057_v40, %v6040_v19  ;;  %v7576_v39 = vmul.f32 %v12972_v42, %v14171_v30  ;;  %v14191_v10 = vld [vmem:[#allocation6 + $0x9b] sm:$0xff] }
 0x735   : > { %v7308_v11 = vadd.f32 %v7276_v26, %v7208_v6  ;;  %v7677_v3 = vmul.f32 %v12976_v44, %v16141_v62  ;;  %v6708_v41 = vadd.f32 %v6676_v49, %v6608_v52  ;;  %v6776_v18 = vmul.f32 %v12893_v29, %v14173_v5  ;;  %v5641_v12 = vld [vmem:[#allocation6 + $0x80] sm:$0xff] }
 0x736   : > { %v8020_v17 = vadd.f32 %v7988_v45, %v7920_v32  ;;  %v6108_v63 = vadd.f32 %v6076_v9, %v6008_v55  ;;  %v6177_v26 = vmul.f32 %v14102_v43, %v12823_v53  ;;  %v16142_v19 = vld [vmem:[#allocation99_spill] sm:$0xff]  ;;  %v16143_v61 = vld [vmem:[#allocation42_spill] sm:$0xff]  ;;  %v6876_v52 = vmul.f32 %v12915_v2, %v14182_v34 }
 0x737   : > { %v7408_v15 = vadd.f32 %v7376_v54, %v7308_v11  ;;  %v7777_v6 = vmul.f32 %v12980_v35, %v16142_v19  ;;  %v7877_v25 = vmul.f32 %v12990_v60, %v16143_v61  ;;  %v6808_v62 = vadd.f32 %v6776_v18, %v6708_v41  ;;  %v5741_v49 = vld [vmem:[#allocation6 + $0x81] sm:$0xff] }
 0x738   : > { %v8120_v45 = vadd.f32 %v8088_v56, %v8020_v17  ;;  %v14201_v32 = vld [vmem:[#allocation6 + $0x9c] sm:$0xff]  ;;  %v6209_v11 = vadd.f32 %v6177_v26, %v6108_v63  ;;  %v6277_v43 = vmul.f32 %v14110_v24, %v12832_v23  ;;  %v6976_v9 = vmul.f32 %v12919_v8, %v14191_v10 }
 0x739   : > { %v7508_v54 = vadd.f32 %v7476_v4, %v7408_v15  ;;  %v6908_v55 = vadd.f32 %v6876_v52, %v6808_v62  ;;  %v6377_v19 = vmul.f32 %v14119_v59, %v12844_v46  ;;  %v5677_v41 = vmul.f32 %v16047_v48, %v5641_v12  ;;  %v5841_v18 = vld [vmem:[#allocation6 + $0x82] sm:$0xff]  ;;  %v14211_v4 = vld [vmem:[#allocation6 + $0xb0] sm:$0xff] }
 0x73a   : > { %v8190_v61 = vsel %vm2869_vm2, %v8120_v45, 0.0  ;;  %16144 = vst [vmem:[#allocation171_spill] sm:$0xff] %v14211_v4  ;;  %v6309_v17 = vadd.f32 %v6277_v43, %v6209_v11  ;;  %v5777_v15 = vmul.f32 %v16049_v58, %v5741_v49  ;;  %v16145_v24 = vld [vmem:[#allocation131_spill] sm:$0xff]  ;;  %v7076_v62 = vmul.f32 %v12923_v27, %v14201_v32  ;;  %v14220_v45 = vld [vmem:[#allocation6 + $0xb1] sm:$0xff]  ;;  %v16146_v43 = vld [vmem:[#allocation128_spill] sm:$0xff] }
 0x73b   : > { %v7608_v56 = vadd.f32 %v7576_v39, %v7508_v54  ;;  %8191 = vadd.xlane.f32.xlu0 %v8190_v61  ;;  %v7977_v63 = vmul.f32 %v12994_v38, %v16145_v24  ;;  %v7008_v26 = vadd.f32 %v6976_v9, %v6908_v55  ;;  %v6477_v59 = vmul.f32 %v14128_v57, %v12863_v33  ;;  %v5941_v12 = vld [vmem:[#allocation6 + $0x83] sm:$0xff]  ;;  %v14222_v39 = vld [vmem:[#allocation6 + $0xb2] sm:$0xff] }
 0x73c   : > { %v6409_v54 = vadd.f32 %v6377_v19, %v6309_v17  ;;  %v5809_v11 = vadd.f32 %v5777_v15, %v5677_v41  ;;  %v5877_v49 = vmul.f32 %v16051_v16, %v5841_v18  ;;  %v8077_v61 = vmul.f32 %v13766_v14, %v16146_v43  ;;  %v6041_v24 = vld [vmem:[#allocation6 + $0x84] sm:$0xff] }
 0x73d   : > { %v7709_v52 = vadd.f32 %v7677_v3, %v7608_v56  ;;  %v7108_v55 = vadd.f32 %v7076_v62, %v7008_v26  ;;  %v7177_v9 = vmul.f32 %v12933_v20, %v14211_v4  ;;  %v6577_v57 = vmul.f32 %v14136_v47, %v12876_v50  ;;  %v14231_v56 = vld [vmem:[#allocation6 + $0xb3] sm:$0xff] }
 0x73e   : > { %v6509_v19 = vadd.f32 %v6477_v59, %v6409_v54  ;;  %v5909_v41 = vadd.f32 %v5877_v49, %v5809_v11  ;;  %v5977_v18 = vmul.f32 %v16054_v31, %v5941_v12  ;;  %v7277_v15 = vmul.f32 %v12943_v37, %v14220_v45 }
 0x73f   : > { %v7809_v3 = vadd.f32 %v7777_v6, %v7709_v52  ;;  %v7209_v17 = vadd.f32 %v7177_v9, %v7108_v55  ;;  %v7377_v26 = vmul.f32 %v12947_v36, %v14222_v39  ;;  %v6677_v47 = vmul.f32 %v14143_v13, %v12886_v22  ;;  %v16147_v9 = vld [vmem:[#allocation102_spill] sm:$0xff] }
 0x740   : > { %v6609_v6 = vadd.f32 %v6577_v57, %v6509_v19  ;;  %v6009_v52 = vadd.f32 %v5977_v18, %v5909_v41  ;;  %v6077_v43 = vmul.f32 %v16057_v40, %v6041_v24  ;;  %v7477_v59 = vmul.f32 %v12968_v7, %v14231_v56  ;;  %v16148_v24 = vld [vmem:[#allocation60_spill] sm:$0xff] }
 0x741   : > { %v7909_v62 = vadd.f32 %v7877_v25, %v7809_v3  ;;  %v7309_v4 = vadd.f32 %v7277_v15, %v7209_v17  ;;  %v7577_v12 = vmul.f32 %v12972_v42, %v14233_v1  ;;  %v6777_v54 = vmul.f32 %v14151_v28, %v12893_v29  ;;  %v14257_v41 = vld [vmem:[#allocation6 + $0x150] sm:$0xff] }
 0x742   : > { %v6709_v49 = vadd.f32 %v6677_v47, %v6609_v6  ;;  %v6109_v55 = vadd.f32 %v6077_v43, %v6009_v52  ;;  %v6178_v13 = vmul.f32 %v14163_v0, %v12823_v53  ;;  %v7678_v57 = vmul.f32 %v12976_v44, %v16147_v9  ;;  %16149 = vst [vmem:[#allocation168_spill] sm:$0xff] %v14257_v41  ;;  %v14261_v15 = vld [vmem:[#allocation6 + $0x151] sm:$0xff] }
 0x743   : > { %v8009_v11 = vadd.f32 %v7977_v63, %v7909_v62  ;;  %v7409_v25 = vadd.f32 %v7377_v26, %v7309_v4  ;;  %v7778_v3 = vmul.f32 %v12980_v35, %v16148_v24  ;;  %v6877_v19 = vmul.f32 %v14159_v21, %v12915_v2  ;;  %16150 = vst [vmem:[#allocation11_spill] sm:$0xff] %v14261_v15  ;;  %v16151_v4 = vld [vmem:[#allocation137_spill] sm:$0xff]  ;;  %v9492_v24 = vld [vmem:[#allocation6 + $0xc0] sm:$0xff] }
 0x744   : > { %v6809_v28 = vadd.f32 %v6777_v54, %v6709_v49  ;;  %v6210_v63 = vadd.f32 %v6178_v13, %v6109_v55  ;;  %v6278_v17 = vmul.f32 %v14173_v5, %v12832_v23  ;;  %v7878_v26 = vmul.f32 %v12990_v60, %v16151_v4  ;;  %v14272_v5 = vld [vmem:[#allocation6 + $0x152] sm:$0xff] }
 0x745   : > { %v8109_v18 = vadd.f32 %v8077_v61, %v8009_v11  ;;  %v7509_v0 = vadd.f32 %v7477_v59, %v7409_v25  ;;  %v6977_v47 = vmul.f32 %v14161_v51, %v12919_v8  ;;  %v6378_v21 = vmul.f32 %v14182_v34, %v12844_v46  ;;  %16152 = vst [vmem:[#allocation12_spill] sm:$0xff] %v14272_v5  ;;  %v16153_v59 = vld [vmem:[#allocation134_spill] sm:$0xff] }
 0x746   : > { %v6909_v61 = vadd.f32 %v6877_v19, %v6809_v28  ;;  %v6310_v6 = vadd.f32 %v6278_v17, %v6210_v63  ;;  %v5694_v52 = vmul.f32 %v16047_v48, %v14257_v41  ;;  %v7978_v54 = vmul.f32 %v12994_v38, %v16153_v59  ;;  %v16154_v11 = vld [vmem:[#allocation58_spill] sm:$0xff]  ;;  %v9493_v63 = vld [vmem:[#allocation6 + $0xc1] sm:$0xff] }
 0x747   : > { %v8157_v62 = vsel %vm2869_vm2, %v8109_v18, 0.0  ;;  %v7609_v43 = vadd.f32 %v7577_v12, %v7509_v0  ;;  %v8078_v51 = vmul.f32 %v13766_v14, %v16154_v11  ;;  %v5794_v34 = vmul.f32 %v16049_v58, %v14261_v15  ;;  %v14284_v9 = vld [vmem:[#allocation6 + $0x153] sm:$0xff]  ;;  %v16157_v59 = vld [vmem:[#allocation171_spill] sm:$0xff] }
 0x748   : > { %8158 = vadd.xlane.f32.xlu1 %v8157_v62  ;;  %v7009_v49 = vadd.f32 %v6977_v47, %v6909_v61  ;;  %v7077_v55 = vmul.f32 %v14171_v30, %v12923_v27  ;;  %v6410_v13 = vadd.f32 %v6378_v21, %v6310_v6  ;;  %v6478_v25 = vmul.f32 %v14191_v10, %v12863_v33  ;;  %v14292_v4 = vld [vmem:[#allocation6 + $0x154] sm:$0xff]  ;;  %v9494_v47 = vld [vmem:[#allocation6 + $0xc2] sm:$0xff] }
 0x749   : > { %16155 = vst [vmem:[#allocation52_spill] sm:$0xff] %v14284_v9  ;;  %v7710_v12 = vadd.f32 %v7678_v57, %v7609_v43  ;;  %v7178_v19 = vmul.f32 %v9492_v24, %v12933_v20  ;;  %v5826_v18 = vadd.f32 %v5794_v34, %v5694_v52  ;;  %v5894_v14 = vmul.f32 %v16051_v16, %v14272_v5  ;;  %v9495_v6 = vld [vmem:[#allocation6 + $0xc3] sm:$0xff]  ;;  %v14385_v5 = vld [vmem:[#allocation6 + $0x171] sm:$0xff] }
 0x74a   : > { %v7109_v28 = vadd.f32 %v7077_v55, %v7009_v49  ;;  %v7278_v17 = vmul.f32 %v9493_v63, %v12943_v37  ;;  %v6510_v0 = vadd.f32 %v6478_v25, %v6410_v13  ;;  %v6578_v30 = vmul.f32 %v14201_v32, %v12876_v50  ;;  %16156 = vst [vmem:[#allocation46_spill] sm:$0xff] %v14292_v4  ;;  %v14300_v34 = vld [vmem:[#allocation6 + $0x168] sm:$0xff]  ;;  %v16161_v63 = vld [vmem:[#allocation101_spill] sm:$0xff] }
 0x74b   : > { %v7810_v10 = vadd.f32 %v7778_v3, %v7710_v12  ;;  %v7378_v57 = vmul.f32 %v9494_v47, %v12947_v36  ;;  %v5926_v21 = vadd.f32 %v5894_v14, %v5826_v18  ;;  %v5994_v62 = vmul.f32 %v16054_v31, %v14284_v9  ;;  %16158 = vst [vmem:[#allocation133_spill] sm:$0xff] %v14300_v34  ;;  %v9496_v49 = vld [vmem:[#allocation6 + $0xc4] sm:$0xff]  ;;  %v16163_v47 = vld [vmem:[#allocation54_spill] sm:$0xff] }
 0x74c   : > { %v7210_v61 = vadd.f32 %v7178_v19, %v7109_v28  ;;  %v7478_v52 = vmul.f32 %v9495_v6, %v12968_v7  ;;  %v6610_v43 = vadd.f32 %v6578_v30, %v6510_v0  ;;  %v6678_v11 = vmul.f32 %v16157_v59, %v12886_v22  ;;  %v16159_v12 = vld [vmem:[#allocation160_spill] sm:$0xff]  ;;  %16174 = vst [vmem:[#allocation173_spill] sm:$0xff] %v14385_v5  ;;  %v16176_v15 = vld [vmem:[#allocation139_spill] sm:$0xff] }
 0x74d   : > { %v7910_v32 = vadd.f32 %v7878_v26, %v7810_v10  ;;  %v7578_v3 = vmul.f32 %v9496_v49, %v12972_v42  ;;  %v6026_v55 = vadd.f32 %v5994_v62, %v5926_v21  ;;  %v6094_v13 = vmul.f32 %v16057_v40, %v14292_v4  ;;  %v14309_v14 = vld [vmem:[#allocation6 + $0x169] sm:$0xff]  ;;  %v14315_v10 = vld [vmem:[#allocation6 + $0x158] sm:$0xff] }
 0x74e   : > { %v7310_v25 = vadd.f32 %v7278_v17, %v7210_v61  ;;  %v7679_v24 = vmul.f32 %v12976_v44, %v16159_v12  ;;  %v6710_v19 = vadd.f32 %v6678_v11, %v6610_v43  ;;  %v6778_v18 = vmul.f32 %v14220_v45, %v12893_v29  ;;  %16160 = vst [vmem:[#allocation13_spill] sm:$0xff] %v14309_v14  ;;  %v14321_v61 = vld [vmem:[#allocation6 + $0x16a] sm:$0xff]  ;;  %v14383_v9 = vld [vmem:[#allocation6 + $0x182] sm:$0xff] }
 0x74f   : > { %v8010_v28 = vadd.f32 %v7978_v54, %v7910_v32  ;;  %v7779_v26 = vmul.f32 %v12980_v35, %v16161_v63  ;;  %v6126_v0 = vadd.f32 %v6094_v13, %v6026_v55  ;;  %v6195_v30 = vmul.f32 %v12823_v53, %v14300_v34  ;;  %16162 = vst [vmem:[#allocation108_spill] sm:$0xff] %v14315_v10  ;;  %v14323_v54 = vld [vmem:[#allocation6 + $0x159] sm:$0xff]  ;;  %v16166_v43 = vld [vmem:[#allocation64_spill] sm:$0xff] }
 0x750   : > { %v7410_v17 = vadd.f32 %v7378_v57, %v7310_v25  ;;  %v7879_v21 = vmul.f32 %v12990_v60, %v16163_v47  ;;  %v6810_v62 = vadd.f32 %v6778_v18, %v6710_v19  ;;  %v6878_v45 = vmul.f32 %v14222_v39, %v12915_v2  ;;  %16164 = vst [vmem:[#allocation130_spill] sm:$0xff] %v14321_v61  ;;  %v14333_v13 = vld [vmem:[#allocation6 + $0x16b] sm:$0xff]  ;;  %v14337_v25 = vld [vmem:[#allocation6 + $0x15a] sm:$0xff] }
 0x751   : > { %16165 = vst [vmem:[#allocation165_spill] sm:$0xff] %v14323_v54  ;;  %v8110_v6 = vadd.f32 %v8078_v51, %v8010_v28  ;;  %v14327_v59 = vmul.f32 %v12994_v38, %v16166_v43  ;;  %v6227_v11 = vadd.f32 %v6195_v30, %v6126_v0  ;;  %v6295_v57 = vmul.f32 %v12832_v23, %v14309_v14  ;;  %v16169_v28 = vld [vmem:[#allocation169_spill] sm:$0xff]  ;;  %v14355_v47 = vld [vmem:[#allocation6 + $0x15b] sm:$0xff] }
 0x752   : > { %v7510_v32 = vadd.f32 %v7478_v52, %v7410_v17  ;;  %v6910_v49 = vadd.f32 %v6878_v45, %v6810_v62  ;;  %v6978_v55 = vmul.f32 %v14231_v56, %v12919_v8  ;;  %16167 = vst [vmem:[#allocation67_spill] sm:$0xff] %v14333_v13  ;;  %v5695_v39 = vmul.f32 %v16047_v48, %v14315_v10  ;;  %v14347_v56 = vld [vmem:[%s15192_s7 + $0x18] ss:$0 sm:$0xff]  ;;  %v14353_v17 = vld [vmem:[#allocation6 + $0x16c] sm:$0xff] }
 0x753   : > { %16168 = vst [vmem:[#allocation62_spill] sm:$0xff] %v14337_v25  ;;  %v8160_v51 = vsel %vm2869_vm2, %v8110_v6, 0.0  ;;  %v6327_v12 = vadd.f32 %v6295_v57, %v6227_v11  ;;  %v6395_v19 = vmul.f32 %v12844_v46, %v14321_v61  ;;  %v5795_v52 = vmul.f32 %v16049_v58, %v14323_v54  ;;  %16170 = vst [vmem:[#allocation141_spill] sm:$0xff] %v14353_v17  ;;  %v9498_v57 = vld [vmem:[#allocation6 + $0xc8] sm:$0xff]  ;;  %v14375_v4 = vld [vmem:[#allocation6 + $0x170] sm:$0xff] }
 0x754   : > { %8161 = vadd.xlane.f32.xlu0 %v8160_v51  ;;  %v7610_v18 = vadd.f32 %v7578_v3, %v7510_v32  ;;  %v8079_v63 = vmul.f32 %v14347_v56, %v16169_v28  ;;  %v7010_v0 = vadd.f32 %v6978_v55, %v6910_v49  ;;  %v7078_v30 = vmul.f32 %v14233_v1, %v12923_v27  ;;  %v9499_v49 = vld [vmem:[#allocation6 + $0xc9] sm:$0xff]  ;;  %v14363_v55 = vld [vmem:[#allocation6 + $0x180] sm:$0xff] }
 0x755   : > { %16171 = vst [vmem:[#allocation162_spill] sm:$0xff] %v14355_v47  ;;  %v6427_v62 = vadd.f32 %v6395_v19, %v6327_v12  ;;  %v6495_v3 = vmul.f32 %v12863_v33, %v14333_v13  ;;  %v5827_v45 = vadd.f32 %v5795_v52, %v5695_v39  ;;  %v5895_v6 = vmul.f32 %v16051_v16, %v14337_v25  ;;  %v14365_v51 = vld [vmem:[#allocation6 + $0x15c] sm:$0xff]  ;;  %v9500_v28 = vld [vmem:[#allocation6 + $0xca] sm:$0xff] }
 0x756   : > { %v7711_v43 = vadd.f32 %v7679_v24, %v7610_v18  ;;  %v7110_v11 = vadd.f32 %v7078_v30, %v7010_v0  ;;  %v7179_v32 = vmul.f32 %v9498_v57, %v12933_v20  ;;  %v7279_v1 = vmul.f32 %v9499_v49, %v12943_v37  ;;  %16172 = vst [vmem:[#allocation41_spill] sm:$0xff] %v14365_v51  ;;  %v9501_v30 = vld [vmem:[#allocation6 + $0xcb] sm:$0xff]  ;;  %v14373_v49 = vld [vmem:[#allocation6 + $0x181] sm:$0xff] }
 0x757   : > { %v6527_v12 = vadd.f32 %v6495_v3, %v6427_v62  ;;  %v6595_v19 = vmul.f32 %v12876_v50, %v14353_v17  ;;  %v5927_v39 = vadd.f32 %v5895_v6, %v5827_v45  ;;  %v5995_v52 = vmul.f32 %v16054_v31, %v14355_v47  ;;  %16173 = vst [vmem:[#allocation138_spill] sm:$0xff] %v14375_v4  ;;  %v7161_v25 = vld [vmem:[#allocation6 + $0x1a0] sm:$0xff] }
 0x758   : > { %v7811_v24 = vadd.f32 %v7779_v26, %v7711_v43  ;;  %v7211_v18 = vadd.f32 %v7179_v32, %v7110_v11  ;;  %v7379_v0 = vmul.f32 %v9500_v28, %v12947_v36  ;;  %v7479_v57 = vmul.f32 %v9501_v30, %v12968_v7  ;;  %v9502_v11 = vld [vmem:[#allocation6 + $0xcc] sm:$0xff]  ;;  %v9503_v28 = vld [vmem:[#allocation6 + $0xe0] sm:$0xff] }
 0x759   : > { %v6627_v62 = vadd.f32 %v6595_v19, %v6527_v12  ;;  %v6695_v3 = vmul.f32 %v12886_v22, %v14363_v55  ;;  %v6027_v45 = vadd.f32 %v5995_v52, %v5927_v39  ;;  %v6095_v6 = vmul.f32 %v16057_v40, %v14365_v51  ;;  %v14389_v39 = vld [vmem:[#allocation6 + $0x183] sm:$0xff] }
 0x75a   : > { %v7911_v26 = vadd.f32 %v7879_v21, %v7811_v24  ;;  %v7311_v43 = vadd.f32 %v7279_v1, %v7211_v18  ;;  %v7579_v32 = vmul.f32 %v9502_v11, %v12972_v42  ;;  %v7680_v30 = vmul.f32 %v9503_v28, %v12976_v44  ;;  %v14393_v1 = vld [vmem:[#allocation6 + $0x172] sm:$0xff]  ;;  %v9504_v11 = vld [vmem:[#allocation6 + $0xe1] sm:$0xff] }
 0x75b   : > { %v6727_v12 = vadd.f32 %v6695_v3, %v6627_v62  ;;  %v6795_v19 = vmul.f32 %v12893_v29, %v14373_v49  ;;  %v6127_v52 = vadd.f32 %v6095_v6, %v6027_v45  ;;  %v6196_v21 = vmul.f32 %v12823_v53, %v14375_v4  ;;  %16175 = vst [vmem:[#allocation37_spill] sm:$0xff] %v14393_v1  ;;  %v14401_v51 = vld [vmem:[#allocation6 + $0x184] sm:$0xff]  ;;  %v14405_v4 = vld [vmem:[#allocation6 + $0x173] sm:$0xff] }
 0x75c   : > { %v8011_v24 = vadd.f32 %v14327_v59, %v7911_v26  ;;  %v7411_v18 = vadd.f32 %v7379_v0, %v7311_v43  ;;  %v7780_v28 = vmul.f32 %v9504_v11, %v12980_v35  ;;  %v7880_v62 = vmul.f32 %v12990_v60, %v16176_v15  ;;  %16177 = vst [vmem:[#allocation170_spill] sm:$0xff] %v14405_v4  ;;  %v14413_v11 = vld [vmem:[#allocation6 + $0x174] sm:$0xff] }
 0x75d   : > { %v6827_v3 = vadd.f32 %v6795_v19, %v6727_v12  ;;  %v6895_v41 = vmul.f32 %v12915_v2, %v14383_v9  ;;  %v6228_v45 = vadd.f32 %v6196_v21, %v6127_v52  ;;  %v6296_v6 = vmul.f32 %v12832_v23, %v14385_v5  ;;  %v14411_v12 = vld [vmem:[#allocation6 + $0x198] sm:$0xff]  ;;  %16178 = vst [vmem:[#allocation61_spill] sm:$0xff] %v14413_v11 }
 0x75e   : > { %v8111_v59 = vadd.f32 %v8079_v63, %v8011_v24  ;;  %v7511_v0 = vadd.f32 %v7479_v57, %v7411_v18  ;;  %v6995_v26 = vmul.f32 %v12919_v8, %v14389_v39  ;;  %v6396_v15 = vmul.f32 %v12844_v46, %v14393_v1 }
 0x75f   : > { %v6927_v43 = vadd.f32 %v6895_v41, %v6827_v3  ;;  %v6328_v19 = vadd.f32 %v6296_v6, %v6228_v45  ;;  %v5696_v52 = vmul.f32 %v14300_v34, %v16047_v48  ;;  %v5796_v21 = vmul.f32 %v14309_v14, %v16049_v58  ;;  %v14424_v3 = vld [vmem:[#allocation6 + $0x199] sm:$0xff]  ;;  %v14426_v6 = vld [vmem:[#allocation6 + $0x188] sm:$0xff] }
 0x760   : > { %v8163_v63 = vsel %vm2869_vm2, %v8111_v59, 0.0  ;;  %v7611_v57 = vadd.f32 %v7579_v32, %v7511_v0  ;;  %v7095_v24 = vmul.f32 %v12923_v27, %v14401_v51  ;;  %v6496_v41 = vmul.f32 %v12863_v33, %v14405_v4  ;;  %16179 = vst [vmem:[#allocation51_spill] sm:$0xff] %v14426_v6  ;;  %v9505_v59 = vld [vmem:[#allocation6 + $0xe3] sm:$0xff] }
 0x761   : > { %8164 = vadd.xlane.f32.xlu1 %v8163_v63  ;;  %v7027_v18 = vadd.f32 %v6995_v26, %v6927_v43  ;;  %v6428_v45 = vadd.f32 %v6396_v15, %v6328_v19  ;;  %v5828_v34 = vadd.f32 %v5796_v21, %v5696_v52  ;;  %v5896_v14 = vmul.f32 %v14321_v61, %v16051_v16  ;;  %v14435_v43 = vld [vmem:[#allocation6 + $0x19a] sm:$0xff]  ;;  %v14439_v52 = vld [vmem:[#allocation6 + $0x189] sm:$0xff] }
 0x762   : > { %v7712_v1 = vadd.f32 %v7680_v30, %v7611_v57  ;;  %v7980_v32 = vmul.f32 %v9505_v59, %v12994_v38  ;;  %v7196_v0 = vmul.f32 %v12933_v20, %v14411_v12  ;;  %v6596_v63 = vmul.f32 %v12876_v50, %v14413_v11  ;;  %v14437_v15 = vld [vmem:[#allocation6 + $0x19b] sm:$0xff]  ;;  %16180 = vst [vmem:[#allocation47_spill] sm:$0xff] %v14439_v52  ;;  %v9506_v59 = vld [vmem:[#allocation6 + $0xe4] sm:$0xff] }
 0x763   : > { %v7127_v26 = vadd.f32 %v7095_v24, %v7027_v18  ;;  %v6528_v19 = vadd.f32 %v6496_v41, %v6428_v45  ;;  %v5928_v21 = vadd.f32 %v5896_v14, %v5828_v34  ;;  %v5996_v30 = vmul.f32 %v14333_v13, %v16054_v31  ;;  %v14448_v11 = vld [vmem:[#allocation6 + $0x19c] sm:$0xff]  ;;  %v14450_v45 = vld [vmem:[#allocation6 + $0x18a] sm:$0xff] }
 0x764   : > { %v7812_v57 = vadd.f32 %v7780_v28, %v7712_v1  ;;  %v8080_v61 = vmul.f32 %v9506_v59, %v14347_v56  ;;  %v7296_v4 = vmul.f32 %v12943_v37, %v14424_v3  ;;  %v6696_v24 = vmul.f32 %v12886_v22, %v14426_v6  ;;  %16181 = vst [vmem:[#allocation14_spill] sm:$0xff] %v14450_v45 }
 0x765   : > { %v7228_v18 = vadd.f32 %v7196_v0, %v7127_v26  ;;  %v6628_v41 = vadd.f32 %v6596_v63, %v6528_v19  ;;  %v6028_v34 = vadd.f32 %v5996_v30, %v5928_v21  ;;  %v6096_v14 = vmul.f32 %v14353_v17, %v16057_v40  ;;  %v14460_v26 = vld [vmem:[#allocation6 + $0x1b0] sm:$0xff] }
 0x766   : > { %v7912_v1 = vadd.f32 %v7880_v62, %v7812_v57  ;;  %v7396_v28 = vmul.f32 %v12947_v36, %v14435_v43  ;;  %v7496_v59 = vmul.f32 %v12968_v7, %v14437_v15  ;;  %v6796_v6 = vmul.f32 %v12893_v29, %v14439_v52  ;;  %v14462_v19 = vld [vmem:[#allocation6 + $0x18b] sm:$0xff] }
 0x767   : > { %v7328_v0 = vadd.f32 %v7296_v4, %v7228_v18  ;;  %v6728_v63 = vadd.f32 %v6696_v24, %v6628_v41  ;;  %16182 = vst [vmem:[#allocation50_spill] sm:$0xff] %v14462_v19  ;;  %v6128_v21 = vadd.f32 %v6096_v14, %v6028_v34  ;;  %v6197_v30 = vmul.f32 %v14363_v55, %v12823_v53  ;;  %v14472_v4 = vld [vmem:[#allocation6 + $0x18c] sm:$0xff]  ;;  %v5651_v18 = vld [vmem:[#allocation6 + $0xf8] sm:$0xff] }
 0x768   : > { %v8012_v62 = vadd.f32 %v7980_v32, %v7912_v1  ;;  %v7596_v57 = vmul.f32 %v12972_v42, %v14448_v11  ;;  %v7697_v17 = vmul.f32 %v12976_v44, %v14460_v26  ;;  %v6896_v52 = vmul.f32 %v12915_v2, %v14450_v45  ;;  %16183 = vst [vmem:[#allocation56_spill] sm:$0xff] %v14472_v4  ;;  %v14474_v41 = vld [vmem:[#allocation6 + $0x1b1] sm:$0xff]  ;;  %v5751_v1 = vld [vmem:[#allocation6 + $0xf9] sm:$0xff] }
 0x769   : > { %v7428_v24 = vadd.f32 %v7396_v28, %v7328_v0  ;;  %v14476_v34 = vld [vmem:[#allocation6 + $0x1b2] sm:$0xff]  ;;  %v6828_v14 = vadd.f32 %v6796_v6, %v6728_v63  ;;  %v6229_v55 = vadd.f32 %v6197_v30, %v6128_v21  ;;  %v6297_v32 = vmul.f32 %v14373_v49, %v12832_v23  ;;  %v5851_v63 = vld [vmem:[#allocation6 + $0xfa] sm:$0xff] }
 0x76a   : > { %v8112_v13 = vadd.f32 %v8080_v61, %v8012_v62  ;;  %v7797_v5 = vmul.f32 %v12980_v35, %v14474_v41  ;;  %v7897_v45 = vmul.f32 %v12990_v60, %v14476_v34  ;;  %v6996_v28 = vmul.f32 %v12919_v8, %v14462_v19  ;;  %v14493_v19 = vld [vmem:[#allocation6 + $0x1b3] sm:$0xff] }
 0x76b   : > { %v7528_v0 = vadd.f32 %v7496_v59, %v7428_v24  ;;  %v6928_v47 = vadd.f32 %v6896_v52, %v6828_v14  ;;  %v6329_v54 = vadd.f32 %v6297_v32, %v6229_v55  ;;  %v6397_v6 = vmul.f32 %v14383_v9, %v12844_v46  ;;  %v7261_v59 = vld [vmem:[#allocation6 + $0x1a1] sm:$0xff] }
 0x76c   : > { %v8166_v49 = vsel %vm2869_vm2, %v8112_v13, 0.0  ;;  %v7096_v61 = vmul.f32 %v12923_v27, %v14472_v4  ;;  %v5687_v21 = vmul.f32 %v16047_v48, %v5651_v18  ;;  %v5787_v30 = vmul.f32 %v16049_v58, %v5751_v1  ;;  %v5951_v14 = vld [vmem:[#allocation6 + $0xfb] sm:$0xff] }
 0x76d   : > { %8167 = vadd.xlane.f32.xlu0 %v8166_v49  ;;  %v7628_v62 = vadd.f32 %v7596_v57, %v7528_v0  ;;  %v7028_v52 = vadd.f32 %v6996_v28, %v6928_v47  ;;  %v6429_v24 = vadd.f32 %v6397_v6, %v6329_v54  ;;  %v6497_v9 = vmul.f32 %v14389_v39, %v12863_v33  ;;  %v7361_v32 = vld [vmem:[#allocation6 + $0x1a2] sm:$0xff]  ;;  %v14501_v57 = vld [vmem:[#allocation6 + $0x1b4] sm:$0xff] }
 0x76e   : > { %v7997_v13 = vmul.f32 %v12994_v38, %v14493_v19  ;;  %v7197_v55 = vmul.f32 %v12933_v20, %v7161_v25  ;;  %v5819_v18 = vadd.f32 %v5787_v30, %v5687_v21  ;;  %v5887_v1 = vmul.f32 %v16051_v16, %v5851_v63  ;;  %v7461_v47 = vld [vmem:[#allocation6 + $0x1a3] sm:$0xff] }
 0x76f   : > { %v7729_v49 = vadd.f32 %v7697_v17, %v7628_v62  ;;  %v7128_v0 = vadd.f32 %v7096_v61, %v7028_v52  ;;  %v6529_v28 = vadd.f32 %v6497_v9, %v6429_v24  ;;  %v6597_v54 = vmul.f32 %v14401_v51, %v12876_v50  ;;  %v6051_v39 = vld [vmem:[#allocation6 + $0xfc] sm:$0xff]  ;;  %v7561_v17 = vld [vmem:[#allocation6 + $0x1a4] sm:$0xff]  ;;  %v14511_v52 = vld [vmem:[#allocation6 + $0x110] sm:$0xff] }
 0x770   : > { %v8097_v6 = vmul.f32 %v14347_v56, %v14501_v57  ;;  %v7297_v4 = vmul.f32 %v12943_v37, %v7261_v59  ;;  %v5919_v25 = vadd.f32 %v5887_v1, %v5819_v18  ;;  %v5987_v21 = vmul.f32 %v16054_v31, %v5951_v14  ;;  %v7662_v62 = vld [vmem:[#allocation6 + $0x1b8] sm:$0xff] }
 0x771   : > { %v7829_v30 = vadd.f32 %v7797_v5, %v7729_v49  ;;  %v7229_v63 = vadd.f32 %v7197_v55, %v7128_v0  ;;  %v6629_v10 = vadd.f32 %v6597_v54, %v6529_v28  ;;  %v6697_v61 = vmul.f32 %v14411_v12, %v12886_v22  ;;  %v7762_v14 = vld [vmem:[#allocation6 + $0x1b9] sm:$0xff]  ;;  %v14518_v49 = vld [vmem:[#allocation6 + $0x111] sm:$0xff] }
 0x772   : > { %v7397_v51 = vmul.f32 %v12947_v36, %v7361_v32  ;;  %v7497_v24 = vmul.f32 %v12968_v7, %v7461_v47  ;;  %v6019_v9 = vadd.f32 %v5987_v21, %v5919_v25  ;;  %v6087_v59 = vmul.f32 %v16057_v40, %v6051_v39 }
 0x773   : > { %v7929_v18 = vadd.f32 %v7897_v45, %v7829_v30  ;;  %v7329_v1 = vadd.f32 %v7297_v4, %v7229_v63  ;;  %v6729_v5 = vadd.f32 %v6697_v61, %v6629_v10  ;;  %v6797_v55 = vmul.f32 %v14424_v3, %v12893_v29  ;;  %v14526_v10 = vld [vmem:[#allocation6 + $0x112] sm:$0xff] }
 0x774   : > { %v7597_v12 = vmul.f32 %v12972_v42, %v7561_v17  ;;  %v7698_v0 = vmul.f32 %v12976_v44, %v7662_v62  ;;  %v6119_v28 = vadd.f32 %v6087_v59, %v6019_v9  ;;  %v6188_v32 = vmul.f32 %v12823_v53, %v14511_v52  ;;  %v5650_v4 = vld [vmem:[#allocation6 + $0xf0] sm:$0xff]  ;;  %v7862_v9 = vld [vmem:[#allocation6 + $0x1ba] sm:$0xff] }
 0x775   : > { %v8029_v47 = vadd.f32 %v7997_v13, %v7929_v18  ;;  %v7429_v54 = vadd.f32 %v7397_v51, %v7329_v1  ;;  %v6829_v39 = vadd.f32 %v6797_v55, %v6729_v5  ;;  %v6897_v45 = vmul.f32 %v14435_v43, %v12915_v2  ;;  %v5750_v3 = vld [vmem:[#allocation6 + $0xf1] sm:$0xff] }
 0x776   : > { %v7798_v25 = vmul.f32 %v12980_v35, %v7762_v14  ;;  %v6997_v21 = vmul.f32 %v14437_v15, %v12919_v8  ;;  %v6220_v30 = vadd.f32 %v6188_v32, %v6119_v28  ;;  %v6288_v63 = vmul.f32 %v12832_v23, %v14518_v49  ;;  %v14535_v43 = vld [vmem:[#allocation6 + $0x113] sm:$0xff]  ;;  %v7962_v28 = vld [vmem:[#allocation6 + $0x1bb] sm:$0xff] }
 0x777   : > { %v8129_v17 = vadd.f32 %v8097_v6, %v8029_v47  ;;  %v7529_v13 = vadd.f32 %v7497_v24, %v7429_v54  ;;  %v6929_v62 = vadd.f32 %v6897_v45, %v6829_v39  ;;  %v7097_v61 = vmul.f32 %v14448_v11, %v12923_v27  ;;  %v5850_v51 = vld [vmem:[#allocation6 + $0xf2] sm:$0xff] }
 0x778   : > { %v6320_v59 = vadd.f32 %v6288_v63, %v6220_v30  ;;  %v6388_v18 = vmul.f32 %v12844_v46, %v14526_v10  ;;  %v5686_v15 = vmul.f32 %v16047_v48, %v5650_v4  ;;  %v5786_v1 = vmul.f32 %v16049_v58, %v5750_v3  ;;  %v14544_v11 = vld [vmem:[#allocation6 + $0x114] sm:$0xff]  ;;  %v8062_v30 = vld [vmem:[#allocation6 + $0x1bc] sm:$0xff] }
 0x779   : > { %v8217_v14 = vsel %vm2869_vm2, %v8129_v17, 0.0  ;;  %v7629_v6 = vadd.f32 %v7597_v12, %v7529_v13  ;;  %v7029_v24 = vadd.f32 %v6997_v21, %v6929_v62  ;;  %v7198_v5 = vmul.f32 %v14460_v26, %v12933_v20  ;;  %v5950_v55 = vld [vmem:[#allocation6 + $0xf3] sm:$0xff]  ;;  %v14552_v26 = vld [vmem:[#allocation6 + $0x128] sm:$0xff] }
 0x77a   : > { %8218 = vadd.xlane.f32.xlu1 %v8217_v14  ;;  %v6420_v32 = vadd.f32 %v6388_v18, %v6320_v59  ;;  %v6488_v47 = vmul.f32 %v12863_v33, %v14535_v43  ;;  %v5818_v54 = vadd.f32 %v5786_v1, %v5686_v15  ;;  %v5886_v39 = vmul.f32 %v16051_v16, %v5850_v51  ;;  %v6050_v21 = vld [vmem:[#allocation6 + $0xf4] sm:$0xff] }
 0x77b   : > { %v7730_v45 = vadd.f32 %v7698_v0, %v7629_v6  ;;  %v7898_v4 = vmul.f32 %v12990_v60, %v7862_v9  ;;  %v7129_v12 = vadd.f32 %v7097_v61, %v7029_v24  ;;  %v7298_v3 = vmul.f32 %v14474_v41, %v12943_v37  ;;  %v14560_v9 = vld [vmem:[#allocation6 + $0x129] sm:$0xff] }
 0x77c   : > { %v6520_v63 = vadd.f32 %v6488_v47, %v6420_v32  ;;  %v6588_v17 = vmul.f32 %v12876_v50, %v14544_v11  ;;  %v5918_v13 = vadd.f32 %v5886_v39, %v5818_v54  ;;  %v5986_v62 = vmul.f32 %v16054_v31, %v5950_v55  ;;  %v14562_v41 = vld [vmem:[#allocation6 + $0x108] sm:$0xff] }
 0x77d   : > { %v7830_v59 = vadd.f32 %v7798_v25, %v7730_v45  ;;  %v7998_v0 = vmul.f32 %v12994_v38, %v7962_v28  ;;  %v7230_v51 = vadd.f32 %v7198_v5, %v7129_v12  ;;  %v7398_v61 = vmul.f32 %v14476_v34, %v12947_v36  ;;  %v14570_v55 = vld [vmem:[#allocation6 + $0x12a] sm:$0xff] }
 0x77e   : > { %v6620_v18 = vadd.f32 %v6588_v17, %v6520_v63  ;;  %v6688_v15 = vmul.f32 %v12886_v22, %v14552_v26  ;;  %v6018_v1 = vadd.f32 %v5986_v62, %v5918_v13  ;;  %v6086_v14 = vmul.f32 %v16057_v40, %v6050_v21  ;;  %16184 = vst [vmem:[#allocation66_spill] sm:$0xff] %v14570_v55  ;;  %v14572_v34 = vld [vmem:[#allocation6 + $0x109] sm:$0xff] }
 0x77f   : > { %v7930_v6 = vadd.f32 %v7898_v4, %v7830_v59  ;;  %v8098_v25 = vmul.f32 %v14347_v56, %v8062_v30  ;;  %v7330_v24 = vadd.f32 %v7298_v3, %v7230_v51  ;;  %v7498_v5 = vmul.f32 %v14493_v19, %v12968_v7  ;;  %v7663_v28 = vld [vmem:[#allocation6 + $0x1c8] sm:$0xff] }
 0x780   : > { %v7763_v32 = vld [vmem:[#allocation6 + $0x1c9] sm:$0xff]  ;;  %v6720_v47 = vadd.f32 %v6688_v15, %v6620_v18  ;;  %v6788_v54 = vmul.f32 %v12893_v29, %v14560_v9  ;;  %v6118_v39 = vadd.f32 %v6086_v14, %v6018_v1  ;;  %v6187_v45 = vmul.f32 %v12823_v53, %v14562_v41 }
 0x781   : > { %v8030_v4 = vadd.f32 %v7998_v0, %v7930_v6  ;;  %v7430_v12 = vadd.f32 %v7398_v61, %v7330_v24  ;;  %v7598_v3 = vmul.f32 %v14501_v57, %v12972_v42  ;;  %v14580_v19 = vld [vmem:[#allocation6 + $0x12b] sm:$0xff]  ;;  %v6888_v63 = vmul.f32 %v12915_v2, %v14570_v55 }
 0x782   : > { %v14582_v21 = vld [vmem:[#allocation6 + $0x10a] sm:$0xff]  ;;  %v6820_v30 = vadd.f32 %v6788_v54, %v6720_v47  ;;  %v6219_v17 = vadd.f32 %v6187_v45, %v6118_v39  ;;  %v6287_v13 = vmul.f32 %v12832_v23, %v14572_v34  ;;  %v7699_v0 = vmul.f32 %v12976_v44, %v7663_v28 }
 0x783   : > { %v8130_v62 = vadd.f32 %v8098_v25, %v8030_v4  ;;  %v7530_v59 = vadd.f32 %v7498_v5, %v7430_v12  ;;  %v7799_v51 = vmul.f32 %v12980_v35, %v7763_v32  ;;  %v14590_v61 = vld [vmem:[#allocation6 + $0x12c] sm:$0xff]  ;;  %v6988_v1 = vmul.f32 %v12919_v8, %v14580_v19  ;;  %v14599_v5 = vld [vmem:[#allocation6 + $0x140] sm:$0xff] }
 0x784   : > { %v14592_v57 = vld [vmem:[#allocation6 + $0x10b] sm:$0xff]  ;;  %v6920_v15 = vadd.f32 %v6888_v63, %v6820_v30  ;;  %v6319_v14 = vadd.f32 %v6287_v13, %v6219_v17  ;;  %v6387_v6 = vmul.f32 %v12844_v46, %v14582_v21  ;;  %v5689_v32 = vmul.f32 %v14511_v52, %v16047_v48  ;;  %v14612_v63 = vld [vmem:[#allocation6 + $0x141] sm:$0xff] }
 0x785   : > { %v7863_v18 = vld [vmem:[#allocation6 + $0x1ca] sm:$0xff]  ;;  %v8220_v25 = vsel %vm2869_vm2, %v8130_v62, 0.0  ;;  %v7630_v24 = vadd.f32 %v7598_v3, %v7530_v59  ;;  %v5789_v47 = vmul.f32 %v14518_v49, %v16049_v58  ;;  %v7088_v45 = vmul.f32 %v12923_v27, %v14590_v61  ;;  %v14614_v17 = vld [vmem:[#allocation6 + $0x120] sm:$0xff] }
 0x786   : > { %v14601_v28 = vld [vmem:[#allocation6 + $0x10c] sm:$0xff]  ;;  %8221 = vadd.xlane.f32.xlu0 %v8220_v25  ;;  %v7020_v39 = vadd.f32 %v6988_v1, %v6920_v15  ;;  %v6419_v4 = vadd.f32 %v6387_v6, %v6319_v14  ;;  %v6487_v12 = vmul.f32 %v12863_v33, %v14592_v57  ;;  %v7899_v30 = vmul.f32 %v12990_v60, %v7863_v18  ;;  %v14623_v14 = vld [vmem:[#allocation6 + $0x142] sm:$0xff] }
 0x787   : > { %v7963_v54 = vld [vmem:[#allocation6 + $0x1cb] sm:$0xff]  ;;  %v7731_v3 = vadd.f32 %v7699_v0, %v7630_v24  ;;  %v5821_v52 = vadd.f32 %v5789_v47, %v5689_v32  ;;  %v5889_v49 = vmul.f32 %v14526_v10, %v16051_v16  ;;  %v7189_v59 = vmul.f32 %v12933_v20, %v14599_v5  ;;  %v14625_v6 = vld [vmem:[#allocation6 + $0x121] sm:$0xff] }
 0x788   : > { %v8063_v13 = vld [vmem:[#allocation6 + $0x1cc] sm:$0xff]  ;;  %v7120_v62 = vadd.f32 %v7088_v45, %v7020_v39  ;;  %v6519_v15 = vadd.f32 %v6487_v12, %v6419_v4  ;;  %v6587_v1 = vmul.f32 %v12876_v50, %v14601_v28  ;;  %v7999_v18 = vmul.f32 %v12994_v38, %v7963_v54  ;;  %v14634_v54 = vld [vmem:[#allocation6 + $0x143] sm:$0xff] }
 0x789   : > { %v7831_v0 = vadd.f32 %v7799_v51, %v7731_v3  ;;  %v5921_v25 = vadd.f32 %v5889_v49, %v5821_v52  ;;  %v5989_v10 = vmul.f32 %v14535_v43, %v16054_v31  ;;  %v7289_v32 = vmul.f32 %v12943_v37, %v14612_v63  ;;  %16185 = vst [vmem:[#allocation109_spill] sm:$0xff] %v14634_v54  ;;  %v14636_v4 = vld [vmem:[#allocation6 + $0x122] sm:$0xff] }
 0x78a   : > { %v7221_v24 = vadd.f32 %v7189_v59, %v7120_v62  ;;  %v6619_v47 = vadd.f32 %v6587_v1, %v6519_v15  ;;  %v6687_v39 = vmul.f32 %v12886_v22, %v14614_v17  ;;  %v8099_v51 = vmul.f32 %v14347_v56, %v8063_v13  ;;  %v14642_v49 = vld [vmem:[#allocation6 + $0x144] sm:$0xff] }
 0x78b   : > { %v7931_v45 = vadd.f32 %v7899_v30, %v7831_v0  ;;  %v6021_v12 = vadd.f32 %v5989_v10, %v5921_v25  ;;  %v6089_v3 = vmul.f32 %v14544_v11, %v16057_v40  ;;  %v7389_v52 = vmul.f32 %v12947_v36, %v14623_v14  ;;  %16186 = vst [vmem:[#allocation135_spill] sm:$0xff] %v14642_v49  ;;  %v14646_v13 = vld [vmem:[#allocation6 + $0x123] sm:$0xff] }
 0x78c   : > { %v7321_v43 = vadd.f32 %v7289_v32, %v7221_v24  ;;  %v6719_v62 = vadd.f32 %v6687_v39, %v6619_v47  ;;  %v6787_v30 = vmul.f32 %v12893_v29, %v14625_v6  ;;  %v6190_v1 = vmul.f32 %v14552_v26, %v12823_v53  ;;  %v14656_v47 = vld [vmem:[#allocation6 + $0x124] sm:$0xff] }
 0x78d   : > { %v8031_v59 = vadd.f32 %v7999_v18, %v7931_v45  ;;  %v6121_v15 = vadd.f32 %v6089_v3, %v6021_v12  ;;  %v7489_v11 = vmul.f32 %v12968_v7, %v14634_v54  ;;  %v6887_v10 = vmul.f32 %v12915_v2, %v14636_v4  ;;  %16187 = vst [vmem:[#allocation49_spill] sm:$0xff] %v14656_v47  ;;  %v16188_v12 = vld [vmem:[#allocation108_spill] sm:$0xff] }
 0x78e   : > { %v7421_v0 = vadd.f32 %v7389_v52, %v7321_v43  ;;  %v6819_v25 = vadd.f32 %v6787_v30, %v6719_v62  ;;  %v7589_v32 = vmul.f32 %v12972_v42, %v14642_v49  ;;  %v6290_v39 = vmul.f32 %v14560_v9, %v12832_v23  ;;  %v14664_v62 = vld [vmem:[#allocation6 + $0x138] sm:$0xff] }
 0x78f   : > { %v8131_v24 = vadd.f32 %v8099_v51, %v8031_v59  ;;  %v6222_v18 = vadd.f32 %v6190_v1, %v6121_v15  ;;  %v7690_v3 = vmul.f32 %v12976_v44, %v16188_v12  ;;  %v6987_v52 = vmul.f32 %v12919_v8, %v14646_v13  ;;  %16189 = vst [vmem:[#allocation68_spill] sm:$0xff] %v14664_v62  ;;  %v16191_v12 = vld [vmem:[#allocation165_spill] sm:$0xff] }
 0x790   : > { %v7521_v45 = vadd.f32 %v7489_v11, %v7421_v0  ;;  %v6919_v43 = vadd.f32 %v6887_v10, %v6819_v25  ;;  %v6390_v59 = vmul.f32 %v14570_v55, %v12844_v46  ;;  %v5688_v15 = vmul.f32 %v14562_v41, %v16047_v48  ;;  %v14673_v25 = vld [vmem:[#allocation6 + $0x139] sm:$0xff] }
 0x791   : > { %v8223_v51 = vsel %vm2869_vm2, %v8131_v24, 0.0  ;;  %v6322_v30 = vadd.f32 %v6290_v39, %v6222_v18  ;;  %v7087_v11 = vmul.f32 %v12923_v27, %v14656_v47  ;;  %16190 = vst [vmem:[#allocation132_spill] sm:$0xff] %v14673_v25  ;;  %v5788_v10 = vmul.f32 %v14572_v34, %v16049_v58  ;;  %v16193_v47 = vld [vmem:[#allocation62_spill] sm:$0xff] }
 0x792   : > { %8224 = vadd.xlane.f32.xlu1 %v8223_v51  ;;  %v7621_v1 = vadd.f32 %v7589_v32, %v7521_v45  ;;  %v7019_v0 = vadd.f32 %v6987_v52, %v6919_v43  ;;  %v7790_v24 = vmul.f32 %v12980_v35, %v16191_v12  ;;  %v7188_v18 = vmul.f32 %v12933_v20, %v14664_v62  ;;  %v14683_v43 = vld [vmem:[#allocation6 + $0x13a] sm:$0xff] }
 0x793   : > { %v6422_v39 = vadd.f32 %v6390_v59, %v6322_v30  ;;  %v6490_v41 = vmul.f32 %v14580_v19, %v12863_v33  ;;  %16192 = vst [vmem:[#allocation167_spill] sm:$0xff] %v14683_v43  ;;  %v5820_v52 = vadd.f32 %v5788_v10, %v5688_v15  ;;  %v5888_v51 = vmul.f32 %v14582_v21, %v16051_v16 }
 0x794   : > { %v7722_v32 = vadd.f32 %v7690_v3, %v7621_v1  ;;  %v7119_v45 = vadd.f32 %v7087_v11, %v7019_v0  ;;  %v7890_v34 = vmul.f32 %v12990_v60, %v16193_v47  ;;  %v7288_v12 = vmul.f32 %v12943_v37, %v14673_v25  ;;  %v14693_v3 = vld [vmem:[#allocation6 + $0x13b] sm:$0xff] }
 0x795   : > { %v6522_v55 = vadd.f32 %v6490_v41, %v6422_v39  ;;  %v6590_v30 = vmul.f32 %v14590_v61, %v12876_v50  ;;  %16194 = vst [vmem:[#allocation143_spill] sm:$0xff] %v14693_v3  ;;  %v5920_v1 = vadd.f32 %v5888_v51, %v5820_v52  ;;  %v5988_v15 = vmul.f32 %v14592_v57, %v16054_v31  ;;  %v16195_v0 = vld [vmem:[#allocation162_spill] sm:$0xff] }
 0x796   : > { %v7822_v59 = vadd.f32 %v7790_v24, %v7722_v32  ;;  %v7220_v62 = vadd.f32 %v7188_v18, %v7119_v45  ;;  %v7990_v21 = vmul.f32 %v12994_v38, %v16195_v0  ;;  %v7388_v11 = vmul.f32 %v12947_v36, %v14683_v43  ;;  %v14703_v24 = vld [vmem:[#allocation6 + $0x13c] sm:$0xff]  ;;  %v16196_v45 = vld [vmem:[#allocation41_spill] sm:$0xff] }
 0x797   : > { %v6622_v10 = vadd.f32 %v6590_v30, %v6522_v55  ;;  %v6690_v39 = vmul.f32 %v14599_v5, %v12886_v22  ;;  %v6020_v18 = vadd.f32 %v5988_v15, %v5920_v1  ;;  %v6088_v32 = vmul.f32 %v14601_v28, %v16057_v40  ;;  %v16197_v28 = vld [vmem:[#allocation168_spill] sm:$0xff] }
 0x798   : > { %v7922_v41 = vadd.f32 %v7890_v34, %v7822_v59  ;;  %v7320_v25 = vadd.f32 %v7288_v12, %v7220_v62  ;;  %v8090_v57 = vmul.f32 %v14347_v56, %v16196_v45  ;;  %v7488_v52 = vmul.f32 %v12968_v7, %v14693_v3 }
 0x799   : > { %v6722_v51 = vadd.f32 %v6690_v39, %v6622_v10  ;;  %v6790_v55 = vmul.f32 %v14612_v63, %v12893_v29  ;;  %v6120_v34 = vadd.f32 %v6088_v32, %v6020_v18  ;;  %v6189_v12 = vmul.f32 %v14614_v17, %v12823_v53 }
 0x79a   : > { %v8022_v30 = vadd.f32 %v7990_v21, %v7922_v41  ;;  %v7420_v43 = vadd.f32 %v7388_v11, %v7320_v25  ;;  %v7588_v62 = vmul.f32 %v12972_v42, %v14703_v24  ;;  %v7689_v59 = vmul.f32 %v12976_v44, %v16197_v28 }
 0x79b   : > { %v6822_v1 = vadd.f32 %v6790_v55, %v6722_v51  ;;  %v6890_v15 = vmul.f32 %v14623_v14, %v12915_v2  ;;  %v6221_v3 = vadd.f32 %v6189_v12, %v6120_v34  ;;  %v6289_v25 = vmul.f32 %v14625_v6, %v12832_v23 }
 0x79c   : > { %v8122_v10 = vadd.f32 %v8090_v57, %v8022_v30  ;;  %v7520_v39 = vadd.f32 %v7488_v52, %v7420_v43  ;;  %v6990_v11 = vmul.f32 %v14634_v54, %v12919_v8  ;;  %v6389_v41 = vmul.f32 %v14636_v4, %v12844_v46  ;;  %v16198_v57 = vld [vmem:[#allocation11_spill] sm:$0xff] }
 0x79d   : > { %v6922_v21 = vadd.f32 %v6890_v15, %v6822_v1  ;;  %v5691_v18 = vmul.f32 %v14552_v26, %v16047_v48  ;;  %v6321_v55 = vadd.f32 %v6289_v25, %v6221_v3  ;;  %v5791_v43 = vmul.f32 %v14560_v9, %v16049_v58  ;;  %v16200_v15 = vld [vmem:[#allocation12_spill] sm:$0xff] }
 0x79e   : > { %v8196_v32 = vsel %vm2869_vm2, %v8122_v10, 0.0  ;;  %v7620_v51 = vadd.f32 %v7588_v62, %v7520_v39  ;;  %v7789_v52 = vmul.f32 %v12980_v35, %v16198_v57  ;;  %v7090_v34 = vmul.f32 %v14642_v49, %v12923_v27  ;;  %v16199_v62 = vld [vmem:[#allocation66_spill] sm:$0xff]  ;;  %v16201_v39 = vld [vmem:[#allocation108_spill] sm:$0xff] }
 0x79f   : > { %8197 = vadd.xlane.f32.xlu0 %v8196_v32  ;;  %v7022_v30 = vadd.f32 %v6990_v11, %v6922_v21  ;;  %v6489_v12 = vmul.f32 %v14646_v13, %v12863_v33  ;;  %v6421_v26 = vadd.f32 %v6389_v41, %v6321_v55  ;;  %v5823_v1 = vadd.f32 %v5791_v43, %v5691_v18  ;;  %v16202_v21 = vld [vmem:[#allocation49_spill] sm:$0xff]  ;;  %v16203_v41 = vld [vmem:[#allocation52_spill] sm:$0xff] }
 0x7a0   : > { %v7721_v28 = vadd.f32 %v7689_v59, %v7620_v51  ;;  %v5891_v3 = vmul.f32 %v16199_v62, %v16051_v16  ;;  %v7889_v9 = vmul.f32 %v12990_v60, %v16200_v15  ;;  %v7191_v25 = vmul.f32 %v12933_v20, %v16201_v39  ;;  %v16204_v55 = vld [vmem:[#allocation165_spill] sm:$0xff] }
 0x7a1   : > { %v7122_v10 = vadd.f32 %v7090_v34, %v7022_v30  ;;  %v6589_v11 = vmul.f32 %v16202_v21, %v12876_v50  ;;  %v6521_v57 = vadd.f32 %v6489_v12, %v6421_v26  ;;  %v5991_v59 = vmul.f32 %v14580_v19, %v16054_v31  ;;  %v16205_v30 = vld [vmem:[#allocation68_spill] sm:$0xff]  ;;  %v16206_v12 = vld [vmem:[#allocation46_spill] sm:$0xff] }
 0x7a2   : > { %v7821_v32 = vadd.f32 %v7789_v52, %v7721_v28  ;;  %v5923_v49 = vadd.f32 %v5891_v3, %v5823_v1  ;;  %v7989_v18 = vmul.f32 %v12994_v38, %v16203_v41  ;;  %v7291_v43 = vmul.f32 %v12943_v37, %v16204_v55  ;;  %v16207_v1 = vld [vmem:[#allocation132_spill] sm:$0xff] }
 0x7a3   : > { %v7223_v51 = vadd.f32 %v7191_v25, %v7122_v10  ;;  %v6689_v34 = vmul.f32 %v16205_v30, %v12886_v22  ;;  %v6621_v15 = vadd.f32 %v6589_v11, %v6521_v57  ;;  %v6091_v52 = vmul.f32 %v14590_v61, %v16057_v40 }
 0x7a4   : > { %v7921_v62 = vadd.f32 %v7889_v9, %v7821_v32  ;;  %v6023_v39 = vadd.f32 %v5991_v59, %v5923_v49  ;;  %v8089_v28 = vmul.f32 %v14347_v56, %v16206_v12  ;;  %v7391_v26 = vmul.f32 %v12947_v36, %v16193_v47  ;;  %v16208_v32 = vld [vmem:[#allocation167_spill] sm:$0xff] }
 0x7a5   : > { %v7323_v19 = vadd.f32 %v7291_v43, %v7223_v51  ;;  %v6789_v3 = vmul.f32 %v16207_v1, %v12893_v29  ;;  %v6721_v25 = vadd.f32 %v6689_v34, %v6621_v15  ;;  %v6192_v9 = vmul.f32 %v14599_v5, %v12823_v53  ;;  %v16209_v34 = vld [vmem:[#allocation138_spill] sm:$0xff]  ;;  %v16210_v15 = vld [vmem:[#allocation143_spill] sm:$0xff] }
 0x7a6   : > { %v8021_v10 = vadd.f32 %v7989_v18, %v7921_v62  ;;  %v6123_v41 = vadd.f32 %v6091_v52, %v6023_v39  ;;  %v7491_v61 = vmul.f32 %v12968_v7, %v16195_v0  ;;  %v7591_v11 = vmul.f32 %v12972_v42, %v16196_v45 }
 0x7a7   : > { %v7423_v49 = vadd.f32 %v7391_v26, %v7323_v19  ;;  %v6889_v57 = vmul.f32 %v16208_v32, %v12915_v2  ;;  %v6821_v51 = vadd.f32 %v6789_v3, %v6721_v25  ;;  %v6292_v18 = vmul.f32 %v14612_v63, %v12832_v23 }
 0x7a8   : > { %v8121_v59 = vadd.f32 %v8089_v28, %v8021_v10  ;;  %v6224_v43 = vadd.f32 %v6192_v9, %v6123_v41  ;;  %v7692_v62 = vmul.f32 %v12976_v44, %v16209_v34  ;;  %v6989_v52 = vmul.f32 %v16210_v15, %v12919_v8  ;;  %v16211_v10 = vld [vmem:[#allocation173_spill] sm:$0xff] }
 0x7a9   : > { %v7523_v39 = vadd.f32 %v7491_v61, %v7423_v49  ;;  %v6392_v12 = vmul.f32 %v14623_v14, %v12844_v46  ;;  %v6921_v26 = vadd.f32 %v6889_v57, %v6821_v51  ;;  %v5690_v28 = vmul.f32 %v14614_v17, %v16047_v48  ;;  %v16212_v41 = vld [vmem:[#allocation37_spill] sm:$0xff] }
 0x7aa   : > { %v8193_v19 = vsel %vm2869_vm2, %v8121_v59, 0.0  ;;  %v6324_v45 = vadd.f32 %v6292_v18, %v6224_v43  ;;  %v7792_v25 = vmul.f32 %v12980_v35, %v16211_v10  ;;  %v7892_v9 = vmul.f32 %v12990_v60, %v16212_v41  ;;  %v16213_v43 = vld [vmem:[#allocation170_spill] sm:$0xff]  ;;  %v9507_v41 = vld [vmem:[#allocation6 + $0x150] sm:$0xff] }
 0x7ab   : > { %8194 = vadd.xlane.f32.xlu1 %v8193_v19  ;;  %v7623_v3 = vadd.f32 %v7591_v11, %v7523_v39  ;;  %v5790_v49 = vmul.f32 %v14625_v6, %v16049_v58  ;;  %v7021_v61 = vadd.f32 %v6989_v52, %v6921_v26  ;;  %v7089_v59 = vmul.f32 %v14703_v24, %v12923_v27  ;;  %v16214_v26 = vld [vmem:[#allocation135_spill] sm:$0xff] }
 0x7ac   : > { %v6424_v57 = vadd.f32 %v6392_v12, %v6324_v45  ;;  %v6492_v51 = vmul.f32 %v14634_v54, %v12863_v33  ;;  %v7992_v11 = vmul.f32 %v12994_v38, %v16213_v43  ;;  %v5890_v39 = vmul.f32 %v14636_v4, %v16051_v16  ;;  %v16215_v12 = vld [vmem:[#allocation61_spill] sm:$0xff] }
 0x7ad   : > { %v7724_v17 = vadd.f32 %v7692_v62, %v7623_v3  ;;  %v5822_v18 = vadd.f32 %v5790_v49, %v5690_v28  ;;  %v7121_v19 = vadd.f32 %v7089_v59, %v7021_v61  ;;  %v7190_v6 = vmul.f32 %v9507_v41, %v12933_v20  ;;  %v9508_v49 = vld [vmem:[#allocation6 + $0x151] sm:$0xff]  ;;  %v16216_v59 = vld [vmem:[#allocation108_spill] sm:$0xff] }
 0x7ae   : > { %v6524_v52 = vadd.f32 %v6492_v51, %v6424_v57  ;;  %v6592_v10 = vmul.f32 %v16214_v26, %v12876_v50  ;;  %v8092_v54 = vmul.f32 %v14347_v56, %v16215_v12  ;;  %v5990_v3 = vmul.f32 %v14646_v13, %v16054_v31  ;;  %v9509_v51 = vld [vmem:[#allocation6 + $0x152] sm:$0xff] }
 0x7af   : > { %v7824_v45 = vadd.f32 %v7792_v25, %v7724_v17  ;;  %v5922_v62 = vadd.f32 %v5890_v39, %v5822_v18  ;;  %v7222_v28 = vadd.f32 %v7190_v6, %v7121_v19  ;;  %v7290_v4 = vmul.f32 %v9508_v49, %v12943_v37  ;;  %v9510_v39 = vld [vmem:[#allocation6 + $0x153] sm:$0xff] }
 0x7b0   : > { %v6624_v61 = vadd.f32 %v6592_v10, %v6524_v52  ;;  %v6692_v41 = vmul.f32 %v12886_v22, %v16216_v59  ;;  %v7390_v43 = vmul.f32 %v9509_v51, %v12947_v36  ;;  %v6090_v17 = vmul.f32 %v16202_v21, %v16057_v40  ;;  %v9511_v52 = vld [vmem:[#allocation6 + $0x154] sm:$0xff] }
 0x7b1   : > { %v7924_v57 = vadd.f32 %v7892_v9, %v7824_v45  ;;  %v6022_v25 = vadd.f32 %v5990_v3, %v5922_v62  ;;  %v7322_v18 = vadd.f32 %v7290_v4, %v7222_v28  ;;  %v7490_v13 = vmul.f32 %v9510_v39, %v12968_v7  ;;  %v16217_v3 = vld [vmem:[#allocation133_spill] sm:$0xff] }
 0x7b2   : > { %v6724_v19 = vadd.f32 %v6692_v41, %v6624_v61  ;;  %v6792_v6 = vmul.f32 %v12893_v29, %v16204_v55  ;;  %v7590_v49 = vmul.f32 %v9511_v52, %v12972_v42  ;;  %v6191_v45 = vmul.f32 %v16205_v30, %v12823_v53  ;;  %v16218_v59 = vld [vmem:[#allocation13_spill] sm:$0xff] }
 0x7b3   : > { %v8024_v10 = vadd.f32 %v7992_v11, %v7924_v57  ;;  %v6122_v9 = vadd.f32 %v6090_v17, %v6022_v25  ;;  %v7422_v62 = vadd.f32 %v7390_v43, %v7322_v18  ;;  %v7691_v21 = vmul.f32 %v12976_v44, %v16217_v3  ;;  %v16221_v3 = vld [vmem:[#allocation67_spill] sm:$0xff] }
 0x7b4   : > { %v6824_v28 = vadd.f32 %v6792_v6, %v6724_v19  ;;  %v6892_v4 = vmul.f32 %v12915_v2, %v16193_v47  ;;  %v7791_v55 = vmul.f32 %v12980_v35, %v16218_v59  ;;  %v6291_v41 = vmul.f32 %v16207_v1, %v12832_v23  ;;  %v16219_v19 = vld [vmem:[#allocation130_spill] sm:$0xff] }
 0x7b5   : > { %v8124_v61 = vadd.f32 %v8092_v54, %v8024_v10  ;;  %v6223_v11 = vadd.f32 %v6191_v45, %v6122_v9  ;;  %v7522_v57 = vadd.f32 %v7490_v13, %v7422_v62  ;;  %v6992_v43 = vmul.f32 %v12919_v8, %v16195_v0  ;;  %v16220_v10 = vld [vmem:[#allocation41_spill] sm:$0xff] }
 0x7b6   : > { %v6924_v51 = vadd.f32 %v6892_v4, %v6824_v28  ;;  %v5693_v25 = vmul.f32 %v14599_v5, %v16047_v48  ;;  %v6391_v54 = vmul.f32 %v16208_v32, %v12844_v46  ;;  %v5793_v47 = vmul.f32 %v14612_v63, %v16049_v58  ;;  %v14843_v4 = vld [vmem:[#allocation6 + $0x150] sm:$0xff] }
 0x7b7   : > { %v8202_v17 = vsel %vm2869_vm2, %v8124_v61, 0.0  ;;  %v6323_v18 = vadd.f32 %v6291_v41, %v6223_v11  ;;  %v7622_v39 = vadd.f32 %v7590_v49, %v7522_v57  ;;  %v7891_v13 = vmul.f32 %v12990_v60, %v16219_v19  ;;  %v16222_v41 = vld [vmem:[#allocation109_spill] sm:$0xff] }
 0x7b8   : > { %8203 = vadd.xlane.f32.xlu0 %v8202_v17  ;;  %v7024_v6 = vadd.f32 %v6992_v43, %v6924_v51  ;;  %v7092_v0 = vmul.f32 %v12923_v27, %v16220_v10  ;;  %v6491_v5 = vmul.f32 %v16210_v15, %v12863_v33  ;;  %v5825_v9 = vadd.f32 %v5793_v47, %v5693_v25  ;;  %v16224_v25 = vld [vmem:[#allocation173_spill] sm:$0xff] }
 0x7b9   : > { %v6423_v52 = vadd.f32 %v6391_v54, %v6323_v18  ;;  %v5893_v45 = vmul.f32 %v14623_v14, %v16051_v16  ;;  %v7723_v62 = vadd.f32 %v7691_v21, %v7622_v39  ;;  %v7991_v63 = vmul.f32 %v12994_v38, %v16221_v3  ;;  %v16223_v14 = vld [vmem:[#allocation141_spill] sm:$0xff] }
 0x7ba   : > { %v7124_v49 = vadd.f32 %v7092_v0, %v7024_v6  ;;  %v7193_v28 = vmul.f32 %v12933_v20, %v16209_v34  ;;  %v6591_v59 = vmul.f32 %v14703_v24, %v12876_v50  ;;  %v5993_v57 = vmul.f32 %v16222_v41, %v16054_v31  ;;  %v14853_v18 = vld [vmem:[#allocation6 + $0x151] sm:$0xff]  ;;  %v16226_v0 = vld [vmem:[#allocation170_spill] sm:$0xff] }
 0x7bb   : > { %v6523_v61 = vadd.f32 %v6491_v5, %v6423_v52  ;;  %v5925_v11 = vadd.f32 %v5893_v45, %v5825_v9  ;;  %v7823_v51 = vadd.f32 %v7791_v55, %v7723_v62  ;;  %v8091_v21 = vmul.f32 %v14347_v56, %v16223_v14  ;;  %v6158_v34 = vld [vmem:[#allocation6 + $0x158] sm:$0xff] }
 0x7bc   : > { %v7225_v43 = vadd.f32 %v7193_v28, %v7124_v49  ;;  %v7293_v17 = vmul.f32 %v12943_v37, %v16224_v25  ;;  %v6691_v47 = vmul.f32 %v12886_v22, %v14843_v4  ;;  %v6093_v19 = vmul.f32 %v16214_v26, %v16057_v40  ;;  %v16225_v10 = vld [vmem:[#allocation37_spill] sm:$0xff]  ;;  %v6258_v9 = vld [vmem:[#allocation6 + $0x159] sm:$0xff] }
 0x7bd   : > { %v6623_v54 = vadd.f32 %v6591_v59, %v6523_v61  ;;  %v6025_v39 = vadd.f32 %v5993_v57, %v5925_v11  ;;  %v7923_v6 = vadd.f32 %v7891_v13, %v7823_v51  ;;  %v7393_v56 = vmul.f32 %v12947_v36, %v16225_v10  ;;  %v14863_v5 = vld [vmem:[#allocation6 + $0x152] sm:$0xff]  ;;  %v6358_v13 = vld [vmem:[#allocation6 + $0x15a] sm:$0xff] }
 0x7be   : > { %v7325_v55 = vadd.f32 %v7293_v17, %v7225_v43  ;;  %v7493_v52 = vmul.f32 %v12968_v7, %v16226_v0  ;;  %v6791_v62 = vmul.f32 %v12893_v29, %v14853_v18  ;;  %v14867_v3 = vld [vmem:[#allocation6 + $0x153] sm:$0xff]  ;;  %v6194_v26 = vmul.f32 %v12823_v53, %v6158_v34  ;;  %v16227_v11 = vld [vmem:[#allocation51_spill] sm:$0xff] }
 0x7bf   : > { %v6723_v45 = vadd.f32 %v6691_v47, %v6623_v54  ;;  %v6125_v49 = vadd.f32 %v6093_v19, %v6025_v39  ;;  %v8023_v28 = vadd.f32 %v7991_v63, %v7923_v6  ;;  %v7593_v59 = vmul.f32 %v12972_v42, %v16215_v12  ;;  %v14876_v14 = vld [vmem:[#allocation6 + $0x154] sm:$0xff]  ;;  %v14882_v39 = vld [vmem:[#allocation6 + $0x168] sm:$0xff]  ;;  %v6558_v6 = vld [vmem:[#allocation6 + $0x15c] sm:$0xff] }
 0x7c0   : > { %v7425_v61 = vadd.f32 %v7393_v56, %v7325_v55  ;;  %v7694_v41 = vmul.f32 %v12976_v44, %v16227_v11  ;;  %v6891_v51 = vmul.f32 %v12915_v2, %v14863_v5  ;;  %v6294_v25 = vmul.f32 %v12832_v23, %v6258_v9  ;;  %v6458_v17 = vld [vmem:[#allocation6 + $0x15b] sm:$0xff] }
 0x7c1   : > { %v6823_v57 = vadd.f32 %v6791_v62, %v6723_v45  ;;  %v6226_v43 = vadd.f32 %v6194_v26, %v6125_v49  ;;  %v8123_v34 = vadd.f32 %v8091_v21, %v8023_v28  ;;  %v6991_v63 = vmul.f32 %v12919_v8, %v14867_v3  ;;  %v14892_v45 = vld [vmem:[#allocation6 + $0x169] sm:$0xff] }
 0x7c2   : > { %v7525_v54 = vadd.f32 %v7493_v52, %v7425_v61  ;;  %v6394_v12 = vmul.f32 %v12844_v46, %v6358_v13  ;;  %v5692_v55 = vmul.f32 %v16205_v30, %v16047_v48  ;;  %v5792_v10 = vmul.f32 %v16207_v1, %v16049_v58  ;;  %v6658_v49 = vld [vmem:[#allocation6 + $0x170] sm:$0xff]  ;;  %v16228_v1 = vld [vmem:[#allocation47_spill] sm:$0xff] }
 0x7c3   : > { %v6923_v47 = vadd.f32 %v6891_v51, %v6823_v57  ;;  %v6326_v19 = vadd.f32 %v6294_v25, %v6226_v43  ;;  %v8199_v56 = vsel %vm2869_vm2, %v8123_v34, 0.0  ;;  %v7091_v0 = vmul.f32 %v12923_v27, %v14876_v14  ;;  %v14901_v57 = vld [vmem:[#allocation6 + $0x16a] sm:$0xff] }
 0x7c4   : > { %v7625_v21 = vadd.f32 %v7593_v59, %v7525_v54  ;;  %v6494_v52 = vmul.f32 %v12863_v33, %v6458_v17  ;;  %8200 = vadd.xlane.f32.xlu1 %v8199_v56  ;;  %v5824_v26 = vadd.f32 %v5792_v10, %v5692_v55  ;;  %v5892_v30 = vmul.f32 %v16208_v32, %v16051_v16  ;;  %v6758_v43 = vld [vmem:[#allocation6 + $0x171] sm:$0xff]  ;;  %v16229_v32 = vld [vmem:[#allocation14_spill] sm:$0xff] }
 0x7c5   : > { %v7023_v9 = vadd.f32 %v6991_v63, %v6923_v47  ;;  %v6426_v62 = vadd.f32 %v6394_v12, %v6326_v19  ;;  %v7794_v28 = vmul.f32 %v12980_v35, %v16228_v1  ;;  %v7192_v61 = vmul.f32 %v12933_v20, %v14882_v39  ;;  %v14910_v47 = vld [vmem:[#allocation6 + $0x16b] sm:$0xff] }
 0x7c6   : > { %v7726_v13 = vadd.f32 %v7694_v41, %v7625_v21  ;;  %v6594_v59 = vmul.f32 %v12876_v50, %v6558_v6  ;;  %v5924_v25 = vadd.f32 %v5892_v30, %v5824_v26  ;;  %v5992_v17 = vmul.f32 %v16210_v15, %v16054_v31  ;;  %v6858_v6 = vld [vmem:[#allocation6 + $0x172] sm:$0xff]  ;;  %v14921_v26 = vld [vmem:[#allocation6 + $0x180] sm:$0xff] }
 0x7c7   : > { %v7123_v11 = vadd.f32 %v7091_v0, %v7023_v9  ;;  %v6526_v51 = vadd.f32 %v6494_v52, %v6426_v62  ;;  %v7894_v41 = vmul.f32 %v12990_v60, %v16229_v32  ;;  %v7292_v54 = vmul.f32 %v12943_v37, %v14892_v45  ;;  %v16230_v15 = vld [vmem:[#allocation50_spill] sm:$0xff]  ;;  %v14919_v62 = vld [vmem:[#allocation6 + $0x16c] sm:$0xff] }
 0x7c8   : > { %v7826_v34 = vadd.f32 %v7794_v28, %v7726_v13  ;;  %v6694_v63 = vmul.f32 %v12886_v22, %v6658_v49  ;;  %v6024_v55 = vadd.f32 %v5992_v17, %v5924_v25  ;;  %v6092_v10 = vmul.f32 %v14703_v24, %v16057_v40  ;;  %v6958_v13 = vld [vmem:[#allocation6 + $0x173] sm:$0xff] }
 0x7c9   : > { %v7224_v12 = vadd.f32 %v7192_v61, %v7123_v11  ;;  %v6626_v19 = vadd.f32 %v6594_v59, %v6526_v51  ;;  %v7994_v21 = vmul.f32 %v12994_v38, %v16230_v15  ;;  %v7392_v0 = vmul.f32 %v12947_v36, %v14901_v57  ;;  %v14928_v61 = vld [vmem:[%s15192_s7 + $0x18] ss:$0 sm:$0xff]  ;;  %v16231_v59 = vld [vmem:[#allocation56_spill] sm:$0xff] }
 0x7ca   : > { %v7926_v56 = vadd.f32 %v7894_v41, %v7826_v34  ;;  %v6794_v52 = vmul.f32 %v12893_v29, %v6758_v43  ;;  %v6124_v1 = vadd.f32 %v6092_v10, %v6024_v55  ;;  %v6193_v24 = vmul.f32 %v14843_v4, %v12823_v53  ;;  %v7058_v32 = vld [vmem:[#allocation6 + $0x174] sm:$0xff]  ;;  %v14942_v10 = vld [vmem:[#allocation6 + $0x181] sm:$0xff] }
 0x7cb   : > { %v7324_v9 = vadd.f32 %v7292_v54, %v7224_v12  ;;  %v6726_v30 = vadd.f32 %v6694_v63, %v6626_v19  ;;  %v8094_v11 = vmul.f32 %v14928_v61, %v16231_v59  ;;  %v7492_v51 = vmul.f32 %v12968_v7, %v14910_v47  ;;  %v7159_v15 = vld [vmem:[#allocation6 + $0x188] sm:$0xff] }
 0x7cc   : > { %v8026_v28 = vadd.f32 %v7994_v21, %v7926_v56  ;;  %v6894_v25 = vmul.f32 %v12915_v2, %v6858_v6  ;;  %v6225_v41 = vadd.f32 %v6193_v24, %v6124_v1  ;;  %v6293_v4 = vmul.f32 %v14853_v18, %v12832_v23  ;;  %v14950_v24 = vld [vmem:[#allocation6 + $0x182] sm:$0xff] }
 0x7cd   : > { %v7424_v17 = vadd.f32 %v7392_v0, %v7324_v9  ;;  %v6826_v34 = vadd.f32 %v6794_v52, %v6726_v30  ;;  %v7592_v63 = vmul.f32 %v12972_v42, %v14919_v62  ;;  %v7693_v12 = vmul.f32 %v12976_v44, %v14921_v26  ;;  %v7259_v59 = vld [vmem:[#allocation6 + $0x189] sm:$0xff] }
 0x7ce   : > { %v8126_v54 = vadd.f32 %v8094_v11, %v8026_v28  ;;  %v6994_v19 = vmul.f32 %v12919_v8, %v6958_v13  ;;  %v6325_v21 = vadd.f32 %v6293_v4, %v6225_v41  ;;  %v6393_v0 = vmul.f32 %v14863_v5, %v12844_v46 }
 0x7cf   : > { %v7524_v55 = vadd.f32 %v7492_v51, %v7424_v17  ;;  %v6926_v56 = vadd.f32 %v6894_v25, %v6826_v34  ;;  %v7094_v52 = vmul.f32 %v12923_v27, %v7058_v32  ;;  %v5697_v9 = vmul.f32 %v6658_v49, %v16047_v48  ;;  %v7359_v34 = vld [vmem:[#allocation6 + $0x18a] sm:$0xff] }
 0x7d0   : > { %v8208_v18 = vsel %vm2869_vm2, %v8126_v54, 0.0  ;;  %v5797_v30 = vmul.f32 %v6758_v43, %v16049_v58  ;;  %v6425_v11 = vadd.f32 %v6393_v0, %v6325_v21  ;;  %v6493_v51 = vmul.f32 %v14867_v3, %v12863_v33  ;;  %v14958_v58 = vld [vmem:[#allocation6 + $0x183] sm:$0xff] }
 0x7d1   : > { %8209 = vadd.xlane.f32.xlu0 %v8208_v18  ;;  %v7624_v1 = vadd.f32 %v7592_v63, %v7524_v55  ;;  %v7026_v28 = vadd.f32 %v6994_v19, %v6926_v56  ;;  %v7793_v5 = vmul.f32 %v12980_v35, %v14942_v10  ;;  %v7195_v25 = vmul.f32 %v12933_v20, %v7159_v15  ;;  %v14966_v56 = vld [vmem:[#allocation6 + $0x184] sm:$0xff] }
 0x7d2   : > { %v5829_v17 = vadd.f32 %v5797_v30, %v5697_v9  ;;  %v5897_v48 = vmul.f32 %v6858_v6, %v16051_v16  ;;  %v6525_v41 = vadd.f32 %v6493_v51, %v6425_v11  ;;  %v6593_v4 = vmul.f32 %v14876_v14, %v12876_v50  ;;  %v7459_v6 = vld [vmem:[#allocation6 + $0x18b] sm:$0xff] }
 0x7d3   : > { %v7725_v49 = vadd.f32 %v7693_v12, %v7624_v1  ;;  %v7126_v43 = vadd.f32 %v7094_v52, %v7026_v28  ;;  %v7893_v3 = vmul.f32 %v12990_v60, %v14950_v24  ;;  %v7295_v54 = vmul.f32 %v12943_v37, %v7259_v59 }
 0x7d4   : > { %v5929_v63 = vadd.f32 %v5897_v48, %v5829_v17  ;;  %v5997_v19 = vmul.f32 %v6958_v13, %v16054_v31  ;;  %v6625_v12 = vadd.f32 %v6593_v4, %v6525_v41  ;;  %v6693_v21 = vmul.f32 %v14882_v39, %v12886_v22  ;;  %v7559_v31 = vld [vmem:[#allocation6 + $0x18c] sm:$0xff]  ;;  %v7660_v17 = vld [vmem:[#allocation6 + $0x1a0] sm:$0xff] }
 0x7d5   : > { %v7825_v55 = vadd.f32 %v7793_v5, %v7725_v49  ;;  %v7227_v16 = vadd.f32 %v7195_v25, %v7126_v43  ;;  %v7993_v14 = vmul.f32 %v12994_v38, %v14958_v58  ;;  %v7395_v0 = vmul.f32 %v12947_v36, %v7359_v34 }
 0x7d6   : > { %v6029_v18 = vadd.f32 %v5997_v19, %v5929_v63  ;;  %v6097_v52 = vmul.f32 %v7058_v32, %v16057_v40  ;;  %v6725_v13 = vadd.f32 %v6693_v21, %v6625_v12  ;;  %v6793_v1 = vmul.f32 %v14892_v45, %v12893_v29 }
 0x7d7   : > { %v7925_v9 = vadd.f32 %v7893_v3, %v7825_v55  ;;  %v7327_v30 = vadd.f32 %v7295_v54, %v7227_v16  ;;  %v8093_v28 = vmul.f32 %v14928_v61, %v14966_v56  ;;  %v7495_v39 = vmul.f32 %v12968_v7, %v7459_v6 }
 0x7d8   : > { %v6129_v11 = vadd.f32 %v6097_v52, %v6029_v18  ;;  %v6198_v51 = vmul.f32 %v7159_v15, %v12823_v53  ;;  %v6825_v48 = vadd.f32 %v6793_v1, %v6725_v13  ;;  %v6893_v40 = vmul.f32 %v14901_v57, %v12915_v2  ;;  %v7760_v15 = vld [vmem:[#allocation6 + $0x1a1] sm:$0xff] }
 0x7d9   : > { %v8025_v5 = vadd.f32 %v7993_v14, %v7925_v9  ;;  %v7427_v25 = vadd.f32 %v7395_v0, %v7327_v30  ;;  %v7595_v32 = vmul.f32 %v12972_v42, %v7559_v31  ;;  %v6298_v45 = vmul.f32 %v7259_v59, %v12832_v23  ;;  %v7860_v23 = vld [vmem:[#allocation6 + $0x1a2] sm:$0xff] }
 0x7da   : > { %v6230_v49 = vadd.f32 %v6198_v51, %v6129_v11  ;;  %v6925_v4 = vadd.f32 %v6893_v40, %v6825_v48  ;;  %v6993_v3 = vmul.f32 %v14910_v47, %v12919_v8  ;;  %v7696_v53 = vmul.f32 %v12976_v44, %v7660_v17  ;;  %v8060_v13 = vld [vmem:[#allocation6 + $0x1a4] sm:$0xff] }
 0x7db   : > { %v8125_v43 = vadd.f32 %v8093_v28, %v8025_v5  ;;  %v7527_v41 = vadd.f32 %v7495_v39, %v7427_v25  ;;  %v6398_v63 = vmul.f32 %v7359_v34, %v12844_v46  ;;  %v7093_v16 = vmul.f32 %v14919_v62, %v12923_v27  ;;  %v7960_v46 = vld [vmem:[#allocation6 + $0x1a3] sm:$0xff]  ;;  %v7659_v25 = vld [vmem:[#allocation6 + $0x198] sm:$0xff] }
 0x7dc   : > { %v6330_v54 = vadd.f32 %v6298_v45, %v6230_v49  ;;  %v7025_v55 = vadd.f32 %v6993_v3, %v6925_v4  ;;  %v6498_v12 = vmul.f32 %v7459_v6, %v12863_v33  ;;  %v7796_v47 = vmul.f32 %v12980_v35, %v7760_v15  ;;  %v7759_v49 = vld [vmem:[#allocation6 + $0x199] sm:$0xff] }
 0x7dd   : > { %v8205_v19 = vsel %vm2869_vm2, %v8125_v43, 0.0  ;;  %v7627_v57 = vadd.f32 %v7595_v32, %v7527_v41  ;;  %v7194_v0 = vmul.f32 %v14921_v26, %v12933_v20  ;;  %v6598_v18 = vmul.f32 %v7559_v31, %v12876_v50  ;;  %v7859_v3 = vld [vmem:[#allocation6 + $0x19a] sm:$0xff] }
 0x7de   : > { %8206 = vadd.xlane.f32.xlu1 %v8205_v19  ;;  %v6430_v59 = vadd.f32 %v6398_v63, %v6330_v54  ;;  %v7125_v14 = vadd.f32 %v7093_v16, %v7025_v55  ;;  %v7896_v9 = vmul.f32 %v12990_v60, %v7860_v23  ;;  %v7294_v30 = vmul.f32 %v14942_v10, %v12943_v37  ;;  %v7363_v63 = vld [vmem:[#allocation6 + $0x1ba] sm:$0xff] }
 0x7df   : > { %v7728_v21 = vadd.f32 %v7696_v53, %v7627_v57  ;;  %v6698_v6 = vmul.f32 %v7660_v17, %v12886_v22  ;;  %v7996_v28 = vmul.f32 %v12994_v38, %v7960_v46  ;;  %v7394_v26 = vmul.f32 %v14950_v24, %v12947_v36  ;;  %v7163_v24 = vld [vmem:[#allocation6 + $0x1b8] sm:$0xff] }
 0x7e0   : > { %v6530_v34 = vadd.f32 %v6498_v12, %v6430_v59  ;;  %v7226_v62 = vadd.f32 %v7194_v0, %v7125_v14  ;;  %v6798_v50 = vmul.f32 %v7760_v15, %v12893_v29  ;;  %v8096_v51 = vmul.f32 %v14928_v61, %v8060_v13  ;;  %v7959_v19 = vld [vmem:[#allocation6 + $0x19b] sm:$0xff] }
 0x7e1   : > { %v7828_v52 = vadd.f32 %v7796_v47, %v7728_v21  ;;  %v7494_v10 = vmul.f32 %v14958_v58, %v12968_v7  ;;  %v6898_v22 = vmul.f32 %v7860_v23, %v12915_v2  ;;  %v7594_v32 = vmul.f32 %v14966_v56, %v12972_v42  ;;  %v7263_v58 = vld [vmem:[#allocation6 + $0x1b9] sm:$0xff] }
 0x7e2   : > { %v6630_v33 = vadd.f32 %v6598_v18, %v6530_v34  ;;  %v7326_v39 = vadd.f32 %v7294_v30, %v7226_v62  ;;  %v6998_v29 = vmul.f32 %v7960_v46, %v12919_v8  ;;  %v7695_v4 = vmul.f32 %v12976_v44, %v7659_v25  ;;  %v7463_v23 = vld [vmem:[#allocation6 + $0x1bb] sm:$0xff]  ;;  %v7664_v18 = vld [vmem:[#allocation6 + $0x1d0] sm:$0xff]  ;;  %v8138_v25 = vpop.xlane.xlu1 %8137 }
 0x7e3   : > { %v7928_v1 = vadd.f32 %v7896_v9, %v7828_v52  ;;  %v7098_v2 = vmul.f32 %v8060_v13, %v12923_v27  ;;  %v7199_v15 = vmul.f32 %v12933_v20, %v7163_v24  ;;  %v7795_v56 = vmul.f32 %v12980_v35, %v7759_v49  ;;  %v8059_v59 = vld [vmem:[#allocation6 + $0x19c] sm:$0xff]  ;;  %v7764_v62 = vld [vmem:[#allocation6 + $0x1d1] sm:$0xff] }
 0x7e4   : > { %v6730_v11 = vadd.f32 %v6698_v6, %v6630_v33  ;;  %v7426_v5 = vadd.f32 %v7394_v26, %v7326_v39  ;;  %v7299_v8 = vmul.f32 %v12943_v37, %v7263_v58  ;;  %v7895_v16 = vmul.f32 %v12990_v60, %v7859_v3  ;;  %v7563_v20 = vld [vmem:[#allocation6 + $0x1bc] sm:$0xff]  ;;  %v7864_v33 = vld [vmem:[#allocation6 + $0x1d2] sm:$0xff] }
 0x7e5   : > { %v8028_v31 = vadd.f32 %v7996_v28, %v7928_v1  ;;  %v7399_v21 = vmul.f32 %v12947_v36, %v7363_v63  ;;  %v7995_v27 = vmul.f32 %v12994_v38, %v7959_v19  ;;  %v7499_v0 = vmul.f32 %v12968_v7, %v7463_v23  ;;  %v7964_v7 = vld [vmem:[#allocation6 + $0x1d3] sm:$0xff] }
 0x7e6   : > { %v6830_v48 = vadd.f32 %v6798_v50, %v6730_v11  ;;  %v7526_v40 = vadd.f32 %v7494_v10, %v7426_v5  ;;  %v8095_v34 = vmul.f32 %v14928_v61, %v8059_v59  ;;  %v7599_v52 = vmul.f32 %v12972_v42, %v7563_v20  ;;  %v8064_v26 = vld [vmem:[#allocation6 + $0x1d4] sm:$0xff]  ;;  %v8643_v10 = vld [vmem:[#allocation7] ss:$0 sm:$0xff] }
 0x7e7   : > { %v8128_v17 = vadd.f32 %v8096_v51, %v8028_v31  ;;  %v7700_v13 = vmul.f32 %v12976_v44, %v7664_v18  ;;  %v7800_v1 = vmul.f32 %v12980_v35, %v7764_v62  ;;  %v7900_v39 = vmul.f32 %v12990_v60, %v7864_v33  ;;  %v8135_v35 = vpop.xlane.xlu0 %8134 }
 0x7e8   : > { %v6930_v45 = vadd.f32 %v6898_v22, %v6830_v48  ;;  %v7626_v41 = vadd.f32 %v7594_v32, %v7526_v40  ;;  %v8000_v42 = vmul.f32 %v12994_v38, %v7964_v7  ;;  %v8100_v31 = vmul.f32 %v14928_v61, %v8064_v26  ;;  %v8171_v48 = vpop.xlane.xlu1 %8170 }
 0x7e9   : > { %v8214_v43 = vsel %vm2869_vm2, %v8128_v17, 0.0 }
 0x7ea   : > { %8215 = vadd.xlane.f32.xlu0 %v8214_v43  ;;  %v7030_v53 = vadd.f32 %v6998_v29, %v6930_v45  ;;  %v7727_v54 = vadd.f32 %v7695_v4, %v7626_v41 }
 0x7eb   : > { %v8141_v22 = vpop.xlane.xlu0 %8140 }
 0x7ec   : > { %v7130_v57 = vadd.f32 %v7098_v2, %v7030_v53  ;;  %v7827_v55 = vadd.f32 %v7795_v56, %v7727_v54  ;;  %v8177_v17 = vpop.xlane.xlu1 %8176 }
 0x7ee   : > { %v7231_v12 = vadd.f32 %v7199_v15, %v7130_v57  ;;  %v7927_v47 = vadd.f32 %v7895_v16, %v7827_v55  ;;  %v16232_v55 = vlaneseq }
 0x7ef   : > { %v8144_v60 = vpop.xlane.xlu0 %8143 }
 0x7f0   : > { %v7331_v14 = vadd.f32 %v7299_v8, %v7231_v12  ;;  %v8027_v46 = vadd.f32 %v7995_v27, %v7927_v47  ;;  %v8147_v40 = vpop.xlane.xlu1 %8146  ;;  %v8304_v16 = vand.u32 127, %v16232_v55  ;;  %v16233_v47 = vld [vmem:[#allocation184_spill] sm:$0xff] }
 0x7f2   : > { %v7431_v37 = vadd.f32 %v7399_v21, %v7331_v14  ;;  %v8127_v9 = vadd.f32 %v8095_v34, %v8027_v46  ;;  %v8309_v59 = vadd.s32 4294967288, %v8304_v16  ;;  %v15032_v27 = vsub.s32 %v8304_v16, %v16233_v47 }
 0x7f3   : > { %v8174_v32 = vpop.xlane.xlu0 %8173 }
 0x7f4   : > { %v7531_v30 = vadd.f32 %v7499_v0, %v7431_v37  ;;  %v8211_v36 = vsel %vm2869_vm2, %v8127_v9, 0.0  ;;  %v8153_v24 = vpop.xlane.xlu1 %8152  ;;  %v15035_v20 = vsub.s32 %v8309_v59, %v16233_v47 }
 0x7f5   : > { %8212 = vadd.xlane.f32.xlu1 %v8211_v36 }
 0x7f6   : > { %v7631_v6 = vadd.f32 %v7599_v52, %v7531_v30 }
 0x7f7   : > { %v8180_v38 = vpop.xlane.xlu0 %8179 }
 0x7f8   : > { %v7732_v28 = vadd.f32 %v7700_v13, %v7631_v6  ;;  %v8183_v49 = vpop.xlane.xlu1 %8182 }
 0x7fa   : > { %v7832_v11 = vadd.f32 %v7800_v1, %v7732_v28 }
 0x7fb   : > { %v8150_v45 = vpop.xlane.xlu0 %8149 }
 0x7fc   : > { %v7932_v50 = vadd.f32 %v7900_v39, %v7832_v11  ;;  %v8189_v61 = vpop.xlane.xlu1 %8188 }
 0x7fe   : > { %v8032_v51 = vadd.f32 %v8000_v42, %v7932_v50 }
 0x7ff   : > { %v8156_v29 = vpop.xlane.xlu0 %8155 }
 0x800   : > { %v8132_v44 = vadd.f32 %v8100_v31, %v8032_v51  ;;  %v8159_v43 = vpop.xlane.xlu1 %8158 }
 0x802   : > { %v8226_v5 = vsel %vm2869_vm2, %v8132_v44, 0.0 }
 0x803   : > { %8227 = vadd.xlane.f32.xlu0 %v8226_v5  ;;  %v8186_v41 = vpop.xlane.xlu0 %8185 }
 0x804   : > { %v8165_v4 = vpop.xlane.xlu1 %8164 }
 0x806   : > { %8236 = vperm.xlu1 %8778, %v8643_v10  }
 0x807   : > { %v8192_v58 = vpop.xlane.xlu0 %8191 }
 0x808   : > { %v8219_v3 = vpop.xlane.xlu1 %8218 }
 0x80b   : > { %v8162_v53 = vpop.xlane.xlu0 %8161 }
 0x80f   : > { %v8168_v15 = vpop.xlane.xlu0 %8167 }
 0x813   : > { %v8222_v56 = vpop.xlane.xlu0 %8221 }
 0x81f   : > { %v8225_v2 = vpop.xlane.xlu1 %8224 }
 0x82c   : > { %v8198_v19 = vpop.xlane.xlu0 %8197 }
 0x838   : > { %v8195_v54 = vpop.xlane.xlu1 %8194 }
 0x845   : > { %v8204_v8 = vpop.xlane.xlu0 %8203 }
 0x851   : > { %v8201_v63 = vpop.xlane.xlu1 %8200 }
 0x85e   : > { %v8210_v12 = vpop.xlane.xlu0 %8209 }
 0x86b   : > { %v8207_v57 = vpop.xlane.xlu1 %8206 }
 0x877   : > { %v8216_v62 = vpop.xlane.xlu0 %8215 }
 0x882   : > { %v8213_v23 = vpop.xlane.xlu1 %8212 }
 0x886   : > { %v8237_v21 = vpop.permute.xlu1 %8236 }
 0x887   : > { %v8239_v14 = vadd.f32 %v8237_v21, %v8135_v35  ;;  %v8240_v0 = vadd.f32 %v8237_v21, %v8138_v25  ;;  %v8241_v46 = vadd.f32 %v8237_v21, %v8141_v22  ;;  %v8242_v34 = vadd.f32 %v8237_v21, %v8144_v60 }
 0x888   : > { %v8243_v18 = vadd.f32 %v8237_v21, %v8147_v40  ;;  %v8244_v37 = vadd.f32 %v8237_v21, %v8150_v45  ;;  %v8245_v52 = vadd.f32 %v8237_v21, %v8153_v24  ;;  %v8246_v9 = vadd.f32 %v8237_v21, %v8156_v29 }
 0x889   : > { %v15037_v30 = vadd.f32 %v8237_v21, %v8159_v43  ;;  %v15039_v13 = vadd.f32 %v8237_v21, %v8162_v53  ;;  %v15041_v36 = vadd.f32 %v8237_v21, %v8165_v4  ;;  %v15043_v33 = vadd.f32 %v8237_v21, %v8168_v15 }
 0x88a   : > { %v15045_v6 = vadd.f32 %v8237_v21, %v8171_v48  ;;  %v15047_v1 = vadd.f32 %v8237_v21, %v8174_v32  ;;  %v15049_v7 = vadd.f32 %v8237_v21, %v8177_v17  ;;  %v15051_v28 = vadd.f32 %v8237_v21, %v8180_v38 }
 0x88b   : > { %v8255_v39 = vadd.f32 %v8237_v21, %v8183_v49  ;;  %v8256_v26 = vadd.f32 %v8237_v21, %v8186_v41  ;;  %v8257_v11 = vadd.f32 %v8237_v21, %v8189_v61  ;;  %v8258_v42 = vadd.f32 %v8237_v21, %v8192_v58 }
 0x88c   : > { %v8259_v50 = vadd.f32 %v8237_v21, %v8195_v54  ;;  %v8260_v31 = vadd.f32 %v8237_v21, %v8198_v19  ;;  %v8261_v51 = vadd.f32 %v8237_v21, %v8201_v63  ;;  %v8262_v44 = vadd.f32 %v8237_v21, %v8204_v8 }
 0x88d   : > { %v8308_v5 = vrot.slane %v8239_v14, %v15032_v27  ;;  %v8313_v10 = vrot.slane %v8240_v0, %v15035_v20  ;;  %v8319_v25 = vrot.slane %v8241_v46, %v15032_v27  ;;  %v8323_v35 = vrot.slane %v8242_v34, %v15035_v20 }
 0x88e   : > { %v8328_v48 = vrot.slane %v8243_v18, %v15032_v27  ;;  %v8332_v22 = vrot.slane %v8244_v37, %v15035_v20  ;;  %v8337_v17 = vrot.slane %v8245_v52, %v15032_v27  ;;  %v8341_v60 = vrot.slane %v8246_v9, %v15035_v20 }
 0x88f   : > { %v8263_v32 = vadd.f32 %v8237_v21, %v8207_v57  ;;  %v8264_v24 = vadd.f32 %v8237_v21, %v8210_v12  ;;  %v8265_v38 = vadd.f32 %v8237_v21, %v8213_v23  ;;  %v8266_v49 = vadd.f32 %v8237_v21, %v8216_v62 }
 0x890   : > { %v8228_v40 = vpop.xlane.xlu0 %8227  ;;  %v8267_v45 = vadd.f32 %v8237_v21, %v8219_v3  ;;  %v8268_v61 = vadd.f32 %v8237_v21, %v8222_v56  ;;  %v15062_v29 = vadd.f32 %v8237_v21, %v8225_v2  ;;  %v8315_v41 = vsel %vm8314_vm12, %v8313_v10, %v8308_v5 }
 0x891   : > { %v8270_v43 = vadd.f32 %v8237_v21, %v8228_v40  ;;  %v8324_v4 = vsel %vm8314_vm12, %v8323_v35, %v8319_v25  ;;  %v8346_v58 = vrot.slane %v15037_v30, %v15032_v27  ;;  %v8350_v53 = vrot.slane %v15039_v13, %v15035_v20 }
 0x892   : > { %v8333_v15 = vsel %vm8314_vm12, %v8332_v22, %v8328_v48  ;;  %v8342_v3 = vsel %vm8314_vm12, %v8341_v60, %v8337_v17  ;;  %v8382_v2 = vrot.slane %v8255_v39, %v15032_v27  ;;  %v8386_v54 = vrot.slane %v8256_v26, %v15035_v20 }
 0x893   : > { %v8355_v56 = vrot.slane %v15041_v36, %v15032_v27  ;;  %v8391_v63 = vrot.slane %v8257_v11, %v15032_v27  ;;  %v8395_v19 = vrot.slane %v8258_v42, %v15035_v20  ;;  %v8400_v57 = vrot.slane %v8259_v50, %v15032_v27 }
 0x894   : > { %v8359_v8 = vrot.slane %v15043_v33, %v15035_v20  ;;  %v8364_v55 = vrot.slane %v15045_v6, %v15032_v27  ;;  %v8404_v16 = vrot.slane %v8260_v31, %v15035_v20  ;;  %v8409_v23 = vrot.slane %v8261_v51, %v15032_v27 }
 0x895   : > { %v8368_v59 = vrot.slane %v15047_v1, %v15035_v20  ;;  %v8387_v12 = vsel %vm8314_vm12, %v8386_v54, %v8382_v2  ;;  %v8396_v21 = vsel %vm8314_vm12, %v8395_v19, %v8391_v63  ;;  %v8413_v47 = vrot.slane %v8262_v44, %v15035_v20 }
 0x896   : > { %v8373_v14 = vrot.slane %v15049_v7, %v15032_v27  ;;  %v8405_v0 = vsel %vm8314_vm12, %v8404_v16, %v8400_v57  ;;  %v8418_v46 = vrot.slane %v8263_v32, %v15032_v27  ;;  %v8422_v34 = vrot.slane %v8264_v24, %v15035_v20 }
 0x897   : > { %v8377_v18 = vrot.slane %v15051_v28, %v15035_v20  ;;  %v8427_v37 = vrot.slane %v8265_v38, %v15032_v27  ;;  %v8431_v52 = vrot.slane %v8266_v49, %v15035_v20  ;;  %v8436_v9 = vrot.slane %v8267_v45, %v15032_v27 }
 0x898   : > { %v8414_v62 = vsel %vm8314_vm12, %v8413_v47, %v8409_v23  ;;  %v8440_v30 = vrot.slane %v8268_v61, %v15035_v20  ;;  %v8452_v13 = vsel %vm8451_vm13, %v8324_v4, %v8315_v41  ;;  %v8465_v36 = vsel %vm8451_vm13, %v8396_v21, %v8387_v12 }
 0x899   : > { %v8445_v33 = vrot.slane %v15062_v29, %v15032_v27  ;;  %v8449_v6 = vrot.slane %v8270_v43, %v15035_v20  ;;  %v8454_v1 = vsel %vm8453_vm14, %v8333_v15, %v8452_v13  ;;  %v8466_v7 = vsel %vm8453_vm14, %v8405_v0, %v8465_v36 }
 0x89a   : > { %v8351_v28 = vsel %vm8314_vm12, %v8350_v53, %v8346_v58  ;;  %v8423_v39 = vsel %vm8314_vm12, %v8422_v34, %v8418_v46  ;;  %v8456_v26 = vsel %vm8455_vm15, %v8342_v3, %v8454_v1  ;;  %v8467_v11 = vsel %vm8455_vm15, %v8414_v62, %v8466_v7 }
 0x89b   : > { %v8360_v42 = vsel %vm8314_vm12, %v8359_v8, %v8355_v56  ;;  %v8432_v27 = vsel %vm8314_vm12, %v8431_v52, %v8427_v37  ;;  %v8458_v20 = vsel %vm8457_vm0, %v8351_v28, %v8456_v26  ;;  %v8468_v50 = vsel %vm8457_vm0, %v8423_v39, %v8467_v11 }
 0x89c   : > { %v8369_v31 = vsel %vm8314_vm12, %v8368_v59, %v8364_v55  ;;  %v8441_v51 = vsel %vm8314_vm12, %v8440_v30, %v8436_v9  ;;  %v8460_v44 = vsel %vm8459_vm1, %v8360_v42, %v8458_v20  ;;  %v8469_v5 = vsel %vm8459_vm1, %v8432_v27, %v8468_v50 }
 0x89d   : > { %v8378_v10 = vsel %vm8314_vm12, %v8377_v18, %v8373_v14  ;;  %v8450_v25 = vsel %vm8314_vm12, %v8449_v6, %v8445_v33  ;;  %v8462_v35 = vsel %vm8461_vm3, %v8369_v31, %v8460_v44  ;;  %v8470_v48 = vsel %vm8461_vm3, %v8441_v51, %v8469_v5 }
 0x89e   : > { %v8464_v22 = vsel %vm8463_vm4, %v8378_v10, %v8462_v35  ;;  %v8471_v17 = vsel %vm8463_vm4, %v8450_v25, %v8470_v48 }
 0x89f   : > { %8474 = vst.msk [vmem:[%s327_s22] sm:$0xff] %vm2869_vm2, %v8464_v22  ;;  %8475 = vst.msk [vmem:[%s327_s22 + $0x8] sm:$0xff] %vm2869_vm2, %v8471_v17 }
 0x8a0   : > { %9526 = shalt.err (!%p9523_p3)
}
 0x8a1   : > { %s9527_s28 = scalar_lea.hbm %s15130_s23, 256  ;;  %s9531_s29 = scalar_lea.hbm %s15194_s9, 512 }
 0x8a2   : > { %p9528_p4 = scmp.ne.s32.totalorder %s15130_s23, %s9527_s28  ;;  %p9532_p9 = scmp.lt.u32.totalorder %s15130_s23, %s15194_s9 }
 0x8a3   : > { %p9533_p10 = scmp.lt.u32.totalorder %s9531_s29, %s9527_s28  ;;  %p9535_p12 = scmp.lt.u32.totalorder %s9527_s28, %s15130_s23 }
 0x8a4   : > { %p9529_p7 = pnand %p9528_p4, %p9680_p5 }
 0x8a5   : > { %p9534_p11 = por %p9533_p10, %p9532_p9 }
 0x8a6   : > { %p9530_p8 = pneg %p9529_p7 }
 0x8a7   : > { %p9536_p13 = por %p9535_p12, %p9534_p11 }
 0x8a9   : > { %p9537_p0 = pnand %p9536_p13, %p9530_p8 }
 0x8ab   : > { %9540 = shalt.err (!%p9537_p0)
}
 0x8ac   : > { %s9587_s17 = smov 128   ;;  %s9588_s25 = smov 8  }
 0x8ad   : > { %8727 = dma.vmem_to_hbm [thread:$0]  (%p9680_p5), %s15132_s27, 256, %s15130_s23, %s15144_s24, %s9587_s17, %s9587_s17, %s9588_s25  }
 0x8ae PF: > { %p8733_p1 = scmp.ge.s32.totalorder %s9575_s14, 2  ;;  %s8505_s26 = sand.u32 1, %s9563_s11  }
 0x8af   : > { %s8506_s15 = scalar_lea.sflag [#allocation9], %s8505_s26 }
 0x8b0   : > { %p8730_p2 = pnand %p8733_p1, %p9684_p6 }
 0x8b2   : > { %9558 = dma.done.wait (!%p8730_p2), %s8506_s15, 256  }
 0x8b3   : > { %9560 = vsyncadd (!%p8730_p2), %s8506_s15, 4294967040  ;;  %p21_p3 = scmp.ge.s32.totalorder %s9667_s16, 4   ;;  %s16234_s11 = smov %s9567_s12 }
 0x8b4   : > { %s16235_s12 = smov %s9571_s13  ;;  %s16236_s13 = smov %s9678_s19 }
 0x8b5   : > { %s16237_s14 = smov %s9667_s16  ;;  %23 = sbr.rel (!%p21_p3) target bundleno = 6 (0x6), region = 164 }
 0x8bc   :  { %8511 = vsyncpa [#allocation9], 1 }
 0x8bd   :  { %8513 = vsyncpa [#allocation9 + $0x1], 1 }

</bundles_post_ra>
